<compile_context>
chip_gen: v7x
topology: tpu7x:2x2x1
jax: 0.10.0
libtpu: 0.0.40
codegen_flags: <defaults>
</compile_context>

<pallas_src>
import functools

import jax
import jax.numpy as jnp
from jax.experimental import pallas as pl
from jax.experimental.pallas import tpu as pltpu

NUM_HEADS = 8
_VMEM_LIMIT = 32 * 1024 * 1024       # safe on v5e/v6e (128 MiB) and v7x (64 MiB)

# MXU operand dtype.  Keep f32 for numerical parity with the PyTorch reference;
# set to jnp.bfloat16 on v6e/v7x for ~2x MXU throughput (accumulation stays f32
# and all elementwise / LayerNorm / gate math stays f32, which also keeps v5e's
# f32-only VPU/EUP path fast).
MXU_DTYPE = jnp.float32


def _mm(a, b):
    return jnp.dot(a.astype(MXU_DTYPE), b.astype(MXU_DTYPE),
                   preferred_element_type=jnp.float32)


def _layer_norm(y, gamma, beta, eps=1e-5):
    mean = jnp.mean(y, axis=-1, keepdims=True)
    var = jnp.mean((y - mean) ** 2, axis=-1, keepdims=True)
    return (y - mean) * jax.lax.rsqrt(var + eps) * gamma + beta


# ---------------------------------------------------------------------------
# Kernel 1: object encoder + frame aggregator + LSTM layer-0 input projection
# ---------------------------------------------------------------------------
def _frames_kernel(x_ref, w1_ref, b1_ref, g1_ref, be1_ref,
                   w2_ref, b2_ref,
                   wagg_ref, bagg_ref, gagg_ref, beagg_ref,
                   wih_ref, bih_ref, o_ref):
    O, tm, F = x_ref.shape
    # batch enc1/enc2 over every object in this row tile: [O*tm, F]
    xf = jnp.concatenate([x_ref[o] for o in range(O)], axis=0)
    e1 = _mm(xf, w1_ref[...]) + b1_ref[...]
    e1 = jnp.maximum(_layer_norm(e1, g1_ref[...], be1_ref[...]), 0.0)
    e2 = _mm(e1, w2_ref[...]) + b2_ref[...]            # [O*tm, hs], object-major
    # frame feature = per-frame concat of per-object encodings -> one K=O*hs dot
    frame_feat = jnp.concatenate(
        [e2[o * tm:(o + 1) * tm, :] for o in range(O)], axis=-1)  # [tm, O*hs]
    frame = _mm(frame_feat, wagg_ref[...]) + bagg_ref[...]
    frame = jnp.maximum(_layer_norm(frame, gagg_ref[...], beagg_ref[...]), 0.0)
    # fused LSTM layer-0 input projection -> lane-dense [tm, 8*memory] output
    o_ref[...] = _mm(frame, wih_ref[...]) + bih_ref[...]


def frames_forward(x_omf, p, tile_m=512):
    """x_omf: [O, M, F] (M = S*B time-major rows) -> [M, 8*memory]."""
    O, M, F = x_omf.shape
    h2 = p["enc1_w"].shape[1]
    hs = p["enc2_w"].shape[1]
    G8 = p["lstm"][0]["w_ih"].shape[1]
    tm = M if M <= tile_m else tile_m
    full = lambda i: (0, 0)
    return pl.pallas_call(
        _frames_kernel,
        out_shape=jax.ShapeDtypeStruct((M, G8), jnp.float32),
        grid=(pl.cdiv(M, tm),),
        in_specs=[
            pl.BlockSpec((O, tm, F), lambda i: (0, i, 0)),
            pl.BlockSpec((F, h2), full),
            pl.BlockSpec((1, h2), full),
            pl.BlockSpec((1, h2), full),
            pl.BlockSpec((1, h2), full),
            pl.BlockSpec((h2, hs), full),
            pl.BlockSpec((1, hs), full),
            pl.BlockSpec((O * hs, hs), full),
            pl.BlockSpec((1, hs), full),
            pl.BlockSpec((1, hs), full),
            pl.BlockSpec((1, hs), full),
            pl.BlockSpec((hs, G8), full),
            pl.BlockSpec((1, G8), full),
        ],
        out_specs=pl.BlockSpec((tm, G8), lambda i: (i, 0)),
        compiler_params=pltpu.CompilerParams(
            dimension_semantics=("parallel",),
            vmem_limit_bytes=_VMEM_LIMIT),
    )(x_omf, p["enc1_w"], p["enc1_b"], p["enc1_ln_g"], p["enc1_ln_b"],
      p["enc2_w"], p["enc2_b"],
      p["agg_w"], p["agg_b"], p["agg_ln_g"], p["agg_ln_b"],
      p["lstm"][0]["w_ih"], p["lstm"][0]["b"])


# ---------------------------------------------------------------------------
# Kernels 2/3: one bidirectional LSTM layer, gridless, time loop in-kernel
# ---------------------------------------------------------------------------
def _lstm_cell(g, c, H):
    """PyTorch gate order i, f, g, o on a [B, 4H] pre-activation."""
    i = jax.nn.sigmoid(g[:, 0 * H:1 * H])
    f = jax.nn.sigmoid(g[:, 1 * H:2 * H])
    gg = jnp.tanh(g[:, 2 * H:3 * H])
    o = jax.nn.sigmoid(g[:, 3 * H:4 * H])
    c_new = f * c + i * gg
    h_new = o * jnp.tanh(c_new)
    return h_new, c_new


def _bilstm_first_kernel(S, B, H, xp_ref, whhf_ref, whhb_ref, o_ref):
    """Layer 0: input projections (incl. bias) precomputed in the frames kernel."""
    G4 = 4 * H
    whh_f = whhf_ref[...]
    whh_b = whhb_ref[...]

    def step(t, carry):
        h_f, c_f, h_b, c_b = carry
        x_f = xp_ref[t]                      # [B, 8H]; fwd gates in cols 0:4H
        x_b = xp_ref[S - 1 - t]              # bwd gates in cols 4H:8H
        g_f = x_f[:, 0:G4] + _mm(h_f, whh_f)
        g_b = x_b[:, G4:2 * G4] + _mm(h_b, whh_b)
        h_f, c_f = _lstm_cell(g_f, c_f, H)
        h_b, c_b = _lstm_cell(g_b, c_b, H)
        # write straight into the resident output slab
        o_ref[t, :, 0:H] = h_f
        o_ref[S - 1 - t, :, H:2 * H] = h_b
        return h_f, c_f, h_b, c_b

    z = jnp.zeros((B, H), jnp.float32)
    jax.lax.fori_loop(0, S, step, (z, z, z, z), unroll=True)


def _bilstm_proj_kernel(S, B, H, x_ref, wf_ref, wb_ref, bf_ref, bb_ref, o_ref):
    """Layers >= 1: input projection folded into the recurrence via [x | h]."""
    w_f = wf_ref[...]                        # [2H + H, 4H] = [W_ih_f ; W_hh_f]
    w_b = wb_ref[...]
    b_f = bf_ref[...]
    b_b = bb_ref[...]

    def step(t, carry):
        h_f, c_f, h_b, c_b = carry
        xin_f = jnp.concatenate([x_ref[t], h_f], axis=-1)          # [B, 3H]
        xin_b = jnp.concatenate([x_ref[S - 1 - t], h_b], axis=-1)  # [B, 3H]
        g_f = _mm(xin_f, w_f) + b_f
        g_b = _mm(xin_b, w_b) + b_b
        h_f, c_f = _lstm_cell(g_f, c_f, H)
        h_b, c_b = _lstm_cell(g_b, c_b, H)
        o_ref[t, :, 0:H] = h_f
        o_ref[S - 1 - t, :, H:2 * H] = h_b
        return h_f, c_f, h_b, c_b

    z = jnp.zeros((B, H), jnp.float32)
    jax.lax.fori_loop(0, S, step, (z, z, z, z), unroll=True)


def bilstm_first(xp_sbg, whh_f, whh_b):
    S, B, G8 = xp_sbg.shape
    H = G8 // 8
    kernel = functools.partial(_bilstm_first_kernel, S, B, H)
    return pl.pallas_call(
        kernel,
        out_shape=jax.ShapeDtypeStruct((S, B, 2 * H), jnp.float32),
        compiler_params=pltpu.CompilerParams(vmem_limit_bytes=_VMEM_LIMIT),
    )(xp_sbg, whh_f, whh_b)


def bilstm_proj(x_sbe, wcat_f, wcat_b, b_f, b_b):
    S, B, E = x_sbe.shape
    H = E // 2
    kernel = functools.partial(_bilstm_proj_kernel, S, B, H)
    return pl.pallas_call(
        kernel,
        out_shape=jax.ShapeDtypeStruct((S, B, 2 * H), jnp.float32),
        compiler_params=pltpu.CompilerParams(vmem_limit_bytes=_VMEM_LIMIT),
    )(x_sbe, wcat_f, wcat_b, b_f, b_b)


# ---------------------------------------------------------------------------
# Kernel 4: self-attention + temporal mean + anomaly classifier + decoder
# ---------------------------------------------------------------------------
def _post_kernel(nh, x_ref, inw_ref, inb_ref, outw_ref, outb_ref,
                 c1w_ref, c1b_ref, cg_ref, cb_ref, c2w_ref, c2b_ref,
                 c3w_ref, c3b_ref,
                 d1w_ref, d1b_ref, d2w_ref, d2b_ref, d3w_ref, d3b_ref,
                 score_ref, rec_ref):
    S, B, E = x_ref.shape
    hd = E // nh
    scale = 1.0 / (float(hd) ** 0.5)
    x = x_ref[...]                                        # [S, B, E]
    inw, inb = inw_ref[...], inb_ref[...]
    outw, outb = outw_ref[...], outb_ref[...]

    reps = []
    for b in range(B):                                    # static unroll over batch
        xb = x[:, b, :]                                   # [S, E]
        qkv = _mm(xb, inw) + inb                          # [S, 3E]
        q = qkv[:, 0:E] * scale
        k = qkv[:, E:2 * E]
        v = qkv[:, 2 * E:3 * E]

        def split_heads(m):
            return jnp.stack([m[:, h * hd:(h + 1) * hd] for h in range(nh)],
                             axis=0)                      # [nh, S, hd]

        qh, kh, vh = split_heads(q), split_heads(k), split_heads(v)
        s = jnp.einsum("hqd,hkd->hqk", qh, kh,
                       preferred_element_type=jnp.float32)
        s = s - jnp.max(s, axis=-1, keepdims=True)
        e = jnp.exp(s)
        pr = e / jnp.sum(e, axis=-1, keepdims=True)       # exact softmax
        ctx = jnp.einsum("hqk,hkd->hqd", pr, vh,
                         preferred_element_type=jnp.float32)
        ctx2 = jnp.concatenate([ctx[h] for h in range(nh)], axis=-1)  # [S, E]
        attn = _mm(ctx2, outw) + outb
        reps.append(jnp.mean(attn, axis=0, keepdims=True))            # [1, E]

    rep = jnp.concatenate(reps, axis=0)                   # [B, E]

    # anomaly classifier (batched over B)
    c1 = _mm(rep, c1w_ref[...]) + c1b_ref[...]
    c1 = jnp.maximum(_layer_norm(c1, cg_ref[...], cb_ref[...]), 0.0)
    c2 = jnp.maximum(_mm(c1, c2w_ref[...]) + c2b_ref[...], 0.0)
    score_ref[...] = jax.nn.sigmoid(_mm(c2, c3w_ref[...]) + c3b_ref[...])

    # decoder (batched over B)
    d1 = jnp.maximum(_mm(rep, d1w_ref[...]) + d1b_ref[...], 0.0)
    d2 = jnp.maximum(_mm(d1, d2w_ref[...]) + d2b_ref[...], 0.0)
    rec_ref[...] = _mm(d2, d3w_ref[...]) + d3b_ref[...]


def post_forward(x_sbe, p, num_heads):
    S, B, E = x_sbe.shape
    OF = p["dec3_w"].shape[1]
    kernel = functools.partial(_post_kernel, num_heads)
    return pl.pallas_call(
        kernel,
        out_shape=(jax.ShapeDtypeStruct((B, 1), jnp.float32),
                   jax.ShapeDtypeStruct((B, OF), jnp.float32)),
        compiler_params=pltpu.CompilerParams(vmem_limit_bytes=_VMEM_LIMIT),
    )(x_sbe, p["attn_in_w"], p["attn_in_b"], p["attn_out_w"], p["attn_out_b"],
      p["cls1_w"], p["cls1_b"], p["cls_ln_g"], p["cls_ln_b"],
      p["cls2_w"], p["cls2_b"], p["cls3_w"], p["cls3_b"],
      p["dec1_w"], p["dec1_b"], p["dec2_w"], p["dec2_b"],
      p["dec3_w"], p["dec3_b"])


# ---------------------------------------------------------------------------
# Parameter init + packing (PyTorch-like uniform init; LSTM weights packed
# into the per-direction layouts consumed by the fused kernels)
# ---------------------------------------------------------------------------
def _uniform(key, shape, bound):
    return jax.random.uniform(key, shape, jnp.float32, -bound, bound)


def _init_linear(key, in_dim, out_dim):
    kw, kb = jax.random.split(key)
    bound = 1.0 / (in_dim ** 0.5)
    return _uniform(kw, (in_dim, out_dim), bound), _uniform(kb, (1, out_dim), bound)


def init_params(key, feature_dim, max_objects, hidden_size, memory_size, num_layers):
    keys = iter(jax.random.split(key, 64))
    p = {}
    h2 = hidden_size // 2
    H = memory_size
    E = 2 * H

    # object encoder
    p["enc1_w"], p["enc1_b"] = _init_linear(next(keys), feature_dim, h2)
    p["enc1_ln_g"] = jnp.ones((1, h2), jnp.float32)
    p["enc1_ln_b"] = jnp.zeros((1, h2), jnp.float32)
    p["enc2_w"], p["enc2_b"] = _init_linear(next(keys), h2, hidden_size)

    # frame aggregator
    p["agg_w"], p["agg_b"] = _init_linear(next(keys), hidden_size * max_objects,
                                          hidden_size)
    p["agg_ln_g"] = jnp.ones((1, hidden_size), jnp.float32)
    p["agg_ln_b"] = jnp.zeros((1, hidden_size), jnp.float32)

    # bidirectional stacked LSTM
    lstm = []
    for layer in range(num_layers):
        in_dim = hidden_size if layer == 0 else E
        bound = 1.0 / (H ** 0.5)
        dirs = []
        for _ in range(2):                       # forward, backward directions
            k1, k2, k3, k4 = jax.random.split(next(keys), 4)
            w_ih = _uniform(k1, (in_dim, 4 * H), bound)
            w_hh = _uniform(k2, (H, 4 * H), bound)
            b = _uniform(k3, (1, 4 * H), bound) + _uniform(k4, (1, 4 * H), bound)
            dirs.append((w_ih, w_hh, b))
        if layer == 0:
            # layer-0 projection fused into the frames kernel: [in, 8H] = [fwd | bwd]
            lstm.append({
                "w_ih": jnp.concatenate([dirs[0][0], dirs[1][0]], axis=1),
                "b": jnp.concatenate([dirs[0][2], dirs[1][2]], axis=1),
                "whh_f": dirs[0][1],
                "whh_b": dirs[1][1],
            })
        else:
            # projection folded into the recurrence: [W_ih ; W_hh] stacked per dir
            lstm.append({
                "wcat_f": jnp.concatenate([dirs[0][0], dirs[0][1]], axis=0),
                "wcat_b": jnp.concatenate([dirs[1][0], dirs[1][1]], axis=0),
                "b_f": dirs[0][2],
                "b_b": dirs[1][2],
            })
    p["lstm"] = lstm

    # multi-head attention (packed in-proj; xavier init parity not attempted)
    p["attn_in_w"], p["attn_in_b"] = _init_linear(next(keys), E, 3 * E)
    p["attn_out_w"], p["attn_out_b"] = _init_linear(next(keys), E, E)

    # anomaly classifier
    p["cls1_w"], p["cls1_b"] = _init_linear(next(keys), E, hidden_size)
    p["cls_ln_g"] = jnp.ones((1, hidden_size), jnp.float32)
    p["cls_ln_b"] = jnp.zeros((1, hidden_size), jnp.float32)
    p["cls2_w"], p["cls2_b"] = _init_linear(next(keys), hidden_size, h2)
    p["cls3_w"], p["cls3_b"] = _init_linear(next(keys), h2, 1)

    # decoder
    p["dec1_w"], p["dec1_b"] = _init_linear(next(keys), E, hidden_size)
    p["dec2_w"], p["dec2_b"] = _init_linear(next(keys), hidden_size,
                                            hidden_size * max_objects)
    p["dec3_w"], p["dec3_b"] = _init_linear(next(keys), hidden_size * max_objects,
                                            feature_dim * max_objects)
    return p


# ---------------------------------------------------------------------------
# Forward pass
# ---------------------------------------------------------------------------
def forward(params, sequence):
    B, S, O, F = sequence.shape
    p = params
    G8 = p["lstm"][0]["w_ih"].shape[1]          # 8 * memory_size

    # [B, S, O, F] -> [O, S*B, F]   (frame rows time-major: row = s*B + b)
    x = jnp.transpose(sequence, (2, 1, 0, 3)).reshape(O, S * B, F)

    # encoder + aggregator + layer-0 LSTM input projection (one kernel)
    xp = frames_forward(x, p)                    # [S*B, 8*memory]

    # stacked bidirectional LSTM (one gridless kernel per layer)
    l0 = p["lstm"][0]
    h_seq = bilstm_first(xp.reshape(S, B, G8), l0["whh_f"], l0["whh_b"])
    for lp in p["lstm"][1:]:
        h_seq = bilstm_proj(h_seq, lp["wcat_f"], lp["wcat_b"],
                            lp["b_f"], lp["b_b"])        # [S, B, 2*memory]

    # attention + temporal mean + classifier + decoder (one kernel);
    # post kernel consumes the [S, B, E] layout directly (no transpose).
    score, rec = post_forward(h_seq, p, NUM_HEADS)
    return score, rec.reshape(B, O, F)


if __name__ == "__main__":
    # small-but-consistent hyperparameters
    feature_dim = 16
    max_objects = 4
    hidden_size = 32
    memory_size = 32        # attention embed_dim = 64, 8 heads -> head_dim 8
    num_layers = 2
    batch, seq_len = 2, 8

    key = jax.random.PRNGKey(0)
    k_param, k_data = jax.random.split(key)
    params = init_params(k_param, feature_dim, max_objects, hidden_size,
                         memory_size, num_layers)
    sequence = jax.random.normal(
        k_data, (batch, seq_len, max_objects, feature_dim), jnp.float32)

    fwd = jax.jit(forward)
    anomaly_score, reconstruction = fwd(params, sequence)
    jax.block_until_ready((anomaly_score, reconstruction))

    assert anomaly_score.shape == (batch, 1)
    assert reconstruction.shape == (batch, max_objects, feature_dim)
    print("KERNEL_OK")
</pallas_src>

<mosaic_0001>
module attributes {stable_mosaic.version = 11 : i64} {
  func.func @_frames_kernel(%arg0: i32, %arg1: memref<4x16x16xf32, #tpu.memory_space<vmem>>, %arg2: memref<16x16xf32, #tpu.memory_space<vmem>>, %arg3: memref<1x16xf32, #tpu.memory_space<vmem>>, %arg4: memref<1x16xf32, #tpu.memory_space<vmem>>, %arg5: memref<1x16xf32, #tpu.memory_space<vmem>>, %arg6: memref<16x32xf32, #tpu.memory_space<vmem>>, %arg7: memref<1x32xf32, #tpu.memory_space<vmem>>, %arg8: memref<128x32xf32, #tpu.memory_space<vmem>>, %arg9: memref<1x32xf32, #tpu.memory_space<vmem>>, %arg10: memref<1x32xf32, #tpu.memory_space<vmem>>, %arg11: memref<1x32xf32, #tpu.memory_space<vmem>>, %arg12: memref<32x256xf32, #tpu.memory_space<vmem>>, %arg13: memref<1x256xf32, #tpu.memory_space<vmem>>, %arg14: memref<16x256xf32, #tpu.memory_space<vmem>>) attributes {dimension_semantics = [#tpu.dimension_semantics<parallel>], iteration_bounds = array<i64: 1>, scalar_prefetch = 0 : i64, scratch_operands = 0 : i64, tpu.core_type = #tpu.core_type<tc>, window_params = [{transform_indices = @transform_0, window_bounds = array<i64: 4, 16, 16>}, {pipeline_mode = #tpu.pipeline_mode<synchronous>, transform_indices = @transform_1, window_bounds = array<i64: 16, 16>}, {pipeline_mode = #tpu.pipeline_mode<synchronous>, transform_indices = @transform_2, window_bounds = array<i64: 1, 16>}, {pipeline_mode = #tpu.pipeline_mode<synchronous>, transform_indices = @transform_3, window_bounds = array<i64: 1, 16>}, {pipeline_mode = #tpu.pipeline_mode<synchronous>, transform_indices = @transform_4, window_bounds = array<i64: 1, 16>}, {pipeline_mode = #tpu.pipeline_mode<synchronous>, transform_indices = @transform_5, window_bounds = array<i64: 16, 32>}, {pipeline_mode = #tpu.pipeline_mode<synchronous>, transform_indices = @transform_6, window_bounds = array<i64: 1, 32>}, {pipeline_mode = #tpu.pipeline_mode<synchronous>, transform_indices = @transform_7, window_bounds = array<i64: 128, 32>}, {pipeline_mode = #tpu.pipeline_mode<synchronous>, transform_indices = @transform_8, window_bounds = array<i64: 1, 32>}, {pipeline_mode = #tpu.pipeline_mode<synchronous>, transform_indices = @transform_9, window_bounds = array<i64: 1, 32>}, {pipeline_mode = #tpu.pipeline_mode<synchronous>, transform_indices = @transform_10, window_bounds = array<i64: 1, 32>}, {pipeline_mode = #tpu.pipeline_mode<synchronous>, transform_indices = @transform_11, window_bounds = array<i64: 32, 256>}, {pipeline_mode = #tpu.pipeline_mode<synchronous>, transform_indices = @transform_12, window_bounds = array<i64: 1, 256>}, {transform_indices = @transform_13, window_bounds = array<i64: 16, 256>}]} {
    %c0 = arith.constant 0 : index
    %c0_0 = arith.constant 0 : index
    %c0_1 = arith.constant 0 : index
    %0 = vector.load %arg1[%c0, %c0_0, %c0_1] : memref<4x16x16xf32, #tpu.memory_space<vmem>>, vector<1x16x16xf32>
    %1 = vector.shape_cast %0 : vector<1x16x16xf32> to vector<16x16xf32>
    %c1 = arith.constant 1 : index
    %c0_2 = arith.constant 0 : index
    %c0_3 = arith.constant 0 : index
    %2 = vector.load %arg1[%c1, %c0_2, %c0_3] : memref<4x16x16xf32, #tpu.memory_space<vmem>>, vector<1x16x16xf32>
    %3 = vector.shape_cast %2 : vector<1x16x16xf32> to vector<16x16xf32>
    %c2 = arith.constant 2 : index
    %c0_4 = arith.constant 0 : index
    %c0_5 = arith.constant 0 : index
    %4 = vector.load %arg1[%c2, %c0_4, %c0_5] : memref<4x16x16xf32, #tpu.memory_space<vmem>>, vector<1x16x16xf32>
    %5 = vector.shape_cast %4 : vector<1x16x16xf32> to vector<16x16xf32>
    %c3 = arith.constant 3 : index
    %c0_6 = arith.constant 0 : index
    %c0_7 = arith.constant 0 : index
    %6 = vector.load %arg1[%c3, %c0_6, %c0_7] : memref<4x16x16xf32, #tpu.memory_space<vmem>>, vector<1x16x16xf32>
    %7 = vector.shape_cast %6 : vector<1x16x16xf32> to vector<16x16xf32>
    %8 = tpu.concatenate %1, %3, %5, %7 in 0 : vector<16x16xf32>, vector<16x16xf32>, vector<16x16xf32>, vector<16x16xf32> -> vector<64x16xf32>
    %c0_8 = arith.constant 0 : index
    %c0_9 = arith.constant 0 : index
    %9 = vector.load %arg2[%c0_8, %c0_9] : memref<16x16xf32, #tpu.memory_space<vmem>>, vector<16x16xf32>
    %cst = arith.constant dense<0.000000e+00> : vector<64x16xf32>
    %10 = tpu.matmul %8, %9, %cst {dimension_numbers = #tpu.dot_dimension_numbers<[1], [0], [0], [1], [0, 0, 1, 1], [], []>} : vector<64x16xf32>, vector<16x16xf32>, vector<64x16xf32> -> vector<64x16xf32>
    %c0_10 = arith.constant 0 : index
    %c0_11 = arith.constant 0 : index
    %11 = vector.load %arg3[%c0_10, %c0_11] : memref<1x16xf32, #tpu.memory_space<vmem>>, vector<1x16xf32>
    %12 = vector.broadcast %11 : vector<1x16xf32> to vector<64x16xf32>
    %13 = arith.addf %10, %12 : vector<64x16xf32>
    %c0_12 = arith.constant 0 : index
    %c0_13 = arith.constant 0 : index
    %14 = vector.load %arg4[%c0_12, %c0_13] : memref<1x16xf32, #tpu.memory_space<vmem>>, vector<1x16xf32>
    %c0_14 = arith.constant 0 : index
    %c0_15 = arith.constant 0 : index
    %15 = vector.load %arg5[%c0_14, %c0_15] : memref<1x16xf32, #tpu.memory_space<vmem>>, vector<1x16xf32>
    %cst_16 = arith.constant dense<0.000000e+00> : vector<64xf32>
    %16 = vector.multi_reduction <add>, %13, %cst_16 [1] : vector<64x16xf32> to vector<64xf32>
    %17 = vector.shape_cast %16 : vector<64xf32> to vector<64x1xf32>
    %cst_17 = arith.constant 1.600000e+01 : f32
    %18 = vector.broadcast %cst_17 : f32 to vector<64x1xf32>
    %19 = arith.divf %17, %18 : vector<64x1xf32>
    %20 = vector.broadcast %19 : vector<64x1xf32> to vector<64x16xf32>
    %21 = arith.subf %13, %20 : vector<64x16xf32>
    %22 = arith.mulf %21, %21 : vector<64x16xf32>
    %cst_18 = arith.constant dense<0.000000e+00> : vector<64xf32>
    %23 = vector.multi_reduction <add>, %22, %cst_18 [1] : vector<64x16xf32> to vector<64xf32>
    %24 = vector.shape_cast %23 : vector<64xf32> to vector<64x1xf32>
    %cst_19 = arith.constant 1.600000e+01 : f32
    %25 = vector.broadcast %cst_19 : f32 to vector<64x1xf32>
    %26 = arith.divf %24, %25 : vector<64x1xf32>
    %27 = vector.broadcast %19 : vector<64x1xf32> to vector<64x16xf32>
    %28 = arith.subf %13, %27 : vector<64x16xf32>
    %cst_20 = arith.constant 9.99999974E-6 : f32
    %29 = vector.broadcast %cst_20 : f32 to vector<64x1xf32>
    %30 = arith.addf %26, %29 : vector<64x1xf32>
    %31 = math.rsqrt %30 : vector<64x1xf32>
    %32 = vector.broadcast %31 : vector<64x1xf32> to vector<64x16xf32>
    %33 = arith.mulf %28, %32 : vector<64x16xf32>
    %34 = vector.broadcast %14 : vector<1x16xf32> to vector<64x16xf32>
    %35 = arith.mulf %33, %34 : vector<64x16xf32>
    %36 = vector.broadcast %15 : vector<1x16xf32> to vector<64x16xf32>
    %37 = arith.addf %35, %36 : vector<64x16xf32>
    %cst_21 = arith.constant 0.000000e+00 : f32
    %38 = vector.broadcast %cst_21 : f32 to vector<64x16xf32>
    %39 = arith.maximumf %37, %38 : vector<64x16xf32>
    %c0_22 = arith.constant 0 : index
    %c0_23 = arith.constant 0 : index
    %40 = vector.load %arg6[%c0_22, %c0_23] : memref<16x32xf32, #tpu.memory_space<vmem>>, vector<16x32xf32>
    %cst_24 = arith.constant dense<0.000000e+00> : vector<64x32xf32>
    %41 = tpu.matmul %39, %40, %cst_24 {dimension_numbers = #tpu.dot_dimension_numbers<[1], [0], [0], [1], [0, 0, 1, 1], [], []>} : vector<64x16xf32>, vector<16x32xf32>, vector<64x32xf32> -> vector<64x32xf32>
    %c0_25 = arith.constant 0 : index
    %c0_26 = arith.constant 0 : index
    %42 = vector.load %arg7[%c0_25, %c0_26] : memref<1x32xf32, #tpu.memory_space<vmem>>, vector<1x32xf32>
    %43 = vector.broadcast %42 : vector<1x32xf32> to vector<64x32xf32>
    %44 = arith.addf %41, %43 : vector<64x32xf32>
    %45 = vector.extract_strided_slice %44 {offsets = [0, 0], sizes = [16, 32], strides = [1, 1]} : vector<64x32xf32> to vector<16x32xf32>
    %46 = vector.extract_strided_slice %44 {offsets = [16, 0], sizes = [16, 32], strides = [1, 1]} : vector<64x32xf32> to vector<16x32xf32>
    %47 = vector.extract_strided_slice %44 {offsets = [32, 0], sizes = [16, 32], strides = [1, 1]} : vector<64x32xf32> to vector<16x32xf32>
    %48 = vector.extract_strided_slice %44 {offsets = [48, 0], sizes = [16, 32], strides = [1, 1]} : vector<64x32xf32> to vector<16x32xf32>
    %49 = tpu.concatenate %45, %46, %47, %48 in 1 : vector<16x32xf32>, vector<16x32xf32>, vector<16x32xf32>, vector<16x32xf32> -> vector<16x128xf32>
    %c0_27 = arith.constant 0 : index
    %c0_28 = arith.constant 0 : index
    %50 = vector.load %arg8[%c0_27, %c0_28] : memref<128x32xf32, #tpu.memory_space<vmem>>, vector<128x32xf32>
    %cst_29 = arith.constant dense<0.000000e+00> : vector<16x32xf32>
    %51 = tpu.matmul %49, %50, %cst_29 {dimension_numbers = #tpu.dot_dimension_numbers<[1], [0], [0], [1], [0, 0, 1, 1], [], []>} : vector<16x128xf32>, vector<128x32xf32>, vector<16x32xf32> -> vector<16x32xf32>
    %c0_30 = arith.constant 0 : index
    %c0_31 = arith.constant 0 : index
    %52 = vector.load %arg9[%c0_30, %c0_31] : memref<1x32xf32, #tpu.memory_space<vmem>>, vector<1x32xf32>
    %53 = vector.broadcast %52 : vector<1x32xf32> to vector<16x32xf32>
    %54 = arith.addf %51, %53 : vector<16x32xf32>
    %c0_32 = arith.constant 0 : index
    %c0_33 = arith.constant 0 : index
    %55 = vector.load %arg10[%c0_32, %c0_33] : memref<1x32xf32, #tpu.memory_space<vmem>>, vector<1x32xf32>
    %c0_34 = arith.constant 0 : index
    %c0_35 = arith.constant 0 : index
    %56 = vector.load %arg11[%c0_34, %c0_35] : memref<1x32xf32, #tpu.memory_space<vmem>>, vector<1x32xf32>
    %cst_36 = arith.constant dense<0.000000e+00> : vector<16xf32>
    %57 = vector.multi_reduction <add>, %54, %cst_36 [1] : vector<16x32xf32> to vector<16xf32>
    %58 = vector.shape_cast %57 : vector<16xf32> to vector<16x1xf32>
    %cst_37 = arith.constant 3.200000e+01 : f32
    %59 = vector.broadcast %cst_37 : f32 to vector<16x1xf32>
    %60 = arith.divf %58, %59 : vector<16x1xf32>
    %61 = vector.broadcast %60 : vector<16x1xf32> to vector<16x32xf32>
    %62 = arith.subf %54, %61 : vector<16x32xf32>
    %63 = arith.mulf %62, %62 : vector<16x32xf32>
    %cst_38 = arith.constant dense<0.000000e+00> : vector<16xf32>
    %64 = vector.multi_reduction <add>, %63, %cst_38 [1] : vector<16x32xf32> to vector<16xf32>
    %65 = vector.shape_cast %64 : vector<16xf32> to vector<16x1xf32>
    %cst_39 = arith.constant 3.200000e+01 : f32
    %66 = vector.broadcast %cst_39 : f32 to vector<16x1xf32>
    %67 = arith.divf %65, %66 : vector<16x1xf32>
    %68 = vector.broadcast %60 : vector<16x1xf32> to vector<16x32xf32>
    %69 = arith.subf %54, %68 : vector<16x32xf32>
    %cst_40 = arith.constant 9.99999974E-6 : f32
    %70 = vector.broadcast %cst_40 : f32 to vector<16x1xf32>
    %71 = arith.addf %67, %70 : vector<16x1xf32>
    %72 = math.rsqrt %71 : vector<16x1xf32>
    %73 = vector.broadcast %72 : vector<16x1xf32> to vector<16x32xf32>
    %74 = arith.mulf %69, %73 : vector<16x32xf32>
    %75 = vector.broadcast %55 : vector<1x32xf32> to vector<16x32xf32>
    %76 = arith.mulf %74, %75 : vector<16x32xf32>
    %77 = vector.broadcast %56 : vector<1x32xf32> to vector<16x32xf32>
    %78 = arith.addf %76, %77 : vector<16x32xf32>
    %cst_41 = arith.constant 0.000000e+00 : f32
    %79 = vector.broadcast %cst_41 : f32 to vector<16x32xf32>
    %80 = arith.maximumf %78, %79 : vector<16x32xf32>
    %c0_42 = arith.constant 0 : index
    %c0_43 = arith.constant 0 : index
    %81 = vector.load %arg12[%c0_42, %c0_43] : memref<32x256xf32, #tpu.memory_space<vmem>>, vector<32x256xf32>
    %cst_44 = arith.constant dense<0.000000e+00> : vector<16x256xf32>
    %82 = tpu.matmul %80, %81, %cst_44 {dimension_numbers = #tpu.dot_dimension_numbers<[1], [0], [0], [1], [0, 0, 1, 1], [], []>} : vector<16x32xf32>, vector<32x256xf32>, vector<16x256xf32> -> vector<16x256xf32>
    %c0_45 = arith.constant 0 : index
    %c0_46 = arith.constant 0 : index
    %83 = vector.load %arg13[%c0_45, %c0_46] : memref<1x256xf32, #tpu.memory_space<vmem>>, vector<1x256xf32>
    %84 = vector.broadcast %83 : vector<1x256xf32> to vector<16x256xf32>
    %85 = arith.addf %82, %84 : vector<16x256xf32>
    %c0_47 = arith.constant 0 : index
    %c0_48 = arith.constant 0 : index
    %86 = vector.load %arg14[%c0_47, %c0_48] : memref<16x256xf32, #tpu.memory_space<vmem>>, vector<16x256xf32>
    tpu.vector_store %arg14[%c0_47, %c0_48], %85 {strides = array<i32>} : memref<16x256xf32, #tpu.memory_space<vmem>>, vector<16x256xf32>,
    return
  }
  func.func @transform_0(%arg0: i32) -> (i32, i32, i32) {
    %c0_i32 = arith.constant 0 : i32
    %c0_i32_0 = arith.constant 0 : i32
    %c0_i32_1 = arith.constant 0 : i32
    return %c0_i32, %arg0, %c0_i32_0 : i32, i32, i32
  }
  func.func @transform_1(%arg0: i32) -> (i32, i32) {
    %c0_i32 = arith.constant 0 : i32
    %c0_i32_0 = arith.constant 0 : i32
    %c0_i32_1 = arith.constant 0 : i32
    return %c0_i32, %c0_i32_0 : i32, i32
  }
  func.func @transform_2(%arg0: i32) -> (i32, i32) {
    %c0_i32 = arith.constant 0 : i32
    %c0_i32_0 = arith.constant 0 : i32
    %c0_i32_1 = arith.constant 0 : i32
    return %c0_i32, %c0_i32_0 : i32, i32
  }
  func.func @transform_3(%arg0: i32) -> (i32, i32) {
    %c0_i32 = arith.constant 0 : i32
    %c0_i32_0 = arith.constant 0 : i32
    %c0_i32_1 = arith.constant 0 : i32
    return %c0_i32, %c0_i32_0 : i32, i32
  }
  func.func @transform_4(%arg0: i32) -> (i32, i32) {
    %c0_i32 = arith.constant 0 : i32
    %c0_i32_0 = arith.constant 0 : i32
    %c0_i32_1 = arith.constant 0 : i32
    return %c0_i32, %c0_i32_0 : i32, i32
  }
  func.func @transform_5(%arg0: i32) -> (i32, i32) {
    %c0_i32 = arith.constant 0 : i32
    %c0_i32_0 = arith.constant 0 : i32
    %c0_i32_1 = arith.constant 0 : i32
    return %c0_i32, %c0_i32_0 : i32, i32
  }
  func.func @transform_6(%arg0: i32) -> (i32, i32) {
    %c0_i32 = arith.constant 0 : i32
    %c0_i32_0 = arith.constant 0 : i32
    %c0_i32_1 = arith.constant 0 : i32
    return %c0_i32, %c0_i32_0 : i32, i32
  }
  func.func @transform_7(%arg0: i32) -> (i32, i32) {
    %c0_i32 = arith.constant 0 : i32
    %c0_i32_0 = arith.constant 0 : i32
    %c0_i32_1 = arith.constant 0 : i32
    return %c0_i32, %c0_i32_0 : i32, i32
  }
  func.func @transform_8(%arg0: i32) -> (i32, i32) {
    %c0_i32 = arith.constant 0 : i32
    %c0_i32_0 = arith.constant 0 : i32
    %c0_i32_1 = arith.constant 0 : i32
    return %c0_i32, %c0_i32_0 : i32, i32
  }
  func.func @transform_9(%arg0: i32) -> (i32, i32) {
    %c0_i32 = arith.constant 0 : i32
    %c0_i32_0 = arith.constant 0 : i32
    %c0_i32_1 = arith.constant 0 : i32
    return %c0_i32, %c0_i32_0 : i32, i32
  }
  func.func @transform_10(%arg0: i32) -> (i32, i32) {
    %c0_i32 = arith.constant 0 : i32
    %c0_i32_0 = arith.constant 0 : i32
    %c0_i32_1 = arith.constant 0 : i32
    return %c0_i32, %c0_i32_0 : i32, i32
  }
  func.func @transform_11(%arg0: i32) -> (i32, i32) {
    %c0_i32 = arith.constant 0 : i32
    %c0_i32_0 = arith.constant 0 : i32
    %c0_i32_1 = arith.constant 0 : i32
    return %c0_i32, %c0_i32_0 : i32, i32
  }
  func.func @transform_12(%arg0: i32) -> (i32, i32) {
    %c0_i32 = arith.constant 0 : i32
    %c0_i32_0 = arith.constant 0 : i32
    %c0_i32_1 = arith.constant 0 : i32
    return %c0_i32, %c0_i32_0 : i32, i32
  }
  func.func @transform_13(%arg0: i32) -> (i32, i32) {
    %c0_i32 = arith.constant 0 : i32
    %c0_i32_0 = arith.constant 0 : i32
    return %arg0, %c0_i32 : i32, i32
  }
}

module attributes {stable_mosaic.version = 11 : i64} {
  func.func @_bilstm_proj_kernel(%arg0: memref<8x2x64xf32, #tpu.memory_space<vmem>>, %arg1: memref<96x128xf32, #tpu.memory_space<vmem>>, %arg2: memref<96x128xf32, #tpu.memory_space<vmem>>, %arg3: memref<1x128xf32, #tpu.memory_space<vmem>>, %arg4: memref<1x128xf32, #tpu.memory_space<vmem>>, %arg5: memref<8x2x64xf32, #tpu.memory_space<vmem>>) attributes {dimension_semantics = [], scalar_prefetch = 0 : i64, scratch_operands = 0 : i64, tpu.core_type = #tpu.core_type<tc>} {
    %c0 = arith.constant 0 : index
    %c0_0 = arith.constant 0 : index
    %0 = vector.load %arg1[%c0, %c0_0] : memref<96x128xf32, #tpu.memory_space<vmem>>, vector<96x128xf32>
    %c0_1 = arith.constant 0 : index
    %c0_2 = arith.constant 0 : index
    %1 = vector.load %arg2[%c0_1, %c0_2] : memref<96x128xf32, #tpu.memory_space<vmem>>, vector<96x128xf32>
    %c0_3 = arith.constant 0 : index
    %c0_4 = arith.constant 0 : index
    %2 = vector.load %arg3[%c0_3, %c0_4] : memref<1x128xf32, #tpu.memory_space<vmem>>, vector<1x128xf32>
    %c0_5 = arith.constant 0 : index
    %c0_6 = arith.constant 0 : index
    %3 = vector.load %arg4[%c0_5, %c0_6] : memref<1x128xf32, #tpu.memory_space<vmem>>, vector<1x128xf32>
    %cst = arith.constant 0.000000e+00 : f32
    %4 = vector.broadcast %cst : f32 to vector<2x32xf32>
    %c0_i32 = arith.constant 0 : i32
    %5 = arith.index_cast %c0_i32 : i32 to index
    %c0_7 = arith.constant 0 : index
    %c0_8 = arith.constant 0 : index
    %6 = vector.load %arg0[%5, %c0_7, %c0_8] : memref<8x2x64xf32, #tpu.memory_space<vmem>>, vector<1x2x64xf32>
    %7 = vector.shape_cast %6 : vector<1x2x64xf32> to vector<2x64xf32>
    %8 = tpu.concatenate %7, %4 in 1 : vector<2x64xf32>, vector<2x32xf32> -> vector<2x96xf32>
    %c7_i32 = arith.constant 7 : i32
    %9 = arith.subi %c7_i32, %c0_i32 : i32
    %10 = arith.index_cast %9 : i32 to index
    %c0_9 = arith.constant 0 : index
    %c0_10 = arith.constant 0 : index
    %11 = vector.load %arg0[%10, %c0_9, %c0_10] : memref<8x2x64xf32, #tpu.memory_space<vmem>>, vector<1x2x64xf32>
    %12 = vector.shape_cast %11 : vector<1x2x64xf32> to vector<2x64xf32>
    %13 = tpu.concatenate %12, %4 in 1 : vector<2x64xf32>, vector<2x32xf32> -> vector<2x96xf32>
    %cst_11 = arith.constant dense<0.000000e+00> : vector<2x128xf32>
    %14 = tpu.matmul %8, %0, %cst_11 {dimension_numbers = #tpu.dot_dimension_numbers<[1], [0], [0], [1], [0, 0, 1, 1], [], []>} : vector<2x96xf32>, vector<96x128xf32>, vector<2x128xf32> -> vector<2x128xf32>
    %15 = vector.broadcast %2 : vector<1x128xf32> to vector<2x128xf32>
    %16 = arith.addf %14, %15 : vector<2x128xf32>
    %cst_12 = arith.constant dense<0.000000e+00> : vector<2x128xf32>
    %17 = tpu.matmul %13, %1, %cst_12 {dimension_numbers = #tpu.dot_dimension_numbers<[1], [0], [0], [1], [0, 0, 1, 1], [], []>} : vector<2x96xf32>, vector<96x128xf32>, vector<2x128xf32> -> vector<2x128xf32>
    %18 = vector.broadcast %3 : vector<1x128xf32> to vector<2x128xf32>
    %19 = arith.addf %17, %18 : vector<2x128xf32>
    %20 = vector.extract_strided_slice %16 {offsets = [0, 0], sizes = [2, 32], strides = [1, 1]} : vector<2x128xf32> to vector<2x32xf32>
    %21 = arith.negf %20 : vector<2x32xf32>
    %22 = math.exp %21 : vector<2x32xf32>
    %cst_13 = arith.constant 1.000000e+00 : f32
    %23 = vector.broadcast %cst_13 : f32 to vector<2x32xf32>
    %24 = arith.addf %23, %22 : vector<2x32xf32>
    %25 = arith.divf %23, %24 : vector<2x32xf32>
    %26 = vector.extract_strided_slice %16 {offsets = [0, 32], sizes = [2, 32], strides = [1, 1]} : vector<2x128xf32> to vector<2x32xf32>
    %27 = arith.negf %26 : vector<2x32xf32>
    %28 = math.exp %27 : vector<2x32xf32>
    %cst_14 = arith.constant 1.000000e+00 : f32
    %29 = vector.broadcast %cst_14 : f32 to vector<2x32xf32>
    %30 = arith.addf %29, %28 : vector<2x32xf32>
    %31 = arith.divf %29, %30 : vector<2x32xf32>
    %32 = vector.extract_strided_slice %16 {offsets = [0, 64], sizes = [2, 32], strides = [1, 1]} : vector<2x128xf32> to vector<2x32xf32>
    %33 = math.tanh %32 : vector<2x32xf32>
    %34 = vector.extract_strided_slice %16 {offsets = [0, 96], sizes = [2, 32], strides = [1, 1]} : vector<2x128xf32> to vector<2x32xf32>
    %35 = arith.negf %34 : vector<2x32xf32>
    %36 = math.exp %35 : vector<2x32xf32>
    %cst_15 = arith.constant 1.000000e+00 : f32
    %37 = vector.broadcast %cst_15 : f32 to vector<2x32xf32>
    %38 = arith.addf %37, %36 : vector<2x32xf32>
    %39 = arith.divf %37, %38 : vector<2x32xf32>
    %40 = arith.mulf %31, %4 : vector<2x32xf32>
    %41 = arith.mulf %25, %33 : vector<2x32xf32>
    %42 = arith.addf %40, %41 : vector<2x32xf32>
    %43 = math.tanh %42 : vector<2x32xf32>
    %44 = arith.mulf %39, %43 : vector<2x32xf32>
    %45 = vector.extract_strided_slice %19 {offsets = [0, 0], sizes = [2, 32], strides = [1, 1]} : vector<2x128xf32> to vector<2x32xf32>
    %46 = arith.negf %45 : vector<2x32xf32>
    %47 = math.exp %46 : vector<2x32xf32>
    %cst_16 = arith.constant 1.000000e+00 : f32
    %48 = vector.broadcast %cst_16 : f32 to vector<2x32xf32>
    %49 = arith.addf %48, %47 : vector<2x32xf32>
    %50 = arith.divf %48, %49 : vector<2x32xf32>
    %51 = vector.extract_strided_slice %19 {offsets = [0, 32], sizes = [2, 32], strides = [1, 1]} : vector<2x128xf32> to vector<2x32xf32>
    %52 = arith.negf %51 : vector<2x32xf32>
    %53 = math.exp %52 : vector<2x32xf32>
    %cst_17 = arith.constant 1.000000e+00 : f32
    %54 = vector.broadcast %cst_17 : f32 to vector<2x32xf32>
    %55 = arith.addf %54, %53 : vector<2x32xf32>
    %56 = arith.divf %54, %55 : vector<2x32xf32>
    %57 = vector.extract_strided_slice %19 {offsets = [0, 64], sizes = [2, 32], strides = [1, 1]} : vector<2x128xf32> to vector<2x32xf32>
    %58 = math.tanh %57 : vector<2x32xf32>
    %59 = vector.extract_strided_slice %19 {offsets = [0, 96], sizes = [2, 32], strides = [1, 1]} : vector<2x128xf32> to vector<2x32xf32>
    %60 = arith.negf %59 : vector<2x32xf32>
    %61 = math.exp %60 : vector<2x32xf32>
    %cst_18 = arith.constant 1.000000e+00 : f32
    %62 = vector.broadcast %cst_18 : f32 to vector<2x32xf32>
    %63 = arith.addf %62, %61 : vector<2x32xf32>
    %64 = arith.divf %62, %63 : vector<2x32xf32>
    %65 = arith.mulf %56, %4 : vector<2x32xf32>
    %66 = arith.mulf %50, %58 : vector<2x32xf32>
    %67 = arith.addf %65, %66 : vector<2x32xf32>
    %68 = math.tanh %67 : vector<2x32xf32>
    %69 = arith.mulf %64, %68 : vector<2x32xf32>
    %70 = arith.index_cast %c0_i32 : i32 to index
    %c0_19 = arith.constant 0 : index
    %c0_20 = arith.constant 0 : index
    %71 = vector.load %arg5[%70, %c0_19, %c0_20] : memref<8x2x64xf32, #tpu.memory_space<vmem>>, vector<1x2x32xf32>
    %72 = vector.shape_cast %71 : vector<1x2x32xf32> to vector<2x32xf32>
    %73 = vector.shape_cast %44 : vector<2x32xf32> to vector<1x2x32xf32>
    tpu.vector_store %arg5[%70, %c0_19, %c0_20], %73 {strides = array<i32>} : memref<8x2x64xf32, #tpu.memory_space<vmem>>, vector<1x2x32xf32>,
    %c7_i32_21 = arith.constant 7 : i32
    %74 = arith.subi %c7_i32_21, %c0_i32 : i32
    %75 = arith.index_cast %74 : i32 to index
    %c0_22 = arith.constant 0 : index
    %c32 = arith.constant 32 : index
    %76 = vector.load %arg5[%75, %c0_22, %c32] : memref<8x2x64xf32, #tpu.memory_space<vmem>>, vector<1x2x32xf32>
    %77 = vector.shape_cast %76 : vector<1x2x32xf32> to vector<2x32xf32>
    %78 = vector.shape_cast %69 : vector<2x32xf32> to vector<1x2x32xf32>
    tpu.vector_store %arg5[%75, %c0_22, %c32], %78 {strides = array<i32>} : memref<8x2x64xf32, #tpu.memory_space<vmem>>, vector<1x2x32xf32>,
    %c1_i32 = arith.constant 1 : i32
    %79 = arith.index_cast %c1_i32 : i32 to index
    %c0_23 = arith.constant 0 : index
    %c0_24 = arith.constant 0 : index
    %80 = vector.load %arg0[%79, %c0_23, %c0_24] : memref<8x2x64xf32, #tpu.memory_space<vmem>>, vector<1x2x64xf32>
    %81 = vector.shape_cast %80 : vector<1x2x64xf32> to vector<2x64xf32>
    %82 = tpu.concatenate %81, %44 in 1 : vector<2x64xf32>, vector<2x32xf32> -> vector<2x96xf32>
    %c7_i32_25 = arith.constant 7 : i32
    %83 = arith.subi %c7_i32_25, %c1_i32 : i32
    %84 = arith.index_cast %83 : i32 to index
    %c0_26 = arith.constant 0 : index
    %c0_27 = arith.constant 0 : index
    %85 = vector.load %arg0[%84, %c0_26, %c0_27] : memref<8x2x64xf32, #tpu.memory_space<vmem>>, vector<1x2x64xf32>
    %86 = vector.shape_cast %85 : vector<1x2x64xf32> to vector<2x64xf32>
    %87 = tpu.concatenate %86, %69 in 1 : vector<2x64xf32>, vector<2x32xf32> -> vector<2x96xf32>
    %cst_28 = arith.constant dense<0.000000e+00> : vector<2x128xf32>
    %88 = tpu.matmul %82, %0, %cst_28 {dimension_numbers = #tpu.dot_dimension_numbers<[1], [0], [0], [1], [0, 0, 1, 1], [], []>} : vector<2x96xf32>, vector<96x128xf32>, vector<2x128xf32> -> vector<2x128xf32>
    %89 = vector.broadcast %2 : vector<1x128xf32> to vector<2x128xf32>
    %90 = arith.addf %88, %89 : vector<2x128xf32>
    %cst_29 = arith.constant dense<0.000000e+00> : vector<2x128xf32>
    %91 = tpu.matmul %87, %1, %cst_29 {dimension_numbers = #tpu.dot_dimension_numbers<[1], [0], [0], [1], [0, 0, 1, 1], [], []>} : vector<2x96xf32>, vector<96x128xf32>, vector<2x128xf32> -> vector<2x128xf32>
    %92 = vector.broadcast %3 : vector<1x128xf32> to vector<2x128xf32>
    %93 = arith.addf %91, %92 : vector<2x128xf32>
    %94 = vector.extract_strided_slice %90 {offsets = [0, 0], sizes = [2, 32], strides = [1, 1]} : vector<2x128xf32> to vector<2x32xf32>
    %95 = arith.negf %94 : vector<2x32xf32>
    %96 = math.exp %95 : vector<2x32xf32>
    %cst_30 = arith.constant 1.000000e+00 : f32
    %97 = vector.broadcast %cst_30 : f32 to vector<2x32xf32>
    %98 = arith.addf %97, %96 : vector<2x32xf32>
    %99 = arith.divf %97, %98 : vector<2x32xf32>
    %100 = vector.extract_strided_slice %90 {offsets = [0, 32], sizes = [2, 32], strides = [1, 1]} : vector<2x128xf32> to vector<2x32xf32>
    %101 = arith.negf %100 : vector<2x32xf32>
    %102 = math.exp %101 : vector<2x32xf32>
    %cst_31 = arith.constant 1.000000e+00 : f32
    %103 = vector.broadcast %cst_31 : f32 to vector<2x32xf32>
    %104 = arith.addf %103, %102 : vector<2x32xf32>
    %105 = arith.divf %103, %104 : vector<2x32xf32>
    %106 = vector.extract_strided_slice %90 {offsets = [0, 64], sizes = [2, 32], strides = [1, 1]} : vector<2x128xf32> to vector<2x32xf32>
    %107 = math.tanh %106 : vector<2x32xf32>
    %108 = vector.extract_strided_slice %90 {offsets = [0, 96], sizes = [2, 32], strides = [1, 1]} : vector<2x128xf32> to vector<2x32xf32>
    %109 = arith.negf %108 : vector<2x32xf32>
    %110 = math.exp %109 : vector<2x32xf32>
    %cst_32 = arith.constant 1.000000e+00 : f32
    %111 = vector.broadcast %cst_32 : f32 to vector<2x32xf32>
    %112 = arith.addf %111, %110 : vector<2x32xf32>
    %113 = arith.divf %111, %112 : vector<2x32xf32>
    %114 = arith.mulf %105, %42 : vector<2x32xf32>
    %115 = arith.mulf %99, %107 : vector<2x32xf32>
    %116 = arith.addf %114, %115 : vector<2x32xf32>
    %117 = math.tanh %116 : vector<2x32xf32>
    %118 = arith.mulf %113, %117 : vector<2x32xf32>
    %119 = vector.extract_strided_slice %93 {offsets = [0, 0], sizes = [2, 32], strides = [1, 1]} : vector<2x128xf32> to vector<2x32xf32>
    %120 = arith.negf %119 : vector<2x32xf32>
    %121 = math.exp %120 : vector<2x32xf32>
    %cst_33 = arith.constant 1.000000e+00 : f32
    %122 = vector.broadcast %cst_33 : f32 to vector<2x32xf32>
    %123 = arith.addf %122, %121 : vector<2x32xf32>
    %124 = arith.divf %122, %123 : vector<2x32xf32>
    %125 = vector.extract_strided_slice %93 {offsets = [0, 32], sizes = [2, 32], strides = [1, 1]} : vector<2x128xf32> to vector<2x32xf32>
    %126 = arith.negf %125 : vector<2x32xf32>
    %127 = math.exp %126 : vector<2x32xf32>
    %cst_34 = arith.constant 1.000000e+00 : f32
    %128 = vector.broadcast %cst_34 : f32 to vector<2x32xf32>
    %129 = arith.addf %128, %127 : vector<2x32xf32>
    %130 = arith.divf %128, %129 : vector<2x32xf32>
    %131 = vector.extract_strided_slice %93 {offsets = [0, 64], sizes = [2, 32], strides = [1, 1]} : vector<2x128xf32> to vector<2x32xf32>
    %132 = math.tanh %131 : vector<2x32xf32>
    %133 = vector.extract_strided_slice %93 {offsets = [0, 96], sizes = [2, 32], strides = [1, 1]} : vector<2x128xf32> to vector<2x32xf32>
    %134 = arith.negf %133 : vector<2x32xf32>
    %135 = math.exp %134 : vector<2x32xf32>
    %cst_35 = arith.constant 1.000000e+00 : f32
    %136 = vector.broadcast %cst_35 : f32 to vector<2x32xf32>
    %137 = arith.addf %136, %135 : vector<2x32xf32>
    %138 = arith.divf %136, %137 : vector<2x32xf32>
    %139 = arith.mulf %130, %67 : vector<2x32xf32>
    %140 = arith.mulf %124, %132 : vector<2x32xf32>
    %141 = arith.addf %139, %140 : vector<2x32xf32>
    %142 = math.tanh %141 : vector<2x32xf32>
    %143 = arith.mulf %138, %142 : vector<2x32xf32>
    %144 = arith.index_cast %c1_i32 : i32 to index
    %c0_36 = arith.constant 0 : index
    %c0_37 = arith.constant 0 : index
    %145 = vector.load %arg5[%144, %c0_36, %c0_37] : memref<8x2x64xf32, #tpu.memory_space<vmem>>, vector<1x2x32xf32>
    %146 = vector.shape_cast %145 : vector<1x2x32xf32> to vector<2x32xf32>
    %147 = vector.shape_cast %118 : vector<2x32xf32> to vector<1x2x32xf32>
    tpu.vector_store %arg5[%144, %c0_36, %c0_37], %147 {strides = array<i32>} : memref<8x2x64xf32, #tpu.memory_space<vmem>>, vector<1x2x32xf32>,
    %c7_i32_38 = arith.constant 7 : i32
    %148 = arith.subi %c7_i32_38, %c1_i32 : i32
    %149 = arith.index_cast %148 : i32 to index
    %c0_39 = arith.constant 0 : index
    %c32_40 = arith.constant 32 : index
    %150 = vector.load %arg5[%149, %c0_39, %c32_40] : memref<8x2x64xf32, #tpu.memory_space<vmem>>, vector<1x2x32xf32>
    %151 = vector.shape_cast %150 : vector<1x2x32xf32> to vector<2x32xf32>
    %152 = vector.shape_cast %143 : vector<2x32xf32> to vector<1x2x32xf32>
    tpu.vector_store %arg5[%149, %c0_39, %c32_40], %152 {strides = array<i32>} : memref<8x2x64xf32, #tpu.memory_space<vmem>>, vector<1x2x32xf32>,
    %c2_i32 = arith.constant 2 : i32
    %153 = arith.index_cast %c2_i32 : i32 to index
    %c0_41 = arith.constant 0 : index
    %c0_42 = arith.constant 0 : index
    %154 = vector.load %arg0[%153, %c0_41, %c0_42] : memref<8x2x64xf32, #tpu.memory_space<vmem>>, vector<1x2x64xf32>
    %155 = vector.shape_cast %154 : vector<1x2x64xf32> to vector<2x64xf32>
    %156 = tpu.concatenate %155, %118 in 1 : vector<2x64xf32>, vector<2x32xf32> -> vector<2x96xf32>
    %c7_i32_43 = arith.constant 7 : i32
    %157 = arith.subi %c7_i32_43, %c2_i32 : i32
    %158 = arith.index_cast %157 : i32 to index
    %c0_44 = arith.constant 0 : index
    %c0_45 = arith.constant 0 : index
    %159 = vector.load %arg0[%158, %c0_44, %c0_45] : memref<8x2x64xf32, #tpu.memory_space<vmem>>, vector<1x2x64xf32>
    %160 = vector.shape_cast %159 : vector<1x2x64xf32> to vector<2x64xf32>
    %161 = tpu.concatenate %160, %143 in 1 : vector<2x64xf32>, vector<2x32xf32> -> vector<2x96xf32>
    %cst_46 = arith.constant dense<0.000000e+00> : vector<2x128xf32>
    %162 = tpu.matmul %156, %0, %cst_46 {dimension_numbers = #tpu.dot_dimension_numbers<[1], [0], [0], [1], [0, 0, 1, 1], [], []>} : vector<2x96xf32>, vector<96x128xf32>, vector<2x128xf32> -> vector<2x128xf32>
    %163 = vector.broadcast %2 : vector<1x128xf32> to vector<2x128xf32>
    %164 = arith.addf %162, %163 : vector<2x128xf32>
    %cst_47 = arith.constant dense<0.000000e+00> : vector<2x128xf32>
    %165 = tpu.matmul %161, %1, %cst_47 {dimension_numbers = #tpu.dot_dimension_numbers<[1], [0], [0], [1], [0, 0, 1, 1], [], []>} : vector<2x96xf32>, vector<96x128xf32>, vector<2x128xf32> -> vector<2x128xf32>
    %166 = vector.broadcast %3 : vector<1x128xf32> to vector<2x128xf32>
    %167 = arith.addf %165, %166 : vector<2x128xf32>
    %168 = vector.extract_strided_slice %164 {offsets = [0, 0], sizes = [2, 32], strides = [1, 1]} : vector<2x128xf32> to vector<2x32xf32>
    %169 = arith.negf %168 : vector<2x32xf32>
    %170 = math.exp %169 : vector<2x32xf32>
    %cst_48 = arith.constant 1.000000e+00 : f32
    %171 = vector.broadcast %cst_48 : f32 to vector<2x32xf32>
    %172 = arith.addf %171, %170 : vector<2x32xf32>
    %173 = arith.divf %171, %172 : vector<2x32xf32>
    %174 = vector.extract_strided_slice %164 {offsets = [0, 32], sizes = [2, 32], strides = [1, 1]} : vector<2x128xf32> to vector<2x32xf32>
    %175 = arith.negf %174 : vector<2x32xf32>
    %176 = math.exp %175 : vector<2x32xf32>
    %cst_49 = arith.constant 1.000000e+00 : f32
    %177 = vector.broadcast %cst_49 : f32 to vector<2x32xf32>
    %178 = arith.addf %177, %176 : vector<2x32xf32>
    %179 = arith.divf %177, %178 : vector<2x32xf32>
    %180 = vector.extract_strided_slice %164 {offsets = [0, 64], sizes = [2, 32], strides = [1, 1]} : vector<2x128xf32> to vector<2x32xf32>
    %181 = math.tanh %180 : vector<2x32xf32>
    %182 = vector.extract_strided_slice %164 {offsets = [0, 96], sizes = [2, 32], strides = [1, 1]} : vector<2x128xf32> to vector<2x32xf32>
    %183 = arith.negf %182 : vector<2x32xf32>
    %184 = math.exp %183 : vector<2x32xf32>
    %cst_50 = arith.constant 1.000000e+00 : f32
    %185 = vector.broadcast %cst_50 : f32 to vector<2x32xf32>
    %186 = arith.addf %185, %184 : vector<2x32xf32>
    %187 = arith.divf %185, %186 : vector<2x32xf32>
    %188 = arith.mulf %179, %116 : vector<2x32xf32>
    %189 = arith.mulf %173, %181 : vector<2x32xf32>
    %190 = arith.addf %188, %189 : vector<2x32xf32>
    %191 = math.tanh %190 : vector<2x32xf32>
    %192 = arith.mulf %187, %191 : vector<2x32xf32>
    %193 = vector.extract_strided_slice %167 {offsets = [0, 0], sizes = [2, 32], strides = [1, 1]} : vector<2x128xf32> to vector<2x32xf32>
    %194 = arith.negf %193 : vector<2x32xf32>
    %195 = math.exp %194 : vector<2x32xf32>
    %cst_51 = arith.constant 1.000000e+00 : f32
    %196 = vector.broadcast %cst_51 : f32 to vector<2x32xf32>
    %197 = arith.addf %196, %195 : vector<2x32xf32>
    %198 = arith.divf %196, %197 : vector<2x32xf32>
    %199 = vector.extract_strided_slice %167 {offsets = [0, 32], sizes = [2, 32], strides = [1, 1]} : vector<2x128xf32> to vector<2x32xf32>
    %200 = arith.negf %199 : vector<2x32xf32>
    %201 = math.exp %200 : vector<2x32xf32>
    %cst_52 = arith.constant 1.000000e+00 : f32
    %202 = vector.broadcast %cst_52 : f32 to vector<2x32xf32>
    %203 = arith.addf %202, %201 : vector<2x32xf32>
    %204 = arith.divf %202, %203 : vector<2x32xf32>
    %205 = vector.extract_strided_slice %167 {offsets = [0, 64], sizes = [2, 32], strides = [1, 1]} : vector<2x128xf32> to vector<2x32xf32>
    %206 = math.tanh %205 : vector<2x32xf32>
    %207 = vector.extract_strided_slice %167 {offsets = [0, 96], sizes = [2, 32], strides = [1, 1]} : vector<2x128xf32> to vector<2x32xf32>
    %208 = arith.negf %207 : vector<2x32xf32>
    %209 = math.exp %208 : vector<2x32xf32>
    %cst_53 = arith.constant 1.000000e+00 : f32
    %210 = vector.broadcast %cst_53 : f32 to vector<2x32xf32>
    %211 = arith.addf %210, %209 : vector<2x32xf32>
    %212 = arith.divf %210, %211 : vector<2x32xf32>
    %213 = arith.mulf %204, %141 : vector<2x32xf32>
    %214 = arith.mulf %198, %206 : vector<2x32xf32>
    %215 = arith.addf %213, %214 : vector<2x32xf32>
    %216 = math.tanh %215 : vector<2x32xf32>
    %217 = arith.mulf %212, %216 : vector<2x32xf32>
    %218 = arith.index_cast %c2_i32 : i32 to index
    %c0_54 = arith.constant 0 : index
    %c0_55 = arith.constant 0 : index
    %219 = vector.load %arg5[%218, %c0_54, %c0_55] : memref<8x2x64xf32, #tpu.memory_space<vmem>>, vector<1x2x32xf32>
    %220 = vector.shape_cast %219 : vector<1x2x32xf32> to vector<2x32xf32>
    %221 = vector.shape_cast %192 : vector<2x32xf32> to vector<1x2x32xf32>
    tpu.vector_store %arg5[%218, %c0_54, %c0_55], %221 {strides = array<i32>} : memref<8x2x64xf32, #tpu.memory_space<vmem>>, vector<1x2x32xf32>,
    %c7_i32_56 = arith.constant 7 : i32
    %222 = arith.subi %c7_i32_56, %c2_i32 : i32
    %223 = arith.index_cast %222 : i32 to index
    %c0_57 = arith.constant 0 : index
    %c32_58 = arith.constant 32 : index
    %224 = vector.load %arg5[%223, %c0_57, %c32_58] : memref<8x2x64xf32, #tpu.memory_space<vmem>>, vector<1x2x32xf32>
    %225 = vector.shape_cast %224 : vector<1x2x32xf32> to vector<2x32xf32>
    %226 = vector.shape_cast %217 : vector<2x32xf32> to vector<1x2x32xf32>
    tpu.vector_store %arg5[%223, %c0_57, %c32_58], %226 {strides = array<i32>} : memref<8x2x64xf32, #tpu.memory_space<vmem>>, vector<1x2x32xf32>,
    %c3_i32 = arith.constant 3 : i32
    %227 = arith.index_cast %c3_i32 : i32 to index
    %c0_59 = arith.constant 0 : index
    %c0_60 = arith.constant 0 : index
    %228 = vector.load %arg0[%227, %c0_59, %c0_60] : memref<8x2x64xf32, #tpu.memory_space<vmem>>, vector<1x2x64xf32>
    %229 = vector.shape_cast %228 : vector<1x2x64xf32> to vector<2x64xf32>
    %230 = tpu.concatenate %229, %192 in 1 : vector<2x64xf32>, vector<2x32xf32> -> vector<2x96xf32>
    %c7_i32_61 = arith.constant 7 : i32
    %231 = arith.subi %c7_i32_61, %c3_i32 : i32
    %232 = arith.index_cast %231 : i32 to index
    %c0_62 = arith.constant 0 : index
    %c0_63 = arith.constant 0 : index
    %233 = vector.load %arg0[%232, %c0_62, %c0_63] : memref<8x2x64xf32, #tpu.memory_space<vmem>>, vector<1x2x64xf32>
    %234 = vector.shape_cast %233 : vector<1x2x64xf32> to vector<2x64xf32>
    %235 = tpu.concatenate %234, %217 in 1 : vector<2x64xf32>, vector<2x32xf32> -> vector<2x96xf32>
    %cst_64 = arith.constant dense<0.000000e+00> : vector<2x128xf32>
    %236 = tpu.matmul %230, %0, %cst_64 {dimension_numbers = #tpu.dot_dimension_numbers<[1], [0], [0], [1], [0, 0, 1, 1], [], []>} : vector<2x96xf32>, vector<96x128xf32>, vector<2x128xf32> -> vector<2x128xf32>
    %237 = vector.broadcast %2 : vector<1x128xf32> to vector<2x128xf32>
    %238 = arith.addf %236, %237 : vector<2x128xf32>
    %cst_65 = arith.constant dense<0.000000e+00> : vector<2x128xf32>
    %239 = tpu.matmul %235, %1, %cst_65 {dimension_numbers = #tpu.dot_dimension_numbers<[1], [0], [0], [1], [0, 0, 1, 1], [], []>} : vector<2x96xf32>, vector<96x128xf32>, vector<2x128xf32> -> vector<2x128xf32>
    %240 = vector.broadcast %3 : vector<1x128xf32> to vector<2x128xf32>
    %241 = arith.addf %239, %240 : vector<2x128xf32>
    %242 = vector.extract_strided_slice %238 {offsets = [0, 0], sizes = [2, 32], strides = [1, 1]} : vector<2x128xf32> to vector<2x32xf32>
    %243 = arith.negf %242 : vector<2x32xf32>
    %244 = math.exp %243 : vector<2x32xf32>
    %cst_66 = arith.constant 1.000000e+00 : f32
    %245 = vector.broadcast %cst_66 : f32 to vector<2x32xf32>
    %246 = arith.addf %245, %244 : vector<2x32xf32>
    %247 = arith.divf %245, %246 : vector<2x32xf32>
    %248 = vector.extract_strided_slice %238 {offsets = [0, 32], sizes = [2, 32], strides = [1, 1]} : vector<2x128xf32> to vector<2x32xf32>
    %249 = arith.negf %248 : vector<2x32xf32>
    %250 = math.exp %249 : vector<2x32xf32>
    %cst_67 = arith.constant 1.000000e+00 : f32
    %251 = vector.broadcast %cst_67 : f32 to vector<2x32xf32>
    %252 = arith.addf %251, %250 : vector<2x32xf32>
    %253 = arith.divf %251, %252 : vector<2x32xf32>
    %254 = vector.extract_strided_slice %238 {offsets = [0, 64], sizes = [2, 32], strides = [1, 1]} : vector<2x128xf32> to vector<2x32xf32>
    %255 = math.tanh %254 : vector<2x32xf32>
    %256 = vector.extract_strided_slice %238 {offsets = [0, 96], sizes = [2, 32], strides = [1, 1]} : vector<2x128xf32> to vector<2x32xf32>
    %257 = arith.negf %256 : vector<2x32xf32>
    %258 = math.exp %257 : vector<2x32xf32>
    %cst_68 = arith.constant 1.000000e+00 : f32
    %259 = vector.broadcast %cst_68 : f32 to vector<2x32xf32>
    %260 = arith.addf %259, %258 : vector<2x32xf32>
    %261 = arith.divf %259, %260 : vector<2x32xf32>
    %262 = arith.mulf %253, %190 : vector<2x32xf32>
    %263 = arith.mulf %247, %255 : vector<2x32xf32>
    %264 = arith.addf %262, %263 : vector<2x32xf32>
    %265 = math.tanh %264 : vector<2x32xf32>
    %266 = arith.mulf %261, %265 : vector<2x32xf32>
    %267 = vector.extract_strided_slice %241 {offsets = [0, 0], sizes = [2, 32], strides = [1, 1]} : vector<2x128xf32> to vector<2x32xf32>
    %268 = arith.negf %267 : vector<2x32xf32>
    %269 = math.exp %268 : vector<2x32xf32>
    %cst_69 = arith.constant 1.000000e+00 : f32
    %270 = vector.broadcast %cst_69 : f32 to vector<2x32xf32>
    %271 = arith.addf %270, %269 : vector<2x32xf32>
    %272 = arith.divf %270, %271 : vector<2x32xf32>
    %273 = vector.extract_strided_slice %241 {offsets = [0, 32], sizes = [2, 32], strides = [1, 1]} : vector<2x128xf32> to vector<2x32xf32>
    %274 = arith.negf %273 : vector<2x32xf32>
    %275 = math.exp %274 : vector<2x32xf32>
    %cst_70 = arith.constant 1.000000e+00 : f32
    %276 = vector.broadcast %cst_70 : f32 to vector<2x32xf32>
    %277 = arith.addf %276, %275 : vector<2x32xf32>
    %278 = arith.divf %276, %277 : vector<2x32xf32>
    %279 = vector.extract_strided_slice %241 {offsets = [0, 64], sizes = [2, 32], strides = [1, 1]} : vector<2x128xf32> to vector<2x32xf32>
    %280 = math.tanh %279 : vector<2x32xf32>
    %281 = vector.extract_strided_slice %241 {offsets = [0, 96], sizes = [2, 32], strides = [1, 1]} : vector<2x128xf32> to vector<2x32xf32>
    %282 = arith.negf %281 : vector<2x32xf32>
    %283 = math.exp %282 : vector<2x32xf32>
    %cst_71 = arith.constant 1.000000e+00 : f32
    %284 = vector.broadcast %cst_71 : f32 to vector<2x32xf32>
    %285 = arith.addf %284, %283 : vector<2x32xf32>
    %286 = arith.divf %284, %285 : vector<2x32xf32>
    %287 = arith.mulf %278, %215 : vector<2x32xf32>
    %288 = arith.mulf %272, %280 : vector<2x32xf32>
    %289 = arith.addf %287, %288 : vector<2x32xf32>
    %290 = math.tanh %289 : vector<2x32xf32>
    %291 = arith.mulf %286, %290 : vector<2x32xf32>
    %292 = arith.index_cast %c3_i32 : i32 to index
    %c0_72 = arith.constant 0 : index
    %c0_73 = arith.constant 0 : index
    %293 = vector.load %arg5[%292, %c0_72, %c0_73] : memref<8x2x64xf32, #tpu.memory_space<vmem>>, vector<1x2x32xf32>
    %294 = vector.shape_cast %293 : vector<1x2x32xf32> to vector<2x32xf32>
    %295 = vector.shape_cast %266 : vector<2x32xf32> to vector<1x2x32xf32>
    tpu.vector_store %arg5[%292, %c0_72, %c0_73], %295 {strides = array<i32>} : memref<8x2x64xf32, #tpu.memory_space<vmem>>, vector<1x2x32xf32>,
    %c7_i32_74 = arith.constant 7 : i32
    %296 = arith.subi %c7_i32_74, %c3_i32 : i32
    %297 = arith.index_cast %296 : i32 to index
    %c0_75 = arith.constant 0 : index
    %c32_76 = arith.constant 32 : index
    %298 = vector.load %arg5[%297, %c0_75, %c32_76] : memref<8x2x64xf32, #tpu.memory_space<vmem>>, vector<1x2x32xf32>
    %299 = vector.shape_cast %298 : vector<1x2x32xf32> to vector<2x32xf32>
    %300 = vector.shape_cast %291 : vector<2x32xf32> to vector<1x2x32xf32>
    tpu.vector_store %arg5[%297, %c0_75, %c32_76], %300 {strides = array<i32>} : memref<8x2x64xf32, #tpu.memory_space<vmem>>, vector<1x2x32xf32>,
    %c4_i32 = arith.constant 4 : i32
    %301 = arith.index_cast %c4_i32 : i32 to index
    %c0_77 = arith.constant 0 : index
    %c0_78 = arith.constant 0 : index
    %302 = vector.load %arg0[%301, %c0_77, %c0_78] : memref<8x2x64xf32, #tpu.memory_space<vmem>>, vector<1x2x64xf32>
    %303 = vector.shape_cast %302 : vector<1x2x64xf32> to vector<2x64xf32>
    %304 = tpu.concatenate %303, %266 in 1 : vector<2x64xf32>, vector<2x32xf32> -> vector<2x96xf32>
    %c7_i32_79 = arith.constant 7 : i32
    %305 = arith.subi %c7_i32_79, %c4_i32 : i32
    %306 = arith.index_cast %305 : i32 to index
    %c0_80 = arith.constant 0 : index
    %c0_81 = arith.constant 0 : index
    %307 = vector.load %arg0[%306, %c0_80, %c0_81] : memref<8x2x64xf32, #tpu.memory_space<vmem>>, vector<1x2x64xf32>
    %308 = vector.shape_cast %307 : vector<1x2x64xf32> to vector<2x64xf32>
    %309 = tpu.concatenate %308, %291 in 1 : vector<2x64xf32>, vector<2x32xf32> -> vector<2x96xf32>
    %cst_82 = arith.constant dense<0.000000e+00> : vector<2x128xf32>
    %310 = tpu.matmul %304, %0, %cst_82 {dimension_numbers = #tpu.dot_dimension_numbers<[1], [0], [0], [1], [0, 0, 1, 1], [], []>} : vector<2x96xf32>, vector<96x128xf32>, vector<2x128xf32> -> vector<2x128xf32>
    %311 = vector.broadcast %2 : vector<1x128xf32> to vector<2x128xf32>
    %312 = arith.addf %310, %311 : vector<2x128xf32>
    %cst_83 = arith.constant dense<0.000000e+00> : vector<2x128xf32>
    %313 = tpu.matmul %309, %1, %cst_83 {dimension_numbers = #tpu.dot_dimension_numbers<[1], [0], [0], [1], [0, 0, 1, 1], [], []>} : vector<2x96xf32>, vector<96x128xf32>, vector<2x128xf32> -> vector<2x128xf32>
    %314 = vector.broadcast %3 : vector<1x128xf32> to vector<2x128xf32>
    %315 = arith.addf %313, %314 : vector<2x128xf32>
    %316 = vector.extract_strided_slice %312 {offsets = [0, 0], sizes = [2, 32], strides = [1, 1]} : vector<2x128xf32> to vector<2x32xf32>
    %317 = arith.negf %316 : vector<2x32xf32>
    %318 = math.exp %317 : vector<2x32xf32>
    %cst_84 = arith.constant 1.000000e+00 : f32
    %319 = vector.broadcast %cst_84 : f32 to vector<2x32xf32>
    %320 = arith.addf %319, %318 : vector<2x32xf32>
    %321 = arith.divf %319, %320 : vector<2x32xf32>
    %322 = vector.extract_strided_slice %312 {offsets = [0, 32], sizes = [2, 32], strides = [1, 1]} : vector<2x128xf32> to vector<2x32xf32>
    %323 = arith.negf %322 : vector<2x32xf32>
    %324 = math.exp %323 : vector<2x32xf32>
    %cst_85 = arith.constant 1.000000e+00 : f32
    %325 = vector.broadcast %cst_85 : f32 to vector<2x32xf32>
    %326 = arith.addf %325, %324 : vector<2x32xf32>
    %327 = arith.divf %325, %326 : vector<2x32xf32>
    %328 = vector.extract_strided_slice %312 {offsets = [0, 64], sizes = [2, 32], strides = [1, 1]} : vector<2x128xf32> to vector<2x32xf32>
    %329 = math.tanh %328 : vector<2x32xf32>
    %330 = vector.extract_strided_slice %312 {offsets = [0, 96], sizes = [2, 32], strides = [1, 1]} : vector<2x128xf32> to vector<2x32xf32>
    %331 = arith.negf %330 : vector<2x32xf32>
    %332 = math.exp %331 : vector<2x32xf32>
    %cst_86 = arith.constant 1.000000e+00 : f32
    %333 = vector.broadcast %cst_86 : f32 to vector<2x32xf32>
    %334 = arith.addf %333, %332 : vector<2x32xf32>
    %335 = arith.divf %333, %334 : vector<2x32xf32>
    %336 = arith.mulf %327, %264 : vector<2x32xf32>
    %337 = arith.mulf %321, %329 : vector<2x32xf32>
    %338 = arith.addf %336, %337 : vector<2x32xf32>
    %339 = math.tanh %338 : vector<2x32xf32>
    %340 = arith.mulf %335, %339 : vector<2x32xf32>
    %341 = vector.extract_strided_slice %315 {offsets = [0, 0], sizes = [2, 32], strides = [1, 1]} : vector<2x128xf32> to vector<2x32xf32>
    %342 = arith.negf %341 : vector<2x32xf32>
    %343 = math.exp %342 : vector<2x32xf32>
    %cst_87 = arith.constant 1.000000e+00 : f32
    %344 = vector.broadcast %cst_87 : f32 to vector<2x32xf32>
    %345 = arith.addf %344, %343 : vector<2x32xf32>
    %346 = arith.divf %344, %345 : vector<2x32xf32>
    %347 = vector.extract_strided_slice %315 {offsets = [0, 32], sizes = [2, 32], strides = [1, 1]} : vector<2x128xf32> to vector<2x32xf32>
    %348 = arith.negf %347 : vector<2x32xf32>
    %349 = math.exp %348 : vector<2x32xf32>
    %cst_88 = arith.constant 1.000000e+00 : f32
    %350 = vector.broadcast %cst_88 : f32 to vector<2x32xf32>
    %351 = arith.addf %350, %349 : vector<2x32xf32>
    %352 = arith.divf %350, %351 : vector<2x32xf32>
    %353 = vector.extract_strided_slice %315 {offsets = [0, 64], sizes = [2, 32], strides = [1, 1]} : vector<2x128xf32> to vector<2x32xf32>
    %354 = math.tanh %353 : vector<2x32xf32>
    %355 = vector.extract_strided_slice %315 {offsets = [0, 96], sizes = [2, 32], strides = [1, 1]} : vector<2x128xf32> to vector<2x32xf32>
    %356 = arith.negf %355 : vector<2x32xf32>
    %357 = math.exp %356 : vector<2x32xf32>
    %cst_89 = arith.constant 1.000000e+00 : f32
    %358 = vector.broadcast %cst_89 : f32 to vector<2x32xf32>
    %359 = arith.addf %358, %357 : vector<2x32xf32>
    %360 = arith.divf %358, %359 : vector<2x32xf32>
    %361 = arith.mulf %352, %289 : vector<2x32xf32>
    %362 = arith.mulf %346, %354 : vector<2x32xf32>
    %363 = arith.addf %361, %362 : vector<2x32xf32>
    %364 = math.tanh %363 : vector<2x32xf32>
    %365 = arith.mulf %360, %364 : vector<2x32xf32>
    %366 = arith.index_cast %c4_i32 : i32 to index
    %c0_90 = arith.constant 0 : index
    %c0_91 = arith.constant 0 : index
    %367 = vector.load %arg5[%366, %c0_90, %c0_91] : memref<8x2x64xf32, #tpu.memory_space<vmem>>, vector<1x2x32xf32>
    %368 = vector.shape_cast %367 : vector<1x2x32xf32> to vector<2x32xf32>
    %369 = vector.shape_cast %340 : vector<2x32xf32> to vector<1x2x32xf32>
    tpu.vector_store %arg5[%366, %c0_90, %c0_91], %369 {strides = array<i32>} : memref<8x2x64xf32, #tpu.memory_space<vmem>>, vector<1x2x32xf32>,
    %c7_i32_92 = arith.constant 7 : i32
    %370 = arith.subi %c7_i32_92, %c4_i32 : i32
    %371 = arith.index_cast %370 : i32 to index
    %c0_93 = arith.constant 0 : index
    %c32_94 = arith.constant 32 : index
    %372 = vector.load %arg5[%371, %c0_93, %c32_94] : memref<8x2x64xf32, #tpu.memory_space<vmem>>, vector<1x2x32xf32>
    %373 = vector.shape_cast %372 : vector<1x2x32xf32> to vector<2x32xf32>
    %374 = vector.shape_cast %365 : vector<2x32xf32> to vector<1x2x32xf32>
    tpu.vector_store %arg5[%371, %c0_93, %c32_94], %374 {strides = array<i32>} : memref<8x2x64xf32, #tpu.memory_space<vmem>>, vector<1x2x32xf32>,
    %c5_i32 = arith.constant 5 : i32
    %375 = arith.index_cast %c5_i32 : i32 to index
    %c0_95 = arith.constant 0 : index
    %c0_96 = arith.constant 0 : index
    %376 = vector.load %arg0[%375, %c0_95, %c0_96] : memref<8x2x64xf32, #tpu.memory_space<vmem>>, vector<1x2x64xf32>
    %377 = vector.shape_cast %376 : vector<1x2x64xf32> to vector<2x64xf32>
    %378 = tpu.concatenate %377, %340 in 1 : vector<2x64xf32>, vector<2x32xf32> -> vector<2x96xf32>
    %c7_i32_97 = arith.constant 7 : i32
    %379 = arith.subi %c7_i32_97, %c5_i32 : i32
    %380 = arith.index_cast %379 : i32 to index
    %c0_98 = arith.constant 0 : index
    %c0_99 = arith.constant 0 : index
    %381 = vector.load %arg0[%380, %c0_98, %c0_99] : memref<8x2x64xf32, #tpu.memory_space<vmem>>, vector<1x2x64xf32>
    %382 = vector.shape_cast %381 : vector<1x2x64xf32> to vector<2x64xf32>
    %383 = tpu.concatenate %382, %365 in 1 : vector<2x64xf32>, vector<2x32xf32> -> vector<2x96xf32>
    %cst_100 = arith.constant dense<0.000000e+00> : vector<2x128xf32>
    %384 = tpu.matmul %378, %0, %cst_100 {dimension_numbers = #tpu.dot_dimension_numbers<[1], [0], [0], [1], [0, 0, 1, 1], [], []>} : vector<2x96xf32>, vector<96x128xf32>, vector<2x128xf32> -> vector<2x128xf32>
    %385 = vector.broadcast %2 : vector<1x128xf32> to vector<2x128xf32>
    %386 = arith.addf %384, %385 : vector<2x128xf32>
    %cst_101 = arith.constant dense<0.000000e+00> : vector<2x128xf32>
    %387 = tpu.matmul %383, %1, %cst_101 {dimension_numbers = #tpu.dot_dimension_numbers<[1], [0], [0], [1], [0, 0, 1, 1], [], []>} : vector<2x96xf32>, vector<96x128xf32>, vector<2x128xf32> -> vector<2x128xf32>
    %388 = vector.broadcast %3 : vector<1x128xf32> to vector<2x128xf32>
    %389 = arith.addf %387, %388 : vector<2x128xf32>
    %390 = vector.extract_strided_slice %386 {offsets = [0, 0], sizes = [2, 32], strides = [1, 1]} : vector<2x128xf32> to vector<2x32xf32>
    %391 = arith.negf %390 : vector<2x32xf32>
    %392 = math.exp %391 : vector<2x32xf32>
    %cst_102 = arith.constant 1.000000e+00 : f32
    %393 = vector.broadcast %cst_102 : f32 to vector<2x32xf32>
    %394 = arith.addf %393, %392 : vector<2x32xf32>
    %395 = arith.divf %393, %394 : vector<2x32xf32>
    %396 = vector.extract_strided_slice %386 {offsets = [0, 32], sizes = [2, 32], strides = [1, 1]} : vector<2x128xf32> to vector<2x32xf32>
    %397 = arith.negf %396 : vector<2x32xf32>
    %398 = math.exp %397 : vector<2x32xf32>
    %cst_103 = arith.constant 1.000000e+00 : f32
    %399 = vector.broadcast %cst_103 : f32 to vector<2x32xf32>
    %400 = arith.addf %399, %398 : vector<2x32xf32>
    %401 = arith.divf %399, %400 : vector<2x32xf32>
    %402 = vector.extract_strided_slice %386 {offsets = [0, 64], sizes = [2, 32], strides = [1, 1]} : vector<2x128xf32> to vector<2x32xf32>
    %403 = math.tanh %402 : vector<2x32xf32>
    %404 = vector.extract_strided_slice %386 {offsets = [0, 96], sizes = [2, 32], strides = [1, 1]} : vector<2x128xf32> to vector<2x32xf32>
    %405 = arith.negf %404 : vector<2x32xf32>
    %406 = math.exp %405 : vector<2x32xf32>
    %cst_104 = arith.constant 1.000000e+00 : f32
    %407 = vector.broadcast %cst_104 : f32 to vector<2x32xf32>
    %408 = arith.addf %407, %406 : vector<2x32xf32>
    %409 = arith.divf %407, %408 : vector<2x32xf32>
    %410 = arith.mulf %401, %338 : vector<2x32xf32>
    %411 = arith.mulf %395, %403 : vector<2x32xf32>
    %412 = arith.addf %410, %411 : vector<2x32xf32>
    %413 = math.tanh %412 : vector<2x32xf32>
    %414 = arith.mulf %409, %413 : vector<2x32xf32>
    %415 = vector.extract_strided_slice %389 {offsets = [0, 0], sizes = [2, 32], strides = [1, 1]} : vector<2x128xf32> to vector<2x32xf32>
    %416 = arith.negf %415 : vector<2x32xf32>
    %417 = math.exp %416 : vector<2x32xf32>
    %cst_105 = arith.constant 1.000000e+00 : f32
    %418 = vector.broadcast %cst_105 : f32 to vector<2x32xf32>
    %419 = arith.addf %418, %417 : vector<2x32xf32>
    %420 = arith.divf %418, %419 : vector<2x32xf32>
    %421 = vector.extract_strided_slice %389 {offsets = [0, 32], sizes = [2, 32], strides = [1, 1]} : vector<2x128xf32> to vector<2x32xf32>
    %422 = arith.negf %421 : vector<2x32xf32>
    %423 = math.exp %422 : vector<2x32xf32>
    %cst_106 = arith.constant 1.000000e+00 : f32
    %424 = vector.broadcast %cst_106 : f32 to vector<2x32xf32>
    %425 = arith.addf %424, %423 : vector<2x32xf32>
    %426 = arith.divf %424, %425 : vector<2x32xf32>
    %427 = vector.extract_strided_slice %389 {offsets = [0, 64], sizes = [2, 32], strides = [1, 1]} : vector<2x128xf32> to vector<2x32xf32>
    %428 = math.tanh %427 : vector<2x32xf32>
    %429 = vector.extract_strided_slice %389 {offsets = [0, 96], sizes = [2, 32], strides = [1, 1]} : vector<2x128xf32> to vector<2x32xf32>
    %430 = arith.negf %429 : vector<2x32xf32>
    %431 = math.exp %430 : vector<2x32xf32>
    %cst_107 = arith.constant 1.000000e+00 : f32
    %432 = vector.broadcast %cst_107 : f32 to vector<2x32xf32>
    %433 = arith.addf %432, %431 : vector<2x32xf32>
    %434 = arith.divf %432, %433 : vector<2x32xf32>
    %435 = arith.mulf %426, %363 : vector<2x32xf32>
    %436 = arith.mulf %420, %428 : vector<2x32xf32>
    %437 = arith.addf %435, %436 : vector<2x32xf32>
    %438 = math.tanh %437 : vector<2x32xf32>
    %439 = arith.mulf %434, %438 : vector<2x32xf32>
    %440 = arith.index_cast %c5_i32 : i32 to index
    %c0_108 = arith.constant 0 : index
    %c0_109 = arith.constant 0 : index
    %441 = vector.load %arg5[%440, %c0_108, %c0_109] : memref<8x2x64xf32, #tpu.memory_space<vmem>>, vector<1x2x32xf32>
    %442 = vector.shape_cast %441 : vector<1x2x32xf32> to vector<2x32xf32>
    %443 = vector.shape_cast %414 : vector<2x32xf32> to vector<1x2x32xf32>
    tpu.vector_store %arg5[%440, %c0_108, %c0_109], %443 {strides = array<i32>} : memref<8x2x64xf32, #tpu.memory_space<vmem>>, vector<1x2x32xf32>,
    %c7_i32_110 = arith.constant 7 : i32
    %444 = arith.subi %c7_i32_110, %c5_i32 : i32
    %445 = arith.index_cast %444 : i32 to index
    %c0_111 = arith.constant 0 : index
    %c32_112 = arith.constant 32 : index
    %446 = vector.load %arg5[%445, %c0_111, %c32_112] : memref<8x2x64xf32, #tpu.memory_space<vmem>>, vector<1x2x32xf32>
    %447 = vector.shape_cast %446 : vector<1x2x32xf32> to vector<2x32xf32>
    %448 = vector.shape_cast %439 : vector<2x32xf32> to vector<1x2x32xf32>
    tpu.vector_store %arg5[%445, %c0_111, %c32_112], %448 {strides = array<i32>} : memref<8x2x64xf32, #tpu.memory_space<vmem>>, vector<1x2x32xf32>,
    %c6_i32 = arith.constant 6 : i32
    %449 = arith.index_cast %c6_i32 : i32 to index
    %c0_113 = arith.constant 0 : index
    %c0_114 = arith.constant 0 : index
    %450 = vector.load %arg0[%449, %c0_113, %c0_114] : memref<8x2x64xf32, #tpu.memory_space<vmem>>, vector<1x2x64xf32>
    %451 = vector.shape_cast %450 : vector<1x2x64xf32> to vector<2x64xf32>
    %452 = tpu.concatenate %451, %414 in 1 : vector<2x64xf32>, vector<2x32xf32> -> vector<2x96xf32>
    %c7_i32_115 = arith.constant 7 : i32
    %453 = arith.subi %c7_i32_115, %c6_i32 : i32
    %454 = arith.index_cast %453 : i32 to index
    %c0_116 = arith.constant 0 : index
    %c0_117 = arith.constant 0 : index
    %455 = vector.load %arg0[%454, %c0_116, %c0_117] : memref<8x2x64xf32, #tpu.memory_space<vmem>>, vector<1x2x64xf32>
    %456 = vector.shape_cast %455 : vector<1x2x64xf32> to vector<2x64xf32>
    %457 = tpu.concatenate %456, %439 in 1 : vector<2x64xf32>, vector<2x32xf32> -> vector<2x96xf32>
    %cst_118 = arith.constant dense<0.000000e+00> : vector<2x128xf32>
    %458 = tpu.matmul %452, %0, %cst_118 {dimension_numbers = #tpu.dot_dimension_numbers<[1], [0], [0], [1], [0, 0, 1, 1], [], []>} : vector<2x96xf32>, vector<96x128xf32>, vector<2x128xf32> -> vector<2x128xf32>
    %459 = vector.broadcast %2 : vector<1x128xf32> to vector<2x128xf32>
    %460 = arith.addf %458, %459 : vector<2x128xf32>
    %cst_119 = arith.constant dense<0.000000e+00> : vector<2x128xf32>
    %461 = tpu.matmul %457, %1, %cst_119 {dimension_numbers = #tpu.dot_dimension_numbers<[1], [0], [0], [1], [0, 0, 1, 1], [], []>} : vector<2x96xf32>, vector<96x128xf32>, vector<2x128xf32> -> vector<2x128xf32>
    %462 = vector.broadcast %3 : vector<1x128xf32> to vector<2x128xf32>
    %463 = arith.addf %461, %462 : vector<2x128xf32>
    %464 = vector.extract_strided_slice %460 {offsets = [0, 0], sizes = [2, 32], strides = [1, 1]} : vector<2x128xf32> to vector<2x32xf32>
    %465 = arith.negf %464 : vector<2x32xf32>
    %466 = math.exp %465 : vector<2x32xf32>
    %cst_120 = arith.constant 1.000000e+00 : f32
    %467 = vector.broadcast %cst_120 : f32 to vector<2x32xf32>
    %468 = arith.addf %467, %466 : vector<2x32xf32>
    %469 = arith.divf %467, %468 : vector<2x32xf32>
    %470 = vector.extract_strided_slice %460 {offsets = [0, 32], sizes = [2, 32], strides = [1, 1]} : vector<2x128xf32> to vector<2x32xf32>
    %471 = arith.negf %470 : vector<2x32xf32>
    %472 = math.exp %471 : vector<2x32xf32>
    %cst_121 = arith.constant 1.000000e+00 : f32
    %473 = vector.broadcast %cst_121 : f32 to vector<2x32xf32>
    %474 = arith.addf %473, %472 : vector<2x32xf32>
    %475 = arith.divf %473, %474 : vector<2x32xf32>
    %476 = vector.extract_strided_slice %460 {offsets = [0, 64], sizes = [2, 32], strides = [1, 1]} : vector<2x128xf32> to vector<2x32xf32>
    %477 = math.tanh %476 : vector<2x32xf32>
    %478 = vector.extract_strided_slice %460 {offsets = [0, 96], sizes = [2, 32], strides = [1, 1]} : vector<2x128xf32> to vector<2x32xf32>
    %479 = arith.negf %478 : vector<2x32xf32>
    %480 = math.exp %479 : vector<2x32xf32>
    %cst_122 = arith.constant 1.000000e+00 : f32
    %481 = vector.broadcast %cst_122 : f32 to vector<2x32xf32>
    %482 = arith.addf %481, %480 : vector<2x32xf32>
    %483 = arith.divf %481, %482 : vector<2x32xf32>
    %484 = arith.mulf %475, %412 : vector<2x32xf32>
    %485 = arith.mulf %469, %477 : vector<2x32xf32>
    %486 = arith.addf %484, %485 : vector<2x32xf32>
    %487 = math.tanh %486 : vector<2x32xf32>
    %488 = arith.mulf %483, %487 : vector<2x32xf32>
    %489 = vector.extract_strided_slice %463 {offsets = [0, 0], sizes = [2, 32], strides = [1, 1]} : vector<2x128xf32> to vector<2x32xf32>
    %490 = arith.negf %489 : vector<2x32xf32>
    %491 = math.exp %490 : vector<2x32xf32>
    %cst_123 = arith.constant 1.000000e+00 : f32
    %492 = vector.broadcast %cst_123 : f32 to vector<2x32xf32>
    %493 = arith.addf %492, %491 : vector<2x32xf32>
    %494 = arith.divf %492, %493 : vector<2x32xf32>
    %495 = vector.extract_strided_slice %463 {offsets = [0, 32], sizes = [2, 32], strides = [1, 1]} : vector<2x128xf32> to vector<2x32xf32>
    %496 = arith.negf %495 : vector<2x32xf32>
    %497 = math.exp %496 : vector<2x32xf32>
    %cst_124 = arith.constant 1.000000e+00 : f32
    %498 = vector.broadcast %cst_124 : f32 to vector<2x32xf32>
    %499 = arith.addf %498, %497 : vector<2x32xf32>
    %500 = arith.divf %498, %499 : vector<2x32xf32>
    %501 = vector.extract_strided_slice %463 {offsets = [0, 64], sizes = [2, 32], strides = [1, 1]} : vector<2x128xf32> to vector<2x32xf32>
    %502 = math.tanh %501 : vector<2x32xf32>
    %503 = vector.extract_strided_slice %463 {offsets = [0, 96], sizes = [2, 32], strides = [1, 1]} : vector<2x128xf32> to vector<2x32xf32>
    %504 = arith.negf %503 : vector<2x32xf32>
    %505 = math.exp %504 : vector<2x32xf32>
    %cst_125 = arith.constant 1.000000e+00 : f32
    %506 = vector.broadcast %cst_125 : f32 to vector<2x32xf32>
    %507 = arith.addf %506, %505 : vector<2x32xf32>
    %508 = arith.divf %506, %507 : vector<2x32xf32>
    %509 = arith.mulf %500, %437 : vector<2x32xf32>
    %510 = arith.mulf %494, %502 : vector<2x32xf32>
    %511 = arith.addf %509, %510 : vector<2x32xf32>
    %512 = math.tanh %511 : vector<2x32xf32>
    %513 = arith.mulf %508, %512 : vector<2x32xf32>
    %514 = arith.index_cast %c6_i32 : i32 to index
    %c0_126 = arith.constant 0 : index
    %c0_127 = arith.constant 0 : index
    %515 = vector.load %arg5[%514, %c0_126, %c0_127] : memref<8x2x64xf32, #tpu.memory_space<vmem>>, vector<1x2x32xf32>
    %516 = vector.shape_cast %515 : vector<1x2x32xf32> to vector<2x32xf32>
    %517 = vector.shape_cast %488 : vector<2x32xf32> to vector<1x2x32xf32>
    tpu.vector_store %arg5[%514, %c0_126, %c0_127], %517 {strides = array<i32>} : memref<8x2x64xf32, #tpu.memory_space<vmem>>, vector<1x2x32xf32>,
    %c7_i32_128 = arith.constant 7 : i32
    %518 = arith.subi %c7_i32_128, %c6_i32 : i32
    %519 = arith.index_cast %518 : i32 to index
    %c0_129 = arith.constant 0 : index
    %c32_130 = arith.constant 32 : index
    %520 = vector.load %arg5[%519, %c0_129, %c32_130] : memref<8x2x64xf32, #tpu.memory_space<vmem>>, vector<1x2x32xf32>
    %521 = vector.shape_cast %520 : vector<1x2x32xf32> to vector<2x32xf32>
    %522 = vector.shape_cast %513 : vector<2x32xf32> to vector<1x2x32xf32>
    tpu.vector_store %arg5[%519, %c0_129, %c32_130], %522 {strides = array<i32>} : memref<8x2x64xf32, #tpu.memory_space<vmem>>, vector<1x2x32xf32>,
    %c7_i32_131 = arith.constant 7 : i32
    %523 = arith.index_cast %c7_i32_131 : i32 to index
    %c0_132 = arith.constant 0 : index
    %c0_133 = arith.constant 0 : index
    %524 = vector.load %arg0[%523, %c0_132, %c0_133] : memref<8x2x64xf32, #tpu.memory_space<vmem>>, vector<1x2x64xf32>
    %525 = vector.shape_cast %524 : vector<1x2x64xf32> to vector<2x64xf32>
    %526 = tpu.concatenate %525, %488 in 1 : vector<2x64xf32>, vector<2x32xf32> -> vector<2x96xf32>
    %c7_i32_134 = arith.constant 7 : i32
    %527 = arith.subi %c7_i32_134, %c7_i32_131 : i32
    %528 = arith.index_cast %527 : i32 to index
    %c0_135 = arith.constant 0 : index
    %c0_136 = arith.constant 0 : index
    %529 = vector.load %arg0[%528, %c0_135, %c0_136] : memref<8x2x64xf32, #tpu.memory_space<vmem>>, vector<1x2x64xf32>
    %530 = vector.shape_cast %529 : vector<1x2x64xf32> to vector<2x64xf32>
    %531 = tpu.concatenate %530, %513 in 1 : vector<2x64xf32>, vector<2x32xf32> -> vector<2x96xf32>
    %cst_137 = arith.constant dense<0.000000e+00> : vector<2x128xf32>
    %532 = tpu.matmul %526, %0, %cst_137 {dimension_numbers = #tpu.dot_dimension_numbers<[1], [0], [0], [1], [0, 0, 1, 1], [], []>} : vector<2x96xf32>, vector<96x128xf32>, vector<2x128xf32> -> vector<2x128xf32>
    %533 = vector.broadcast %2 : vector<1x128xf32> to vector<2x128xf32>
    %534 = arith.addf %532, %533 : vector<2x128xf32>
    %cst_138 = arith.constant dense<0.000000e+00> : vector<2x128xf32>
    %535 = tpu.matmul %531, %1, %cst_138 {dimension_numbers = #tpu.dot_dimension_numbers<[1], [0], [0], [1], [0, 0, 1, 1], [], []>} : vector<2x96xf32>, vector<96x128xf32>, vector<2x128xf32> -> vector<2x128xf32>
    %536 = vector.broadcast %3 : vector<1x128xf32> to vector<2x128xf32>
    %537 = arith.addf %535, %536 : vector<2x128xf32>
    %538 = vector.extract_strided_slice %534 {offsets = [0, 0], sizes = [2, 32], strides = [1, 1]} : vector<2x128xf32> to vector<2x32xf32>
    %539 = arith.negf %538 : vector<2x32xf32>
    %540 = math.exp %539 : vector<2x32xf32>
    %cst_139 = arith.constant 1.000000e+00 : f32
    %541 = vector.broadcast %cst_139 : f32 to vector<2x32xf32>
    %542 = arith.addf %541, %540 : vector<2x32xf32>
    %543 = arith.divf %541, %542 : vector<2x32xf32>
    %544 = vector.extract_strided_slice %534 {offsets = [0, 32], sizes = [2, 32], strides = [1, 1]} : vector<2x128xf32> to vector<2x32xf32>
    %545 = arith.negf %544 : vector<2x32xf32>
    %546 = math.exp %545 : vector<2x32xf32>
    %cst_140 = arith.constant 1.000000e+00 : f32
    %547 = vector.broadcast %cst_140 : f32 to vector<2x32xf32>
    %548 = arith.addf %547, %546 : vector<2x32xf32>
    %549 = arith.divf %547, %548 : vector<2x32xf32>
    %550 = vector.extract_strided_slice %534 {offsets = [0, 64], sizes = [2, 32], strides = [1, 1]} : vector<2x128xf32> to vector<2x32xf32>
    %551 = math.tanh %550 : vector<2x32xf32>
    %552 = vector.extract_strided_slice %534 {offsets = [0, 96], sizes = [2, 32], strides = [1, 1]} : vector<2x128xf32> to vector<2x32xf32>
    %553 = arith.negf %552 : vector<2x32xf32>
    %554 = math.exp %553 : vector<2x32xf32>
    %cst_141 = arith.constant 1.000000e+00 : f32
    %555 = vector.broadcast %cst_141 : f32 to vector<2x32xf32>
    %556 = arith.addf %555, %554 : vector<2x32xf32>
    %557 = arith.divf %555, %556 : vector<2x32xf32>
    %558 = arith.mulf %549, %486 : vector<2x32xf32>
    %559 = arith.mulf %543, %551 : vector<2x32xf32>
    %560 = arith.addf %558, %559 : vector<2x32xf32>
    %561 = math.tanh %560 : vector<2x32xf32>
    %562 = arith.mulf %557, %561 : vector<2x32xf32>
    %563 = vector.extract_strided_slice %537 {offsets = [0, 0], sizes = [2, 32], strides = [1, 1]} : vector<2x128xf32> to vector<2x32xf32>
    %564 = arith.negf %563 : vector<2x32xf32>
    %565 = math.exp %564 : vector<2x32xf32>
    %cst_142 = arith.constant 1.000000e+00 : f32
    %566 = vector.broadcast %cst_142 : f32 to vector<2x32xf32>
    %567 = arith.addf %566, %565 : vector<2x32xf32>
    %568 = arith.divf %566, %567 : vector<2x32xf32>
    %569 = vector.extract_strided_slice %537 {offsets = [0, 32], sizes = [2, 32], strides = [1, 1]} : vector<2x128xf32> to vector<2x32xf32>
    %570 = arith.negf %569 : vector<2x32xf32>
    %571 = math.exp %570 : vector<2x32xf32>
    %cst_143 = arith.constant 1.000000e+00 : f32
    %572 = vector.broadcast %cst_143 : f32 to vector<2x32xf32>
    %573 = arith.addf %572, %571 : vector<2x32xf32>
    %574 = arith.divf %572, %573 : vector<2x32xf32>
    %575 = vector.extract_strided_slice %537 {offsets = [0, 64], sizes = [2, 32], strides = [1, 1]} : vector<2x128xf32> to vector<2x32xf32>
    %576 = math.tanh %575 : vector<2x32xf32>
    %577 = vector.extract_strided_slice %537 {offsets = [0, 96], sizes = [2, 32], strides = [1, 1]} : vector<2x128xf32> to vector<2x32xf32>
    %578 = arith.negf %577 : vector<2x32xf32>
    %579 = math.exp %578 : vector<2x32xf32>
    %cst_144 = arith.constant 1.000000e+00 : f32
    %580 = vector.broadcast %cst_144 : f32 to vector<2x32xf32>
    %581 = arith.addf %580, %579 : vector<2x32xf32>
    %582 = arith.divf %580, %581 : vector<2x32xf32>
    %583 = arith.mulf %574, %511 : vector<2x32xf32>
    %584 = arith.mulf %568, %576 : vector<2x32xf32>
    %585 = arith.addf %583, %584 : vector<2x32xf32>
    %586 = math.tanh %585 : vector<2x32xf32>
    %587 = arith.mulf %582, %586 : vector<2x32xf32>
    %588 = arith.index_cast %c7_i32_131 : i32 to index
    %c0_145 = arith.constant 0 : index
    %c0_146 = arith.constant 0 : index
    %589 = vector.load %arg5[%588, %c0_145, %c0_146] : memref<8x2x64xf32, #tpu.memory_space<vmem>>, vector<1x2x32xf32>
    %590 = vector.shape_cast %589 : vector<1x2x32xf32> to vector<2x32xf32>
    %591 = vector.shape_cast %562 : vector<2x32xf32> to vector<1x2x32xf32>
    tpu.vector_store %arg5[%588, %c0_145, %c0_146], %591 {strides = array<i32>} : memref<8x2x64xf32, #tpu.memory_space<vmem>>, vector<1x2x32xf32>,
    %c7_i32_147 = arith.constant 7 : i32
    %592 = arith.subi %c7_i32_147, %c7_i32_131 : i32
    %593 = arith.index_cast %592 : i32 to index
    %c0_148 = arith.constant 0 : index
    %c32_149 = arith.constant 32 : index
    %594 = vector.load %arg5[%593, %c0_148, %c32_149] : memref<8x2x64xf32, #tpu.memory_space<vmem>>, vector<1x2x32xf32>
    %595 = vector.shape_cast %594 : vector<1x2x32xf32> to vector<2x32xf32>
    %596 = vector.shape_cast %587 : vector<2x32xf32> to vector<1x2x32xf32>
    tpu.vector_store %arg5[%593, %c0_148, %c32_149], %596 {strides = array<i32>} : memref<8x2x64xf32, #tpu.memory_space<vmem>>, vector<1x2x32xf32>,
    %c8_i32 = arith.constant 8 : i32
    return
  }
}

module attributes {stable_mosaic.version = 11 : i64} {
  func.func @_bilstm_first_kernel(%arg0: memref<8x2x256xf32, #tpu.memory_space<vmem>>, %arg1: memref<32x128xf32, #tpu.memory_space<vmem>>, %arg2: memref<32x128xf32, #tpu.memory_space<vmem>>, %arg3: memref<8x2x64xf32, #tpu.memory_space<vmem>>) attributes {dimension_semantics = [], scalar_prefetch = 0 : i64, scratch_operands = 0 : i64, tpu.core_type = #tpu.core_type<tc>} {
    %c0 = arith.constant 0 : index
    %c0_0 = arith.constant 0 : index
    %0 = vector.load %arg1[%c0, %c0_0] : memref<32x128xf32, #tpu.memory_space<vmem>>, vector<32x128xf32>
    %c0_1 = arith.constant 0 : index
    %c0_2 = arith.constant 0 : index
    %1 = vector.load %arg2[%c0_1, %c0_2] : memref<32x128xf32, #tpu.memory_space<vmem>>, vector<32x128xf32>
    %cst = arith.constant 0.000000e+00 : f32
    %2 = vector.broadcast %cst : f32 to vector<2x32xf32>
    %c0_i32 = arith.constant 0 : i32
    %3 = arith.index_cast %c0_i32 : i32 to index
    %c0_3 = arith.constant 0 : index
    %c0_4 = arith.constant 0 : index
    %4 = vector.load %arg0[%3, %c0_3, %c0_4] : memref<8x2x256xf32, #tpu.memory_space<vmem>>, vector<1x2x256xf32>
    %5 = vector.shape_cast %4 : vector<1x2x256xf32> to vector<2x256xf32>
    %c7_i32 = arith.constant 7 : i32
    %6 = arith.subi %c7_i32, %c0_i32 : i32
    %7 = arith.index_cast %6 : i32 to index
    %c0_5 = arith.constant 0 : index
    %c0_6 = arith.constant 0 : index
    %8 = vector.load %arg0[%7, %c0_5, %c0_6] : memref<8x2x256xf32, #tpu.memory_space<vmem>>, vector<1x2x256xf32>
    %9 = vector.shape_cast %8 : vector<1x2x256xf32> to vector<2x256xf32>
    %10 = vector.extract_strided_slice %5 {offsets = [0, 0], sizes = [2, 128], strides = [1, 1]} : vector<2x256xf32> to vector<2x128xf32>
    %cst_7 = arith.constant dense<0.000000e+00> : vector<2x128xf32>
    %11 = tpu.matmul %2, %0, %cst_7 {dimension_numbers = #tpu.dot_dimension_numbers<[1], [0], [0], [1], [0, 0, 1, 1], [], []>} : vector<2x32xf32>, vector<32x128xf32>, vector<2x128xf32> -> vector<2x128xf32>
    %12 = arith.addf %10, %11 : vector<2x128xf32>
    %13 = vector.extract_strided_slice %9 {offsets = [0, 128], sizes = [2, 128], strides = [1, 1]} : vector<2x256xf32> to vector<2x128xf32>
    %cst_8 = arith.constant dense<0.000000e+00> : vector<2x128xf32>
    %14 = tpu.matmul %2, %1, %cst_8 {dimension_numbers = #tpu.dot_dimension_numbers<[1], [0], [0], [1], [0, 0, 1, 1], [], []>} : vector<2x32xf32>, vector<32x128xf32>, vector<2x128xf32> -> vector<2x128xf32>
    %15 = arith.addf %13, %14 : vector<2x128xf32>
    %16 = vector.extract_strided_slice %12 {offsets = [0, 0], sizes = [2, 32], strides = [1, 1]} : vector<2x128xf32> to vector<2x32xf32>
    %17 = arith.negf %16 : vector<2x32xf32>
    %18 = math.exp %17 : vector<2x32xf32>
    %cst_9 = arith.constant 1.000000e+00 : f32
    %19 = vector.broadcast %cst_9 : f32 to vector<2x32xf32>
    %20 = arith.addf %19, %18 : vector<2x32xf32>
    %21 = arith.divf %19, %20 : vector<2x32xf32>
    %22 = vector.extract_strided_slice %12 {offsets = [0, 32], sizes = [2, 32], strides = [1, 1]} : vector<2x128xf32> to vector<2x32xf32>
    %23 = arith.negf %22 : vector<2x32xf32>
    %24 = math.exp %23 : vector<2x32xf32>
    %cst_10 = arith.constant 1.000000e+00 : f32
    %25 = vector.broadcast %cst_10 : f32 to vector<2x32xf32>
    %26 = arith.addf %25, %24 : vector<2x32xf32>
    %27 = arith.divf %25, %26 : vector<2x32xf32>
    %28 = vector.extract_strided_slice %12 {offsets = [0, 64], sizes = [2, 32], strides = [1, 1]} : vector<2x128xf32> to vector<2x32xf32>
    %29 = math.tanh %28 : vector<2x32xf32>
    %30 = vector.extract_strided_slice %12 {offsets = [0, 96], sizes = [2, 32], strides = [1, 1]} : vector<2x128xf32> to vector<2x32xf32>
    %31 = arith.negf %30 : vector<2x32xf32>
    %32 = math.exp %31 : vector<2x32xf32>
    %cst_11 = arith.constant 1.000000e+00 : f32
    %33 = vector.broadcast %cst_11 : f32 to vector<2x32xf32>
    %34 = arith.addf %33, %32 : vector<2x32xf32>
    %35 = arith.divf %33, %34 : vector<2x32xf32>
    %36 = arith.mulf %27, %2 : vector<2x32xf32>
    %37 = arith.mulf %21, %29 : vector<2x32xf32>
    %38 = arith.addf %36, %37 : vector<2x32xf32>
    %39 = math.tanh %38 : vector<2x32xf32>
    %40 = arith.mulf %35, %39 : vector<2x32xf32>
    %41 = vector.extract_strided_slice %15 {offsets = [0, 0], sizes = [2, 32], strides = [1, 1]} : vector<2x128xf32> to vector<2x32xf32>
    %42 = arith.negf %41 : vector<2x32xf32>
    %43 = math.exp %42 : vector<2x32xf32>
    %cst_12 = arith.constant 1.000000e+00 : f32
    %44 = vector.broadcast %cst_12 : f32 to vector<2x32xf32>
    %45 = arith.addf %44, %43 : vector<2x32xf32>
    %46 = arith.divf %44, %45 : vector<2x32xf32>
    %47 = vector.extract_strided_slice %15 {offsets = [0, 32], sizes = [2, 32], strides = [1, 1]} : vector<2x128xf32> to vector<2x32xf32>
    %48 = arith.negf %47 : vector<2x32xf32>
    %49 = math.exp %48 : vector<2x32xf32>
    %cst_13 = arith.constant 1.000000e+00 : f32
    %50 = vector.broadcast %cst_13 : f32 to vector<2x32xf32>
    %51 = arith.addf %50, %49 : vector<2x32xf32>
    %52 = arith.divf %50, %51 : vector<2x32xf32>
    %53 = vector.extract_strided_slice %15 {offsets = [0, 64], sizes = [2, 32], strides = [1, 1]} : vector<2x128xf32> to vector<2x32xf32>
    %54 = math.tanh %53 : vector<2x32xf32>
    %55 = vector.extract_strided_slice %15 {offsets = [0, 96], sizes = [2, 32], strides = [1, 1]} : vector<2x128xf32> to vector<2x32xf32>
    %56 = arith.negf %55 : vector<2x32xf32>
    %57 = math.exp %56 : vector<2x32xf32>
    %cst_14 = arith.constant 1.000000e+00 : f32
    %58 = vector.broadcast %cst_14 : f32 to vector<2x32xf32>
    %59 = arith.addf %58, %57 : vector<2x32xf32>
    %60 = arith.divf %58, %59 : vector<2x32xf32>
    %61 = arith.mulf %52, %2 : vector<2x32xf32>
    %62 = arith.mulf %46, %54 : vector<2x32xf32>
    %63 = arith.addf %61, %62 : vector<2x32xf32>
    %64 = math.tanh %63 : vector<2x32xf32>
    %65 = arith.mulf %60, %64 : vector<2x32xf32>
    %66 = arith.index_cast %c0_i32 : i32 to index
    %c0_15 = arith.constant 0 : index
    %c0_16 = arith.constant 0 : index
    %67 = vector.load %arg3[%66, %c0_15, %c0_16] : memref<8x2x64xf32, #tpu.memory_space<vmem>>, vector<1x2x32xf32>
    %68 = vector.shape_cast %67 : vector<1x2x32xf32> to vector<2x32xf32>
    %69 = vector.shape_cast %40 : vector<2x32xf32> to vector<1x2x32xf32>
    tpu.vector_store %arg3[%66, %c0_15, %c0_16], %69 {strides = array<i32>} : memref<8x2x64xf32, #tpu.memory_space<vmem>>, vector<1x2x32xf32>,
    %c7_i32_17 = arith.constant 7 : i32
    %70 = arith.subi %c7_i32_17, %c0_i32 : i32
    %71 = arith.index_cast %70 : i32 to index
    %c0_18 = arith.constant 0 : index
    %c32 = arith.constant 32 : index
    %72 = vector.load %arg3[%71, %c0_18, %c32] : memref<8x2x64xf32, #tpu.memory_space<vmem>>, vector<1x2x32xf32>
    %73 = vector.shape_cast %72 : vector<1x2x32xf32> to vector<2x32xf32>
    %74 = vector.shape_cast %65 : vector<2x32xf32> to vector<1x2x32xf32>
    tpu.vector_store %arg3[%71, %c0_18, %c32], %74 {strides = array<i32>} : memref<8x2x64xf32, #tpu.memory_space<vmem>>, vector<1x2x32xf32>,
    %c1_i32 = arith.constant 1 : i32
    %75 = arith.index_cast %c1_i32 : i32 to index
    %c0_19 = arith.constant 0 : index
    %c0_20 = arith.constant 0 : index
    %76 = vector.load %arg0[%75, %c0_19, %c0_20] : memref<8x2x256xf32, #tpu.memory_space<vmem>>, vector<1x2x256xf32>
    %77 = vector.shape_cast %76 : vector<1x2x256xf32> to vector<2x256xf32>
    %c7_i32_21 = arith.constant 7 : i32
    %78 = arith.subi %c7_i32_21, %c1_i32 : i32
    %79 = arith.index_cast %78 : i32 to index
    %c0_22 = arith.constant 0 : index
    %c0_23 = arith.constant 0 : index
    %80 = vector.load %arg0[%79, %c0_22, %c0_23] : memref<8x2x256xf32, #tpu.memory_space<vmem>>, vector<1x2x256xf32>
    %81 = vector.shape_cast %80 : vector<1x2x256xf32> to vector<2x256xf32>
    %82 = vector.extract_strided_slice %77 {offsets = [0, 0], sizes = [2, 128], strides = [1, 1]} : vector<2x256xf32> to vector<2x128xf32>
    %cst_24 = arith.constant dense<0.000000e+00> : vector<2x128xf32>
    %83 = tpu.matmul %40, %0, %cst_24 {dimension_numbers = #tpu.dot_dimension_numbers<[1], [0], [0], [1], [0, 0, 1, 1], [], []>} : vector<2x32xf32>, vector<32x128xf32>, vector<2x128xf32> -> vector<2x128xf32>
    %84 = arith.addf %82, %83 : vector<2x128xf32>
    %85 = vector.extract_strided_slice %81 {offsets = [0, 128], sizes = [2, 128], strides = [1, 1]} : vector<2x256xf32> to vector<2x128xf32>
    %cst_25 = arith.constant dense<0.000000e+00> : vector<2x128xf32>
    %86 = tpu.matmul %65, %1, %cst_25 {dimension_numbers = #tpu.dot_dimension_numbers<[1], [0], [0], [1], [0, 0, 1, 1], [], []>} : vector<2x32xf32>, vector<32x128xf32>, vector<2x128xf32> -> vector<2x128xf32>
    %87 = arith.addf %85, %86 : vector<2x128xf32>
    %88 = vector.extract_strided_slice %84 {offsets = [0, 0], sizes = [2, 32], strides = [1, 1]} : vector<2x128xf32> to vector<2x32xf32>
    %89 = arith.negf %88 : vector<2x32xf32>
    %90 = math.exp %89 : vector<2x32xf32>
    %cst_26 = arith.constant 1.000000e+00 : f32
    %91 = vector.broadcast %cst_26 : f32 to vector<2x32xf32>
    %92 = arith.addf %91, %90 : vector<2x32xf32>
    %93 = arith.divf %91, %92 : vector<2x32xf32>
    %94 = vector.extract_strided_slice %84 {offsets = [0, 32], sizes = [2, 32], strides = [1, 1]} : vector<2x128xf32> to vector<2x32xf32>
    %95 = arith.negf %94 : vector<2x32xf32>
    %96 = math.exp %95 : vector<2x32xf32>
    %cst_27 = arith.constant 1.000000e+00 : f32
    %97 = vector.broadcast %cst_27 : f32 to vector<2x32xf32>
    %98 = arith.addf %97, %96 : vector<2x32xf32>
    %99 = arith.divf %97, %98 : vector<2x32xf32>
    %100 = vector.extract_strided_slice %84 {offsets = [0, 64], sizes = [2, 32], strides = [1, 1]} : vector<2x128xf32> to vector<2x32xf32>
    %101 = math.tanh %100 : vector<2x32xf32>
    %102 = vector.extract_strided_slice %84 {offsets = [0, 96], sizes = [2, 32], strides = [1, 1]} : vector<2x128xf32> to vector<2x32xf32>
    %103 = arith.negf %102 : vector<2x32xf32>
    %104 = math.exp %103 : vector<2x32xf32>
    %cst_28 = arith.constant 1.000000e+00 : f32
    %105 = vector.broadcast %cst_28 : f32 to vector<2x32xf32>
    %106 = arith.addf %105, %104 : vector<2x32xf32>
    %107 = arith.divf %105, %106 : vector<2x32xf32>
    %108 = arith.mulf %99, %38 : vector<2x32xf32>
    %109 = arith.mulf %93, %101 : vector<2x32xf32>
    %110 = arith.addf %108, %109 : vector<2x32xf32>
    %111 = math.tanh %110 : vector<2x32xf32>
    %112 = arith.mulf %107, %111 : vector<2x32xf32>
    %113 = vector.extract_strided_slice %87 {offsets = [0, 0], sizes = [2, 32], strides = [1, 1]} : vector<2x128xf32> to vector<2x32xf32>
    %114 = arith.negf %113 : vector<2x32xf32>
    %115 = math.exp %114 : vector<2x32xf32>
    %cst_29 = arith.constant 1.000000e+00 : f32
    %116 = vector.broadcast %cst_29 : f32 to vector<2x32xf32>
    %117 = arith.addf %116, %115 : vector<2x32xf32>
    %118 = arith.divf %116, %117 : vector<2x32xf32>
    %119 = vector.extract_strided_slice %87 {offsets = [0, 32], sizes = [2, 32], strides = [1, 1]} : vector<2x128xf32> to vector<2x32xf32>
    %120 = arith.negf %119 : vector<2x32xf32>
    %121 = math.exp %120 : vector<2x32xf32>
    %cst_30 = arith.constant 1.000000e+00 : f32
    %122 = vector.broadcast %cst_30 : f32 to vector<2x32xf32>
    %123 = arith.addf %122, %121 : vector<2x32xf32>
    %124 = arith.divf %122, %123 : vector<2x32xf32>
    %125 = vector.extract_strided_slice %87 {offsets = [0, 64], sizes = [2, 32], strides = [1, 1]} : vector<2x128xf32> to vector<2x32xf32>
    %126 = math.tanh %125 : vector<2x32xf32>
    %127 = vector.extract_strided_slice %87 {offsets = [0, 96], sizes = [2, 32], strides = [1, 1]} : vector<2x128xf32> to vector<2x32xf32>
    %128 = arith.negf %127 : vector<2x32xf32>
    %129 = math.exp %128 : vector<2x32xf32>
    %cst_31 = arith.constant 1.000000e+00 : f32
    %130 = vector.broadcast %cst_31 : f32 to vector<2x32xf32>
    %131 = arith.addf %130, %129 : vector<2x32xf32>
    %132 = arith.divf %130, %131 : vector<2x32xf32>
    %133 = arith.mulf %124, %63 : vector<2x32xf32>
    %134 = arith.mulf %118, %126 : vector<2x32xf32>
    %135 = arith.addf %133, %134 : vector<2x32xf32>
    %136 = math.tanh %135 : vector<2x32xf32>
    %137 = arith.mulf %132, %136 : vector<2x32xf32>
    %138 = arith.index_cast %c1_i32 : i32 to index
    %c0_32 = arith.constant 0 : index
    %c0_33 = arith.constant 0 : index
    %139 = vector.load %arg3[%138, %c0_32, %c0_33] : memref<8x2x64xf32, #tpu.memory_space<vmem>>, vector<1x2x32xf32>
    %140 = vector.shape_cast %139 : vector<1x2x32xf32> to vector<2x32xf32>
    %141 = vector.shape_cast %112 : vector<2x32xf32> to vector<1x2x32xf32>
    tpu.vector_store %arg3[%138, %c0_32, %c0_33], %141 {strides = array<i32>} : memref<8x2x64xf32, #tpu.memory_space<vmem>>, vector<1x2x32xf32>,
    %c7_i32_34 = arith.constant 7 : i32
    %142 = arith.subi %c7_i32_34, %c1_i32 : i32
    %143 = arith.index_cast %142 : i32 to index
    %c0_35 = arith.constant 0 : index
    %c32_36 = arith.constant 32 : index
    %144 = vector.load %arg3[%143, %c0_35, %c32_36] : memref<8x2x64xf32, #tpu.memory_space<vmem>>, vector<1x2x32xf32>
    %145 = vector.shape_cast %144 : vector<1x2x32xf32> to vector<2x32xf32>
    %146 = vector.shape_cast %137 : vector<2x32xf32> to vector<1x2x32xf32>
    tpu.vector_store %arg3[%143, %c0_35, %c32_36], %146 {strides = array<i32>} : memref<8x2x64xf32, #tpu.memory_space<vmem>>, vector<1x2x32xf32>,
    %c2_i32 = arith.constant 2 : i32
    %147 = arith.index_cast %c2_i32 : i32 to index
    %c0_37 = arith.constant 0 : index
    %c0_38 = arith.constant 0 : index
    %148 = vector.load %arg0[%147, %c0_37, %c0_38] : memref<8x2x256xf32, #tpu.memory_space<vmem>>, vector<1x2x256xf32>
    %149 = vector.shape_cast %148 : vector<1x2x256xf32> to vector<2x256xf32>
    %c7_i32_39 = arith.constant 7 : i32
    %150 = arith.subi %c7_i32_39, %c2_i32 : i32
    %151 = arith.index_cast %150 : i32 to index
    %c0_40 = arith.constant 0 : index
    %c0_41 = arith.constant 0 : index
    %152 = vector.load %arg0[%151, %c0_40, %c0_41] : memref<8x2x256xf32, #tpu.memory_space<vmem>>, vector<1x2x256xf32>
    %153 = vector.shape_cast %152 : vector<1x2x256xf32> to vector<2x256xf32>
    %154 = vector.extract_strided_slice %149 {offsets = [0, 0], sizes = [2, 128], strides = [1, 1]} : vector<2x256xf32> to vector<2x128xf32>
    %cst_42 = arith.constant dense<0.000000e+00> : vector<2x128xf32>
    %155 = tpu.matmul %112, %0, %cst_42 {dimension_numbers = #tpu.dot_dimension_numbers<[1], [0], [0], [1], [0, 0, 1, 1], [], []>} : vector<2x32xf32>, vector<32x128xf32>, vector<2x128xf32> -> vector<2x128xf32>
    %156 = arith.addf %154, %155 : vector<2x128xf32>
    %157 = vector.extract_strided_slice %153 {offsets = [0, 128], sizes = [2, 128], strides = [1, 1]} : vector<2x256xf32> to vector<2x128xf32>
    %cst_43 = arith.constant dense<0.000000e+00> : vector<2x128xf32>
    %158 = tpu.matmul %137, %1, %cst_43 {dimension_numbers = #tpu.dot_dimension_numbers<[1], [0], [0], [1], [0, 0, 1, 1], [], []>} : vector<2x32xf32>, vector<32x128xf32>, vector<2x128xf32> -> vector<2x128xf32>
    %159 = arith.addf %157, %158 : vector<2x128xf32>
    %160 = vector.extract_strided_slice %156 {offsets = [0, 0], sizes = [2, 32], strides = [1, 1]} : vector<2x128xf32> to vector<2x32xf32>
    %161 = arith.negf %160 : vector<2x32xf32>
    %162 = math.exp %161 : vector<2x32xf32>
    %cst_44 = arith.constant 1.000000e+00 : f32
    %163 = vector.broadcast %cst_44 : f32 to vector<2x32xf32>
    %164 = arith.addf %163, %162 : vector<2x32xf32>
    %165 = arith.divf %163, %164 : vector<2x32xf32>
    %166 = vector.extract_strided_slice %156 {offsets = [0, 32], sizes = [2, 32], strides = [1, 1]} : vector<2x128xf32> to vector<2x32xf32>
    %167 = arith.negf %166 : vector<2x32xf32>
    %168 = math.exp %167 : vector<2x32xf32>
    %cst_45 = arith.constant 1.000000e+00 : f32
    %169 = vector.broadcast %cst_45 : f32 to vector<2x32xf32>
    %170 = arith.addf %169, %168 : vector<2x32xf32>
    %171 = arith.divf %169, %170 : vector<2x32xf32>
    %172 = vector.extract_strided_slice %156 {offsets = [0, 64], sizes = [2, 32], strides = [1, 1]} : vector<2x128xf32> to vector<2x32xf32>
    %173 = math.tanh %172 : vector<2x32xf32>
    %174 = vector.extract_strided_slice %156 {offsets = [0, 96], sizes = [2, 32], strides = [1, 1]} : vector<2x128xf32> to vector<2x32xf32>
    %175 = arith.negf %174 : vector<2x32xf32>
    %176 = math.exp %175 : vector<2x32xf32>
    %cst_46 = arith.constant 1.000000e+00 : f32
    %177 = vector.broadcast %cst_46 : f32 to vector<2x32xf32>
    %178 = arith.addf %177, %176 : vector<2x32xf32>
    %179 = arith.divf %177, %178 : vector<2x32xf32>
    %180 = arith.mulf %171, %110 : vector<2x32xf32>
    %181 = arith.mulf %165, %173 : vector<2x32xf32>
    %182 = arith.addf %180, %181 : vector<2x32xf32>
    %183 = math.tanh %182 : vector<2x32xf32>
    %184 = arith.mulf %179, %183 : vector<2x32xf32>
    %185 = vector.extract_strided_slice %159 {offsets = [0, 0], sizes = [2, 32], strides = [1, 1]} : vector<2x128xf32> to vector<2x32xf32>
    %186 = arith.negf %185 : vector<2x32xf32>
    %187 = math.exp %186 : vector<2x32xf32>
    %cst_47 = arith.constant 1.000000e+00 : f32
    %188 = vector.broadcast %cst_47 : f32 to vector<2x32xf32>
    %189 = arith.addf %188, %187 : vector<2x32xf32>
    %190 = arith.divf %188, %189 : vector<2x32xf32>
    %191 = vector.extract_strided_slice %159 {offsets = [0, 32], sizes = [2, 32], strides = [1, 1]} : vector<2x128xf32> to vector<2x32xf32>
    %192 = arith.negf %191 : vector<2x32xf32>
    %193 = math.exp %192 : vector<2x32xf32>
    %cst_48 = arith.constant 1.000000e+00 : f32
    %194 = vector.broadcast %cst_48 : f32 to vector<2x32xf32>
    %195 = arith.addf %194, %193 : vector<2x32xf32>
    %196 = arith.divf %194, %195 : vector<2x32xf32>
    %197 = vector.extract_strided_slice %159 {offsets = [0, 64], sizes = [2, 32], strides = [1, 1]} : vector<2x128xf32> to vector<2x32xf32>
    %198 = math.tanh %197 : vector<2x32xf32>
    %199 = vector.extract_strided_slice %159 {offsets = [0, 96], sizes = [2, 32], strides = [1, 1]} : vector<2x128xf32> to vector<2x32xf32>
    %200 = arith.negf %199 : vector<2x32xf32>
    %201 = math.exp %200 : vector<2x32xf32>
    %cst_49 = arith.constant 1.000000e+00 : f32
    %202 = vector.broadcast %cst_49 : f32 to vector<2x32xf32>
    %203 = arith.addf %202, %201 : vector<2x32xf32>
    %204 = arith.divf %202, %203 : vector<2x32xf32>
    %205 = arith.mulf %196, %135 : vector<2x32xf32>
    %206 = arith.mulf %190, %198 : vector<2x32xf32>
    %207 = arith.addf %205, %206 : vector<2x32xf32>
    %208 = math.tanh %207 : vector<2x32xf32>
    %209 = arith.mulf %204, %208 : vector<2x32xf32>
    %210 = arith.index_cast %c2_i32 : i32 to index
    %c0_50 = arith.constant 0 : index
    %c0_51 = arith.constant 0 : index
    %211 = vector.load %arg3[%210, %c0_50, %c0_51] : memref<8x2x64xf32, #tpu.memory_space<vmem>>, vector<1x2x32xf32>
    %212 = vector.shape_cast %211 : vector<1x2x32xf32> to vector<2x32xf32>
    %213 = vector.shape_cast %184 : vector<2x32xf32> to vector<1x2x32xf32>
    tpu.vector_store %arg3[%210, %c0_50, %c0_51], %213 {strides = array<i32>} : memref<8x2x64xf32, #tpu.memory_space<vmem>>, vector<1x2x32xf32>,
    %c7_i32_52 = arith.constant 7 : i32
    %214 = arith.subi %c7_i32_52, %c2_i32 : i32
    %215 = arith.index_cast %214 : i32 to index
    %c0_53 = arith.constant 0 : index
    %c32_54 = arith.constant 32 : index
    %216 = vector.load %arg3[%215, %c0_53, %c32_54] : memref<8x2x64xf32, #tpu.memory_space<vmem>>, vector<1x2x32xf32>
    %217 = vector.shape_cast %216 : vector<1x2x32xf32> to vector<2x32xf32>
    %218 = vector.shape_cast %209 : vector<2x32xf32> to vector<1x2x32xf32>
    tpu.vector_store %arg3[%215, %c0_53, %c32_54], %218 {strides = array<i32>} : memref<8x2x64xf32, #tpu.memory_space<vmem>>, vector<1x2x32xf32>,
    %c3_i32 = arith.constant 3 : i32
    %219 = arith.index_cast %c3_i32 : i32 to index
    %c0_55 = arith.constant 0 : index
    %c0_56 = arith.constant 0 : index
    %220 = vector.load %arg0[%219, %c0_55, %c0_56] : memref<8x2x256xf32, #tpu.memory_space<vmem>>, vector<1x2x256xf32>
    %221 = vector.shape_cast %220 : vector<1x2x256xf32> to vector<2x256xf32>
    %c7_i32_57 = arith.constant 7 : i32
    %222 = arith.subi %c7_i32_57, %c3_i32 : i32
    %223 = arith.index_cast %222 : i32 to index
    %c0_58 = arith.constant 0 : index
    %c0_59 = arith.constant 0 : index
    %224 = vector.load %arg0[%223, %c0_58, %c0_59] : memref<8x2x256xf32, #tpu.memory_space<vmem>>, vector<1x2x256xf32>
    %225 = vector.shape_cast %224 : vector<1x2x256xf32> to vector<2x256xf32>
    %226 = vector.extract_strided_slice %221 {offsets = [0, 0], sizes = [2, 128], strides = [1, 1]} : vector<2x256xf32> to vector<2x128xf32>
    %cst_60 = arith.constant dense<0.000000e+00> : vector<2x128xf32>
    %227 = tpu.matmul %184, %0, %cst_60 {dimension_numbers = #tpu.dot_dimension_numbers<[1], [0], [0], [1], [0, 0, 1, 1], [], []>} : vector<2x32xf32>, vector<32x128xf32>, vector<2x128xf32> -> vector<2x128xf32>
    %228 = arith.addf %226, %227 : vector<2x128xf32>
    %229 = vector.extract_strided_slice %225 {offsets = [0, 128], sizes = [2, 128], strides = [1, 1]} : vector<2x256xf32> to vector<2x128xf32>
    %cst_61 = arith.constant dense<0.000000e+00> : vector<2x128xf32>
    %230 = tpu.matmul %209, %1, %cst_61 {dimension_numbers = #tpu.dot_dimension_numbers<[1], [0], [0], [1], [0, 0, 1, 1], [], []>} : vector<2x32xf32>, vector<32x128xf32>, vector<2x128xf32> -> vector<2x128xf32>
    %231 = arith.addf %229, %230 : vector<2x128xf32>
    %232 = vector.extract_strided_slice %228 {offsets = [0, 0], sizes = [2, 32], strides = [1, 1]} : vector<2x128xf32> to vector<2x32xf32>
    %233 = arith.negf %232 : vector<2x32xf32>
    %234 = math.exp %233 : vector<2x32xf32>
    %cst_62 = arith.constant 1.000000e+00 : f32
    %235 = vector.broadcast %cst_62 : f32 to vector<2x32xf32>
    %236 = arith.addf %235, %234 : vector<2x32xf32>
    %237 = arith.divf %235, %236 : vector<2x32xf32>
    %238 = vector.extract_strided_slice %228 {offsets = [0, 32], sizes = [2, 32], strides = [1, 1]} : vector<2x128xf32> to vector<2x32xf32>
    %239 = arith.negf %238 : vector<2x32xf32>
    %240 = math.exp %239 : vector<2x32xf32>
    %cst_63 = arith.constant 1.000000e+00 : f32
    %241 = vector.broadcast %cst_63 : f32 to vector<2x32xf32>
    %242 = arith.addf %241, %240 : vector<2x32xf32>
    %243 = arith.divf %241, %242 : vector<2x32xf32>
    %244 = vector.extract_strided_slice %228 {offsets = [0, 64], sizes = [2, 32], strides = [1, 1]} : vector<2x128xf32> to vector<2x32xf32>
    %245 = math.tanh %244 : vector<2x32xf32>
    %246 = vector.extract_strided_slice %228 {offsets = [0, 96], sizes = [2, 32], strides = [1, 1]} : vector<2x128xf32> to vector<2x32xf32>
    %247 = arith.negf %246 : vector<2x32xf32>
    %248 = math.exp %247 : vector<2x32xf32>
    %cst_64 = arith.constant 1.000000e+00 : f32
    %249 = vector.broadcast %cst_64 : f32 to vector<2x32xf32>
    %250 = arith.addf %249, %248 : vector<2x32xf32>
    %251 = arith.divf %249, %250 : vector<2x32xf32>
    %252 = arith.mulf %243, %182 : vector<2x32xf32>
    %253 = arith.mulf %237, %245 : vector<2x32xf32>
    %254 = arith.addf %252, %253 : vector<2x32xf32>
    %255 = math.tanh %254 : vector<2x32xf32>
    %256 = arith.mulf %251, %255 : vector<2x32xf32>
    %257 = vector.extract_strided_slice %231 {offsets = [0, 0], sizes = [2, 32], strides = [1, 1]} : vector<2x128xf32> to vector<2x32xf32>
    %258 = arith.negf %257 : vector<2x32xf32>
    %259 = math.exp %258 : vector<2x32xf32>
    %cst_65 = arith.constant 1.000000e+00 : f32
    %260 = vector.broadcast %cst_65 : f32 to vector<2x32xf32>
    %261 = arith.addf %260, %259 : vector<2x32xf32>
    %262 = arith.divf %260, %261 : vector<2x32xf32>
    %263 = vector.extract_strided_slice %231 {offsets = [0, 32], sizes = [2, 32], strides = [1, 1]} : vector<2x128xf32> to vector<2x32xf32>
    %264 = arith.negf %263 : vector<2x32xf32>
    %265 = math.exp %264 : vector<2x32xf32>
    %cst_66 = arith.constant 1.000000e+00 : f32
    %266 = vector.broadcast %cst_66 : f32 to vector<2x32xf32>
    %267 = arith.addf %266, %265 : vector<2x32xf32>
    %268 = arith.divf %266, %267 : vector<2x32xf32>
    %269 = vector.extract_strided_slice %231 {offsets = [0, 64], sizes = [2, 32], strides = [1, 1]} : vector<2x128xf32> to vector<2x32xf32>
    %270 = math.tanh %269 : vector<2x32xf32>
    %271 = vector.extract_strided_slice %231 {offsets = [0, 96], sizes = [2, 32], strides = [1, 1]} : vector<2x128xf32> to vector<2x32xf32>
    %272 = arith.negf %271 : vector<2x32xf32>
    %273 = math.exp %272 : vector<2x32xf32>
    %cst_67 = arith.constant 1.000000e+00 : f32
    %274 = vector.broadcast %cst_67 : f32 to vector<2x32xf32>
    %275 = arith.addf %274, %273 : vector<2x32xf32>
    %276 = arith.divf %274, %275 : vector<2x32xf32>
    %277 = arith.mulf %268, %207 : vector<2x32xf32>
    %278 = arith.mulf %262, %270 : vector<2x32xf32>
    %279 = arith.addf %277, %278 : vector<2x32xf32>
    %280 = math.tanh %279 : vector<2x32xf32>
    %281 = arith.mulf %276, %280 : vector<2x32xf32>
    %282 = arith.index_cast %c3_i32 : i32 to index
    %c0_68 = arith.constant 0 : index
    %c0_69 = arith.constant 0 : index
    %283 = vector.load %arg3[%282, %c0_68, %c0_69] : memref<8x2x64xf32, #tpu.memory_space<vmem>>, vector<1x2x32xf32>
    %284 = vector.shape_cast %283 : vector<1x2x32xf32> to vector<2x32xf32>
    %285 = vector.shape_cast %256 : vector<2x32xf32> to vector<1x2x32xf32>
    tpu.vector_store %arg3[%282, %c0_68, %c0_69], %285 {strides = array<i32>} : memref<8x2x64xf32, #tpu.memory_space<vmem>>, vector<1x2x32xf32>,
    %c7_i32_70 = arith.constant 7 : i32
    %286 = arith.subi %c7_i32_70, %c3_i32 : i32
    %287 = arith.index_cast %286 : i32 to index
    %c0_71 = arith.constant 0 : index
    %c32_72 = arith.constant 32 : index
    %288 = vector.load %arg3[%287, %c0_71, %c32_72] : memref<8x2x64xf32, #tpu.memory_space<vmem>>, vector<1x2x32xf32>
    %289 = vector.shape_cast %288 : vector<1x2x32xf32> to vector<2x32xf32>
    %290 = vector.shape_cast %281 : vector<2x32xf32> to vector<1x2x32xf32>
    tpu.vector_store %arg3[%287, %c0_71, %c32_72], %290 {strides = array<i32>} : memref<8x2x64xf32, #tpu.memory_space<vmem>>, vector<1x2x32xf32>,
    %c4_i32 = arith.constant 4 : i32
    %291 = arith.index_cast %c4_i32 : i32 to index
    %c0_73 = arith.constant 0 : index
    %c0_74 = arith.constant 0 : index
    %292 = vector.load %arg0[%291, %c0_73, %c0_74] : memref<8x2x256xf32, #tpu.memory_space<vmem>>, vector<1x2x256xf32>
    %293 = vector.shape_cast %292 : vector<1x2x256xf32> to vector<2x256xf32>
    %c7_i32_75 = arith.constant 7 : i32
    %294 = arith.subi %c7_i32_75, %c4_i32 : i32
    %295 = arith.index_cast %294 : i32 to index
    %c0_76 = arith.constant 0 : index
    %c0_77 = arith.constant 0 : index
    %296 = vector.load %arg0[%295, %c0_76, %c0_77] : memref<8x2x256xf32, #tpu.memory_space<vmem>>, vector<1x2x256xf32>
    %297 = vector.shape_cast %296 : vector<1x2x256xf32> to vector<2x256xf32>
    %298 = vector.extract_strided_slice %293 {offsets = [0, 0], sizes = [2, 128], strides = [1, 1]} : vector<2x256xf32> to vector<2x128xf32>
    %cst_78 = arith.constant dense<0.000000e+00> : vector<2x128xf32>
    %299 = tpu.matmul %256, %0, %cst_78 {dimension_numbers = #tpu.dot_dimension_numbers<[1], [0], [0], [1], [0, 0, 1, 1], [], []>} : vector<2x32xf32>, vector<32x128xf32>, vector<2x128xf32> -> vector<2x128xf32>
    %300 = arith.addf %298, %299 : vector<2x128xf32>
    %301 = vector.extract_strided_slice %297 {offsets = [0, 128], sizes = [2, 128], strides = [1, 1]} : vector<2x256xf32> to vector<2x128xf32>
    %cst_79 = arith.constant dense<0.000000e+00> : vector<2x128xf32>
    %302 = tpu.matmul %281, %1, %cst_79 {dimension_numbers = #tpu.dot_dimension_numbers<[1], [0], [0], [1], [0, 0, 1, 1], [], []>} : vector<2x32xf32>, vector<32x128xf32>, vector<2x128xf32> -> vector<2x128xf32>
    %303 = arith.addf %301, %302 : vector<2x128xf32>
    %304 = vector.extract_strided_slice %300 {offsets = [0, 0], sizes = [2, 32], strides = [1, 1]} : vector<2x128xf32> to vector<2x32xf32>
    %305 = arith.negf %304 : vector<2x32xf32>
    %306 = math.exp %305 : vector<2x32xf32>
    %cst_80 = arith.constant 1.000000e+00 : f32
    %307 = vector.broadcast %cst_80 : f32 to vector<2x32xf32>
    %308 = arith.addf %307, %306 : vector<2x32xf32>
    %309 = arith.divf %307, %308 : vector<2x32xf32>
    %310 = vector.extract_strided_slice %300 {offsets = [0, 32], sizes = [2, 32], strides = [1, 1]} : vector<2x128xf32> to vector<2x32xf32>
    %311 = arith.negf %310 : vector<2x32xf32>
    %312 = math.exp %311 : vector<2x32xf32>
    %cst_81 = arith.constant 1.000000e+00 : f32
    %313 = vector.broadcast %cst_81 : f32 to vector<2x32xf32>
    %314 = arith.addf %313, %312 : vector<2x32xf32>
    %315 = arith.divf %313, %314 : vector<2x32xf32>
    %316 = vector.extract_strided_slice %300 {offsets = [0, 64], sizes = [2, 32], strides = [1, 1]} : vector<2x128xf32> to vector<2x32xf32>
    %317 = math.tanh %316 : vector<2x32xf32>
    %318 = vector.extract_strided_slice %300 {offsets = [0, 96], sizes = [2, 32], strides = [1, 1]} : vector<2x128xf32> to vector<2x32xf32>
    %319 = arith.negf %318 : vector<2x32xf32>
    %320 = math.exp %319 : vector<2x32xf32>
    %cst_82 = arith.constant 1.000000e+00 : f32
    %321 = vector.broadcast %cst_82 : f32 to vector<2x32xf32>
    %322 = arith.addf %321, %320 : vector<2x32xf32>
    %323 = arith.divf %321, %322 : vector<2x32xf32>
    %324 = arith.mulf %315, %254 : vector<2x32xf32>
    %325 = arith.mulf %309, %317 : vector<2x32xf32>
    %326 = arith.addf %324, %325 : vector<2x32xf32>
    %327 = math.tanh %326 : vector<2x32xf32>
    %328 = arith.mulf %323, %327 : vector<2x32xf32>
    %329 = vector.extract_strided_slice %303 {offsets = [0, 0], sizes = [2, 32], strides = [1, 1]} : vector<2x128xf32> to vector<2x32xf32>
    %330 = arith.negf %329 : vector<2x32xf32>
    %331 = math.exp %330 : vector<2x32xf32>
    %cst_83 = arith.constant 1.000000e+00 : f32
    %332 = vector.broadcast %cst_83 : f32 to vector<2x32xf32>
    %333 = arith.addf %332, %331 : vector<2x32xf32>
    %334 = arith.divf %332, %333 : vector<2x32xf32>
    %335 = vector.extract_strided_slice %303 {offsets = [0, 32], sizes = [2, 32], strides = [1, 1]} : vector<2x128xf32> to vector<2x32xf32>
    %336 = arith.negf %335 : vector<2x32xf32>
    %337 = math.exp %336 : vector<2x32xf32>
    %cst_84 = arith.constant 1.000000e+00 : f32
    %338 = vector.broadcast %cst_84 : f32 to vector<2x32xf32>
    %339 = arith.addf %338, %337 : vector<2x32xf32>
    %340 = arith.divf %338, %339 : vector<2x32xf32>
    %341 = vector.extract_strided_slice %303 {offsets = [0, 64], sizes = [2, 32], strides = [1, 1]} : vector<2x128xf32> to vector<2x32xf32>
    %342 = math.tanh %341 : vector<2x32xf32>
    %343 = vector.extract_strided_slice %303 {offsets = [0, 96], sizes = [2, 32], strides = [1, 1]} : vector<2x128xf32> to vector<2x32xf32>
    %344 = arith.negf %343 : vector<2x32xf32>
    %345 = math.exp %344 : vector<2x32xf32>
    %cst_85 = arith.constant 1.000000e+00 : f32
    %346 = vector.broadcast %cst_85 : f32 to vector<2x32xf32>
    %347 = arith.addf %346, %345 : vector<2x32xf32>
    %348 = arith.divf %346, %347 : vector<2x32xf32>
    %349 = arith.mulf %340, %279 : vector<2x32xf32>
    %350 = arith.mulf %334, %342 : vector<2x32xf32>
    %351 = arith.addf %349, %350 : vector<2x32xf32>
    %352 = math.tanh %351 : vector<2x32xf32>
    %353 = arith.mulf %348, %352 : vector<2x32xf32>
    %354 = arith.index_cast %c4_i32 : i32 to index
    %c0_86 = arith.constant 0 : index
    %c0_87 = arith.constant 0 : index
    %355 = vector.load %arg3[%354, %c0_86, %c0_87] : memref<8x2x64xf32, #tpu.memory_space<vmem>>, vector<1x2x32xf32>
    %356 = vector.shape_cast %355 : vector<1x2x32xf32> to vector<2x32xf32>
    %357 = vector.shape_cast %328 : vector<2x32xf32> to vector<1x2x32xf32>
    tpu.vector_store %arg3[%354, %c0_86, %c0_87], %357 {strides = array<i32>} : memref<8x2x64xf32, #tpu.memory_space<vmem>>, vector<1x2x32xf32>,
    %c7_i32_88 = arith.constant 7 : i32
    %358 = arith.subi %c7_i32_88, %c4_i32 : i32
    %359 = arith.index_cast %358 : i32 to index
    %c0_89 = arith.constant 0 : index
    %c32_90 = arith.constant 32 : index
    %360 = vector.load %arg3[%359, %c0_89, %c32_90] : memref<8x2x64xf32, #tpu.memory_space<vmem>>, vector<1x2x32xf32>
    %361 = vector.shape_cast %360 : vector<1x2x32xf32> to vector<2x32xf32>
    %362 = vector.shape_cast %353 : vector<2x32xf32> to vector<1x2x32xf32>
    tpu.vector_store %arg3[%359, %c0_89, %c32_90], %362 {strides = array<i32>} : memref<8x2x64xf32, #tpu.memory_space<vmem>>, vector<1x2x32xf32>,
    %c5_i32 = arith.constant 5 : i32
    %363 = arith.index_cast %c5_i32 : i32 to index
    %c0_91 = arith.constant 0 : index
    %c0_92 = arith.constant 0 : index
    %364 = vector.load %arg0[%363, %c0_91, %c0_92] : memref<8x2x256xf32, #tpu.memory_space<vmem>>, vector<1x2x256xf32>
    %365 = vector.shape_cast %364 : vector<1x2x256xf32> to vector<2x256xf32>
    %c7_i32_93 = arith.constant 7 : i32
    %366 = arith.subi %c7_i32_93, %c5_i32 : i32
    %367 = arith.index_cast %366 : i32 to index
    %c0_94 = arith.constant 0 : index
    %c0_95 = arith.constant 0 : index
    %368 = vector.load %arg0[%367, %c0_94, %c0_95] : memref<8x2x256xf32, #tpu.memory_space<vmem>>, vector<1x2x256xf32>
    %369 = vector.shape_cast %368 : vector<1x2x256xf32> to vector<2x256xf32>
    %370 = vector.extract_strided_slice %365 {offsets = [0, 0], sizes = [2, 128], strides = [1, 1]} : vector<2x256xf32> to vector<2x128xf32>
    %cst_96 = arith.constant dense<0.000000e+00> : vector<2x128xf32>
    %371 = tpu.matmul %328, %0, %cst_96 {dimension_numbers = #tpu.dot_dimension_numbers<[1], [0], [0], [1], [0, 0, 1, 1], [], []>} : vector<2x32xf32>, vector<32x128xf32>, vector<2x128xf32> -> vector<2x128xf32>
    %372 = arith.addf %370, %371 : vector<2x128xf32>
    %373 = vector.extract_strided_slice %369 {offsets = [0, 128], sizes = [2, 128], strides = [1, 1]} : vector<2x256xf32> to vector<2x128xf32>
    %cst_97 = arith.constant dense<0.000000e+00> : vector<2x128xf32>
    %374 = tpu.matmul %353, %1, %cst_97 {dimension_numbers = #tpu.dot_dimension_numbers<[1], [0], [0], [1], [0, 0, 1, 1], [], []>} : vector<2x32xf32>, vector<32x128xf32>, vector<2x128xf32> -> vector<2x128xf32>
    %375 = arith.addf %373, %374 : vector<2x128xf32>
    %376 = vector.extract_strided_slice %372 {offsets = [0, 0], sizes = [2, 32], strides = [1, 1]} : vector<2x128xf32> to vector<2x32xf32>
    %377 = arith.negf %376 : vector<2x32xf32>
    %378 = math.exp %377 : vector<2x32xf32>
    %cst_98 = arith.constant 1.000000e+00 : f32
    %379 = vector.broadcast %cst_98 : f32 to vector<2x32xf32>
    %380 = arith.addf %379, %378 : vector<2x32xf32>
    %381 = arith.divf %379, %380 : vector<2x32xf32>
    %382 = vector.extract_strided_slice %372 {offsets = [0, 32], sizes = [2, 32], strides = [1, 1]} : vector<2x128xf32> to vector<2x32xf32>
    %383 = arith.negf %382 : vector<2x32xf32>
    %384 = math.exp %383 : vector<2x32xf32>
    %cst_99 = arith.constant 1.000000e+00 : f32
    %385 = vector.broadcast %cst_99 : f32 to vector<2x32xf32>
    %386 = arith.addf %385, %384 : vector<2x32xf32>
    %387 = arith.divf %385, %386 : vector<2x32xf32>
    %388 = vector.extract_strided_slice %372 {offsets = [0, 64], sizes = [2, 32], strides = [1, 1]} : vector<2x128xf32> to vector<2x32xf32>
    %389 = math.tanh %388 : vector<2x32xf32>
    %390 = vector.extract_strided_slice %372 {offsets = [0, 96], sizes = [2, 32], strides = [1, 1]} : vector<2x128xf32> to vector<2x32xf32>
    %391 = arith.negf %390 : vector<2x32xf32>
    %392 = math.exp %391 : vector<2x32xf32>
    %cst_100 = arith.constant 1.000000e+00 : f32
    %393 = vector.broadcast %cst_100 : f32 to vector<2x32xf32>
    %394 = arith.addf %393, %392 : vector<2x32xf32>
    %395 = arith.divf %393, %394 : vector<2x32xf32>
    %396 = arith.mulf %387, %326 : vector<2x32xf32>
    %397 = arith.mulf %381, %389 : vector<2x32xf32>
    %398 = arith.addf %396, %397 : vector<2x32xf32>
    %399 = math.tanh %398 : vector<2x32xf32>
    %400 = arith.mulf %395, %399 : vector<2x32xf32>
    %401 = vector.extract_strided_slice %375 {offsets = [0, 0], sizes = [2, 32], strides = [1, 1]} : vector<2x128xf32> to vector<2x32xf32>
    %402 = arith.negf %401 : vector<2x32xf32>
    %403 = math.exp %402 : vector<2x32xf32>
    %cst_101 = arith.constant 1.000000e+00 : f32
    %404 = vector.broadcast %cst_101 : f32 to vector<2x32xf32>
    %405 = arith.addf %404, %403 : vector<2x32xf32>
    %406 = arith.divf %404, %405 : vector<2x32xf32>
    %407 = vector.extract_strided_slice %375 {offsets = [0, 32], sizes = [2, 32], strides = [1, 1]} : vector<2x128xf32> to vector<2x32xf32>
    %408 = arith.negf %407 : vector<2x32xf32>
    %409 = math.exp %408 : vector<2x32xf32>
    %cst_102 = arith.constant 1.000000e+00 : f32
    %410 = vector.broadcast %cst_102 : f32 to vector<2x32xf32>
    %411 = arith.addf %410, %409 : vector<2x32xf32>
    %412 = arith.divf %410, %411 : vector<2x32xf32>
    %413 = vector.extract_strided_slice %375 {offsets = [0, 64], sizes = [2, 32], strides = [1, 1]} : vector<2x128xf32> to vector<2x32xf32>
    %414 = math.tanh %413 : vector<2x32xf32>
    %415 = vector.extract_strided_slice %375 {offsets = [0, 96], sizes = [2, 32], strides = [1, 1]} : vector<2x128xf32> to vector<2x32xf32>
    %416 = arith.negf %415 : vector<2x32xf32>
    %417 = math.exp %416 : vector<2x32xf32>
    %cst_103 = arith.constant 1.000000e+00 : f32
    %418 = vector.broadcast %cst_103 : f32 to vector<2x32xf32>
    %419 = arith.addf %418, %417 : vector<2x32xf32>
    %420 = arith.divf %418, %419 : vector<2x32xf32>
    %421 = arith.mulf %412, %351 : vector<2x32xf32>
    %422 = arith.mulf %406, %414 : vector<2x32xf32>
    %423 = arith.addf %421, %422 : vector<2x32xf32>
    %424 = math.tanh %423 : vector<2x32xf32>
    %425 = arith.mulf %420, %424 : vector<2x32xf32>
    %426 = arith.index_cast %c5_i32 : i32 to index
    %c0_104 = arith.constant 0 : index
    %c0_105 = arith.constant 0 : index
    %427 = vector.load %arg3[%426, %c0_104, %c0_105] : memref<8x2x64xf32, #tpu.memory_space<vmem>>, vector<1x2x32xf32>
    %428 = vector.shape_cast %427 : vector<1x2x32xf32> to vector<2x32xf32>
    %429 = vector.shape_cast %400 : vector<2x32xf32> to vector<1x2x32xf32>
    tpu.vector_store %arg3[%426, %c0_104, %c0_105], %429 {strides = array<i32>} : memref<8x2x64xf32, #tpu.memory_space<vmem>>, vector<1x2x32xf32>,
    %c7_i32_106 = arith.constant 7 : i32
    %430 = arith.subi %c7_i32_106, %c5_i32 : i32
    %431 = arith.index_cast %430 : i32 to index
    %c0_107 = arith.constant 0 : index
    %c32_108 = arith.constant 32 : index
    %432 = vector.load %arg3[%431, %c0_107, %c32_108] : memref<8x2x64xf32, #tpu.memory_space<vmem>>, vector<1x2x32xf32>
    %433 = vector.shape_cast %432 : vector<1x2x32xf32> to vector<2x32xf32>
    %434 = vector.shape_cast %425 : vector<2x32xf32> to vector<1x2x32xf32>
    tpu.vector_store %arg3[%431, %c0_107, %c32_108], %434 {strides = array<i32>} : memref<8x2x64xf32, #tpu.memory_space<vmem>>, vector<1x2x32xf32>,
    %c6_i32 = arith.constant 6 : i32
    %435 = arith.index_cast %c6_i32 : i32 to index
    %c0_109 = arith.constant 0 : index
    %c0_110 = arith.constant 0 : index
    %436 = vector.load %arg0[%435, %c0_109, %c0_110] : memref<8x2x256xf32, #tpu.memory_space<vmem>>, vector<1x2x256xf32>
    %437 = vector.shape_cast %436 : vector<1x2x256xf32> to vector<2x256xf32>
    %c7_i32_111 = arith.constant 7 : i32
    %438 = arith.subi %c7_i32_111, %c6_i32 : i32
    %439 = arith.index_cast %438 : i32 to index
    %c0_112 = arith.constant 0 : index
    %c0_113 = arith.constant 0 : index
    %440 = vector.load %arg0[%439, %c0_112, %c0_113] : memref<8x2x256xf32, #tpu.memory_space<vmem>>, vector<1x2x256xf32>
    %441 = vector.shape_cast %440 : vector<1x2x256xf32> to vector<2x256xf32>
    %442 = vector.extract_strided_slice %437 {offsets = [0, 0], sizes = [2, 128], strides = [1, 1]} : vector<2x256xf32> to vector<2x128xf32>
    %cst_114 = arith.constant dense<0.000000e+00> : vector<2x128xf32>
    %443 = tpu.matmul %400, %0, %cst_114 {dimension_numbers = #tpu.dot_dimension_numbers<[1], [0], [0], [1], [0, 0, 1, 1], [], []>} : vector<2x32xf32>, vector<32x128xf32>, vector<2x128xf32> -> vector<2x128xf32>
    %444 = arith.addf %442, %443 : vector<2x128xf32>
    %445 = vector.extract_strided_slice %441 {offsets = [0, 128], sizes = [2, 128], strides = [1, 1]} : vector<2x256xf32> to vector<2x128xf32>
    %cst_115 = arith.constant dense<0.000000e+00> : vector<2x128xf32>
    %446 = tpu.matmul %425, %1, %cst_115 {dimension_numbers = #tpu.dot_dimension_numbers<[1], [0], [0], [1], [0, 0, 1, 1], [], []>} : vector<2x32xf32>, vector<32x128xf32>, vector<2x128xf32> -> vector<2x128xf32>
    %447 = arith.addf %445, %446 : vector<2x128xf32>
    %448 = vector.extract_strided_slice %444 {offsets = [0, 0], sizes = [2, 32], strides = [1, 1]} : vector<2x128xf32> to vector<2x32xf32>
    %449 = arith.negf %448 : vector<2x32xf32>
    %450 = math.exp %449 : vector<2x32xf32>
    %cst_116 = arith.constant 1.000000e+00 : f32
    %451 = vector.broadcast %cst_116 : f32 to vector<2x32xf32>
    %452 = arith.addf %451, %450 : vector<2x32xf32>
    %453 = arith.divf %451, %452 : vector<2x32xf32>
    %454 = vector.extract_strided_slice %444 {offsets = [0, 32], sizes = [2, 32], strides = [1, 1]} : vector<2x128xf32> to vector<2x32xf32>
    %455 = arith.negf %454 : vector<2x32xf32>
    %456 = math.exp %455 : vector<2x32xf32>
    %cst_117 = arith.constant 1.000000e+00 : f32
    %457 = vector.broadcast %cst_117 : f32 to vector<2x32xf32>
    %458 = arith.addf %457, %456 : vector<2x32xf32>
    %459 = arith.divf %457, %458 : vector<2x32xf32>
    %460 = vector.extract_strided_slice %444 {offsets = [0, 64], sizes = [2, 32], strides = [1, 1]} : vector<2x128xf32> to vector<2x32xf32>
    %461 = math.tanh %460 : vector<2x32xf32>
    %462 = vector.extract_strided_slice %444 {offsets = [0, 96], sizes = [2, 32], strides = [1, 1]} : vector<2x128xf32> to vector<2x32xf32>
    %463 = arith.negf %462 : vector<2x32xf32>
    %464 = math.exp %463 : vector<2x32xf32>
    %cst_118 = arith.constant 1.000000e+00 : f32
    %465 = vector.broadcast %cst_118 : f32 to vector<2x32xf32>
    %466 = arith.addf %465, %464 : vector<2x32xf32>
    %467 = arith.divf %465, %466 : vector<2x32xf32>
    %468 = arith.mulf %459, %398 : vector<2x32xf32>
    %469 = arith.mulf %453, %461 : vector<2x32xf32>
    %470 = arith.addf %468, %469 : vector<2x32xf32>
    %471 = math.tanh %470 : vector<2x32xf32>
    %472 = arith.mulf %467, %471 : vector<2x32xf32>
    %473 = vector.extract_strided_slice %447 {offsets = [0, 0], sizes = [2, 32], strides = [1, 1]} : vector<2x128xf32> to vector<2x32xf32>
    %474 = arith.negf %473 : vector<2x32xf32>
    %475 = math.exp %474 : vector<2x32xf32>
    %cst_119 = arith.constant 1.000000e+00 : f32
    %476 = vector.broadcast %cst_119 : f32 to vector<2x32xf32>
    %477 = arith.addf %476, %475 : vector<2x32xf32>
    %478 = arith.divf %476, %477 : vector<2x32xf32>
    %479 = vector.extract_strided_slice %447 {offsets = [0, 32], sizes = [2, 32], strides = [1, 1]} : vector<2x128xf32> to vector<2x32xf32>
    %480 = arith.negf %479 : vector<2x32xf32>
    %481 = math.exp %480 : vector<2x32xf32>
    %cst_120 = arith.constant 1.000000e+00 : f32
    %482 = vector.broadcast %cst_120 : f32 to vector<2x32xf32>
    %483 = arith.addf %482, %481 : vector<2x32xf32>
    %484 = arith.divf %482, %483 : vector<2x32xf32>
    %485 = vector.extract_strided_slice %447 {offsets = [0, 64], sizes = [2, 32], strides = [1, 1]} : vector<2x128xf32> to vector<2x32xf32>
    %486 = math.tanh %485 : vector<2x32xf32>
    %487 = vector.extract_strided_slice %447 {offsets = [0, 96], sizes = [2, 32], strides = [1, 1]} : vector<2x128xf32> to vector<2x32xf32>
    %488 = arith.negf %487 : vector<2x32xf32>
    %489 = math.exp %488 : vector<2x32xf32>
    %cst_121 = arith.constant 1.000000e+00 : f32
    %490 = vector.broadcast %cst_121 : f32 to vector<2x32xf32>
    %491 = arith.addf %490, %489 : vector<2x32xf32>
    %492 = arith.divf %490, %491 : vector<2x32xf32>
    %493 = arith.mulf %484, %423 : vector<2x32xf32>
    %494 = arith.mulf %478, %486 : vector<2x32xf32>
    %495 = arith.addf %493, %494 : vector<2x32xf32>
    %496 = math.tanh %495 : vector<2x32xf32>
    %497 = arith.mulf %492, %496 : vector<2x32xf32>
    %498 = arith.index_cast %c6_i32 : i32 to index
    %c0_122 = arith.constant 0 : index
    %c0_123 = arith.constant 0 : index
    %499 = vector.load %arg3[%498, %c0_122, %c0_123] : memref<8x2x64xf32, #tpu.memory_space<vmem>>, vector<1x2x32xf32>
    %500 = vector.shape_cast %499 : vector<1x2x32xf32> to vector<2x32xf32>
    %501 = vector.shape_cast %472 : vector<2x32xf32> to vector<1x2x32xf32>
    tpu.vector_store %arg3[%498, %c0_122, %c0_123], %501 {strides = array<i32>} : memref<8x2x64xf32, #tpu.memory_space<vmem>>, vector<1x2x32xf32>,
    %c7_i32_124 = arith.constant 7 : i32
    %502 = arith.subi %c7_i32_124, %c6_i32 : i32
    %503 = arith.index_cast %502 : i32 to index
    %c0_125 = arith.constant 0 : index
    %c32_126 = arith.constant 32 : index
    %504 = vector.load %arg3[%503, %c0_125, %c32_126] : memref<8x2x64xf32, #tpu.memory_space<vmem>>, vector<1x2x32xf32>
    %505 = vector.shape_cast %504 : vector<1x2x32xf32> to vector<2x32xf32>
    %506 = vector.shape_cast %497 : vector<2x32xf32> to vector<1x2x32xf32>
    tpu.vector_store %arg3[%503, %c0_125, %c32_126], %506 {strides = array<i32>} : memref<8x2x64xf32, #tpu.memory_space<vmem>>, vector<1x2x32xf32>,
    %c7_i32_127 = arith.constant 7 : i32
    %507 = arith.index_cast %c7_i32_127 : i32 to index
    %c0_128 = arith.constant 0 : index
    %c0_129 = arith.constant 0 : index
    %508 = vector.load %arg0[%507, %c0_128, %c0_129] : memref<8x2x256xf32, #tpu.memory_space<vmem>>, vector<1x2x256xf32>
    %509 = vector.shape_cast %508 : vector<1x2x256xf32> to vector<2x256xf32>
    %c7_i32_130 = arith.constant 7 : i32
    %510 = arith.subi %c7_i32_130, %c7_i32_127 : i32
    %511 = arith.index_cast %510 : i32 to index
    %c0_131 = arith.constant 0 : index
    %c0_132 = arith.constant 0 : index
    %512 = vector.load %arg0[%511, %c0_131, %c0_132] : memref<8x2x256xf32, #tpu.memory_space<vmem>>, vector<1x2x256xf32>
    %513 = vector.shape_cast %512 : vector<1x2x256xf32> to vector<2x256xf32>
    %514 = vector.extract_strided_slice %509 {offsets = [0, 0], sizes = [2, 128], strides = [1, 1]} : vector<2x256xf32> to vector<2x128xf32>
    %cst_133 = arith.constant dense<0.000000e+00> : vector<2x128xf32>
    %515 = tpu.matmul %472, %0, %cst_133 {dimension_numbers = #tpu.dot_dimension_numbers<[1], [0], [0], [1], [0, 0, 1, 1], [], []>} : vector<2x32xf32>, vector<32x128xf32>, vector<2x128xf32> -> vector<2x128xf32>
    %516 = arith.addf %514, %515 : vector<2x128xf32>
    %517 = vector.extract_strided_slice %513 {offsets = [0, 128], sizes = [2, 128], strides = [1, 1]} : vector<2x256xf32> to vector<2x128xf32>
    %cst_134 = arith.constant dense<0.000000e+00> : vector<2x128xf32>
    %518 = tpu.matmul %497, %1, %cst_134 {dimension_numbers = #tpu.dot_dimension_numbers<[1], [0], [0], [1], [0, 0, 1, 1], [], []>} : vector<2x32xf32>, vector<32x128xf32>, vector<2x128xf32> -> vector<2x128xf32>
    %519 = arith.addf %517, %518 : vector<2x128xf32>
    %520 = vector.extract_strided_slice %516 {offsets = [0, 0], sizes = [2, 32], strides = [1, 1]} : vector<2x128xf32> to vector<2x32xf32>
    %521 = arith.negf %520 : vector<2x32xf32>
    %522 = math.exp %521 : vector<2x32xf32>
    %cst_135 = arith.constant 1.000000e+00 : f32
    %523 = vector.broadcast %cst_135 : f32 to vector<2x32xf32>
    %524 = arith.addf %523, %522 : vector<2x32xf32>
    %525 = arith.divf %523, %524 : vector<2x32xf32>
    %526 = vector.extract_strided_slice %516 {offsets = [0, 32], sizes = [2, 32], strides = [1, 1]} : vector<2x128xf32> to vector<2x32xf32>
    %527 = arith.negf %526 : vector<2x32xf32>
    %528 = math.exp %527 : vector<2x32xf32>
    %cst_136 = arith.constant 1.000000e+00 : f32
    %529 = vector.broadcast %cst_136 : f32 to vector<2x32xf32>
    %530 = arith.addf %529, %528 : vector<2x32xf32>
    %531 = arith.divf %529, %530 : vector<2x32xf32>
    %532 = vector.extract_strided_slice %516 {offsets = [0, 64], sizes = [2, 32], strides = [1, 1]} : vector<2x128xf32> to vector<2x32xf32>
    %533 = math.tanh %532 : vector<2x32xf32>
    %534 = vector.extract_strided_slice %516 {offsets = [0, 96], sizes = [2, 32], strides = [1, 1]} : vector<2x128xf32> to vector<2x32xf32>
    %535 = arith.negf %534 : vector<2x32xf32>
    %536 = math.exp %535 : vector<2x32xf32>
    %cst_137 = arith.constant 1.000000e+00 : f32
    %537 = vector.broadcast %cst_137 : f32 to vector<2x32xf32>
    %538 = arith.addf %537, %536 : vector<2x32xf32>
    %539 = arith.divf %537, %538 : vector<2x32xf32>
    %540 = arith.mulf %531, %470 : vector<2x32xf32>
    %541 = arith.mulf %525, %533 : vector<2x32xf32>
    %542 = arith.addf %540, %541 : vector<2x32xf32>
    %543 = math.tanh %542 : vector<2x32xf32>
    %544 = arith.mulf %539, %543 : vector<2x32xf32>
    %545 = vector.extract_strided_slice %519 {offsets = [0, 0], sizes = [2, 32], strides = [1, 1]} : vector<2x128xf32> to vector<2x32xf32>
    %546 = arith.negf %545 : vector<2x32xf32>
    %547 = math.exp %546 : vector<2x32xf32>
    %cst_138 = arith.constant 1.000000e+00 : f32
    %548 = vector.broadcast %cst_138 : f32 to vector<2x32xf32>
    %549 = arith.addf %548, %547 : vector<2x32xf32>
    %550 = arith.divf %548, %549 : vector<2x32xf32>
    %551 = vector.extract_strided_slice %519 {offsets = [0, 32], sizes = [2, 32], strides = [1, 1]} : vector<2x128xf32> to vector<2x32xf32>
    %552 = arith.negf %551 : vector<2x32xf32>
    %553 = math.exp %552 : vector<2x32xf32>
    %cst_139 = arith.constant 1.000000e+00 : f32
    %554 = vector.broadcast %cst_139 : f32 to vector<2x32xf32>
    %555 = arith.addf %554, %553 : vector<2x32xf32>
    %556 = arith.divf %554, %555 : vector<2x32xf32>
    %557 = vector.extract_strided_slice %519 {offsets = [0, 64], sizes = [2, 32], strides = [1, 1]} : vector<2x128xf32> to vector<2x32xf32>
    %558 = math.tanh %557 : vector<2x32xf32>
    %559 = vector.extract_strided_slice %519 {offsets = [0, 96], sizes = [2, 32], strides = [1, 1]} : vector<2x128xf32> to vector<2x32xf32>
    %560 = arith.negf %559 : vector<2x32xf32>
    %561 = math.exp %560 : vector<2x32xf32>
    %cst_140 = arith.constant 1.000000e+00 : f32
    %562 = vector.broadcast %cst_140 : f32 to vector<2x32xf32>
    %563 = arith.addf %562, %561 : vector<2x32xf32>
    %564 = arith.divf %562, %563 : vector<2x32xf32>
    %565 = arith.mulf %556, %495 : vector<2x32xf32>
    %566 = arith.mulf %550, %558 : vector<2x32xf32>
    %567 = arith.addf %565, %566 : vector<2x32xf32>
    %568 = math.tanh %567 : vector<2x32xf32>
    %569 = arith.mulf %564, %568 : vector<2x32xf32>
    %570 = arith.index_cast %c7_i32_127 : i32 to index
    %c0_141 = arith.constant 0 : index
    %c0_142 = arith.constant 0 : index
    %571 = vector.load %arg3[%570, %c0_141, %c0_142] : memref<8x2x64xf32, #tpu.memory_space<vmem>>, vector<1x2x32xf32>
    %572 = vector.shape_cast %571 : vector<1x2x32xf32> to vector<2x32xf32>
    %573 = vector.shape_cast %544 : vector<2x32xf32> to vector<1x2x32xf32>
    tpu.vector_store %arg3[%570, %c0_141, %c0_142], %573 {strides = array<i32>} : memref<8x2x64xf32, #tpu.memory_space<vmem>>, vector<1x2x32xf32>,
    %c7_i32_143 = arith.constant 7 : i32
    %574 = arith.subi %c7_i32_143, %c7_i32_127 : i32
    %575 = arith.index_cast %574 : i32 to index
    %c0_144 = arith.constant 0 : index
    %c32_145 = arith.constant 32 : index
    %576 = vector.load %arg3[%575, %c0_144, %c32_145] : memref<8x2x64xf32, #tpu.memory_space<vmem>>, vector<1x2x32xf32>
    %577 = vector.shape_cast %576 : vector<1x2x32xf32> to vector<2x32xf32>
    %578 = vector.shape_cast %569 : vector<2x32xf32> to vector<1x2x32xf32>
    tpu.vector_store %arg3[%575, %c0_144, %c32_145], %578 {strides = array<i32>} : memref<8x2x64xf32, #tpu.memory_space<vmem>>, vector<1x2x32xf32>,
    %c8_i32 = arith.constant 8 : i32
    return
  }
}

module attributes {stable_mosaic.version = 11 : i64} {
  func.func @_post_kernel(%arg0: memref<8x2x64xf32, #tpu.memory_space<vmem>>, %arg1: memref<64x192xf32, #tpu.memory_space<vmem>>, %arg2: memref<1x192xf32, #tpu.memory_space<vmem>>, %arg3: memref<64x64xf32, #tpu.memory_space<vmem>>, %arg4: memref<1x64xf32, #tpu.memory_space<vmem>>, %arg5: memref<64x32xf32, #tpu.memory_space<vmem>>, %arg6: memref<1x32xf32, #tpu.memory_space<vmem>>, %arg7: memref<1x32xf32, #tpu.memory_space<vmem>>, %arg8: memref<1x32xf32, #tpu.memory_space<vmem>>, %arg9: memref<32x16xf32, #tpu.memory_space<vmem>>, %arg10: memref<1x16xf32, #tpu.memory_space<vmem>>, %arg11: memref<16x1xf32, #tpu.memory_space<vmem>>, %arg12: memref<1x1xf32, #tpu.memory_space<vmem>>, %arg13: memref<64x32xf32, #tpu.memory_space<vmem>>, %arg14: memref<1x32xf32, #tpu.memory_space<vmem>>, %arg15: memref<32x128xf32, #tpu.memory_space<vmem>>, %arg16: memref<1x128xf32, #tpu.memory_space<vmem>>, %arg17: memref<128x64xf32, #tpu.memory_space<vmem>>, %arg18: memref<1x64xf32, #tpu.memory_space<vmem>>, %arg19: memref<2x1xf32, #tpu.memory_space<vmem>>, %arg20: memref<2x64xf32, #tpu.memory_space<vmem>>) attributes {dimension_semantics = [], scalar_prefetch = 0 : i64, scratch_operands = 0 : i64, tpu.core_type = #tpu.core_type<tc>} {
    %c0 = arith.constant 0 : index
    %c0_0 = arith.constant 0 : index
    %c0_1 = arith.constant 0 : index
    %0 = vector.load %arg0[%c0, %c0_0, %c0_1] : memref<8x2x64xf32, #tpu.memory_space<vmem>>, vector<8x2x64xf32>
    %c0_2 = arith.constant 0 : index
    %c0_3 = arith.constant 0 : index
    %1 = vector.load %arg1[%c0_2, %c0_3] : memref<64x192xf32, #tpu.memory_space<vmem>>, vector<64x192xf32>
    %c0_4 = arith.constant 0 : index
    %c0_5 = arith.constant 0 : index
    %2 = vector.load %arg2[%c0_4, %c0_5] : memref<1x192xf32, #tpu.memory_space<vmem>>, vector<1x192xf32>
    %c0_6 = arith.constant 0 : index
    %c0_7 = arith.constant 0 : index
    %3 = vector.load %arg3[%c0_6, %c0_7] : memref<64x64xf32, #tpu.memory_space<vmem>>, vector<64x64xf32>
    %c0_8 = arith.constant 0 : index
    %c0_9 = arith.constant 0 : index
    %4 = vector.load %arg4[%c0_8, %c0_9] : memref<1x64xf32, #tpu.memory_space<vmem>>, vector<1x64xf32>
    %5 = vector.extract_strided_slice %0 {offsets = [0, 0, 0], sizes = [8, 1, 64], strides = [1, 1, 1]} : vector<8x2x64xf32> to vector<8x1x64xf32>
    %6 = vector.shape_cast %5 : vector<8x1x64xf32> to vector<8x64xf32>
    %cst = arith.constant dense<0.000000e+00> : vector<8x192xf32>
    %7 = tpu.matmul %6, %1, %cst {dimension_numbers = #tpu.dot_dimension_numbers<[1], [0], [0], [1], [0, 0, 1, 1], [], []>} : vector<8x64xf32>, vector<64x192xf32>, vector<8x192xf32> -> vector<8x192xf32>
    %8 = vector.broadcast %2 : vector<1x192xf32> to vector<8x192xf32>
    %9 = arith.addf %7, %8 : vector<8x192xf32>
    %10 = vector.extract_strided_slice %9 {offsets = [0, 0], sizes = [8, 64], strides = [1, 1]} : vector<8x192xf32> to vector<8x64xf32>
    %cst_10 = arith.constant 0.353553385 : f32
    %11 = vector.broadcast %cst_10 : f32 to vector<8x64xf32>
    %12 = arith.mulf %10, %11 : vector<8x64xf32>
    %13 = vector.extract_strided_slice %9 {offsets = [0, 64], sizes = [8, 64], strides = [1, 1]} : vector<8x192xf32> to vector<8x64xf32>
    %14 = vector.extract_strided_slice %9 {offsets = [0, 128], sizes = [8, 64], strides = [1, 1]} : vector<8x192xf32> to vector<8x64xf32>
    %15 = vector.extract_strided_slice %12 {offsets = [0, 0], sizes = [8, 8], strides = [1, 1]} : vector<8x64xf32> to vector<8x8xf32>
    %16 = vector.extract_strided_slice %12 {offsets = [0, 8], sizes = [8, 8], strides = [1, 1]} : vector<8x64xf32> to vector<8x8xf32>
    %17 = vector.extract_strided_slice %12 {offsets = [0, 16], sizes = [8, 8], strides = [1, 1]} : vector<8x64xf32> to vector<8x8xf32>
    %18 = vector.extract_strided_slice %12 {offsets = [0, 24], sizes = [8, 8], strides = [1, 1]} : vector<8x64xf32> to vector<8x8xf32>
    %19 = vector.extract_strided_slice %12 {offsets = [0, 32], sizes = [8, 8], strides = [1, 1]} : vector<8x64xf32> to vector<8x8xf32>
    %20 = vector.extract_strided_slice %12 {offsets = [0, 40], sizes = [8, 8], strides = [1, 1]} : vector<8x64xf32> to vector<8x8xf32>
    %21 = vector.extract_strided_slice %12 {offsets = [0, 48], sizes = [8, 8], strides = [1, 1]} : vector<8x64xf32> to vector<8x8xf32>
    %22 = vector.extract_strided_slice %12 {offsets = [0, 56], sizes = [8, 8], strides = [1, 1]} : vector<8x64xf32> to vector<8x8xf32>
    %23 = vector.shape_cast %15 : vector<8x8xf32> to vector<1x8x8xf32>
    %24 = vector.shape_cast %16 : vector<8x8xf32> to vector<1x8x8xf32>
    %25 = vector.shape_cast %17 : vector<8x8xf32> to vector<1x8x8xf32>
    %26 = vector.shape_cast %18 : vector<8x8xf32> to vector<1x8x8xf32>
    %27 = vector.shape_cast %19 : vector<8x8xf32> to vector<1x8x8xf32>
    %28 = vector.shape_cast %20 : vector<8x8xf32> to vector<1x8x8xf32>
    %29 = vector.shape_cast %21 : vector<8x8xf32> to vector<1x8x8xf32>
    %30 = vector.shape_cast %22 : vector<8x8xf32> to vector<1x8x8xf32>
    %31 = tpu.concatenate %23, %24, %25, %26, %27, %28, %29, %30 in 0 : vector<1x8x8xf32>, vector<1x8x8xf32>, vector<1x8x8xf32>, vector<1x8x8xf32>, vector<1x8x8xf32>, vector<1x8x8xf32>, vector<1x8x8xf32>, vector<1x8x8xf32> -> vector<8x8x8xf32>
    %32 = vector.extract_strided_slice %13 {offsets = [0, 0], sizes = [8, 8], strides = [1, 1]} : vector<8x64xf32> to vector<8x8xf32>
    %33 = vector.extract_strided_slice %13 {offsets = [0, 8], sizes = [8, 8], strides = [1, 1]} : vector<8x64xf32> to vector<8x8xf32>
    %34 = vector.extract_strided_slice %13 {offsets = [0, 16], sizes = [8, 8], strides = [1, 1]} : vector<8x64xf32> to vector<8x8xf32>
    %35 = vector.extract_strided_slice %13 {offsets = [0, 24], sizes = [8, 8], strides = [1, 1]} : vector<8x64xf32> to vector<8x8xf32>
    %36 = vector.extract_strided_slice %13 {offsets = [0, 32], sizes = [8, 8], strides = [1, 1]} : vector<8x64xf32> to vector<8x8xf32>
    %37 = vector.extract_strided_slice %13 {offsets = [0, 40], sizes = [8, 8], strides = [1, 1]} : vector<8x64xf32> to vector<8x8xf32>
    %38 = vector.extract_strided_slice %13 {offsets = [0, 48], sizes = [8, 8], strides = [1, 1]} : vector<8x64xf32> to vector<8x8xf32>
    %39 = vector.extract_strided_slice %13 {offsets = [0, 56], sizes = [8, 8], strides = [1, 1]} : vector<8x64xf32> to vector<8x8xf32>
    %40 = vector.shape_cast %32 : vector<8x8xf32> to vector<1x8x8xf32>
    %41 = vector.shape_cast %33 : vector<8x8xf32> to vector<1x8x8xf32>
    %42 = vector.shape_cast %34 : vector<8x8xf32> to vector<1x8x8xf32>
    %43 = vector.shape_cast %35 : vector<8x8xf32> to vector<1x8x8xf32>
    %44 = vector.shape_cast %36 : vector<8x8xf32> to vector<1x8x8xf32>
    %45 = vector.shape_cast %37 : vector<8x8xf32> to vector<1x8x8xf32>
    %46 = vector.shape_cast %38 : vector<8x8xf32> to vector<1x8x8xf32>
    %47 = vector.shape_cast %39 : vector<8x8xf32> to vector<1x8x8xf32>
    %48 = tpu.concatenate %40, %41, %42, %43, %44, %45, %46, %47 in 0 : vector<1x8x8xf32>, vector<1x8x8xf32>, vector<1x8x8xf32>, vector<1x8x8xf32>, vector<1x8x8xf32>, vector<1x8x8xf32>, vector<1x8x8xf32>, vector<1x8x8xf32> -> vector<8x8x8xf32>
    %49 = vector.extract_strided_slice %14 {offsets = [0, 0], sizes = [8, 8], strides = [1, 1]} : vector<8x64xf32> to vector<8x8xf32>
    %50 = vector.extract_strided_slice %14 {offsets = [0, 8], sizes = [8, 8], strides = [1, 1]} : vector<8x64xf32> to vector<8x8xf32>
    %51 = vector.extract_strided_slice %14 {offsets = [0, 16], sizes = [8, 8], strides = [1, 1]} : vector<8x64xf32> to vector<8x8xf32>
    %52 = vector.extract_strided_slice %14 {offsets = [0, 24], sizes = [8, 8], strides = [1, 1]} : vector<8x64xf32> to vector<8x8xf32>
    %53 = vector.extract_strided_slice %14 {offsets = [0, 32], sizes = [8, 8], strides = [1, 1]} : vector<8x64xf32> to vector<8x8xf32>
    %54 = vector.extract_strided_slice %14 {offsets = [0, 40], sizes = [8, 8], strides = [1, 1]} : vector<8x64xf32> to vector<8x8xf32>
    %55 = vector.extract_strided_slice %14 {offsets = [0, 48], sizes = [8, 8], strides = [1, 1]} : vector<8x64xf32> to vector<8x8xf32>
    %56 = vector.extract_strided_slice %14 {offsets = [0, 56], sizes = [8, 8], strides = [1, 1]} : vector<8x64xf32> to vector<8x8xf32>
    %57 = vector.shape_cast %49 : vector<8x8xf32> to vector<1x8x8xf32>
    %58 = vector.shape_cast %50 : vector<8x8xf32> to vector<1x8x8xf32>
    %59 = vector.shape_cast %51 : vector<8x8xf32> to vector<1x8x8xf32>
    %60 = vector.shape_cast %52 : vector<8x8xf32> to vector<1x8x8xf32>
    %61 = vector.shape_cast %53 : vector<8x8xf32> to vector<1x8x8xf32>
    %62 = vector.shape_cast %54 : vector<8x8xf32> to vector<1x8x8xf32>
    %63 = vector.shape_cast %55 : vector<8x8xf32> to vector<1x8x8xf32>
    %64 = vector.shape_cast %56 : vector<8x8xf32> to vector<1x8x8xf32>
    %65 = tpu.concatenate %57, %58, %59, %60, %61, %62, %63, %64 in 0 : vector<1x8x8xf32>, vector<1x8x8xf32>, vector<1x8x8xf32>, vector<1x8x8xf32>, vector<1x8x8xf32>, vector<1x8x8xf32>, vector<1x8x8xf32>, vector<1x8x8xf32> -> vector<8x8x8xf32>
    "tpu.trace_start"() <{level = 10 : i32, message = "hqd,hkd->hqk"}> : () -> ()
    %cst_11 = arith.constant dense<0.000000e+00> : vector<8x8x8xf32>
    %66 = tpu.matmul %31, %48, %cst_11 {dimension_numbers = #tpu.dot_dimension_numbers<[2], [2], [1], [1], [0, 0, 0, 1, 1, 1], [0], [0]>} : vector<8x8x8xf32>, vector<8x8x8xf32>, vector<8x8x8xf32> -> vector<8x8x8xf32>
    "tpu.trace_stop"() : () -> ()
    %cst_12 = arith.constant dense<0xFF800000> : vector<8x8xf32>
    %67 = vector.multi_reduction <maximumf>, %66, %cst_12 [2] : vector<8x8x8xf32> to vector<8x8xf32>
    %68 = vector.shape_cast %67 : vector<8x8xf32> to vector<8x8x1xf32>
    %69 = vector.broadcast %68 : vector<8x8x1xf32> to vector<8x8x8xf32>
    %70 = arith.subf %66, %69 : vector<8x8x8xf32>
    %71 = math.exp %70 : vector<8x8x8xf32>
    %cst_13 = arith.constant dense<0.000000e+00> : vector<8x8xf32>
    %72 = vector.multi_reduction <add>, %71, %cst_13 [2] : vector<8x8x8xf32> to vector<8x8xf32>
    %73 = vector.shape_cast %72 : vector<8x8xf32> to vector<8x8x1xf32>
    %74 = vector.broadcast %73 : vector<8x8x1xf32> to vector<8x8x8xf32>
    %75 = arith.divf %71, %74 : vector<8x8x8xf32>
    "tpu.trace_start"() <{level = 10 : i32, message = "hqk,hkd->hqd"}> : () -> ()
    %cst_14 = arith.constant dense<0.000000e+00> : vector<8x8x8xf32>
    %76 = tpu.matmul %75, %65, %cst_14 {dimension_numbers = #tpu.dot_dimension_numbers<[2], [1], [1], [2], [0, 0, 0, 1, 1, 2], [0], [0]>} : vector<8x8x8xf32>, vector<8x8x8xf32>, vector<8x8x8xf32> -> vector<8x8x8xf32>
    "tpu.trace_stop"() : () -> ()
    %77 = vector.extract_strided_slice %76 {offsets = [0, 0, 0], sizes = [1, 8, 8], strides = [1, 1, 1]} : vector<8x8x8xf32> to vector<1x8x8xf32>
    %78 = vector.shape_cast %77 : vector<1x8x8xf32> to vector<8x8xf32>
    %79 = vector.extract_strided_slice %76 {offsets = [1, 0, 0], sizes = [1, 8, 8], strides = [1, 1, 1]} : vector<8x8x8xf32> to vector<1x8x8xf32>
    %80 = vector.shape_cast %79 : vector<1x8x8xf32> to vector<8x8xf32>
    %81 = vector.extract_strided_slice %76 {offsets = [2, 0, 0], sizes = [1, 8, 8], strides = [1, 1, 1]} : vector<8x8x8xf32> to vector<1x8x8xf32>
    %82 = vector.shape_cast %81 : vector<1x8x8xf32> to vector<8x8xf32>
    %83 = vector.extract_strided_slice %76 {offsets = [3, 0, 0], sizes = [1, 8, 8], strides = [1, 1, 1]} : vector<8x8x8xf32> to vector<1x8x8xf32>
    %84 = vector.shape_cast %83 : vector<1x8x8xf32> to vector<8x8xf32>
    %85 = vector.extract_strided_slice %76 {offsets = [4, 0, 0], sizes = [1, 8, 8], strides = [1, 1, 1]} : vector<8x8x8xf32> to vector<1x8x8xf32>
    %86 = vector.shape_cast %85 : vector<1x8x8xf32> to vector<8x8xf32>
    %87 = vector.extract_strided_slice %76 {offsets = [5, 0, 0], sizes = [1, 8, 8], strides = [1, 1, 1]} : vector<8x8x8xf32> to vector<1x8x8xf32>
    %88 = vector.shape_cast %87 : vector<1x8x8xf32> to vector<8x8xf32>
    %89 = vector.extract_strided_slice %76 {offsets = [6, 0, 0], sizes = [1, 8, 8], strides = [1, 1, 1]} : vector<8x8x8xf32> to vector<1x8x8xf32>
    %90 = vector.shape_cast %89 : vector<1x8x8xf32> to vector<8x8xf32>
    %91 = vector.extract_strided_slice %76 {offsets = [7, 0, 0], sizes = [1, 8, 8], strides = [1, 1, 1]} : vector<8x8x8xf32> to vector<1x8x8xf32>
    %92 = vector.shape_cast %91 : vector<1x8x8xf32> to vector<8x8xf32>
    %93 = tpu.concatenate %78, %80, %82, %84, %86, %88, %90, %92 in 1 : vector<8x8xf32>, vector<8x8xf32>, vector<8x8xf32>, vector<8x8xf32>, vector<8x8xf32>, vector<8x8xf32>, vector<8x8xf32>, vector<8x8xf32> -> vector<8x64xf32>
    %cst_15 = arith.constant dense<0.000000e+00> : vector<8x64xf32>
    %94 = tpu.matmul %93, %3, %cst_15 {dimension_numbers = #tpu.dot_dimension_numbers<[1], [0], [0], [1], [0, 0, 1, 1], [], []>} : vector<8x64xf32>, vector<64x64xf32>, vector<8x64xf32> -> vector<8x64xf32>
    %95 = vector.broadcast %4 : vector<1x64xf32> to vector<8x64xf32>
    %96 = arith.addf %94, %95 : vector<8x64xf32>
    %cst_16 = arith.constant dense<0.000000e+00> : vector<64xf32>
    %97 = vector.multi_reduction <add>, %96, %cst_16 [0] : vector<8x64xf32> to vector<64xf32>
    %98 = vector.shape_cast %97 : vector<64xf32> to vector<1x64xf32>
    %cst_17 = arith.constant 8.000000e+00 : f32
    %99 = vector.broadcast %cst_17 : f32 to vector<1x64xf32>
    %100 = arith.divf %98, %99 : vector<1x64xf32>
    %101 = vector.extract_strided_slice %0 {offsets = [0, 1, 0], sizes = [8, 1, 64], strides = [1, 1, 1]} : vector<8x2x64xf32> to vector<8x1x64xf32>
    %102 = vector.shape_cast %101 : vector<8x1x64xf32> to vector<8x64xf32>
    %cst_18 = arith.constant dense<0.000000e+00> : vector<8x192xf32>
    %103 = tpu.matmul %102, %1, %cst_18 {dimension_numbers = #tpu.dot_dimension_numbers<[1], [0], [0], [1], [0, 0, 1, 1], [], []>} : vector<8x64xf32>, vector<64x192xf32>, vector<8x192xf32> -> vector<8x192xf32>
    %104 = vector.broadcast %2 : vector<1x192xf32> to vector<8x192xf32>
    %105 = arith.addf %103, %104 : vector<8x192xf32>
    %106 = vector.extract_strided_slice %105 {offsets = [0, 0], sizes = [8, 64], strides = [1, 1]} : vector<8x192xf32> to vector<8x64xf32>
    %cst_19 = arith.constant 0.353553385 : f32
    %107 = vector.broadcast %cst_19 : f32 to vector<8x64xf32>
    %108 = arith.mulf %106, %107 : vector<8x64xf32>
    %109 = vector.extract_strided_slice %105 {offsets = [0, 64], sizes = [8, 64], strides = [1, 1]} : vector<8x192xf32> to vector<8x64xf32>
    %110 = vector.extract_strided_slice %105 {offsets = [0, 128], sizes = [8, 64], strides = [1, 1]} : vector<8x192xf32> to vector<8x64xf32>
    %111 = vector.extract_strided_slice %108 {offsets = [0, 0], sizes = [8, 8], strides = [1, 1]} : vector<8x64xf32> to vector<8x8xf32>
    %112 = vector.extract_strided_slice %108 {offsets = [0, 8], sizes = [8, 8], strides = [1, 1]} : vector<8x64xf32> to vector<8x8xf32>
    %113 = vector.extract_strided_slice %108 {offsets = [0, 16], sizes = [8, 8], strides = [1, 1]} : vector<8x64xf32> to vector<8x8xf32>
    %114 = vector.extract_strided_slice %108 {offsets = [0, 24], sizes = [8, 8], strides = [1, 1]} : vector<8x64xf32> to vector<8x8xf32>
    %115 = vector.extract_strided_slice %108 {offsets = [0, 32], sizes = [8, 8], strides = [1, 1]} : vector<8x64xf32> to vector<8x8xf32>
    %116 = vector.extract_strided_slice %108 {offsets = [0, 40], sizes = [8, 8], strides = [1, 1]} : vector<8x64xf32> to vector<8x8xf32>
    %117 = vector.extract_strided_slice %108 {offsets = [0, 48], sizes = [8, 8], strides = [1, 1]} : vector<8x64xf32> to vector<8x8xf32>
    %118 = vector.extract_strided_slice %108 {offsets = [0, 56], sizes = [8, 8], strides = [1, 1]} : vector<8x64xf32> to vector<8x8xf32>
    %119 = vector.shape_cast %111 : vector<8x8xf32> to vector<1x8x8xf32>
    %120 = vector.shape_cast %112 : vector<8x8xf32> to vector<1x8x8xf32>
    %121 = vector.shape_cast %113 : vector<8x8xf32> to vector<1x8x8xf32>
    %122 = vector.shape_cast %114 : vector<8x8xf32> to vector<1x8x8xf32>
    %123 = vector.shape_cast %115 : vector<8x8xf32> to vector<1x8x8xf32>
    %124 = vector.shape_cast %116 : vector<8x8xf32> to vector<1x8x8xf32>
    %125 = vector.shape_cast %117 : vector<8x8xf32> to vector<1x8x8xf32>
    %126 = vector.shape_cast %118 : vector<8x8xf32> to vector<1x8x8xf32>
    %127 = tpu.concatenate %119, %120, %121, %122, %123, %124, %125, %126 in 0 : vector<1x8x8xf32>, vector<1x8x8xf32>, vector<1x8x8xf32>, vector<1x8x8xf32>, vector<1x8x8xf32>, vector<1x8x8xf32>, vector<1x8x8xf32>, vector<1x8x8xf32> -> vector<8x8x8xf32>
    %128 = vector.extract_strided_slice %109 {offsets = [0, 0], sizes = [8, 8], strides = [1, 1]} : vector<8x64xf32> to vector<8x8xf32>
    %129 = vector.extract_strided_slice %109 {offsets = [0, 8], sizes = [8, 8], strides = [1, 1]} : vector<8x64xf32> to vector<8x8xf32>
    %130 = vector.extract_strided_slice %109 {offsets = [0, 16], sizes = [8, 8], strides = [1, 1]} : vector<8x64xf32> to vector<8x8xf32>
    %131 = vector.extract_strided_slice %109 {offsets = [0, 24], sizes = [8, 8], strides = [1, 1]} : vector<8x64xf32> to vector<8x8xf32>
    %132 = vector.extract_strided_slice %109 {offsets = [0, 32], sizes = [8, 8], strides = [1, 1]} : vector<8x64xf32> to vector<8x8xf32>
    %133 = vector.extract_strided_slice %109 {offsets = [0, 40], sizes = [8, 8], strides = [1, 1]} : vector<8x64xf32> to vector<8x8xf32>
    %134 = vector.extract_strided_slice %109 {offsets = [0, 48], sizes = [8, 8], strides = [1, 1]} : vector<8x64xf32> to vector<8x8xf32>
    %135 = vector.extract_strided_slice %109 {offsets = [0, 56], sizes = [8, 8], strides = [1, 1]} : vector<8x64xf32> to vector<8x8xf32>
    %136 = vector.shape_cast %128 : vector<8x8xf32> to vector<1x8x8xf32>
    %137 = vector.shape_cast %129 : vector<8x8xf32> to vector<1x8x8xf32>
    %138 = vector.shape_cast %130 : vector<8x8xf32> to vector<1x8x8xf32>
    %139 = vector.shape_cast %131 : vector<8x8xf32> to vector<1x8x8xf32>
    %140 = vector.shape_cast %132 : vector<8x8xf32> to vector<1x8x8xf32>
    %141 = vector.shape_cast %133 : vector<8x8xf32> to vector<1x8x8xf32>
    %142 = vector.shape_cast %134 : vector<8x8xf32> to vector<1x8x8xf32>
    %143 = vector.shape_cast %135 : vector<8x8xf32> to vector<1x8x8xf32>
    %144 = tpu.concatenate %136, %137, %138, %139, %140, %141, %142, %143 in 0 : vector<1x8x8xf32>, vector<1x8x8xf32>, vector<1x8x8xf32>, vector<1x8x8xf32>, vector<1x8x8xf32>, vector<1x8x8xf32>, vector<1x8x8xf32>, vector<1x8x8xf32> -> vector<8x8x8xf32>
    %145 = vector.extract_strided_slice %110 {offsets = [0, 0], sizes = [8, 8], strides = [1, 1]} : vector<8x64xf32> to vector<8x8xf32>
    %146 = vector.extract_strided_slice %110 {offsets = [0, 8], sizes = [8, 8], strides = [1, 1]} : vector<8x64xf32> to vector<8x8xf32>
    %147 = vector.extract_strided_slice %110 {offsets = [0, 16], sizes = [8, 8], strides = [1, 1]} : vector<8x64xf32> to vector<8x8xf32>
    %148 = vector.extract_strided_slice %110 {offsets = [0, 24], sizes = [8, 8], strides = [1, 1]} : vector<8x64xf32> to vector<8x8xf32>
    %149 = vector.extract_strided_slice %110 {offsets = [0, 32], sizes = [8, 8], strides = [1, 1]} : vector<8x64xf32> to vector<8x8xf32>
    %150 = vector.extract_strided_slice %110 {offsets = [0, 40], sizes = [8, 8], strides = [1, 1]} : vector<8x64xf32> to vector<8x8xf32>
    %151 = vector.extract_strided_slice %110 {offsets = [0, 48], sizes = [8, 8], strides = [1, 1]} : vector<8x64xf32> to vector<8x8xf32>
    %152 = vector.extract_strided_slice %110 {offsets = [0, 56], sizes = [8, 8], strides = [1, 1]} : vector<8x64xf32> to vector<8x8xf32>
    %153 = vector.shape_cast %145 : vector<8x8xf32> to vector<1x8x8xf32>
    %154 = vector.shape_cast %146 : vector<8x8xf32> to vector<1x8x8xf32>
    %155 = vector.shape_cast %147 : vector<8x8xf32> to vector<1x8x8xf32>
    %156 = vector.shape_cast %148 : vector<8x8xf32> to vector<1x8x8xf32>
    %157 = vector.shape_cast %149 : vector<8x8xf32> to vector<1x8x8xf32>
    %158 = vector.shape_cast %150 : vector<8x8xf32> to vector<1x8x8xf32>
    %159 = vector.shape_cast %151 : vector<8x8xf32> to vector<1x8x8xf32>
    %160 = vector.shape_cast %152 : vector<8x8xf32> to vector<1x8x8xf32>
    %161 = tpu.concatenate %153, %154, %155, %156, %157, %158, %159, %160 in 0 : vector<1x8x8xf32>, vector<1x8x8xf32>, vector<1x8x8xf32>, vector<1x8x8xf32>, vector<1x8x8xf32>, vector<1x8x8xf32>, vector<1x8x8xf32>, vector<1x8x8xf32> -> vector<8x8x8xf32>
    "tpu.trace_start"() <{level = 10 : i32, message = "hqd,hkd->hqk"}> : () -> ()
    %cst_20 = arith.constant dense<0.000000e+00> : vector<8x8x8xf32>
    %162 = tpu.matmul %127, %144, %cst_20 {dimension_numbers = #tpu.dot_dimension_numbers<[2], [2], [1], [1], [0, 0, 0, 1, 1, 1], [0], [0]>} : vector<8x8x8xf32>, vector<8x8x8xf32>, vector<8x8x8xf32> -> vector<8x8x8xf32>
    "tpu.trace_stop"() : () -> ()
    %cst_21 = arith.constant dense<0xFF800000> : vector<8x8xf32>
    %163 = vector.multi_reduction <maximumf>, %162, %cst_21 [2] : vector<8x8x8xf32> to vector<8x8xf32>
    %164 = vector.shape_cast %163 : vector<8x8xf32> to vector<8x8x1xf32>
    %165 = vector.broadcast %164 : vector<8x8x1xf32> to vector<8x8x8xf32>
    %166 = arith.subf %162, %165 : vector<8x8x8xf32>
    %167 = math.exp %166 : vector<8x8x8xf32>
    %cst_22 = arith.constant dense<0.000000e+00> : vector<8x8xf32>
    %168 = vector.multi_reduction <add>, %167, %cst_22 [2] : vector<8x8x8xf32> to vector<8x8xf32>
    %169 = vector.shape_cast %168 : vector<8x8xf32> to vector<8x8x1xf32>
    %170 = vector.broadcast %169 : vector<8x8x1xf32> to vector<8x8x8xf32>
    %171 = arith.divf %167, %170 : vector<8x8x8xf32>
    "tpu.trace_start"() <{level = 10 : i32, message = "hqk,hkd->hqd"}> : () -> ()
    %cst_23 = arith.constant dense<0.000000e+00> : vector<8x8x8xf32>
    %172 = tpu.matmul %171, %161, %cst_23 {dimension_numbers = #tpu.dot_dimension_numbers<[2], [1], [1], [2], [0, 0, 0, 1, 1, 2], [0], [0]>} : vector<8x8x8xf32>, vector<8x8x8xf32>, vector<8x8x8xf32> -> vector<8x8x8xf32>
    "tpu.trace_stop"() : () -> ()
    %173 = vector.extract_strided_slice %172 {offsets = [0, 0, 0], sizes = [1, 8, 8], strides = [1, 1, 1]} : vector<8x8x8xf32> to vector<1x8x8xf32>
    %174 = vector.shape_cast %173 : vector<1x8x8xf32> to vector<8x8xf32>
    %175 = vector.extract_strided_slice %172 {offsets = [1, 0, 0], sizes = [1, 8, 8], strides = [1, 1, 1]} : vector<8x8x8xf32> to vector<1x8x8xf32>
    %176 = vector.shape_cast %175 : vector<1x8x8xf32> to vector<8x8xf32>
    %177 = vector.extract_strided_slice %172 {offsets = [2, 0, 0], sizes = [1, 8, 8], strides = [1, 1, 1]} : vector<8x8x8xf32> to vector<1x8x8xf32>
    %178 = vector.shape_cast %177 : vector<1x8x8xf32> to vector<8x8xf32>
    %179 = vector.extract_strided_slice %172 {offsets = [3, 0, 0], sizes = [1, 8, 8], strides = [1, 1, 1]} : vector<8x8x8xf32> to vector<1x8x8xf32>
    %180 = vector.shape_cast %179 : vector<1x8x8xf32> to vector<8x8xf32>
    %181 = vector.extract_strided_slice %172 {offsets = [4, 0, 0], sizes = [1, 8, 8], strides = [1, 1, 1]} : vector<8x8x8xf32> to vector<1x8x8xf32>
    %182 = vector.shape_cast %181 : vector<1x8x8xf32> to vector<8x8xf32>
    %183 = vector.extract_strided_slice %172 {offsets = [5, 0, 0], sizes = [1, 8, 8], strides = [1, 1, 1]} : vector<8x8x8xf32> to vector<1x8x8xf32>
    %184 = vector.shape_cast %183 : vector<1x8x8xf32> to vector<8x8xf32>
    %185 = vector.extract_strided_slice %172 {offsets = [6, 0, 0], sizes = [1, 8, 8], strides = [1, 1, 1]} : vector<8x8x8xf32> to vector<1x8x8xf32>
    %186 = vector.shape_cast %185 : vector<1x8x8xf32> to vector<8x8xf32>
    %187 = vector.extract_strided_slice %172 {offsets = [7, 0, 0], sizes = [1, 8, 8], strides = [1, 1, 1]} : vector<8x8x8xf32> to vector<1x8x8xf32>
    %188 = vector.shape_cast %187 : vector<1x8x8xf32> to vector<8x8xf32>
    %189 = tpu.concatenate %174, %176, %178, %180, %182, %184, %186, %188 in 1 : vector<8x8xf32>, vector<8x8xf32>, vector<8x8xf32>, vector<8x8xf32>, vector<8x8xf32>, vector<8x8xf32>, vector<8x8xf32>, vector<8x8xf32> -> vector<8x64xf32>
    %cst_24 = arith.constant dense<0.000000e+00> : vector<8x64xf32>
    %190 = tpu.matmul %189, %3, %cst_24 {dimension_numbers = #tpu.dot_dimension_numbers<[1], [0], [0], [1], [0, 0, 1, 1], [], []>} : vector<8x64xf32>, vector<64x64xf32>, vector<8x64xf32> -> vector<8x64xf32>
    %191 = vector.broadcast %4 : vector<1x64xf32> to vector<8x64xf32>
    %192 = arith.addf %190, %191 : vector<8x64xf32>
    %cst_25 = arith.constant dense<0.000000e+00> : vector<64xf32>
    %193 = vector.multi_reduction <add>, %192, %cst_25 [0] : vector<8x64xf32> to vector<64xf32>
    %194 = vector.shape_cast %193 : vector<64xf32> to vector<1x64xf32>
    %cst_26 = arith.constant 8.000000e+00 : f32
    %195 = vector.broadcast %cst_26 : f32 to vector<1x64xf32>
    %196 = arith.divf %194, %195 : vector<1x64xf32>
    %197 = tpu.concatenate %100, %196 in 0 : vector<1x64xf32>, vector<1x64xf32> -> vector<2x64xf32>
    %c0_27 = arith.constant 0 : index
    %c0_28 = arith.constant 0 : index
    %198 = vector.load %arg5[%c0_27, %c0_28] : memref<64x32xf32, #tpu.memory_space<vmem>>, vector<64x32xf32>
    %cst_29 = arith.constant dense<0.000000e+00> : vector<2x32xf32>
    %199 = tpu.matmul %197, %198, %cst_29 {dimension_numbers = #tpu.dot_dimension_numbers<[1], [0], [0], [1], [0, 0, 1, 1], [], []>} : vector<2x64xf32>, vector<64x32xf32>, vector<2x32xf32> -> vector<2x32xf32>
    %c0_30 = arith.constant 0 : index
    %c0_31 = arith.constant 0 : index
    %200 = vector.load %arg6[%c0_30, %c0_31] : memref<1x32xf32, #tpu.memory_space<vmem>>, vector<1x32xf32>
    %201 = vector.broadcast %200 : vector<1x32xf32> to vector<2x32xf32>
    %202 = arith.addf %199, %201 : vector<2x32xf32>
    %c0_32 = arith.constant 0 : index
    %c0_33 = arith.constant 0 : index
    %203 = vector.load %arg7[%c0_32, %c0_33] : memref<1x32xf32, #tpu.memory_space<vmem>>, vector<1x32xf32>
    %c0_34 = arith.constant 0 : index
    %c0_35 = arith.constant 0 : index
    %204 = vector.load %arg8[%c0_34, %c0_35] : memref<1x32xf32, #tpu.memory_space<vmem>>, vector<1x32xf32>
    %cst_36 = arith.constant dense<0.000000e+00> : vector<2xf32>
    %205 = vector.multi_reduction <add>, %202, %cst_36 [1] : vector<2x32xf32> to vector<2xf32>
    %206 = vector.shape_cast %205 : vector<2xf32> to vector<2x1xf32>
    %cst_37 = arith.constant 3.200000e+01 : f32
    %207 = vector.broadcast %cst_37 : f32 to vector<2x1xf32>
    %208 = arith.divf %206, %207 : vector<2x1xf32>
    %209 = vector.broadcast %208 : vector<2x1xf32> to vector<2x32xf32>
    %210 = arith.subf %202, %209 : vector<2x32xf32>
    %211 = arith.mulf %210, %210 : vector<2x32xf32>
    %cst_38 = arith.constant dense<0.000000e+00> : vector<2xf32>
    %212 = vector.multi_reduction <add>, %211, %cst_38 [1] : vector<2x32xf32> to vector<2xf32>
    %213 = vector.shape_cast %212 : vector<2xf32> to vector<2x1xf32>
    %cst_39 = arith.constant 3.200000e+01 : f32
    %214 = vector.broadcast %cst_39 : f32 to vector<2x1xf32>
    %215 = arith.divf %213, %214 : vector<2x1xf32>
    %216 = vector.broadcast %208 : vector<2x1xf32> to vector<2x32xf32>
    %217 = arith.subf %202, %216 : vector<2x32xf32>
    %cst_40 = arith.constant 9.99999974E-6 : f32
    %218 = vector.broadcast %cst_40 : f32 to vector<2x1xf32>
    %219 = arith.addf %215, %218 : vector<2x1xf32>
    %220 = math.rsqrt %219 : vector<2x1xf32>
    %221 = vector.broadcast %220 : vector<2x1xf32> to vector<2x32xf32>
    %222 = arith.mulf %217, %221 : vector<2x32xf32>
    %223 = vector.broadcast %203 : vector<1x32xf32> to vector<2x32xf32>
    %224 = arith.mulf %222, %223 : vector<2x32xf32>
    %225 = vector.broadcast %204 : vector<1x32xf32> to vector<2x32xf32>
    %226 = arith.addf %224, %225 : vector<2x32xf32>
    %cst_41 = arith.constant 0.000000e+00 : f32
    %227 = vector.broadcast %cst_41 : f32 to vector<2x32xf32>
    %228 = arith.maximumf %226, %227 : vector<2x32xf32>
    %c0_42 = arith.constant 0 : index
    %c0_43 = arith.constant 0 : index
    %229 = vector.load %arg9[%c0_42, %c0_43] : memref<32x16xf32, #tpu.memory_space<vmem>>, vector<32x16xf32>
    %cst_44 = arith.constant dense<0.000000e+00> : vector<2x16xf32>
    %230 = tpu.matmul %228, %229, %cst_44 {dimension_numbers = #tpu.dot_dimension_numbers<[1], [0], [0], [1], [0, 0, 1, 1], [], []>} : vector<2x32xf32>, vector<32x16xf32>, vector<2x16xf32> -> vector<2x16xf32>
    %c0_45 = arith.constant 0 : index
    %c0_46 = arith.constant 0 : index
    %231 = vector.load %arg10[%c0_45, %c0_46] : memref<1x16xf32, #tpu.memory_space<vmem>>, vector<1x16xf32>
    %232 = vector.broadcast %231 : vector<1x16xf32> to vector<2x16xf32>
    %233 = arith.addf %230, %232 : vector<2x16xf32>
    %cst_47 = arith.constant 0.000000e+00 : f32
    %234 = vector.broadcast %cst_47 : f32 to vector<2x16xf32>
    %235 = arith.maximumf %233, %234 : vector<2x16xf32>
    %c0_48 = arith.constant 0 : index
    %c0_49 = arith.constant 0 : index
    %236 = vector.load %arg11[%c0_48, %c0_49] : memref<16x1xf32, #tpu.memory_space<vmem>>, vector<16x1xf32>
    %cst_50 = arith.constant dense<0.000000e+00> : vector<2x1xf32>
    %237 = tpu.matmul %235, %236, %cst_50 {dimension_numbers = #tpu.dot_dimension_numbers<[1], [0], [0], [1], [0, 0, 1, 1], [], []>} : vector<2x16xf32>, vector<16x1xf32>, vector<2x1xf32> -> vector<2x1xf32>
    %c0_51 = arith.constant 0 : index
    %c0_52 = arith.constant 0 : index
    %238 = vector.load %arg12[%c0_51, %c0_52] : memref<1x1xf32, #tpu.memory_space<vmem>>, vector<1x1xf32>
    %239 = vector.broadcast %238 : vector<1x1xf32> to vector<2x1xf32>
    %240 = arith.addf %237, %239 : vector<2x1xf32>
    %241 = arith.negf %240 : vector<2x1xf32>
    %242 = math.exp %241 : vector<2x1xf32>
    %cst_53 = arith.constant 1.000000e+00 : f32
    %243 = vector.broadcast %cst_53 : f32 to vector<2x1xf32>
    %244 = arith.addf %243, %242 : vector<2x1xf32>
    %245 = arith.divf %243, %244 : vector<2x1xf32>
    %c0_54 = arith.constant 0 : index
    %c0_55 = arith.constant 0 : index
    %246 = vector.load %arg19[%c0_54, %c0_55] : memref<2x1xf32, #tpu.memory_space<vmem>>, vector<2x1xf32>
    tpu.vector_store %arg19[%c0_54, %c0_55], %245 {strides = array<i32>} : memref<2x1xf32, #tpu.memory_space<vmem>>, vector<2x1xf32>,
    %c0_56 = arith.constant 0 : index
    %c0_57 = arith.constant 0 : index
    %247 = vector.load %arg13[%c0_56, %c0_57] : memref<64x32xf32, #tpu.memory_space<vmem>>, vector<64x32xf32>
    %cst_58 = arith.constant dense<0.000000e+00> : vector<2x32xf32>
    %248 = tpu.matmul %197, %247, %cst_58 {dimension_numbers = #tpu.dot_dimension_numbers<[1], [0], [0], [1], [0, 0, 1, 1], [], []>} : vector<2x64xf32>, vector<64x32xf32>, vector<2x32xf32> -> vector<2x32xf32>
    %c0_59 = arith.constant 0 : index
    %c0_60 = arith.constant 0 : index
    %249 = vector.load %arg14[%c0_59, %c0_60] : memref<1x32xf32, #tpu.memory_space<vmem>>, vector<1x32xf32>
    %250 = vector.broadcast %249 : vector<1x32xf32> to vector<2x32xf32>
    %251 = arith.addf %248, %250 : vector<2x32xf32>
    %cst_61 = arith.constant 0.000000e+00 : f32
    %252 = vector.broadcast %cst_61 : f32 to vector<2x32xf32>
    %253 = arith.maximumf %251, %252 : vector<2x32xf32>
    %c0_62 = arith.constant 0 : index
    %c0_63 = arith.constant 0 : index
    %254 = vector.load %arg15[%c0_62, %c0_63] : memref<32x128xf32, #tpu.memory_space<vmem>>, vector<32x128xf32>
    %cst_64 = arith.constant dense<0.000000e+00> : vector<2x128xf32>
    %255 = tpu.matmul %253, %254, %cst_64 {dimension_numbers = #tpu.dot_dimension_numbers<[1], [0], [0], [1], [0, 0, 1, 1], [], []>} : vector<2x32xf32>, vector<32x128xf32>, vector<2x128xf32> -> vector<2x128xf32>
    %c0_65 = arith.constant 0 : index
    %c0_66 = arith.constant 0 : index
    %256 = vector.load %arg16[%c0_65, %c0_66] : memref<1x128xf32, #tpu.memory_space<vmem>>, vector<1x128xf32>
    %257 = vector.broadcast %256 : vector<1x128xf32> to vector<2x128xf32>
    %258 = arith.addf %255, %257 : vector<2x128xf32>
    %cst_67 = arith.constant 0.000000e+00 : f32
    %259 = vector.broadcast %cst_67 : f32 to vector<2x128xf32>
    %260 = arith.maximumf %258, %259 : vector<2x128xf32>
    %c0_68 = arith.constant 0 : index
    %c0_69 = arith.constant 0 : index
    %261 = vector.load %arg17[%c0_68, %c0_69] : memref<128x64xf32, #tpu.memory_space<vmem>>, vector<128x64xf32>
    %cst_70 = arith.constant dense<0.000000e+00> : vector<2x64xf32>
    %262 = tpu.matmul %260, %261, %cst_70 {dimension_numbers = #tpu.dot_dimension_numbers<[1], [0], [0], [1], [0, 0, 1, 1], [], []>} : vector<2x128xf32>, vector<128x64xf32>, vector<2x64xf32> -> vector<2x64xf32>
    %c0_71 = arith.constant 0 : index
    %c0_72 = arith.constant 0 : index
    %263 = vector.load %arg18[%c0_71, %c0_72] : memref<1x64xf32, #tpu.memory_space<vmem>>, vector<1x64xf32>
    %264 = vector.broadcast %263 : vector<1x64xf32> to vector<2x64xf32>
    %265 = arith.addf %262, %264 : vector<2x64xf32>
    %c0_73 = arith.constant 0 : index
    %c0_74 = arith.constant 0 : index
    %266 = vector.load %arg20[%c0_73, %c0_74] : memref<2x64xf32, #tpu.memory_space<vmem>>, vector<2x64xf32>
    tpu.vector_store %arg20[%c0_73, %c0_74], %265 {strides = array<i32>} : memref<2x64xf32, #tpu.memory_space<vmem>>, vector<2x64xf32>,
    return
  }
}

</mosaic_0001>

<bundles_post_ra>
// kernel: forward.4
= control target key start
LH: loop header
LB: loop body
LE: loop exit
PB: predicated region body
PF: predicated region fallthrough
CT: control target
= control target key end

     0   :  { %vm64_vm0 = vcmask 130048   ;;  %s987_s24 = smov 32   ;;  %s989_s25 = smov 96   ;;  %vm499_vm1 = vcmask 261120   ;;  %vm502_vm2 = vcmask 523264   ;;  %vm505_vm3 = vcmask 785408   ;;  %s1285_s1 = inlined_call_operand.vmem [shape: f32[16,16], index: 1, kind: input, shape index: {}]   ;;  %s1286_s0 = inlined_call_operand.vmem [shape: f32[4,16,16], index: 0, kind: input, shape index: {}]   ;;  %s1287_s2 = inlined_call_operand.vmem [shape: f32[1,16], index: 2, kind: input, shape index: {}]   ;;  %s1288_s5 = inlined_call_operand.vmem [shape: f32[16,32], index: 5, kind: input, shape index: {}]   ;;  %s1289_s3 = inlined_call_operand.vmem [shape: f32[1,16], index: 3, kind: input, shape index: {}]   ;;  %s1290_s4 = inlined_call_operand.vmem [shape: f32[1,16], index: 4, kind: input, shape index: {}]   ;;  %s1291_s7 = inlined_call_operand.vmem [shape: f32[128,32], index: 7, kind: input, shape index: {}]   ;;  %s1292_s6 = inlined_call_operand.vmem [shape: f32[1,32], index: 6, kind: input, shape index: {}]   ;;  %s1293_s8 = inlined_call_operand.vmem [shape: f32[1,32], index: 8, kind: input, shape index: {}]   ;;  %s1294_s11 = inlined_call_operand.vmem [shape: f32[32,256], index: 11, kind: input, shape index: {}]   ;;  %s1295_s9 = inlined_call_operand.vmem [shape: f32[1,32], index: 9, kind: input, shape index: {}]   ;;  %s1296_s10 = inlined_call_operand.vmem [shape: f32[1,32], index: 10, kind: input, shape index: {}]   ;;  %s1297_s12 = inlined_call_operand.vmem [shape: f32[1,256], index: 12, kind: input, shape index: {}]   ;;  %s1298_s13 = inlined_call_operand.vmem [shape: f32[16,256], index: 13, kind: output, shape index: {}]  }
   0x1   :  { %v55_v0 = vld [vmem:[%s1285_s1] sm:$0xff]  ;;  %v56_v1 = vld [vmem:[%s1285_s1 + $0x8] sm:$0xff]  ;;  %v764_v5 = vld [vmem:[%s1286_s0 + $0x10] sm:$0xff] }
   0x2   :  { %v44_v2 = vld [vmem:[%s1286_s0] sm:$0xff]  ;;  %v900_v3 = vpack.c.bf16 %v56_v1, %v55_v0  ;;  %v45_v4 = vld [vmem:[%s1286_s0 + $0x8] sm:$0xff]  ;;  %v765_v6 = vld [vmem:[%s1286_s0 + $0x18] sm:$0xff] }
   0x3   :  { %837 = vmatprep.mubr.msk.f32.mxu0 %vm64_vm0, %v44_v2  ;;  %v766_v7 = vld [vmem:[%s1286_s0 + $0x20] sm:$0xff]  ;;  %v767_v8 = vld [vmem:[%s1286_s0 + $0x28] sm:$0xff]  ;;  %v768_v9 = vld [vmem:[%s1286_s0 + $0x30] sm:$0xff] }
   0x4   :  { %901 = vmatprep.subr.bf16.mxu0 %v900_v3  ;;  %v769_v10 = vld [vmem:[%s1286_s0 + $0x38] sm:$0xff]  ;;  %v770_v11 = vld [vmem:[%s1287_s2] ss:$0 sm:$0xff] }
   0x5   :  { %903 = vmatpush3.bf16.msra.mxu0 %v900_v3 }
   0x8   :  { %838 = vmatmul.mubr.msk.f32.vlgmr.msra.gmra.mrb[0].mxu0 %vm64_vm0, %v45_v4 }
   0x9   :  { %840 = vmatprep.mubr.msk.f32.mxu0 %vm64_vm0, %v764_v5 }
   0xc   :  { %841 = vmatmul.mubr.msk.f32.gmra.mrb[2].mxu0 %vm64_vm0, %v765_v6 }
   0xd   :  { %843 = vmatprep.mubr.msk.f32.mxu0 %vm64_vm0, %v766_v7 }
  0x10   :  { %844 = vmatmul.mubr.msk.f32.gmra.mrb[4].mxu0 %vm64_vm0, %v767_v8 }
  0x11   :  { %846 = vmatprep.mubr.msk.f32.mxu0 %vm64_vm0, %v768_v9 }
  0x14   :  { %847 = vmatmul.mubr.msk.f32.gmra.mrb[6].mxu0 %vm64_vm0, %v769_v10 }
  0xdb   :  { %v839_v12 = vpop.f32.mrb[0].mxu0 }
  0xdc   :  { %v155_v13 = vpop.f32.mrb[1].mxu0  ;;  %v161_v15 = vadd.f32 %v839_v12, %v770_v11  ;;  %v337_v12 = vld [vmem:[%s1288_s5] sm:$0xff] }
  0xdd   :  { %v156_v14 = vadd.f32 %v770_v11, %v155_v13  ;;  %v338_v13 = vld [vmem:[%s1288_s5 + $0x8] sm:$0xff] }
  0xde   :  { %v199_v23 = vsel %vm64_vm0, %v161_v15, 0.0 }
  0xdf   :  { %v842_v16 = vpop.f32.mrb[2].mxu0  ;;  %v196_v17 = vsel %vm64_vm0, %v156_v14, 0.0 }
  0xe0   :  { %v165_v18 = vpop.f32.mrb[3].mxu0  ;;  %197 = vadd.xlane.f32.xlu0 %v196_v17  ;;  %v171_v20 = vadd.f32 %v842_v16, %v770_v11 }
  0xe1   :  { %v166_v19 = vadd.f32 %v770_v11, %v165_v18 }
  0xe2   :  { %v205_v28 = vsel %vm64_vm0, %v171_v20, 0.0 }
  0xe3   :  { %v845_v21 = vpop.f32.mrb[4].mxu0  ;;  %v202_v22 = vsel %vm64_vm0, %v166_v19, 0.0 }
  0xe4   :  { %v175_v24 = vpop.f32.mrb[5].mxu0  ;;  %203 = vadd.xlane.f32.xlu1 %v202_v22  ;;  %200 = vadd.xlane.f32.xlu0 %v199_v23  ;;  %v181_v26 = vadd.f32 %v845_v21, %v770_v11 }
  0xe5   :  { %v176_v25 = vadd.f32 %v770_v11, %v175_v24 }
  0xe6   :  { %v211_v33 = vsel %vm64_vm0, %v181_v26, 0.0 }
  0xe7   :  { %v848_v27 = vpop.f32.mrb[6].mxu0  ;;  %v208_v29 = vsel %vm64_vm0, %v176_v25, 0.0 }
  0xe8   :  { %v185_v30 = vpop.f32.mrb[7].mxu0  ;;  %206 = vadd.xlane.f32.xlu1 %v205_v28  ;;  %209 = vadd.xlane.f32.xlu0 %v208_v29  ;;  %v191_v32 = vadd.f32 %v848_v27, %v770_v11 }
  0xe9   :  { %v186_v31 = vadd.f32 %v770_v11, %v185_v30 }
  0xea   :  { %v217_v35 = vsel %vm64_vm0, %v191_v32, 0.0 }
  0xeb   :  { %v214_v34 = vsel %vm64_vm0, %v186_v31, 0.0 }
  0xec   :  { %212 = vadd.xlane.f32.xlu1 %v211_v33  ;;  %215 = vadd.xlane.f32.xlu0 %v214_v34 }
  0xf0   :  { %218 = vadd.xlane.f32.xlu1 %v217_v35 }
 0x16d   :  { %v198_v36 = vpop.xlane.xlu0 %197 }
 0x16e   :  { %v221_v37 = vmul.f32 0.0625, %v198_v36 }
 0x170   :  { %v1110_v38 = vsub.f32 %v156_v14, %v221_v37  ;;  %v904_v14 = vpack.c.bf16 %v338_v13, %v337_v12  ;;  %v779_v37 = vld [vmem:[%s1289_s3] ss:$0 sm:$0xff] }
 0x171   :  { %v204_v39 = vpop.xlane.xlu1 %203  ;;  %v201_v40 = vpop.xlane.xlu0 %200 }
 0x172   :  { %v223_v41 = vmul.f32 0.0625, %v204_v39  ;;  %v222_v42 = vmul.f32 0.0625, %v201_v40  ;;  %v237_v43 = vmul.f32 %v1110_v38, %v1110_v38  ;;  %905 = vmatprep.subr.bf16.mxu1 %v904_v14 }
 0x173   :  { %907 = vmatpush3.bf16.msra.mxu1 %v904_v14 }
 0x174   :  { %v1114_v44 = vsub.f32 %v166_v19, %v223_v41  ;;  %v1116_v45 = vsub.f32 %v161_v15, %v222_v42  ;;  %v245_v46 = vsel %vm64_vm0, %v237_v43, 0.0  ;;  %v780_v42 = vld [vmem:[%s1290_s4] ss:$0 sm:$0xff] }
 0x175   :  { %v207_v47 = vpop.xlane.xlu1 %206  ;;  %246 = vadd.xlane.f32.xlu0 %v245_v46  ;;  %v210_v48 = vpop.xlane.xlu0 %209 }
 0x176   :  { %v224_v49 = vmul.f32 0.0625, %v207_v47  ;;  %v225_v50 = vmul.f32 0.0625, %v210_v48  ;;  %v239_v51 = vmul.f32 %v1114_v44, %v1114_v44  ;;  %v238_v52 = vmul.f32 %v1116_v45, %v1116_v45 }
 0x178   :  { %v1123_v53 = vsub.f32 %v171_v20, %v224_v49  ;;  %v1125_v54 = vsub.f32 %v176_v25, %v225_v50  ;;  %v251_v55 = vsel %vm64_vm0, %v239_v51, 0.0  ;;  %v248_v56 = vsel %vm64_vm0, %v238_v52, 0.0 }
 0x179   :  { %v213_v57 = vpop.xlane.xlu1 %212  ;;  %252 = vadd.xlane.f32.xlu0 %v251_v55  ;;  %249 = vadd.xlane.f32.xlu1 %v248_v56  ;;  %v216_v58 = vpop.xlane.xlu0 %215 }
 0x17a   :  { %v226_v59 = vmul.f32 0.0625, %v213_v57  ;;  %v227_v60 = vmul.f32 0.0625, %v216_v58  ;;  %v240_v61 = vmul.f32 %v1123_v53, %v1123_v53  ;;  %v241_v62 = vmul.f32 %v1125_v54, %v1125_v54 }
 0x17c   :  { %v1133_v63 = vsub.f32 %v181_v26, %v226_v59  ;;  %v1135_v0 = vsub.f32 %v186_v31, %v227_v60  ;;  %v254_v1 = vsel %vm64_vm0, %v240_v61, 0.0  ;;  %v257_v2 = vsel %vm64_vm0, %v241_v62, 0.0 }
 0x17d   :  { %v219_v3 = vpop.xlane.xlu1 %218  ;;  %255 = vadd.xlane.f32.xlu1 %v254_v1  ;;  %258 = vadd.xlane.f32.xlu0 %v257_v2 }
 0x17e   :  { %v228_v4 = vmul.f32 0.0625, %v219_v3  ;;  %v242_v5 = vmul.f32 %v1133_v63, %v1133_v63  ;;  %v243_v6 = vmul.f32 %v1135_v0, %v1135_v0 }
 0x180   :  { %v1143_v7 = vsub.f32 %v191_v32, %v228_v4  ;;  %v260_v8 = vsel %vm64_vm0, %v242_v5, 0.0  ;;  %v263_v9 = vsel %vm64_vm0, %v243_v6, 0.0 }
 0x181   :  { %261 = vadd.xlane.f32.xlu1 %v260_v8  ;;  %264 = vadd.xlane.f32.xlu0 %v263_v9 }
 0x182   :  { %v244_v10 = vmul.f32 %v1143_v7, %v1143_v7 }
 0x184   :  { %v266_v11 = vsel %vm64_vm0, %v244_v10, 0.0 }
 0x185   :  { %267 = vadd.xlane.f32.xlu1 %v266_v11 }
 0x202   :  { %v247_v15 = vpop.xlane.xlu0 %246 }
 0x203   :  { %v269_v16 = vmul.f32 0.0625, %v247_v15 }
 0x205   :  { %v277_v17 = vadd.f32 1e-05, %v269_v16 }
 0x206   :  { %v250_v18 = vpop.xlane.xlu1 %249  ;;  %v253_v19 = vpop.xlane.xlu0 %252 }
 0x207   :  { %967 = vrsqrt.f32 %v277_v17  ;;  %v270_v20 = vmul.f32 0.0625, %v250_v18  ;;  %v271_v21 = vmul.f32 0.0625, %v253_v19  ;;  %v508_v18 = vld [vmem:[%s1291_s7] sm:$0xff]  ;;  %v510_v19 = vld [vmem:[%s1291_s7 + $0x10] sm:$0xff] }
 0x209   :  { %v278_v22 = vadd.f32 1e-05, %v270_v20  ;;  %v279_v23 = vadd.f32 1e-05, %v271_v21  ;;  %v511_v21 = vld [vmem:[%s1291_s7 + $0x18] sm:$0xff] }
 0x20a   :  { %v256_v24 = vpop.xlane.xlu1 %255  ;;  %v259_v25 = vpop.xlane.xlu0 %258 }
 0x20b   :  { %969 = vrsqrt.f32 %v278_v22  ;;  %v272_v26 = vmul.f32 0.0625, %v256_v24  ;;  %v273_v27 = vmul.f32 0.0625, %v259_v25  ;;  %v912_v22 = vpack.c.bf16 %v511_v21, %v510_v19  ;;  %v513_v24 = vld [vmem:[%s1291_s7 + $0x28] sm:$0xff] }
 0x20c   :  { %971 = vrsqrt.f32 %v279_v23  ;;  %v512_v23 = vld [vmem:[%s1291_s7 + $0x20] sm:$0xff] }
 0x20d   :  { %v280_v28 = vadd.f32 1e-05, %v272_v26  ;;  %v281_v29 = vadd.f32 1e-05, %v273_v27  ;;  %v916_v25 = vpack.c.bf16 %v513_v24, %v512_v23  ;;  %v514_v26 = vld [vmem:[%s1291_s7 + $0x30] sm:$0xff]  ;;  %v515_v27 = vld [vmem:[%s1291_s7 + $0x38] sm:$0xff] }
 0x20e   :  { %v262_v30 = vpop.xlane.xlu1 %261  ;;  %v265_v31 = vpop.xlane.xlu0 %264 }
 0x20f   :  { %973 = vrsqrt.f32 %v280_v28  ;;  %v274_v32 = vmul.f32 0.0625, %v262_v30  ;;  %v275_v33 = vmul.f32 0.0625, %v265_v31  ;;  %v920_v28 = vpack.c.bf16 %v515_v27, %v514_v26  ;;  %v517_v30 = vld [vmem:[%s1291_s7 + $0x48] sm:$0xff] }
 0x210   :  { %975 = vrsqrt.f32 %v281_v29  ;;  %v516_v29 = vld [vmem:[%s1291_s7 + $0x40] sm:$0xff] }
 0x211   :  { %v968_v34 = vpop.eup %967  ;;  %v282_v35 = vadd.f32 1e-05, %v274_v32  ;;  %v283_v36 = vadd.f32 1e-05, %v275_v33  ;;  %v924_v31 = vpack.c.bf16 %v517_v30, %v516_v29  ;;  %v518_v32 = vld [vmem:[%s1291_s7 + $0x50] sm:$0xff]  ;;  %v519_v33 = vld [vmem:[%s1291_s7 + $0x58] sm:$0xff] }
 0x212   :  { %v268_v39 = vpop.xlane.xlu1 %267  ;;  %v293_v40 = vmul.f32 %v968_v34, %v1110_v38  ;;  %v928_v34 = vpack.c.bf16 %v519_v33, %v518_v32  ;;  %v654_v29 = vld [vmem:[%s1294_s11 + $0x8] sm:$0xff]  ;;  %v656_v30 = vld [vmem:[%s1294_s11 + $0x18] sm:$0xff]  ;;  %v653_v32 = vld [vmem:[%s1294_s11] sm:$0xff] }
 0x213   :  { %977 = vrsqrt.f32 %v282_v35  ;;  %v276_v41 = vmul.f32 0.0625, %v268_v39  ;;  %v781_v35 = vld [vmem:[%s1292_s6] ss:$0 sm:$0xff]  ;;  %v655_v33 = vld [vmem:[%s1294_s11 + $0x10] sm:$0xff] }
 0x214   :  { %979 = vrsqrt.f32 %v283_v36  ;;  %v307_v43 = vmul.f32 %v779_v37, %v293_v40  ;;  %v520_v36 = vld [vmem:[%s1291_s7 + $0x60] sm:$0xff] }
 0x215   :  { %v970_v46 = vpop.eup %969  ;;  %v284_v47 = vadd.f32 1e-05, %v276_v41 }
 0x216   :  { %v972_v48 = vpop.eup %971  ;;  %v321_v49 = vadd.f32 %v780_v42, %v307_v43  ;;  %v294_v50 = vmul.f32 %v970_v46, %v1116_v45  ;;  %v522_v46 = vld [vmem:[%s1291_s7 + $0x70] sm:$0xff] }
 0x217   :  { %981 = vrsqrt.f32 %v284_v47  ;;  %v295_v51 = vmul.f32 %v972_v48, %v1114_v44  ;;  %v523_v47 = vld [vmem:[%s1291_s7 + $0x78] sm:$0xff] }
 0x218   :  { %v329_v52 = vmax.f32 %v321_v49, 0.0  ;;  %v308_v55 = vmul.f32 %v779_v37, %v294_v50  ;;  %v936_v49 = vpack.c.bf16 %v523_v47, %v522_v46 }
 0x219   :  { %v974_v38 = vpop.eup %973  ;;  %v309_v56 = vmul.f32 %v779_v37, %v295_v51 }
 0x21a   :  { %v976_v57 = vpop.eup %975  ;;  %853 = vmatprep.mubr.msk.f32.mxu1 %vm64_vm0, %v329_v52  ;;  %v322_v58 = vadd.f32 %v780_v42, %v308_v55  ;;  %v296_v59 = vmul.f32 %v974_v38, %v1123_v53 }
 0x21b   :  { %v323_v60 = vadd.f32 %v780_v42, %v309_v56  ;;  %v297_v61 = vmul.f32 %v976_v57, %v1125_v54 }
 0x21c   :  { %v330_v62 = vmax.f32 %v322_v58, 0.0  ;;  %v310_v1 = vmul.f32 %v779_v37, %v296_v59 }
 0x21d   :  { %v978_v2 = vpop.eup %977  ;;  %v331_v45 = vmax.f32 %v323_v60, 0.0  ;;  %v311_v3 = vmul.f32 %v779_v37, %v297_v61 }
 0x21e   :  { %v980_v4 = vpop.eup %979  ;;  %854 = vmatmul.mubr.msk.f32.vlgmr.msra.gmra.mrb[0].mxu1 %vm64_vm0, %v330_v62  ;;  %v324_v44 = vadd.f32 %v780_v42, %v310_v1  ;;  %v298_v5 = vmul.f32 %v978_v2, %v1133_v63 }
 0x21f   :  { %856 = vmatprep.mubr.msk.f32.mxu1 %vm64_vm0, %v331_v45  ;;  %v325_v6 = vadd.f32 %v780_v42, %v311_v3  ;;  %v299_v8 = vmul.f32 %v980_v4, %v1135_v0 }
 0x220   :  { %v332_v53 = vmax.f32 %v324_v44, 0.0  ;;  %v312_v9 = vmul.f32 %v779_v37, %v298_v5 }
 0x221   :  { %v982_v10 = vpop.eup %981  ;;  %v333_v54 = vmax.f32 %v325_v6, 0.0  ;;  %v313_v11 = vmul.f32 %v779_v37, %v299_v8 }
 0x222   :  { %857 = vmatmul.mubr.msk.f32.gmra.mrb[2].mxu1 %vm64_vm0, %v332_v53  ;;  %v326_v12 = vadd.f32 %v780_v42, %v312_v9  ;;  %v300_v13 = vmul.f32 %v982_v10, %v1143_v7  ;;  %v509_v7 = vld [vmem:[%s1291_s7 + $0x8] sm:$0xff] }
 0x223   :  { %859 = vmatprep.mubr.msk.f32.mxu1 %vm64_vm0, %v333_v54  ;;  %v327_v14 = vadd.f32 %v780_v42, %v313_v11  ;;  %v908_v20 = vpack.c.bf16 %v509_v7, %v508_v18 }
 0x224   :  { %v334_v15 = vmax.f32 %v326_v12, 0.0  ;;  %v314_v63 = vmul.f32 %v779_v37, %v300_v13  ;;  %v521_v37 = vld [vmem:[%s1291_s7 + $0x68] sm:$0xff]  ;;  %s988_s7 = smov 64  }
 0x225   :  { %v335_v16 = vmax.f32 %v327_v14, 0.0  ;;  %909 = vmatprep.subr.bf16.mxu0 %v908_v20  ;;  %v932_v40 = vpack.c.bf16 %v521_v37, %v520_v36  ;;  %v660_v36 = vld [vmem:[%s1294_s11 + $0x38] sm:$0xff] }
 0x226   :  { %860 = vmatmul.mubr.msk.f32.gmra.mrb[4].mxu1 %vm64_vm0, %v334_v15  ;;  %v328_v17 = vadd.f32 %v780_v42, %v314_v63  ;;  %911 = vmatpush3.bf16.msra.mxu0 %v908_v20  ;;  %v790_v15 = vld [vmem:[%s1293_s8] ss:$0 sm:$0xff] }
 0x227   :  { %862 = vmatprep.mubr.msk.f32.mxu1 %vm64_vm0, %v335_v16  ;;  %913 = vmatprep.subr.bf16.mxu0 %v912_v22 }
 0x228   :  { %v336_v0 = vmax.f32 %v328_v17, 0.0 }
 0x22a   :  { %863 = vmatmul.mubr.msk.f32.gmra.mrb[6].mxu1 %vm64_vm0, %v336_v0  ;;  %915 = vmatpush3.bf16.msra.mxu0 %v912_v22 }
 0x22b   :  { %917 = vmatprep.subr.bf16.mxu0 %v916_v25 }
 0x22e   :  { %919 = vmatpush3.bf16.msra.mxu0 %v916_v25 }
 0x22f   :  { %921 = vmatprep.subr.bf16.mxu0 %v920_v28 }
 0x232   :  { %923 = vmatpush3.bf16.msra.mxu0 %v920_v28 }
 0x233   :  { %925 = vmatprep.subr.bf16.mxu0 %v924_v31 }
 0x236   :  { %927 = vmatpush3.bf16.msra.mxu0 %v924_v31  ;;  %v940_v31 = vpack.c.bf16 %v656_v30, %v654_v29 }
 0x237   :  { %929 = vmatprep.subr.bf16.mxu0 %v928_v34 }
 0x238   :  { %941 = vmatprep.subr.bf16.mxu1 %v940_v31 }
 0x23a   :  { %931 = vmatpush3.bf16.msra.mxu0 %v928_v34  ;;  %v942_v34 = vpack.c.bf16 %v655_v33, %v653_v32 }
 0x23b   :  { %933 = vmatprep.subr.bf16.mxu0 %v932_v40 }
 0x23c   :  { %943 = vmatpush1.bf16.msra.mxu1 %v942_v34 }
 0x23e   :  { %935 = vmatpush3.bf16.msra.mxu0 %v932_v40  ;;  %v659_v40 = vld [vmem:[%s1294_s11 + $0x30] sm:$0xff] }
 0x23f   :  { %937 = vmatprep.subr.bf16.mxu0 %v936_v49 }
 0x242   :  { %939 = vmatpush3.bf16.msra.mxu0 %v936_v49 }
 0x2f1   :  { %v855_v39 = vpop.f32.mrb[0].mxu1 }
 0x2f2   :  { %v442_v41 = vadd.f32 %v855_v39, %v781_v35  ;;  %v436_v42 = vpop.f32.mrb[1].mxu1  ;;  %v657_v39 = vld [vmem:[%s1294_s11 + $0x20] sm:$0xff] }
 0x2f3   :  { %v437_v43 = vadd.f32 %v781_v35, %v436_v42  ;;  %v990_v42 = vmov 0.0  }
 0x2f4   :  { %743 = vmatprep.mubr.f32.mxu1 %v990_v42 }
 0x2f5   :  { %v858_v48 = vpop.f32.mrb[2].mxu1 }
 0x2f6   :  { %v452_v50 = vadd.f32 %v858_v48, %v781_v35  ;;  %v446_v51 = vpop.f32.mrb[3].mxu1 }
 0x2f7   :  { %v447_v52 = vadd.f32 %v781_v35, %v446_v51 }
 0x2f9   :  { %v952_v55 = vpack.i.bf16 %v452_v50, %v447_v52  ;;  %v861_v38 = vpop.f32.mrb[4].mxu1  ;;  %v791_v52 = vld [vmem:[%s1295_s9] ss:$0 sm:$0xff] }
 0x2fa   :  { %v462_v56 = vadd.f32 %v861_v38, %v781_v35  ;;  %v456_v57 = vpop.f32.mrb[5].mxu1  ;;  %v792_v38 = vld [vmem:[%s1296_s10] ss:$0 sm:$0xff] }
 0x2fb   :  { %v457_v58 = vadd.f32 %v781_v35, %v456_v57  ;;  %953 = vrot.lane.b32.xlu0 %v952_v55, %s987_s24 }
 0x2fd   :  { %v957_v59 = vpack.i.bf16 %v462_v56, %v457_v58  ;;  %v864_v60 = vpop.f32.mrb[6].mxu1 }
 0x2fe   :  { %v472_v61 = vadd.f32 %v864_v60, %v781_v35  ;;  %v466_v62 = vpop.f32.mrb[7].mxu1 }
 0x2ff   :  { %v467_v1 = vadd.f32 %v781_v35, %v466_v62  ;;  %958 = vrot.lane.b32.xlu1 %v957_v59, %s988_s7  ;;  %v658_v35 = vld [vmem:[%s1294_s11 + $0x28] sm:$0xff] }
 0x300   :  { %v944_v37 = vpack.c.bf16 %v660_v36, %v658_v35 }
 0x301   :  { %v962_v2 = vpack.i.bf16 %v472_v61, %v467_v1 }
 0x302   :  { %945 = vmatprep.subr.bf16.mxu1 %v944_v37 }
 0x303   :  { %963 = vrot.lane.b32.xlu1 %v962_v2, %s989_s25  ;;  %v663_v2 = vlaneseq }
 0x36d   :  { %v954_v45 = vpop.permute.xlu0 %953 }
 0x36e   :  { %v956_v4 = vunpack.i.h.bf16 %v954_v45  ;;  %v955_v44 = vunpack.i.l.bf16 %v954_v45  ;;  %v664_v45 = vshrl.u32 %v663_v2, 7 }
 0x370   :  { %v501_v53 = vsel %vm499_vm1, %v442_v41, %v956_v4  ;;  %v500_v54 = vsel %vm499_vm1, %v437_v43, %v955_v44  ;;  %v946_v41 = vpack.c.bf16 %v659_v40, %v657_v39  ;;  %v661_v4 = vld [vmem:[%s1297_s12] sm:$0x3]  ;;  %v669_v44 = vsub.s32 1, %v664_v45 }
 0x371   :  { %v959_v3 = vpop.permute.xlu1 %958 }
 0x372   :  { %v961_v5 = vunpack.i.h.bf16 %v959_v3  ;;  %v960_v6 = vunpack.i.l.bf16 %v959_v3  ;;  %947 = vmatpush1.bf16.msra.mxu1 %v946_v41  ;;  %v665_v3 = vsub.s32 0, %v664_v45 }
 0x374   :  { %v504_v11 = vsel %vm502_vm2, %v501_v53, %v961_v5  ;;  %v503_v12 = vsel %vm502_vm2, %v500_v54, %v960_v6  ;;  %v666_v5 = vrot.slane %v661_v4, %v665_v3  ;;  %v670_v6 = vrot.slane %v661_v4, %v669_v44 }
 0x375   :  { %v964_v8 = vpop.permute.xlu1 %963 }
 0x376   :  { %v966_v9 = vunpack.i.h.bf16 %v964_v8  ;;  %v965_v10 = vunpack.i.l.bf16 %v964_v8 }
 0x378   :  { %v506_v13 = vsel %vm505_vm3, %v503_v12, %v965_v10  ;;  %v507_v14 = vsel %vm505_vm3, %v504_v11, %v966_v9 }
 0x379   :  { %897 = vmatprep.mubr.f32.mxu0 %v506_v13 }
 0x37a   :  { %898 = vmatmul.mubr.f32.vlgmr.msra.gmra.mrb[8].mxu0 %v507_v14 }
 0x44d   :  { %v899_v63 = vpop.f32.mrb[8].mxu0 }
 0x44e   :  { %v603_v16 = vadd.f32 %v899_v63, %v790_v15  ;;  %v597_v17 = vpop.f32.mrb[9].mxu0 }
 0x44f   :  { %v598_v0 = vadd.f32 %v790_v15, %v597_v17 }
 0x450   :  { %v611_v18 = vsel %vm499_vm1, %v603_v16, 0.0 }
 0x451   :  { %612 = vadd.xlane.f32.xlu0 %v611_v18  ;;  %v608_v7 = vsel %vm499_vm1, %v598_v0, 0.0 }
 0x452   :  { %609 = vadd.xlane.f32.xlu1 %v608_v7 }
 0x4de   :  { %v613_v19 = vpop.xlane.xlu0 %612 }
 0x4df   :  { %v616_v20 = vmul.f32 0.03125, %v613_v19  ;;  %v610_v21 = vpop.xlane.xlu1 %609 }
 0x4e0   :  { %v615_v22 = vmul.f32 0.03125, %v610_v21 }
 0x4e1   :  { %v618_v23 = vsub.f32 %v603_v16, %v616_v20 }
 0x4e2   :  { %v617_v24 = vsub.f32 %v598_v0, %v615_v22 }
 0x4e3   :  { %v620_v27 = vmul.f32 %v618_v23, %v618_v23 }
 0x4e4   :  { %v619_v25 = vmul.f32 %v617_v24, %v617_v24 }
 0x4e5   :  { %v624_v28 = vsel %vm499_vm1, %v620_v27, 0.0 }
 0x4e6   :  { %v621_v26 = vsel %vm499_vm1, %v619_v25, 0.0 }
 0x4e7   :  { %622 = vadd.xlane.f32.xlu0 %v621_v26 }
 0x4eb   :  { %625 = vadd.xlane.f32.xlu0 %v624_v28 }
 0x574   :  { %v623_v43 = vpop.xlane.xlu0 %622 }
 0x575   :  { %v627_v46 = vmul.f32 0.03125, %v623_v43 }
 0x577   :  { %v629_v47 = vadd.f32 1e-05, %v627_v46 }
 0x578   :  { %v626_v48 = vpop.xlane.xlu0 %625 }
 0x579   :  { %983 = vrsqrt.f32 %v629_v47  ;;  %v628_v49 = vmul.f32 0.03125, %v626_v48 }
 0x57b   :  { %v630_v50 = vadd.f32 1e-05, %v628_v49 }
 0x57d   :  { %985 = vrsqrt.f32 %v630_v50 }
 0x583   :  { %v984_v51 = vpop.eup %983 }
 0x584   :  { %v633_v55 = vmul.f32 %v984_v51, %v617_v24 }
 0x586   :  { %v641_v56 = vmul.f32 %v791_v52, %v633_v55 }
 0x587   :  { %v986_v57 = vpop.eup %985 }
 0x588   :  { %v649_v58 = vadd.f32 %v792_v38, %v641_v56  ;;  %v634_v59 = vmul.f32 %v986_v57, %v618_v23 }
 0x58a   :  { %v651_v60 = vmax.f32 %v649_v58, 0.0  ;;  %v642_v61 = vmul.f32 %v791_v52, %v634_v59 }
 0x58c   :  { %793 = vmatmul.mubr.msk.f32.vlgmr.msra.gmra.mrb[8].mxu1 %vm499_vm1, %v651_v60  ;;  %v650_v62 = vadd.f32 %v792_v38, %v642_v61 }
 0x58d   :  { %749 = vmatprep.mubr.f32.mxu1 %v990_v42 }
 0x58e   :  { %v652_v1 = vmax.f32 %v650_v62, 0.0 }
 0x590   :  { %794 = vmatmul.mubr.msk.f32.gmra.mrb[10].mxu1 %vm499_vm1, %v652_v1 }
 0x65f   :  { %v745_v8 = vpop.f32.mrb[8].mxu1 }
 0x660   :  { %v746_v53 = vadd.f32 %v745_v8, %v666_v5  ;;  %v747_v9 = vpop.f32.mrb[9].mxu1 }
 0x661   :  { %v748_v10 = vadd.f32 %v747_v9, %v670_v6 }
 0x662   :  { %756 = vst [vmem:[%s1298_s13] sm:$0xff] %v746_v53 }
 0x663   :  { %757 = vst [vmem:[%s1298_s13 + $0x8] sm:$0xff] %v748_v10  ;;  %v751_v54 = vpop.f32.mrb[10].mxu1 }
 0x664   :  { %v752_v11 = vadd.f32 %v751_v54, %v666_v5  ;;  %v753_v12 = vpop.f32.mrb[11].mxu1 }
 0x665   :  { %v754_v13 = vadd.f32 %v753_v12, %v670_v6 }
 0x666   :  { %758 = vst [vmem:[%s1298_s13 + $0x10] sm:$0xff] %v752_v11 }
 0x667   :  { %759 = vst [vmem:[%s1298_s13 + $0x18] sm:$0xff] %v754_v13 }

// kernel: forward.6
= control target key start
LH: loop header
LB: loop body
LE: loop exit
PB: predicated region body
PF: predicated region fallthrough
CT: control target
= control target key end

     0   :  { %v2912_v0 = vmov 0.0|0.0   ;;  %vm2913_vm0 = vmmov 0   ;;  %v2914_v8 = vmov 0.0   ;;  %vm47_vm1 = vcmask 523264   ;;  %s2915_s22 = smov 64   ;;  %s2916_s23 = smov 32   ;;  %s3624_s1 = inlined_call_operand.vmem [shape: f32[96,128], index: 1, kind: input, shape index: {}]   ;;  %s3625_s2 = inlined_call_operand.vmem [shape: f32[96,128], index: 2, kind: input, shape index: {}]   ;;  %s3626_s0 = inlined_call_operand.vmem [shape: f32[8,2,64], index: 0, kind: input, shape index: {}]   ;;  %s3627_s3 = inlined_call_operand.vmem [shape: f32[1,128], index: 3, kind: input, shape index: {}]   ;;  %s3628_s4 = inlined_call_operand.vmem [shape: f32[1,128], index: 4, kind: input, shape index: {}]   ;;  %s3629_s5 = inlined_call_operand.vmem [shape: f32[8,2,64], index: 5, kind: output, shape index: {}]  }
   0x1   :  { %2488 = vmatprep.subr.bf16.mxu0 %v2912_v0  ;;  %v20_v1 = vld [vmem:[%s3624_s1] sm:$0xff]  ;;  %v21_v2 = vld [vmem:[%s3624_s1 + $0x8] sm:$0xff]  ;;  %2506 = vmatprep.subr.bf16.mxu1 %v2912_v0  ;;  %v22_v6 = vld [vmem:[%s3624_s1 + $0x10] sm:$0xff]  ;;  %vm58_vm2 = vcmask 785408   ;;  %s2917_s24 = smov 96   ;;  %vm263_vm3 = vcmask 254976  }
   0x2   :  { %v32_v3 = vld [vmem:[%s3625_s2] sm:$0xff]  ;;  %v2959_v4 = vpack.c.bf16 %v21_v2, %v20_v1  ;;  %v33_v5 = vld [vmem:[%s3625_s2 + $0x8] sm:$0xff]  ;;  %v23_v7 = vld [vmem:[%s3624_s1 + $0x18] sm:$0xff]  ;;  %2080 = vmatprep.mubr.msk.f32.mxu0 %vm2913_vm0, %v2914_v8  ;;  %2107 = vmatprep.mubr.msk.f32.mxu1 %vm2913_vm0, %v2914_v8  ;;  %vm270_vm4 = vcmask 517376  }
   0x3   :  { %v2974_v9 = vpack.c.bf16 %v33_v5, %v32_v3  ;;  %v34_v10 = vld [vmem:[%s3625_s2 + $0x10] sm:$0xff]  ;;  %v35_v11 = vld [vmem:[%s3625_s2 + $0x18] sm:$0xff]  ;;  %v2983_v12 = vpack.c.bf16 %v23_v7, %v22_v6  ;;  %v24_v14 = vld [vmem:[%s3624_s1 + $0x20] sm:$0xff] }
   0x4   :  { %2490 = vmatpush3.bf16.msra.mxu0 %v2959_v4  ;;  %v2987_v13 = vpack.c.bf16 %v35_v11, %v34_v10  ;;  %v25_v15 = vld [vmem:[%s3624_s1 + $0x28] sm:$0xff]  ;;  %v36_v16 = vld [vmem:[%s3625_s2 + $0x20] sm:$0xff]  ;;  %v26_v20 = vld [vmem:[%s3624_s1 + $0x30] sm:$0xff] }
   0x5   :  { %2491 = vmatprep.subr.bf16.mxu0 %v2912_v0  ;;  %2508 = vmatpush3.bf16.msra.mxu1 %v2974_v9  ;;  %v37_v17 = vld [vmem:[%s3625_s2 + $0x28] sm:$0xff]  ;;  %v3003_v18 = vpack.c.bf16 %v25_v15, %v24_v14  ;;  %v27_v21 = vld [vmem:[%s3624_s1 + $0x38] sm:$0xff]  ;;  %v38_v22 = vld [vmem:[%s3625_s2 + $0x30] sm:$0xff] }
   0x6   :  { %2509 = vmatprep.subr.bf16.mxu1 %v2912_v0  ;;  %v3007_v19 = vpack.c.bf16 %v37_v17, %v36_v16  ;;  %v39_v23 = vld [vmem:[%s3625_s2 + $0x38] sm:$0xff]  ;;  %v3023_v24 = vpack.c.bf16 %v27_v21, %v26_v20  ;;  %v28_v26 = vld [vmem:[%s3624_s1 + $0x40] sm:$0xff]  ;;  %v29_v27 = vld [vmem:[%s3624_s1 + $0x48] sm:$0xff] }
   0x7   :  { %v3027_v25 = vpack.c.bf16 %v39_v23, %v38_v22  ;;  %v40_v28 = vld [vmem:[%s3625_s2 + $0x40] sm:$0xff]  ;;  %v41_v29 = vld [vmem:[%s3625_s2 + $0x48] sm:$0xff]  ;;  %v3043_v30 = vpack.c.bf16 %v29_v27, %v28_v26  ;;  %v30_v32 = vld [vmem:[%s3624_s1 + $0x50] sm:$0xff] }
   0x8   :  { %2493 = vmatpush3.bf16.msra.mxu0 %v2983_v12  ;;  %v3047_v31 = vpack.c.bf16 %v41_v29, %v40_v28  ;;  %v31_v33 = vld [vmem:[%s3624_s1 + $0x58] sm:$0xff]  ;;  %v42_v34 = vld [vmem:[%s3625_s2 + $0x50] sm:$0xff]  ;;  %v46_v37 = vld [vmem:[%s3626_s0] sm:$0x3] }
   0x9   :  { %2494 = vmatprep.subr.bf16.mxu0 %v2912_v0  ;;  %2511 = vmatpush3.bf16.msra.mxu1 %v2987_v13  ;;  %v43_v35 = vld [vmem:[%s3625_s2 + $0x58] sm:$0xff]  ;;  %v3063_v36 = vpack.c.bf16 %v31_v33, %v30_v32  ;;  %v1786_v39 = vld [vmem:[%s3626_s0 + $0xe] sm:$0x3]  ;;  %v48_v40 = vsel %vm47_vm1, %v46_v37, 0.0  ;;  %v3115_v42 = vld [vmem:[%s3627_s3] ss:$0 sm:$0xff] }
   0xa   :  { %2512 = vmatprep.subr.bf16.mxu1 %v2912_v0  ;;  %v3070_v38 = vpack.c.bf16 %v43_v35, %v42_v34  ;;  %v51_v41 = vsel %vm47_vm1, %v1786_v39, 0.0  ;;  %v3120_v43 = vld [vmem:[%s3628_s4] ss:$0 sm:$0xff]  ;;  %v1794_v20 = vld [vmem:[%s3626_s0 + $0x2] sm:$0x3] }
   0xb   :  { %v1795_v23 = vld [vmem:[%s3626_s0 + $0xc] sm:$0x3] }
   0xc   :  { %2496 = vmatpush3.bf16.msra.mxu0 %v3003_v18 }
   0xd   :  { %2497 = vmatprep.subr.bf16.mxu0 %v2912_v0  ;;  %2514 = vmatpush3.bf16.msra.mxu1 %v3007_v19 }
   0xe   :  { %2515 = vmatprep.subr.bf16.mxu1 %v2912_v0 }
  0x10   :  { %2499 = vmatpush3.bf16.msra.mxu0 %v3023_v24 }
  0x11   :  { %2500 = vmatprep.subr.bf16.mxu0 %v2912_v0  ;;  %2517 = vmatpush3.bf16.msra.mxu1 %v3027_v25 }
  0x12   :  { %2518 = vmatprep.subr.bf16.mxu1 %v2912_v0 }
  0x14   :  { %2502 = vmatpush3.bf16.msra.mxu0 %v3043_v30 }
  0x15   :  { %2503 = vmatprep.subr.bf16.mxu0 %v2912_v0  ;;  %2520 = vmatpush3.bf16.msra.mxu1 %v3047_v31 }
  0x16   :  { %2521 = vmatprep.subr.bf16.mxu1 %v2912_v0 }
  0x18   :  { %2505 = vmatpush3.bf16.msra.mxu0 %v3063_v36 }
  0x19   :  { %2523 = vmatpush3.bf16.msra.mxu1 %v3070_v38  ;;  %2524 = vmatprep.subr.bf16.mxu0 %v2912_v0 }
  0x1a   :  { %2542 = vmatprep.subr.bf16.mxu1 %v2912_v0 }
  0x1b   :  { %2081 = vmatmul.mubr.msk.f32.vlgmr.msra.gmra.mrb[0].mxu0 %vm58_vm2, %v48_v40 }
  0x1c   :  { %2108 = vmatmul.mubr.msk.f32.vlgmr.msra.gmra.mrb[0].mxu1 %vm58_vm2, %v51_v41  ;;  %2526 = vmatpush3.bf16.msra.mxu0 %v2959_v4 }
  0x1d   :  { %2527 = vmatprep.subr.bf16.mxu0 %v2912_v0  ;;  %2544 = vmatpush3.bf16.msra.mxu1 %v2974_v9 }
  0x1e   :  { %2545 = vmatprep.subr.bf16.mxu1 %v2912_v0  ;;  %2134 = vmatprep.mubr.msk.f32.mxu0 %vm2913_vm0, %v2914_v8 }
  0x1f   :  { %2161 = vmatprep.mubr.msk.f32.mxu1 %vm2913_vm0, %v2914_v8 }
  0x20   :  { %2529 = vmatpush3.bf16.msra.mxu0 %v2983_v12 }
  0x21   :  { %2530 = vmatprep.subr.bf16.mxu0 %v2912_v0  ;;  %2547 = vmatpush3.bf16.msra.mxu1 %v2987_v13 }
  0x22   :  { %2548 = vmatprep.subr.bf16.mxu1 %v2912_v0 }
  0x24   :  { %2532 = vmatpush3.bf16.msra.mxu0 %v3003_v18 }
  0x25   :  { %2533 = vmatprep.subr.bf16.mxu0 %v2912_v0  ;;  %2550 = vmatpush3.bf16.msra.mxu1 %v3007_v19 }
  0x26   :  { %2551 = vmatprep.subr.bf16.mxu1 %v2912_v0 }
  0x28   :  { %2535 = vmatpush3.bf16.msra.mxu0 %v3023_v24 }
  0x29   :  { %2536 = vmatprep.subr.bf16.mxu0 %v2912_v0  ;;  %2553 = vmatpush3.bf16.msra.mxu1 %v3027_v25 }
  0x2a   :  { %2554 = vmatprep.subr.bf16.mxu1 %v2912_v0 }
  0x2c   :  { %2538 = vmatpush3.bf16.msra.mxu0 %v3043_v30 }
  0x2d   :  { %2539 = vmatprep.subr.bf16.mxu0 %v2912_v0  ;;  %2556 = vmatpush3.bf16.msra.mxu1 %v3047_v31 }
  0x2e   :  { %2557 = vmatprep.subr.bf16.mxu1 %v2912_v0 }
  0x30   :  { %2541 = vmatpush3.bf16.msra.mxu0 %v3063_v36 }
  0x31   :  { %2559 = vmatpush3.bf16.msra.mxu1 %v3070_v38  ;;  %2560 = vmatprep.subr.bf16.mxu0 %v2912_v0 }
  0x32   :  { %2578 = vmatprep.subr.bf16.mxu1 %v2912_v0 }
  0xee   :  { %v128_v44 = vpop.f32.mrb[0].mxu0 }
  0xef   :  { %v129_v45 = vadd.f32 %v3115_v42, %v128_v44  ;;  %v2082_v46 = vpop.f32.mrb[1].mxu0  ;;  %v207_v47 = vpop.f32.mrb[0].mxu1 }
  0xf0   :  { %v208_v48 = vadd.f32 %v3120_v43, %v207_v47  ;;  %v2109_v49 = vpop.f32.mrb[1].mxu1 }
  0xf1   :  { %2782 = vtanh.f32 %v129_v45  ;;  %v1791_v52 = vmul.f32 -1.442695, %v129_v45 }
  0xf2   :  { %2784 = vtanh.f32 %v208_v48  ;;  %v1792_v53 = vmul.f32 -1.442695, %v208_v48 }
  0xf3   :  { %2786 = vpow2.f32 %v1791_v52 }
  0xf4   :  { %2788 = vpow2.f32 %v1792_v53 }
  0xfb   :  { %v2783_v50 = vpop.eup %2782 }
  0xfc   :  { %220 = vrot.lane.b32.xlu0 %v2783_v50, %s2915_s22  ;;  %v2785_v51 = vpop.eup %2784 }
  0xfd   :  { %v2787_v54 = vpop.eup %2786 }
  0xfe   :  { %v214_v55 = vadd.f32 1.0, %v2787_v54  ;;  %v2789_v56 = vpop.eup %2788 }
  0xff   :  { %v238_v57 = vadd.f32 1.0, %v2789_v56 }
 0x100   :  { %244 = vrot.lane.b32.xlu0 %v2785_v51, %s2915_s22  ;;  %2790 = vrcp.f32 %v214_v55 }
 0x101   :  { %2792 = vrcp.f32 %v238_v57 }
 0x10a   :  { %v2791_v58 = vpop.eup %2790 }
 0x10b   :  { %v2793_v61 = vpop.eup %2792  ;;  %v218_v1 = vmul.f32 0.0, %v2791_v58 }
 0x10c   :  { %v242_v5 = vmul.f32 0.0, %v2793_v61 }
 0x16e   :  { %v221_v59 = vpop.permute.xlu0 %220 }
 0x16f   :  { %v223_v60 = vmul.f32 %v2791_v58, %v221_v59 }
 0x171   :  { %225 = vrot.lane.b32.xlu1 %v223_v60, %s2916_s23 }
 0x172   :  { %v245_v62 = vpop.permute.xlu0 %244 }
 0x173   :  { %v247_v63 = vmul.f32 %v2793_v61, %v245_v62 }
 0x175   :  { %249 = vrot.lane.b32.xlu1 %v247_v63, %s2916_s23 }
 0x1e3   :  { %v226_v2 = vpop.permute.xlu1 %225 }
 0x1e4   :  { %v3128_v3 = vadd.f32 %v226_v2, %v218_v1 }
 0x1e6   :  { %2794 = vtanh.f32 %v3128_v3 }
 0x1e7   :  { %v250_v6 = vpop.permute.xlu1 %249 }
 0x1e8   :  { %v3131_v7 = vadd.f32 %v250_v6, %v242_v5 }
 0x1ea   :  { %2796 = vtanh.f32 %v3131_v7 }
 0x1f0   :  { %v2795_v10 = vpop.eup %2794 }
 0x1f1   :  { %231 = vrot.lane.b32.xlu0 %v2795_v10, %s2915_s22 }
 0x1f4   :  { %v2797_v11 = vpop.eup %2796 }
 0x1f5   :  { %255 = vrot.lane.b32.xlu1 %v2797_v11, %s2915_s22 }
 0x263   :  { %v232_v14 = vpop.permute.xlu0 %231 }
 0x264   :  { %v3136_v15 = vmul.f32 %v2791_v58, %v232_v14 }
 0x266   :  { %274 = vrot.lane.b32.xlu0 %v3136_v15, %s2917_s24 }
 0x267   :  { %v256_v16 = vpop.permute.xlu1 %255 }
 0x268   :  { %v3140_v17 = vmul.f32 %v2793_v61, %v256_v16 }
 0x26a   :  { %280 = vrot.lane.b32.xlu1 %v3140_v17, %s2917_s24 }
 0x2d8   :  { %v275_v21 = vpop.permute.xlu0 %274 }
 0x2d9   :  { %v277_v22 = vsel %vm47_vm1, %v1794_v20, %v275_v21 }
 0x2da   :  { %2135 = vmatmul.mubr.msk.f32.vlgmr.msra.gmra.mrb[2].mxu0 %vm58_vm2, %v277_v22 }
 0x2db   :  { %2562 = vmatpush3.bf16.msra.mxu0 %v2959_v4  ;;  %2188 = vmatprep.mubr.msk.f32.mxu0 %vm2913_vm0, %v2914_v8 }
 0x2dc   :  { %v281_v26 = vpop.permute.xlu1 %280  ;;  %2563 = vmatprep.subr.bf16.mxu0 %v2912_v0 }
 0x2dd   :  { %v283_v27 = vsel %vm47_vm1, %v1795_v23, %v281_v26 }
 0x2de   :  { %2162 = vmatmul.mubr.msk.f32.vlgmr.msra.gmra.mrb[2].mxu1 %vm58_vm2, %v283_v27 }
 0x2df   :  { %2565 = vmatpush3.bf16.msra.mxu0 %v2983_v12  ;;  %2580 = vmatpush3.bf16.msra.mxu1 %v2974_v9 }
 0x2e0   :  { %2566 = vmatprep.subr.bf16.mxu0 %v2912_v0  ;;  %2581 = vmatprep.subr.bf16.mxu1 %v2912_v0 }
 0x2e1   :  { %2215 = vmatprep.mubr.msk.f32.mxu1 %vm2913_vm0, %v2914_v8 }
 0x2e3   :  { %2568 = vmatpush3.bf16.msra.mxu0 %v3003_v18  ;;  %2583 = vmatpush3.bf16.msra.mxu1 %v2987_v13 }
 0x2e4   :  { %2569 = vmatprep.subr.bf16.mxu0 %v2912_v0  ;;  %2584 = vmatprep.subr.bf16.mxu1 %v2912_v0 }
 0x2e7   :  { %2571 = vmatpush3.bf16.msra.mxu0 %v3023_v24  ;;  %2586 = vmatpush3.bf16.msra.mxu1 %v3007_v19 }
 0x2e8   :  { %2572 = vmatprep.subr.bf16.mxu0 %v2912_v0  ;;  %2587 = vmatprep.subr.bf16.mxu1 %v2912_v0 }
 0x2eb   :  { %2574 = vmatpush3.bf16.msra.mxu0 %v3043_v30  ;;  %2589 = vmatpush3.bf16.msra.mxu1 %v3027_v25 }
 0x2ec   :  { %2575 = vmatprep.subr.bf16.mxu0 %v2912_v0  ;;  %2590 = vmatprep.subr.bf16.mxu1 %v2912_v0 }
 0x2ef   :  { %2577 = vmatpush3.bf16.msra.mxu0 %v3063_v36  ;;  %2592 = vmatpush3.bf16.msra.mxu1 %v3047_v31 }
 0x2f0   :  { %2593 = vmatprep.subr.bf16.mxu1 %v2912_v0  ;;  %2596 = vmatprep.subr.bf16.mxu0 %v2912_v0 }
 0x2f3   :  { %2595 = vmatpush3.bf16.msra.mxu1 %v3070_v38 }
 0x2f4   :  { %2614 = vmatprep.subr.bf16.mxu1 %v2912_v0 }
 0x3ad   :  { %v353_v28 = vpop.f32.mrb[2].mxu0 }
 0x3ae   :  { %v354_v29 = vadd.f32 %v3115_v42, %v353_v28  ;;  %v2136_v32 = vpop.f32.mrb[3].mxu0 }
 0x3b0   :  { %2798 = vtanh.f32 %v354_v29  ;;  %v1798_v40 = vmul.f32 -1.442695, %v354_v29 }
 0x3b1   :  { %v426_v33 = vpop.f32.mrb[2].mxu1 }
 0x3b2   :  { %v427_v34 = vadd.f32 %v3120_v43, %v426_v33  ;;  %v2163_v35 = vpop.f32.mrb[3].mxu1 }
 0x3b4   :  { %2800 = vtanh.f32 %v427_v34  ;;  %v1799_v41 = vmul.f32 -1.442695, %v427_v34 }
 0x3b5   :  { %2802 = vpow2.f32 %v1798_v40 }
 0x3b6   :  { %2804 = vpow2.f32 %v1799_v41 }
 0x3ba   :  { %v2799_v37 = vpop.eup %2798 }
 0x3bb   :  { %439 = vrot.lane.b32.xlu0 %v2799_v37, %s2915_s22 }
 0x3be   :  { %v2801_v39 = vpop.eup %2800 }
 0x3bf   :  { %463 = vrot.lane.b32.xlu1 %v2801_v39, %s2915_s22  ;;  %v2803_v44 = vpop.eup %2802 }
 0x3c0   :  { %v433_v45 = vadd.f32 1.0, %v2803_v44  ;;  %v2805_v46 = vpop.eup %2804 }
 0x3c1   :  { %v457_v47 = vadd.f32 1.0, %v2805_v46 }
 0x3c2   :  { %2806 = vrcp.f32 %v433_v45 }
 0x3c3   :  { %2808 = vrcp.f32 %v457_v47 }
 0x3cc   :  { %v2807_v48 = vpop.eup %2806 }
 0x3cd   :  { %v2809_v51 = vpop.eup %2808  ;;  %v437_v54 = vmul.f32 %v2807_v48, %v3128_v3  ;;  %v1802_v3 = vld [vmem:[%s3626_s0 + $0x4] sm:$0x3] }
 0x3ce   :  { %v461_v57 = vmul.f32 %v2809_v51, %v3131_v7  ;;  %v1803_v7 = vld [vmem:[%s3626_s0 + $0xa] sm:$0x3] }
 0x42d   :  { %v440_v49 = vpop.permute.xlu0 %439 }
 0x42e   :  { %v442_v50 = vmul.f32 %v2807_v48, %v440_v49 }
 0x430   :  { %444 = vrot.lane.b32.xlu0 %v442_v50, %s2916_s23 }
 0x431   :  { %v464_v52 = vpop.permute.xlu1 %463 }
 0x432   :  { %v466_v53 = vmul.f32 %v2809_v51, %v464_v52 }
 0x434   :  { %468 = vrot.lane.b32.xlu1 %v466_v53, %s2916_s23 }
 0x4a2   :  { %v445_v55 = vpop.permute.xlu0 %444 }
 0x4a3   :  { %v3189_v56 = vadd.f32 %v445_v55, %v437_v54 }
 0x4a5   :  { %2810 = vtanh.f32 %v3189_v56 }
 0x4a6   :  { %v469_v58 = vpop.permute.xlu1 %468 }
 0x4a7   :  { %v3193_v59 = vadd.f32 %v469_v58, %v461_v57  ;;  %v1810_v58 = vld [vmem:[%s3626_s0 + $0x6] sm:$0x3] }
 0x4a9   :  { %2812 = vtanh.f32 %v3193_v59 }
 0x4af   :  { %v2811_v60 = vpop.eup %2810 }
 0x4b0   :  { %450 = vrot.lane.b32.xlu0 %v2811_v60, %s2915_s22 }
 0x4b3   :  { %v2813_v61 = vpop.eup %2812 }
 0x4b4   :  { %474 = vrot.lane.b32.xlu1 %v2813_v61, %s2915_s22  ;;  %v1811_v61 = vld [vmem:[%s3626_s0 + $0x8] sm:$0x3] }
 0x522   :  { %v451_v62 = vpop.permute.xlu0 %450 }
 0x523   :  { %v3198_v63 = vmul.f32 %v2807_v48, %v451_v62 }
 0x525   :  { %492 = vrot.lane.b32.xlu0 %v3198_v63, %s2917_s24 }
 0x526   :  { %v475_v1 = vpop.permute.xlu1 %474 }
 0x527   :  { %v3202_v2 = vmul.f32 %v2809_v51, %v475_v1 }
 0x529   :  { %498 = vrot.lane.b32.xlu1 %v3202_v2, %s2917_s24 }
 0x597   :  { %v493_v5 = vpop.permute.xlu0 %492 }
 0x598   :  { %v495_v6 = vsel %vm47_vm1, %v1802_v3, %v493_v5 }
 0x599   :  { %2189 = vmatmul.mubr.msk.f32.vlgmr.msra.gmra.mrb[4].mxu0 %vm58_vm2, %v495_v6 }
 0x59a   :  { %2598 = vmatpush3.bf16.msra.mxu0 %v2959_v4  ;;  %2242 = vmatprep.mubr.msk.f32.mxu0 %vm2913_vm0, %v2914_v8 }
 0x59b   :  { %v499_v10 = vpop.permute.xlu1 %498  ;;  %2599 = vmatprep.subr.bf16.mxu0 %v2912_v0 }
 0x59c   :  { %v501_v11 = vsel %vm47_vm1, %v1803_v7, %v499_v10 }
 0x59d   :  { %2216 = vmatmul.mubr.msk.f32.vlgmr.msra.gmra.mrb[4].mxu1 %vm58_vm2, %v501_v11 }
 0x59e   :  { %2601 = vmatpush3.bf16.msra.mxu0 %v2983_v12  ;;  %2616 = vmatpush3.bf16.msra.mxu1 %v2974_v9 }
 0x59f   :  { %2602 = vmatprep.subr.bf16.mxu0 %v2912_v0  ;;  %2617 = vmatprep.subr.bf16.mxu1 %v2912_v0 }
 0x5a0   :  { %2269 = vmatprep.mubr.msk.f32.mxu1 %vm2913_vm0, %v2914_v8 }
 0x5a2   :  { %2604 = vmatpush3.bf16.msra.mxu0 %v3003_v18  ;;  %2619 = vmatpush3.bf16.msra.mxu1 %v2987_v13 }
 0x5a3   :  { %2605 = vmatprep.subr.bf16.mxu0 %v2912_v0  ;;  %2620 = vmatprep.subr.bf16.mxu1 %v2912_v0 }
 0x5a6   :  { %2607 = vmatpush3.bf16.msra.mxu0 %v3023_v24  ;;  %2622 = vmatpush3.bf16.msra.mxu1 %v3007_v19 }
 0x5a7   :  { %2608 = vmatprep.subr.bf16.mxu0 %v2912_v0  ;;  %2623 = vmatprep.subr.bf16.mxu1 %v2912_v0 }
 0x5aa   :  { %2610 = vmatpush3.bf16.msra.mxu0 %v3043_v30  ;;  %2625 = vmatpush3.bf16.msra.mxu1 %v3027_v25 }
 0x5ab   :  { %2611 = vmatprep.subr.bf16.mxu0 %v2912_v0  ;;  %2626 = vmatprep.subr.bf16.mxu1 %v2912_v0 }
 0x5ae   :  { %2613 = vmatpush3.bf16.msra.mxu0 %v3063_v36  ;;  %2628 = vmatpush3.bf16.msra.mxu1 %v3047_v31 }
 0x5af   :  { %2629 = vmatprep.subr.bf16.mxu1 %v2912_v0  ;;  %2632 = vmatprep.subr.bf16.mxu0 %v2912_v0 }
 0x5b2   :  { %2631 = vmatpush3.bf16.msra.mxu1 %v3070_v38 }
 0x5b3   :  { %2650 = vmatprep.subr.bf16.mxu1 %v2912_v0 }
 0x66c   :  { %v571_v14 = vpop.f32.mrb[4].mxu0 }
 0x66d   :  { %v572_v16 = vadd.f32 %v3115_v42, %v571_v14  ;;  %v2190_v20 = vpop.f32.mrb[5].mxu0 }
 0x66f   :  { %2814 = vtanh.f32 %v572_v16  ;;  %v1806_v28 = vmul.f32 -1.442695, %v572_v16 }
 0x670   :  { %v644_v21 = vpop.f32.mrb[4].mxu1 }
 0x671   :  { %v645_v22 = vadd.f32 %v3120_v43, %v644_v21  ;;  %v2217_v23 = vpop.f32.mrb[5].mxu1 }
 0x673   :  { %2816 = vtanh.f32 %v645_v22  ;;  %v1807_v29 = vmul.f32 -1.442695, %v645_v22 }
 0x674   :  { %2818 = vpow2.f32 %v1806_v28 }
 0x675   :  { %2820 = vpow2.f32 %v1807_v29 }
 0x679   :  { %v2815_v26 = vpop.eup %2814 }
 0x67a   :  { %657 = vrot.lane.b32.xlu0 %v2815_v26, %s2915_s22 }
 0x67d   :  { %v2817_v27 = vpop.eup %2816 }
 0x67e   :  { %681 = vrot.lane.b32.xlu1 %v2817_v27, %s2915_s22  ;;  %v2819_v32 = vpop.eup %2818 }
 0x67f   :  { %v651_v33 = vadd.f32 1.0, %v2819_v32  ;;  %v2821_v34 = vpop.eup %2820 }
 0x680   :  { %v675_v35 = vadd.f32 1.0, %v2821_v34 }
 0x681   :  { %2822 = vrcp.f32 %v651_v33 }
 0x682   :  { %2824 = vrcp.f32 %v675_v35 }
 0x68b   :  { %v2823_v37 = vpop.eup %2822 }
 0x68c   :  { %v2825_v41 = vpop.eup %2824  ;;  %v655_v46 = vmul.f32 %v2823_v37, %v3189_v56 }
 0x68d   :  { %v679_v49 = vmul.f32 %v2825_v41, %v3193_v59 }
 0x6ec   :  { %v658_v39 = vpop.permute.xlu0 %657 }
 0x6ed   :  { %v660_v40 = vmul.f32 %v2823_v37, %v658_v39 }
 0x6ef   :  { %662 = vrot.lane.b32.xlu0 %v660_v40, %s2916_s23 }
 0x6f0   :  { %v682_v44 = vpop.permute.xlu1 %681 }
 0x6f1   :  { %v684_v45 = vmul.f32 %v2825_v41, %v682_v44 }
 0x6f3   :  { %686 = vrot.lane.b32.xlu1 %v684_v45, %s2916_s23 }
 0x761   :  { %v663_v47 = vpop.permute.xlu0 %662 }
 0x762   :  { %v3251_v48 = vadd.f32 %v663_v47, %v655_v46 }
 0x764   :  { %2826 = vtanh.f32 %v3251_v48 }
 0x765   :  { %v687_v50 = vpop.permute.xlu1 %686 }
 0x766   :  { %v3255_v51 = vadd.f32 %v687_v50, %v679_v49 }
 0x768   :  { %2828 = vtanh.f32 %v3255_v51 }
 0x76e   :  { %v2827_v52 = vpop.eup %2826 }
 0x76f   :  { %668 = vrot.lane.b32.xlu0 %v2827_v52, %s2915_s22 }
 0x772   :  { %v2829_v53 = vpop.eup %2828 }
 0x773   :  { %692 = vrot.lane.b32.xlu1 %v2829_v53, %s2915_s22 }
 0x7e1   :  { %v669_v54 = vpop.permute.xlu0 %668 }
 0x7e2   :  { %v3260_v55 = vmul.f32 %v2823_v37, %v669_v54 }
 0x7e4   :  { %710 = vrot.lane.b32.xlu0 %v3260_v55, %s2917_s24 }
 0x7e5   :  { %v693_v56 = vpop.permute.xlu1 %692 }
 0x7e6   :  { %v3264_v57 = vmul.f32 %v2825_v41, %v693_v56  ;;  %v1819_v56 = vld [vmem:[%s3626_s0 + $0x6] sm:$0x3] }
 0x7e8   :  { %716 = vrot.lane.b32.xlu1 %v3264_v57, %s2917_s24 }
 0x856   :  { %v711_v59 = vpop.permute.xlu0 %710 }
 0x857   :  { %v713_v60 = vsel %vm47_vm1, %v1810_v58, %v711_v59 }
 0x858   :  { %2243 = vmatmul.mubr.msk.f32.vlgmr.msra.gmra.mrb[6].mxu0 %vm58_vm2, %v713_v60 }
 0x859   :  { %2634 = vmatpush3.bf16.msra.mxu0 %v2959_v4  ;;  %2296 = vmatprep.mubr.msk.f32.mxu0 %vm2913_vm0, %v2914_v8 }
 0x85a   :  { %v717_v62 = vpop.permute.xlu1 %716  ;;  %2635 = vmatprep.subr.bf16.mxu0 %v2912_v0 }
 0x85b   :  { %v719_v1 = vsel %vm47_vm1, %v1811_v61, %v717_v62 }
 0x85c   :  { %2270 = vmatmul.mubr.msk.f32.vlgmr.msra.gmra.mrb[6].mxu1 %vm58_vm2, %v719_v1 }
 0x85d   :  { %2637 = vmatpush3.bf16.msra.mxu0 %v2983_v12  ;;  %2652 = vmatpush3.bf16.msra.mxu1 %v2974_v9 }
 0x85e   :  { %2638 = vmatprep.subr.bf16.mxu0 %v2912_v0  ;;  %2653 = vmatprep.subr.bf16.mxu1 %v2912_v0 }
 0x85f   :  { %2323 = vmatprep.mubr.msk.f32.mxu1 %vm2913_vm0, %v2914_v8 }
 0x861   :  { %2640 = vmatpush3.bf16.msra.mxu0 %v3003_v18  ;;  %2655 = vmatpush3.bf16.msra.mxu1 %v2987_v13 }
 0x862   :  { %2641 = vmatprep.subr.bf16.mxu0 %v2912_v0  ;;  %2656 = vmatprep.subr.bf16.mxu1 %v2912_v0 }
 0x865   :  { %2643 = vmatpush3.bf16.msra.mxu0 %v3023_v24  ;;  %2658 = vmatpush3.bf16.msra.mxu1 %v3007_v19 }
 0x866   :  { %2644 = vmatprep.subr.bf16.mxu0 %v2912_v0  ;;  %2659 = vmatprep.subr.bf16.mxu1 %v2912_v0 }
 0x869   :  { %2646 = vmatpush3.bf16.msra.mxu0 %v3043_v30  ;;  %2661 = vmatpush3.bf16.msra.mxu1 %v3027_v25 }
 0x86a   :  { %2647 = vmatprep.subr.bf16.mxu0 %v2912_v0  ;;  %2662 = vmatprep.subr.bf16.mxu1 %v2912_v0 }
 0x86d   :  { %2649 = vmatpush3.bf16.msra.mxu0 %v3063_v36  ;;  %2664 = vmatpush3.bf16.msra.mxu1 %v3047_v31 }
 0x86e   :  { %2665 = vmatprep.subr.bf16.mxu1 %v2912_v0  ;;  %2668 = vmatprep.subr.bf16.mxu0 %v2912_v0 }
 0x871   :  { %2667 = vmatpush3.bf16.msra.mxu1 %v3070_v38 }
 0x872   :  { %2686 = vmatprep.subr.bf16.mxu1 %v2912_v0 }
 0x92b   :  { %v789_v3 = vpop.f32.mrb[6].mxu0 }
 0x92c   :  { %v790_v5 = vadd.f32 %v3115_v42, %v789_v3  ;;  %v2244_v6 = vpop.f32.mrb[7].mxu0 }
 0x92e   :  { %2830 = vtanh.f32 %v790_v5  ;;  %v1814_v20 = vmul.f32 -1.442695, %v790_v5 }
 0x92f   :  { %v862_v7 = vpop.f32.mrb[6].mxu1 }
 0x930   :  { %v863_v10 = vadd.f32 %v3120_v43, %v862_v7  ;;  %v2271_v11 = vpop.f32.mrb[7].mxu1 }
 0x932   :  { %2832 = vtanh.f32 %v863_v10  ;;  %v1815_v21 = vmul.f32 -1.442695, %v863_v10 }
 0x933   :  { %2834 = vpow2.f32 %v1814_v20 }
 0x934   :  { %2836 = vpow2.f32 %v1815_v21 }
 0x938   :  { %v2831_v14 = vpop.eup %2830 }
 0x939   :  { %875 = vrot.lane.b32.xlu0 %v2831_v14, %s2915_s22 }
 0x93c   :  { %v2833_v16 = vpop.eup %2832 }
 0x93d   :  { %899 = vrot.lane.b32.xlu1 %v2833_v16, %s2915_s22  ;;  %v2835_v22 = vpop.eup %2834 }
 0x93e   :  { %v869_v23 = vadd.f32 1.0, %v2835_v22  ;;  %v2837_v26 = vpop.eup %2836 }
 0x93f   :  { %v893_v27 = vadd.f32 1.0, %v2837_v26 }
 0x940   :  { %2838 = vrcp.f32 %v869_v23 }
 0x941   :  { %2840 = vrcp.f32 %v893_v27 }
 0x94a   :  { %v2839_v28 = vpop.eup %2838 }
 0x94b   :  { %v2841_v33 = vpop.eup %2840  ;;  %v873_v37 = vmul.f32 %v2839_v28, %v3251_v48 }
 0x94c   :  { %v897_v41 = vmul.f32 %v2841_v33, %v3255_v51  ;;  %v1818_v51 = vld [vmem:[%s3626_s0 + $0x8] sm:$0x3] }
 0x9ab   :  { %v876_v29 = vpop.permute.xlu0 %875 }
 0x9ac   :  { %v878_v32 = vmul.f32 %v2839_v28, %v876_v29 }
 0x9ae   :  { %880 = vrot.lane.b32.xlu0 %v878_v32, %s2916_s23 }
 0x9af   :  { %v900_v34 = vpop.permute.xlu1 %899 }
 0x9b0   :  { %v902_v35 = vmul.f32 %v2841_v33, %v900_v34 }
 0x9b2   :  { %904 = vrot.lane.b32.xlu1 %v902_v35, %s2916_s23 }
 0xa20   :  { %v881_v39 = vpop.permute.xlu0 %880 }
 0xa21   :  { %v3313_v40 = vadd.f32 %v881_v39, %v873_v37 }
 0xa23   :  { %2842 = vtanh.f32 %v3313_v40 }
 0xa24   :  { %v905_v44 = vpop.permute.xlu1 %904 }
 0xa25   :  { %v3317_v45 = vadd.f32 %v905_v44, %v897_v41 }
 0xa27   :  { %2844 = vtanh.f32 %v3317_v45 }
 0xa2d   :  { %v2843_v46 = vpop.eup %2842 }
 0xa2e   :  { %886 = vrot.lane.b32.xlu0 %v2843_v46, %s2915_s22 }
 0xa31   :  { %v2845_v47 = vpop.eup %2844 }
 0xa32   :  { %910 = vrot.lane.b32.xlu1 %v2845_v47, %s2915_s22 }
 0xaa0   :  { %v887_v49 = vpop.permute.xlu0 %886 }
 0xaa1   :  { %v3322_v48 = vmul.f32 %v2839_v28, %v887_v49 }
 0xaa3   :  { %927 = vrot.lane.b32.xlu0 %v3322_v48, %s2917_s24 }
 0xaa4   :  { %v911_v50 = vpop.permute.xlu1 %910 }
 0xaa5   :  { %v3326_v52 = vmul.f32 %v2841_v33, %v911_v50 }
 0xaa7   :  { %932 = vrot.lane.b32.xlu1 %v3326_v52, %s2917_s24 }
 0xb15   :  { %v928_v53 = vpop.permute.xlu0 %927 }
 0xb16   :  { %v930_v54 = vsel %vm47_vm1, %v1818_v51, %v928_v53  ;;  %v1827_v53 = vld [vmem:[%s3626_s0 + $0x4] sm:$0x3] }
 0xb17   :  { %2297 = vmatmul.mubr.msk.f32.vlgmr.msra.gmra.mrb[8].mxu0 %vm58_vm2, %v930_v54 }
 0xb18   :  { %2670 = vmatpush3.bf16.msra.mxu0 %v2959_v4  ;;  %2350 = vmatprep.mubr.msk.f32.mxu0 %vm2913_vm0, %v2914_v8 }
 0xb19   :  { %v933_v58 = vpop.permute.xlu1 %932  ;;  %2671 = vmatprep.subr.bf16.mxu0 %v2912_v0 }
 0xb1a   :  { %v935_v59 = vsel %vm47_vm1, %v1819_v56, %v933_v58 }
 0xb1b   :  { %2324 = vmatmul.mubr.msk.f32.vlgmr.msra.gmra.mrb[8].mxu1 %vm58_vm2, %v935_v59 }
 0xb1c   :  { %2673 = vmatpush3.bf16.msra.mxu0 %v2983_v12  ;;  %2688 = vmatpush3.bf16.msra.mxu1 %v2974_v9 }
 0xb1d   :  { %2674 = vmatprep.subr.bf16.mxu0 %v2912_v0  ;;  %2689 = vmatprep.subr.bf16.mxu1 %v2912_v0 }
 0xb1e   :  { %2377 = vmatprep.mubr.msk.f32.mxu1 %vm2913_vm0, %v2914_v8 }
 0xb20   :  { %2676 = vmatpush3.bf16.msra.mxu0 %v3003_v18  ;;  %2691 = vmatpush3.bf16.msra.mxu1 %v2987_v13 }
 0xb21   :  { %2677 = vmatprep.subr.bf16.mxu0 %v2912_v0  ;;  %2692 = vmatprep.subr.bf16.mxu1 %v2912_v0 }
 0xb24   :  { %2679 = vmatpush3.bf16.msra.mxu0 %v3023_v24  ;;  %2694 = vmatpush3.bf16.msra.mxu1 %v3007_v19 }
 0xb25   :  { %2680 = vmatprep.subr.bf16.mxu0 %v2912_v0  ;;  %2695 = vmatprep.subr.bf16.mxu1 %v2912_v0 }
 0xb28   :  { %2682 = vmatpush3.bf16.msra.mxu0 %v3043_v30  ;;  %2697 = vmatpush3.bf16.msra.mxu1 %v3027_v25 }
 0xb29   :  { %2683 = vmatprep.subr.bf16.mxu0 %v2912_v0  ;;  %2698 = vmatprep.subr.bf16.mxu1 %v2912_v0 }
 0xb2c   :  { %2685 = vmatpush3.bf16.msra.mxu0 %v3063_v36  ;;  %2700 = vmatpush3.bf16.msra.mxu1 %v3047_v31 }
 0xb2d   :  { %2701 = vmatprep.subr.bf16.mxu1 %v2912_v0  ;;  %2704 = vmatprep.subr.bf16.mxu0 %v2912_v0 }
 0xb30   :  { %2703 = vmatpush3.bf16.msra.mxu1 %v3070_v38 }
 0xb31   :  { %2722 = vmatprep.subr.bf16.mxu1 %v2912_v0 }
 0xbea   :  { %v1005_v60 = vpop.f32.mrb[8].mxu0 }
 0xbeb   :  { %v1006_v61 = vadd.f32 %v3115_v42, %v1005_v60  ;;  %v2298_v62 = vpop.f32.mrb[9].mxu0 }
 0xbed   :  { %2846 = vtanh.f32 %v1006_v61  ;;  %v1822_v10 = vmul.f32 -1.442695, %v1006_v61 }
 0xbee   :  { %v1078_v1 = vpop.f32.mrb[8].mxu1 }
 0xbef   :  { %v1079_v3 = vadd.f32 %v3120_v43, %v1078_v1  ;;  %v2325_v5 = vpop.f32.mrb[9].mxu1 }
 0xbf1   :  { %2848 = vtanh.f32 %v1079_v3  ;;  %v1823_v11 = vmul.f32 -1.442695, %v1079_v3 }
 0xbf2   :  { %2850 = vpow2.f32 %v1822_v10 }
 0xbf3   :  { %2852 = vpow2.f32 %v1823_v11 }
 0xbf7   :  { %v2847_v6 = vpop.eup %2846 }
 0xbf8   :  { %1091 = vrot.lane.b32.xlu0 %v2847_v6, %s2915_s22 }
 0xbfb   :  { %v2849_v7 = vpop.eup %2848 }
 0xbfc   :  { %1115 = vrot.lane.b32.xlu1 %v2849_v7, %s2915_s22  ;;  %v2851_v14 = vpop.eup %2850 }
 0xbfd   :  { %v1085_v16 = vadd.f32 1.0, %v2851_v14  ;;  %v2853_v20 = vpop.eup %2852 }
 0xbfe   :  { %v1109_v21 = vadd.f32 1.0, %v2853_v20 }
 0xbff   :  { %2854 = vrcp.f32 %v1085_v16 }
 0xc00   :  { %2856 = vrcp.f32 %v1109_v21 }
 0xc09   :  { %v2855_v22 = vpop.eup %2854 }
 0xc0a   :  { %v2857_v27 = vpop.eup %2856  ;;  %v1089_v32 = vmul.f32 %v2855_v22, %v3313_v40 }
 0xc0b   :  { %v1113_v35 = vmul.f32 %v2857_v27, %v3317_v45  ;;  %v1826_v45 = vld [vmem:[%s3626_s0 + $0xa] sm:$0x3] }
 0xc6a   :  { %v1092_v23 = vpop.permute.xlu0 %1091 }
 0xc6b   :  { %v1094_v26 = vmul.f32 %v2855_v22, %v1092_v23 }
 0xc6d   :  { %1096 = vrot.lane.b32.xlu0 %v1094_v26, %s2916_s23 }
 0xc6e   :  { %v1116_v28 = vpop.permute.xlu1 %1115 }
 0xc6f   :  { %v1118_v29 = vmul.f32 %v2857_v27, %v1116_v28 }
 0xc71   :  { %1120 = vrot.lane.b32.xlu1 %v1118_v29, %s2916_s23 }
 0xcdf   :  { %v1097_v33 = vpop.permute.xlu0 %1096 }
 0xce0   :  { %v3375_v34 = vadd.f32 %v1097_v33, %v1089_v32 }
 0xce2   :  { %2858 = vtanh.f32 %v3375_v34 }
 0xce3   :  { %v1121_v37 = vpop.permute.xlu1 %1120 }
 0xce4   :  { %v3379_v39 = vadd.f32 %v1121_v37, %v1113_v35 }
 0xce6   :  { %2860 = vtanh.f32 %v3379_v39 }
 0xcec   :  { %v2859_v41 = vpop.eup %2858 }
 0xced   :  { %1102 = vrot.lane.b32.xlu0 %v2859_v41, %s2915_s22 }
 0xcf0   :  { %v2861_v44 = vpop.eup %2860 }
 0xcf1   :  { %1126 = vrot.lane.b32.xlu1 %v2861_v44, %s2915_s22 }
 0xd5f   :  { %v1103_v46 = vpop.permute.xlu0 %1102 }
 0xd60   :  { %v3384_v40 = vmul.f32 %v2855_v22, %v1103_v46 }
 0xd62   :  { %1141 = vrot.lane.b32.xlu0 %v3384_v40, %s2917_s24 }
 0xd63   :  { %v1127_v47 = vpop.permute.xlu1 %1126 }
 0xd64   :  { %v3388_v49 = vmul.f32 %v2857_v27, %v1127_v47 }
 0xd66   :  { %1146 = vrot.lane.b32.xlu1 %v3388_v49, %s2917_s24 }
 0xdd4   :  { %v1142_v50 = vpop.permute.xlu0 %1141 }
 0xdd5   :  { %v1144_v51 = vsel %vm47_vm1, %v1826_v45, %v1142_v50 }
 0xdd6   :  { %2351 = vmatmul.mubr.msk.f32.vlgmr.msra.gmra.mrb[10].mxu0 %vm58_vm2, %v1144_v51 }
 0xdd7   :  { %2706 = vmatpush3.bf16.msra.mxu0 %v2959_v4  ;;  %2404 = vmatprep.mubr.msk.f32.mxu0 %vm2913_vm0, %v2914_v8 }
 0xdd8   :  { %v1147_v54 = vpop.permute.xlu1 %1146  ;;  %2707 = vmatprep.subr.bf16.mxu0 %v2912_v0 }
 0xdd9   :  { %v1149_v56 = vsel %vm47_vm1, %v1827_v53, %v1147_v54  ;;  %v1835_v53 = vld [vmem:[%s3626_s0 + $0x2] sm:$0x3] }
 0xdda   :  { %2378 = vmatmul.mubr.msk.f32.vlgmr.msra.gmra.mrb[10].mxu1 %vm58_vm2, %v1149_v56 }
 0xddb   :  { %2709 = vmatpush3.bf16.msra.mxu0 %v2983_v12  ;;  %2724 = vmatpush3.bf16.msra.mxu1 %v2974_v9 }
 0xddc   :  { %2710 = vmatprep.subr.bf16.mxu0 %v2912_v0  ;;  %2725 = vmatprep.subr.bf16.mxu1 %v2912_v0 }
 0xddd   :  { %2431 = vmatprep.mubr.msk.f32.mxu1 %vm2913_vm0, %v2914_v8 }
 0xddf   :  { %2712 = vmatpush3.bf16.msra.mxu0 %v3003_v18  ;;  %2727 = vmatpush3.bf16.msra.mxu1 %v2987_v13 }
 0xde0   :  { %2713 = vmatprep.subr.bf16.mxu0 %v2912_v0  ;;  %2728 = vmatprep.subr.bf16.mxu1 %v2912_v0 }
 0xde3   :  { %2715 = vmatpush3.bf16.msra.mxu0 %v3023_v24  ;;  %2730 = vmatpush3.bf16.msra.mxu1 %v3007_v19 }
 0xde4   :  { %2716 = vmatprep.subr.bf16.mxu0 %v2912_v0  ;;  %2731 = vmatprep.subr.bf16.mxu1 %v2912_v0 }
 0xde7   :  { %2718 = vmatpush3.bf16.msra.mxu0 %v3043_v30  ;;  %2733 = vmatpush3.bf16.msra.mxu1 %v3027_v25 }
 0xde8   :  { %2719 = vmatprep.subr.bf16.mxu0 %v2912_v0  ;;  %2734 = vmatprep.subr.bf16.mxu1 %v2912_v0 }
 0xdeb   :  { %2721 = vmatpush3.bf16.msra.mxu0 %v3063_v36  ;;  %2736 = vmatpush3.bf16.msra.mxu1 %v3047_v31 }
 0xdec   :  { %2737 = vmatprep.subr.bf16.mxu1 %v2912_v0  ;;  %2740 = vmatprep.subr.bf16.mxu0 %v2912_v0 }
 0xdef   :  { %2739 = vmatpush3.bf16.msra.mxu1 %v3070_v38 }
 0xdf0   :  { %2758 = vmatprep.subr.bf16.mxu1 %v2912_v0 }
 0xea9   :  { %v1219_v58 = vpop.f32.mrb[10].mxu0 }
 0xeaa   :  { %v1220_v59 = vadd.f32 %v3115_v42, %v1219_v58  ;;  %v2352_v60 = vpop.f32.mrb[11].mxu0 }
 0xeac   :  { %2862 = vtanh.f32 %v1220_v59  ;;  %v1830_v6 = vmul.f32 -1.442695, %v1220_v59 }
 0xead   :  { %v1292_v61 = vpop.f32.mrb[10].mxu1 }
 0xeae   :  { %v1293_v62 = vadd.f32 %v3120_v43, %v1292_v61  ;;  %v2379_v1 = vpop.f32.mrb[11].mxu1 }
 0xeb0   :  { %2864 = vtanh.f32 %v1293_v62  ;;  %v1831_v7 = vmul.f32 -1.442695, %v1293_v62 }
 0xeb1   :  { %2866 = vpow2.f32 %v1830_v6 }
 0xeb2   :  { %2868 = vpow2.f32 %v1831_v7 }
 0xeb6   :  { %v2863_v3 = vpop.eup %2862 }
 0xeb7   :  { %1305 = vrot.lane.b32.xlu0 %v2863_v3, %s2915_s22 }
 0xeba   :  { %v2865_v5 = vpop.eup %2864 }
 0xebb   :  { %1329 = vrot.lane.b32.xlu1 %v2865_v5, %s2915_s22  ;;  %v2867_v10 = vpop.eup %2866 }
 0xebc   :  { %v1299_v11 = vadd.f32 1.0, %v2867_v10  ;;  %v2869_v14 = vpop.eup %2868 }
 0xebd   :  { %v1323_v16 = vadd.f32 1.0, %v2869_v14 }
 0xebe   :  { %2870 = vrcp.f32 %v1299_v11 }
 0xebf   :  { %2872 = vrcp.f32 %v1323_v16 }
 0xec8   :  { %v2871_v20 = vpop.eup %2870 }
 0xec9   :  { %v2873_v23 = vpop.eup %2872  ;;  %v1303_v28 = vmul.f32 %v2871_v20, %v3375_v34 }
 0xeca   :  { %v1327_v33 = vmul.f32 %v2873_v23, %v3379_v39  ;;  %v1834_v39 = vld [vmem:[%s3626_s0 + $0xc] sm:$0x3] }
 0xf29   :  { %v1306_v21 = vpop.permute.xlu0 %1305 }
 0xf2a   :  { %v1308_v22 = vmul.f32 %v2871_v20, %v1306_v21 }
 0xf2c   :  { %1310 = vrot.lane.b32.xlu0 %v1308_v22, %s2916_s23  ;;  %v1842_v22 = vld [vmem:[%s3626_s0 + $0xe] sm:$0x3] }
 0xf2d   :  { %v1330_v26 = vpop.permute.xlu1 %1329 }
 0xf2e   :  { %v1332_v27 = vmul.f32 %v2873_v23, %v1330_v26 }
 0xf30   :  { %1334 = vrot.lane.b32.xlu1 %v1332_v27, %s2916_s23  ;;  %v1573_v27 = vld [vmem:[%s3626_s0] sm:$0x3] }
 0xf9e   :  { %v1311_v29 = vpop.permute.xlu0 %1310 }
 0xf9f   :  { %v3437_v32 = vadd.f32 %v1311_v29, %v1303_v28 }
 0xfa1   :  { %2874 = vtanh.f32 %v3437_v32 }
 0xfa2   :  { %v1335_v35 = vpop.permute.xlu1 %1334 }
 0xfa3   :  { %v3441_v37 = vadd.f32 %v1335_v35, %v1327_v33  ;;  %v2910_v33 = vld [vmem:[%s3627_s3] ss:$0 sm:$0xff] }
 0xfa5   :  { %2876 = vtanh.f32 %v3441_v37 }
 0xfab   :  { %v2875_v41 = vpop.eup %2874 }
 0xfac   :  { %1316 = vrot.lane.b32.xlu0 %v2875_v41, %s2915_s22 }
 0xfaf   :  { %v2877_v44 = vpop.eup %2876 }
 0xfb0   :  { %1340 = vrot.lane.b32.xlu1 %v2877_v44, %s2915_s22  ;;  %v2911_v44 = vld [vmem:[%s3628_s4] ss:$0 sm:$0xff] }
0x101e   :  { %v1317_v46 = vpop.permute.xlu0 %1316 }
0x101f   :  { %v3446_v34 = vmul.f32 %v2871_v20, %v1317_v46 }
0x1021   :  { %1355 = vrot.lane.b32.xlu0 %v3446_v34, %s2917_s24 }
0x1022   :  { %v1341_v47 = vpop.permute.xlu1 %1340 }
0x1023   :  { %v3450_v45 = vmul.f32 %v2873_v23, %v1341_v47 }
0x1025   :  { %1360 = vrot.lane.b32.xlu1 %v3450_v45, %s2917_s24 }
0x1093   :  { %v1356_v50 = vpop.permute.xlu0 %1355 }
0x1094   :  { %v1358_v51 = vsel %vm47_vm1, %v1834_v39, %v1356_v50 }
0x1095   :  { %2405 = vmatmul.mubr.msk.f32.vlgmr.msra.gmra.mrb[12].mxu0 %vm58_vm2, %v1358_v51 }
0x1096   :  { %2742 = vmatpush3.bf16.msra.mxu0 %v2959_v4  ;;  %2458 = vmatprep.mubr.msk.f32.mxu0 %vm2913_vm0, %v2914_v8 }
0x1097   :  { %v1361_v54 = vpop.permute.xlu1 %1360  ;;  %2743 = vmatprep.subr.bf16.mxu0 %v2912_v0 }
0x1098   :  { %v1363_v56 = vsel %vm47_vm1, %v1835_v53, %v1361_v54 }
0x1099   :  { %2432 = vmatmul.mubr.msk.f32.vlgmr.msra.gmra.mrb[12].mxu1 %vm58_vm2, %v1363_v56 }
0x109a   :  { %2745 = vmatpush3.bf16.msra.mxu0 %v2983_v12  ;;  %2760 = vmatpush3.bf16.msra.mxu1 %v2974_v9 }
0x109b   :  { %2746 = vmatprep.subr.bf16.mxu0 %v2912_v0  ;;  %2761 = vmatprep.subr.bf16.mxu1 %v2912_v0 }
0x109c   :  { %2485 = vmatprep.mubr.msk.f32.mxu1 %vm2913_vm0, %v2914_v8 }
0x109e   :  { %2748 = vmatpush3.bf16.msra.mxu0 %v3003_v18  ;;  %2763 = vmatpush3.bf16.msra.mxu1 %v2987_v13 }
0x109f   :  { %2749 = vmatprep.subr.bf16.mxu0 %v2912_v0  ;;  %2764 = vmatprep.subr.bf16.mxu1 %v2912_v0 }
0x10a2   :  { %2751 = vmatpush3.bf16.msra.mxu0 %v3023_v24  ;;  %2766 = vmatpush3.bf16.msra.mxu1 %v3007_v19 }
0x10a3   :  { %2752 = vmatprep.subr.bf16.mxu0 %v2912_v0  ;;  %2767 = vmatprep.subr.bf16.mxu1 %v2912_v0 }
0x10a6   :  { %2754 = vmatpush3.bf16.msra.mxu0 %v3043_v30  ;;  %2769 = vmatpush3.bf16.msra.mxu1 %v3027_v25 }
0x10a7   :  { %2755 = vmatprep.subr.bf16.mxu0 %v2912_v0  ;;  %2770 = vmatprep.subr.bf16.mxu1 %v2912_v0 }
0x10aa   :  { %2757 = vmatpush3.bf16.msra.mxu0 %v3063_v36  ;;  %2772 = vmatpush3.bf16.msra.mxu1 %v3047_v31 }
0x10ab   :  { %2773 = vmatprep.subr.bf16.mxu1 %v2912_v0 }
0x10ae   :  { %2775 = vmatpush3.bf16.msra.mxu1 %v3070_v38 }
0x1168   :  { %v1433_v4 = vpop.f32.mrb[12].mxu0 }
0x1169   :  { %v1434_v8 = vadd.f32 %v3115_v42, %v1433_v4  ;;  %v2406_v9 = vpop.f32.mrb[13].mxu0 }
0x116b   :  { %2878 = vtanh.f32 %v1434_v8  ;;  %v1838_v25 = vmul.f32 -1.442695, %v1434_v8 }
0x116c   :  { %v1506_v12 = vpop.f32.mrb[12].mxu1 }
0x116d   :  { %v1507_v13 = vadd.f32 %v3120_v43, %v1506_v12  ;;  %v2433_v18 = vpop.f32.mrb[13].mxu1 }
0x116f   :  { %2880 = vtanh.f32 %v1507_v13  ;;  %v1839_v0 = vmul.f32 -1.442695, %v1507_v13 }
0x1170   :  { %2882 = vpow2.f32 %v1838_v25 }
0x1171   :  { %2884 = vpow2.f32 %v1839_v0 }
0x1175   :  { %v2879_v19 = vpop.eup %2878 }
0x1176   :  { %1519 = vrot.lane.b32.xlu0 %v2879_v19, %s2915_s22 }
0x1179   :  { %v2881_v24 = vpop.eup %2880 }
0x117a   :  { %1543 = vrot.lane.b32.xlu1 %v2881_v24, %s2915_s22  ;;  %v2883_v30 = vpop.eup %2882 }
0x117b   :  { %v1513_v31 = vadd.f32 1.0, %v2883_v30  ;;  %v2885_v36 = vpop.eup %2884 }
0x117c   :  { %v1537_v38 = vadd.f32 1.0, %v2885_v36 }
0x117d   :  { %2886 = vrcp.f32 %v1513_v31 }
0x117e   :  { %2888 = vrcp.f32 %v1537_v38 }
0x1187   :  { %v2887_v42 = vpop.eup %2886 }
0x1188   :  { %v2889_v59 = vpop.eup %2888  ;;  %v1517_v62 = vmul.f32 %v2887_v42, %v3437_v32 }
0x1189   :  { %v1541_v5 = vmul.f32 %v2889_v59, %v3441_v37 }
0x11e8   :  { %v1520_v43 = vpop.permute.xlu0 %1519 }
0x11e9   :  { %v1522_v58 = vmul.f32 %v2887_v42, %v1520_v43 }
0x11eb   :  { %1524 = vrot.lane.b32.xlu0 %v1522_v58, %s2916_s23 }
0x11ec   :  { %v1544_v60 = vpop.permute.xlu1 %1543 }
0x11ed   :  { %v1546_v61 = vmul.f32 %v2889_v59, %v1544_v60 }
0x11ef   :  { %1548 = vrot.lane.b32.xlu1 %v1546_v61, %s2916_s23 }
0x125d   :  { %v1525_v1 = vpop.permute.xlu0 %1524 }
0x125e   :  { %v1527_v3 = vadd.f32 %v1525_v1, %v1517_v62 }
0x1260   :  { %2890 = vtanh.f32 %v1527_v3 }
0x1261   :  { %v1549_v6 = vpop.permute.xlu1 %1548 }
0x1262   :  { %v1551_v7 = vadd.f32 %v1549_v6, %v1541_v5 }
0x1264   :  { %2892 = vtanh.f32 %v1551_v7 }
0x126a   :  { %v2891_v10 = vpop.eup %2890 }
0x126b   :  { %1530 = vrot.lane.b32.xlu0 %v2891_v10, %s2915_s22 }
0x126e   :  { %v2893_v11 = vpop.eup %2892 }
0x126f   :  { %1554 = vrot.lane.b32.xlu1 %v2893_v11, %s2915_s22 }
0x12dd   :  { %v1531_v14 = vpop.permute.xlu0 %1530 }
0x12de   :  { %v3500_v16 = vmul.f32 %v2887_v42, %v1531_v14 }
0x12e0   :  { %1569 = vrot.lane.b32.xlu0 %v3500_v16, %s2917_s24 }
0x12e1   :  { %v1555_v20 = vpop.permute.xlu1 %1554 }
0x12e2   :  { %v3504_v21 = vmul.f32 %v2889_v59, %v1555_v20 }
0x12e4   :  { %1574 = vrot.lane.b32.xlu1 %v3504_v21, %s2917_s24 }
0x1352   :  { %v1570_v23 = vpop.permute.xlu0 %1569 }
0x1353   :  { %v1572_v26 = vsel %vm47_vm1, %v1842_v22, %v1570_v23 }
0x1354   :  { %2459 = vmatmul.mubr.msk.f32.vlgmr.msra.gmra.mrb[14].mxu0 %vm58_vm2, %v1572_v26 }
0x1356   :  { %v1575_v28 = vpop.permute.xlu1 %1574 }
0x1357   :  { %v1577_v29 = vsel %vm47_vm1, %v1573_v27, %v1575_v28 }
0x1358   :  { %2486 = vmatmul.mubr.msk.f32.vlgmr.msra.gmra.mrb[14].mxu1 %vm58_vm2, %v1577_v29 }
0x1427   :  { %v1647_v32 = vpop.f32.mrb[14].mxu0 }
0x1428   :  { %v1648_v35 = vadd.f32 %v2910_v33, %v1647_v32  ;;  %v2460_v37 = vpop.f32.mrb[15].mxu0 }
0x142a   :  { %2894 = vtanh.f32 %v1648_v35  ;;  %v1845_v51 = vmul.f32 -1.442695, %v1648_v35 }
0x142b   :  { %v1720_v41 = vpop.f32.mrb[14].mxu1 }
0x142c   :  { %v1721_v46 = vadd.f32 %v2911_v44, %v1720_v41  ;;  %v2487_v47 = vpop.f32.mrb[15].mxu1 }
0x142e   :  { %2896 = vtanh.f32 %v1721_v46  ;;  %v1846_v53 = vmul.f32 -1.442695, %v1721_v46 }
0x142f   :  { %2898 = vpow2.f32 %v1845_v51 }
0x1430   :  { %2900 = vpow2.f32 %v1846_v53 }
0x1434   :  { %v2895_v39 = vpop.eup %2894 }
0x1435   :  { %1733 = vrot.lane.b32.xlu0 %v2895_v39, %s2915_s22 }
0x1438   :  { %v2897_v50 = vpop.eup %2896 }
0x1439   :  { %1757 = vrot.lane.b32.xlu1 %v2897_v50, %s2915_s22  ;;  %v2899_v54 = vpop.eup %2898 }
0x143a   :  { %v1727_v56 = vadd.f32 1.0, %v2899_v54  ;;  %v2901_v4 = vpop.eup %2900 }
0x143b   :  { %v1751_v8 = vadd.f32 1.0, %v2901_v4 }
0x143c   :  { %2902 = vrcp.f32 %v1727_v56 }
0x143d   :  { %2904 = vrcp.f32 %v1751_v8 }
0x1446   :  { %v2903_v9 = vpop.eup %2902 }
0x1447   :  { %v2905_v18 = vpop.eup %2904  ;;  %v1731_v25 = vmul.f32 %v2903_v9, %v1527_v3 }
0x1448   :  { %v1755_v31 = vmul.f32 %v2905_v18, %v1551_v7 }
0x14a7   :  { %v1734_v12 = vpop.permute.xlu0 %1733 }
0x14a8   :  { %v1736_v13 = vmul.f32 %v2903_v9, %v1734_v12 }
0x14aa   :  { %1738 = vrot.lane.b32.xlu0 %v1736_v13, %s2916_s23 }
0x14ab   :  { %v1758_v19 = vpop.permute.xlu1 %1757 }
0x14ac   :  { %v1760_v24 = vmul.f32 %v2905_v18, %v1758_v19 }
0x14ae   :  { %1762 = vrot.lane.b32.xlu1 %v1760_v24, %s2916_s23 }
0x151c   :  { %v1739_v0 = vpop.permute.xlu0 %1738 }
0x151d   :  { %v1741_v30 = vadd.f32 %v1739_v0, %v1731_v25 }
0x151f   :  { %2906 = vtanh.f32 %v1741_v30 }
0x1520   :  { %v1763_v36 = vpop.permute.xlu1 %1762 }
0x1521   :  { %v1765_v38 = vadd.f32 %v1763_v36, %v1755_v31 }
0x1523   :  { %2908 = vtanh.f32 %v1765_v38 }
0x1529   :  { %v2907_v42 = vpop.eup %2906 }
0x152a   :  { %1744 = vrot.lane.b32.xlu0 %v2907_v42, %s2915_s22 }
0x152d   :  { %v2909_v43 = vpop.eup %2908 }
0x152e   :  { %1768 = vrot.lane.b32.xlu1 %v2909_v43, %s2915_s22  ;;  %260 = vrot.lane.b32.xlu0 %v3136_v15, %s2916_s23 }
0x1532   :  { %266 = vrot.lane.b32.xlu1 %v3140_v17, %s2915_s22  ;;  %479 = vrot.lane.b32.xlu0 %v3198_v63, %s2916_s23 }
0x1536   :  { %485 = vrot.lane.b32.xlu1 %v3202_v2, %s2915_s22  ;;  %697 = vrot.lane.b32.xlu0 %v3260_v55, %s2916_s23 }
0x153a   :  { %703 = vrot.lane.b32.xlu1 %v3264_v57, %s2915_s22  ;;  %915 = vrot.lane.b32.xlu0 %v3322_v48, %s2916_s23 }
0x153e   :  { %921 = vrot.lane.b32.xlu1 %v3326_v52, %s2915_s22  ;;  %1131 = vrot.lane.b32.xlu0 %v3384_v40, %s2916_s23 }
0x1542   :  { %1136 = vrot.lane.b32.xlu1 %v3388_v49, %s2915_s22  ;;  %1345 = vrot.lane.b32.xlu0 %v3446_v34, %s2916_s23 }
0x1546   :  { %1350 = vrot.lane.b32.xlu1 %v3450_v45, %s2915_s22  ;;  %1559 = vrot.lane.b32.xlu0 %v3500_v16, %s2916_s23 }
0x154a   :  { %1564 = vrot.lane.b32.xlu1 %v3504_v21, %s2915_s22 }
0x159c   :  { %v1745_v15 = vpop.permute.xlu0 %1744 }
0x159d   :  { %v1747_v17 = vmul.f32 %v2903_v9, %v1745_v15 }
0x159f   :  { %1773 = vrot.lane.b32.xlu0 %v1747_v17, %s2916_s23 }
0x15a0   :  { %v1769_v63 = vpop.permute.xlu1 %1768  ;;  %v261_v2 = vpop.permute.xlu0 %260 }
0x15a1   :  { %v1771_v55 = vmul.f32 %v2905_v18, %v1769_v63  ;;  %264 = vst.msk [vmem:[%s3629_s5] sm:$0x3] %vm263_vm3, %v261_v2 }
0x15a3   :  { %1778 = vrot.lane.b32.xlu1 %v1771_v55, %s2915_s22 }
0x15a4   :  { %v267_v57 = vpop.permute.xlu1 %266  ;;  %v480_v48 = vpop.permute.xlu0 %479 }
0x15a5   :  { %1793 = vst.msk [vmem:[%s3629_s5 + $0xe] sm:$0x3] %vm270_vm4, %v267_v57 }
0x15a6   :  { %1800 = vst.msk [vmem:[%s3629_s5 + $0x2] sm:$0x3] %vm263_vm3, %v480_v48 }
0x15a8   :  { %v486_v52 = vpop.permute.xlu1 %485  ;;  %v698_v40 = vpop.permute.xlu0 %697 }
0x15a9   :  { %1801 = vst.msk [vmem:[%s3629_s5 + $0xc] sm:$0x3] %vm270_vm4, %v486_v52 }
0x15aa   :  { %1808 = vst.msk [vmem:[%s3629_s5 + $0x4] sm:$0x3] %vm263_vm3, %v698_v40 }
0x15ac   :  { %v704_v49 = vpop.permute.xlu1 %703  ;;  %v916_v34 = vpop.permute.xlu0 %915 }
0x15ad   :  { %1809 = vst.msk [vmem:[%s3629_s5 + $0xa] sm:$0x3] %vm270_vm4, %v704_v49 }
0x15ae   :  { %1816 = vst.msk [vmem:[%s3629_s5 + $0x6] sm:$0x3] %vm263_vm3, %v916_v34 }
0x15b0   :  { %v922_v45 = vpop.permute.xlu1 %921  ;;  %v1132_v58 = vpop.permute.xlu0 %1131 }
0x15b1   :  { %1817 = vst.msk [vmem:[%s3629_s5 + $0x8] sm:$0x3] %vm270_vm4, %v922_v45 }
0x15b2   :  { %1824 = vst.msk [vmem:[%s3629_s5 + $0x8] sm:$0x3] %vm263_vm3, %v1132_v58 }
0x15b4   :  { %v1137_v59 = vpop.permute.xlu1 %1136  ;;  %v1346_v60 = vpop.permute.xlu0 %1345 }
0x15b5   :  { %1825 = vst.msk [vmem:[%s3629_s5 + $0x6] sm:$0x3] %vm270_vm4, %v1137_v59 }
0x15b6   :  { %1832 = vst.msk [vmem:[%s3629_s5 + $0xa] sm:$0x3] %vm263_vm3, %v1346_v60 }
0x15b8   :  { %v1351_v61 = vpop.permute.xlu1 %1350  ;;  %v1560_v62 = vpop.permute.xlu0 %1559 }
0x15b9   :  { %1833 = vst.msk [vmem:[%s3629_s5 + $0x4] sm:$0x3] %vm270_vm4, %v1351_v61 }
0x15ba   :  { %1840 = vst.msk [vmem:[%s3629_s5 + $0xc] sm:$0x3] %vm263_vm3, %v1560_v62 }
0x15bc   :  { %v1565_v1 = vpop.permute.xlu1 %1564 }
0x15bd   :  { %1841 = vst.msk [vmem:[%s3629_s5 + $0x2] sm:$0x3] %vm270_vm4, %v1565_v1 }
0x1611   :  { %v1774_v3 = vpop.permute.xlu0 %1773 }
0x1612   :  { %1847 = vst.msk [vmem:[%s3629_s5 + $0xe] sm:$0x3] %vm263_vm3, %v1774_v3 }
0x1615   :  { %v1779_v5 = vpop.permute.xlu1 %1778 }
0x1616   :  { %1781 = vst.msk [vmem:[%s3629_s5] sm:$0x3] %vm270_vm4, %v1779_v5 }

// kernel: forward.5
= control target key start
LH: loop header
LB: loop body
LE: loop exit
PB: predicated region body
PF: predicated region fallthrough
CT: control target
= control target key end

     0   :  { %v2384_v0 = vmov 0.0|0.0   ;;  %vm2385_vm0 = vmmov 0   ;;  %v2386_v8 = vmov 0.0   ;;  %s2387_s30 = smov 64   ;;  %s2388_s4 = smov 32   ;;  %v226_v47 = vlaneseq  ;;  %s2839_s1 = inlined_call_operand.vmem [shape: f32[32,128], index: 1, kind: input, shape index: {}]   ;;  %s2840_s2 = inlined_call_operand.vmem [shape: f32[32,128], index: 2, kind: input, shape index: {}]   ;;  %s2841_s0 = inlined_call_operand.vmem [shape: f32[8,2,256], index: 0, kind: input, shape index: {}]   ;;  %s2842_s3 = inlined_call_operand.vmem [shape: f32[8,2,64], index: 3, kind: output, shape index: {}]  }
   0x1   :  { %2154 = vmatprep.subr.bf16.mxu0 %v2384_v0  ;;  %v14_v1 = vld [vmem:[%s2839_s1] sm:$0xff]  ;;  %v15_v2 = vld [vmem:[%s2839_s1 + $0x8] sm:$0xff]  ;;  %2160 = vmatprep.subr.bf16.mxu1 %v2384_v0  ;;  %v16_v6 = vld [vmem:[%s2839_s1 + $0x10] sm:$0xff]  ;;  %v2389_v45 = vmov 1983009808   ;;  %vm233_vm1 = vcmask 254976  }
   0x2   :  { %v18_v3 = vld [vmem:[%s2840_s2] sm:$0xff]  ;;  %v2421_v4 = vpack.c.bf16 %v15_v2, %v14_v1  ;;  %v19_v5 = vld [vmem:[%s2840_s2 + $0x8] sm:$0xff]  ;;  %v17_v7 = vld [vmem:[%s2839_s1 + $0x18] sm:$0xff]  ;;  %1986 = vmatprep.mubr.msk.f32.mxu0 %vm2385_vm0, %v2386_v8  ;;  %1997 = vmatprep.mubr.msk.f32.mxu1 %vm2385_vm0, %v2386_v8  ;;  %v224_v46 = vunpack.c.l.s4 %v2389_v45  ;;  %v227_v49 = vshrl.u32 %v226_v47, 7  ;;  %vm25_vm2 = vcmask 261120  }
   0x3   :  { %v2436_v9 = vpack.c.bf16 %v19_v5, %v18_v3  ;;  %v20_v10 = vld [vmem:[%s2840_s2 + $0x10] sm:$0xff]  ;;  %v21_v11 = vld [vmem:[%s2840_s2 + $0x18] sm:$0xff]  ;;  %v2445_v12 = vpack.c.bf16 %v17_v7, %v16_v6  ;;  %v22_v15 = vld [vmem:[%s2841_s0] sm:$0xf]  ;;  %vm247_vm3 = vcmask 517376  }
   0x4   :  { %2156 = vmatpush3.bf16.msra.mxu0 %v2421_v4  ;;  %v2449_v13 = vpack.c.bf16 %v21_v11, %v20_v10  ;;  %v1840_v14 = vld [vmem:[%s2841_s0 + $0x1c] sm:$0xf]  ;;  %v225_v48 = vunpack.c.0.s8 %v224_v46  ;;  %v1844_v59 = vld [vmem:[%s2841_s0 + $0x4] sm:$0xf]  ;;  %v1845_v60 = vld [vmem:[%s2841_s0 + $0x18] sm:$0xf] }
   0x5   :  { %2157 = vmatprep.subr.bf16.mxu0 %v2384_v0  ;;  %2162 = vmatpush3.bf16.msra.mxu1 %v2436_v9  ;;  %v171_v16 = vrot.slane %v1840_v14, 2  ;;  %v401_v1 = vrot.slane %v1845_v60, 2 }
   0x6   :  { %2163 = vmatprep.subr.bf16.mxu1 %v2384_v0  ;;  %v2488_v50 = vsub.s32 %v225_v48, %v227_v49 }
   0x8   :  { %2159 = vmatpush3.bf16.msra.mxu0 %v2445_v12 }
   0x9   :  { %2165 = vmatpush3.bf16.msra.mxu1 %v2449_v13  ;;  %2166 = vmatprep.subr.bf16.mxu0 %v2384_v0 }
   0xa   :  { %2172 = vmatprep.subr.bf16.mxu1 %v2384_v0 }
   0xb   :  { %1987 = vmatmul.mubr.f32.vlgmr.msra.gmra.mrb[0].mxu0 %v2386_v8 }
   0xc   :  { %1998 = vmatmul.mubr.f32.vlgmr.msra.gmra.mrb[0].mxu1 %v2386_v8  ;;  %2168 = vmatpush3.bf16.msra.mxu0 %v2421_v4 }
   0xd   :  { %2169 = vmatprep.subr.bf16.mxu0 %v2384_v0  ;;  %2174 = vmatpush3.bf16.msra.mxu1 %v2436_v9 }
   0xe   :  { %2008 = vmatprep.mubr.msk.f32.mxu0 %vm2385_vm0, %v2386_v8  ;;  %2175 = vmatprep.subr.bf16.mxu1 %v2384_v0 }
   0xf   :  { %2019 = vmatprep.mubr.msk.f32.mxu1 %vm2385_vm0, %v2386_v8 }
  0x10   :  { %2171 = vmatpush3.bf16.msra.mxu0 %v2445_v12 }
  0x11   :  { %2177 = vmatpush3.bf16.msra.mxu1 %v2449_v13  ;;  %2178 = vmatprep.subr.bf16.mxu0 %v2384_v0 }
  0x12   :  { %2184 = vmatprep.subr.bf16.mxu1 %v2384_v0 }
  0xde   :  { %v95_v17 = vpop.f32.mrb[0].mxu0 }
  0xdf   :  { %v99_v18 = vadd.f32 %v95_v17, %v22_v15  ;;  %v1988_v19 = vpop.f32.mrb[1].mxu0  ;;  %v166_v20 = vpop.f32.mrb[0].mxu1 }
  0xe0   :  { %v173_v21 = vadd.f32 %v171_v16, %v166_v20  ;;  %v1999_v22 = vpop.f32.mrb[1].mxu1 }
  0xe1   :  { %2256 = vtanh.f32 %v99_v18  ;;  %v1841_v25 = vmul.f32 -1.442695, %v99_v18 }
  0xe2   :  { %2258 = vtanh.f32 %v173_v21  ;;  %v1842_v26 = vmul.f32 -1.442695, %v173_v21 }
  0xe3   :  { %2260 = vpow2.f32 %v1841_v25 }
  0xe4   :  { %2262 = vpow2.f32 %v1842_v26 }
  0xeb   :  { %v2257_v23 = vpop.eup %2256 }
  0xec   :  { %183 = vrot.lane.b32.xlu0 %v2257_v23, %s2387_s30  ;;  %v2259_v24 = vpop.eup %2258 }
  0xed   :  { %v2261_v27 = vpop.eup %2260 }
  0xee   :  { %v177_v28 = vadd.f32 1.0, %v2261_v27  ;;  %v2263_v29 = vpop.eup %2262 }
  0xef   :  { %v201_v30 = vadd.f32 1.0, %v2263_v29 }
  0xf0   :  { %207 = vrot.lane.b32.xlu0 %v2259_v24, %s2387_s30  ;;  %2264 = vrcp.f32 %v177_v28 }
  0xf1   :  { %2266 = vrcp.f32 %v201_v30 }
  0xfa   :  { %v2265_v31 = vpop.eup %2264 }
  0xfb   :  { %v2267_v34 = vpop.eup %2266  ;;  %v181_v37 = vmul.f32 0.0, %v2265_v31 }
  0xfc   :  { %v205_v40 = vmul.f32 0.0, %v2267_v34 }
 0x15e   :  { %v184_v32 = vpop.permute.xlu0 %183 }
 0x15f   :  { %v186_v33 = vmul.f32 %v2265_v31, %v184_v32 }
 0x161   :  { %188 = vrot.lane.b32.xlu1 %v186_v33, %s2388_s4 }
 0x162   :  { %v208_v35 = vpop.permute.xlu0 %207 }
 0x163   :  { %v210_v36 = vmul.f32 %v2267_v34, %v208_v35 }
 0x165   :  { %212 = vrot.lane.b32.xlu1 %v210_v36, %s2388_s4 }
 0x1d3   :  { %v189_v38 = vpop.permute.xlu1 %188 }
 0x1d4   :  { %v2480_v39 = vadd.f32 %v189_v38, %v181_v37 }
 0x1d6   :  { %2268 = vtanh.f32 %v2480_v39 }
 0x1d7   :  { %v213_v41 = vpop.permute.xlu1 %212 }
 0x1d8   :  { %v2483_v42 = vadd.f32 %v213_v41, %v205_v40  ;;  %v1852_v40 = vld [vmem:[%s2841_s0 + $0x8] sm:$0xf]  ;;  %v1853_v41 = vld [vmem:[%s2841_s0 + $0x14] sm:$0xf] }
 0x1d9   :  { %v630_v45 = vrot.slane %v1853_v41, 2 }
 0x1da   :  { %2270 = vtanh.f32 %v2483_v42 }
 0x1e0   :  { %v2269_v43 = vpop.eup %2268 }
 0x1e1   :  { %194 = vrot.lane.b32.xlu0 %v2269_v43, %s2387_s30 }
 0x1e4   :  { %v2271_v44 = vpop.eup %2270 }
 0x1e5   :  { %218 = vrot.lane.b32.xlu1 %v2271_v44, %s2387_s30 }
 0x253   :  { %v195_v51 = vpop.permute.xlu0 %194 }
 0x254   :  { %v197_v52 = vmul.f32 %v2265_v31, %v195_v51 }
 0x256   :  { %v229_v53 = vrot.slane %v197_v52, %v2488_v50 }
 0x257   :  { %v219_v54 = vpop.permute.xlu1 %218 }
 0x258   :  { %v221_v55 = vmul.f32 %v2267_v34, %v219_v54  ;;  %230 = vrot.lane.b32.xlu0 %v229_v53, %s2388_s4 }
 0x25a   :  { %v2493_v56 = vrot.slane %v221_v55, %v2488_v50 }
 0x25c   :  { %326 = vrot.lane.b32.xlu1 %v2493_v56, %s2388_s4 }
 0x2ca   :  { %v231_v57 = vpop.permute.xlu0 %230 }
 0x2cb   :  { %234 = vst.msk [vmem:[%s2842_s3] sm:$0x3] %vm233_vm1, %v231_v57  ;;  %2009 = vmatmul.mubr.msk.f32.vlgmr.msra.gmra.mrb[2].mxu0 %vm25_vm2, %v231_v57 }
 0x2cc   :  { %2180 = vmatpush3.bf16.msra.mxu0 %v2421_v4  ;;  %2030 = vmatprep.mubr.msk.f32.mxu0 %vm2385_vm0, %v2386_v8 }
 0x2cd   :  { %2181 = vmatprep.subr.bf16.mxu0 %v2384_v0 }
 0x2ce   :  { %v327_v58 = vpop.permute.xlu1 %326 }
 0x2cf   :  { %2020 = vmatmul.mubr.msk.f32.vlgmr.msra.gmra.mrb[2].mxu1 %vm25_vm2, %v327_v58 }
 0x2d0   :  { %2183 = vmatpush3.bf16.msra.mxu0 %v2445_v12  ;;  %2186 = vmatpush3.bf16.msra.mxu1 %v2436_v9 }
 0x2d1   :  { %2187 = vmatprep.subr.bf16.mxu1 %v2384_v0  ;;  %2041 = vmatprep.mubr.msk.f32.mxu1 %vm2385_vm0, %v2386_v8 }
 0x2d2   :  { %2190 = vmatprep.subr.bf16.mxu0 %v2384_v0 }
 0x2d4   :  { %2189 = vmatpush3.bf16.msra.mxu1 %v2449_v13 }
 0x2d5   :  { %2196 = vmatprep.subr.bf16.mxu1 %v2384_v0 }
 0x39e   :  { %v321_v61 = vpop.f32.mrb[2].mxu0 }
 0x39f   :  { %v325_v62 = vadd.f32 %v1844_v59, %v321_v61  ;;  %v2010_v63 = vpop.f32.mrb[3].mxu0 }
 0x3a1   :  { %2272 = vtanh.f32 %v325_v62  ;;  %v1848_v10 = vmul.f32 -1.442695, %v325_v62 }
 0x3a2   :  { %v396_v2 = vpop.f32.mrb[2].mxu1 }
 0x3a3   :  { %v403_v3 = vadd.f32 %v401_v1, %v396_v2  ;;  %v2021_v5 = vpop.f32.mrb[3].mxu1 }
 0x3a5   :  { %2274 = vtanh.f32 %v403_v3  ;;  %v1849_v11 = vmul.f32 -1.442695, %v403_v3 }
 0x3a6   :  { %2276 = vpow2.f32 %v1848_v10 }
 0x3a7   :  { %2278 = vpow2.f32 %v1849_v11 }
 0x3ab   :  { %v2273_v6 = vpop.eup %2272 }
 0x3ac   :  { %413 = vrot.lane.b32.xlu0 %v2273_v6, %s2387_s30 }
 0x3af   :  { %v2275_v7 = vpop.eup %2274 }
 0x3b0   :  { %437 = vrot.lane.b32.xlu1 %v2275_v7, %s2387_s30  ;;  %v2277_v14 = vpop.eup %2276 }
 0x3b1   :  { %v407_v15 = vadd.f32 1.0, %v2277_v14  ;;  %v2279_v16 = vpop.eup %2278 }
 0x3b2   :  { %v431_v17 = vadd.f32 1.0, %v2279_v16 }
 0x3b3   :  { %2280 = vrcp.f32 %v407_v15 }
 0x3b4   :  { %2282 = vrcp.f32 %v431_v17 }
 0x3bd   :  { %v2281_v18 = vpop.eup %2280 }
 0x3be   :  { %v2283_v21 = vpop.eup %2282  ;;  %v411_v24 = vmul.f32 %v2281_v18, %v2480_v39 }
 0x3bf   :  { %v435_v27 = vmul.f32 %v2283_v21, %v2483_v42 }
 0x41e   :  { %v414_v19 = vpop.permute.xlu0 %413 }
 0x41f   :  { %v416_v20 = vmul.f32 %v2281_v18, %v414_v19 }
 0x421   :  { %418 = vrot.lane.b32.xlu0 %v416_v20, %s2388_s4 }
 0x422   :  { %v438_v22 = vpop.permute.xlu1 %437 }
 0x423   :  { %v440_v23 = vmul.f32 %v2283_v21, %v438_v22 }
 0x425   :  { %442 = vrot.lane.b32.xlu1 %v440_v23, %s2388_s4  ;;  %v1860_v23 = vld [vmem:[%s2841_s0 + $0xc] sm:$0xf] }
 0x493   :  { %v419_v25 = vpop.permute.xlu0 %418 }
 0x494   :  { %v2526_v26 = vadd.f32 %v419_v25, %v411_v24  ;;  %v1861_v24 = vld [vmem:[%s2841_s0 + $0x10] sm:$0xf] }
 0x496   :  { %2284 = vtanh.f32 %v2526_v26 }
 0x497   :  { %v443_v28 = vpop.permute.xlu1 %442 }
 0x498   :  { %v2530_v29 = vadd.f32 %v443_v28, %v435_v27  ;;  %v859_v28 = vrot.slane %v1861_v24, 2 }
 0x49a   :  { %2286 = vtanh.f32 %v2530_v29 }
 0x4a0   :  { %v2285_v30 = vpop.eup %2284 }
 0x4a1   :  { %424 = vrot.lane.b32.xlu0 %v2285_v30, %s2387_s30 }
 0x4a4   :  { %v2287_v31 = vpop.eup %2286 }
 0x4a5   :  { %448 = vrot.lane.b32.xlu1 %v2287_v31, %s2387_s30 }
 0x513   :  { %v425_v32 = vpop.permute.xlu0 %424 }
 0x514   :  { %v427_v33 = vmul.f32 %v2281_v18, %v425_v32 }
 0x516   :  { %v459_v34 = vrot.slane %v427_v33, %v2488_v50 }
 0x517   :  { %v449_v35 = vpop.permute.xlu1 %448 }
 0x518   :  { %v451_v36 = vmul.f32 %v2283_v21, %v449_v35  ;;  %460 = vrot.lane.b32.xlu0 %v459_v34, %s2388_s4 }
 0x51a   :  { %v2538_v37 = vrot.slane %v451_v36, %v2488_v50 }
 0x51c   :  { %555 = vrot.lane.b32.xlu1 %v2538_v37, %s2388_s4 }
 0x58a   :  { %v461_v38 = vpop.permute.xlu0 %460 }
 0x58b   :  { %1850 = vst.msk [vmem:[%s2842_s3 + $0x2] sm:$0x3] %vm233_vm1, %v461_v38  ;;  %2031 = vmatmul.mubr.msk.f32.vlgmr.msra.gmra.mrb[4].mxu0 %vm25_vm2, %v461_v38 }
 0x58c   :  { %2192 = vmatpush3.bf16.msra.mxu0 %v2421_v4  ;;  %2052 = vmatprep.mubr.msk.f32.mxu0 %vm2385_vm0, %v2386_v8 }
 0x58d   :  { %2193 = vmatprep.subr.bf16.mxu0 %v2384_v0 }
 0x58e   :  { %v556_v39 = vpop.permute.xlu1 %555 }
 0x58f   :  { %2042 = vmatmul.mubr.msk.f32.vlgmr.msra.gmra.mrb[4].mxu1 %vm25_vm2, %v556_v39 }
 0x590   :  { %2195 = vmatpush3.bf16.msra.mxu0 %v2445_v12  ;;  %2198 = vmatpush3.bf16.msra.mxu1 %v2436_v9 }
 0x591   :  { %2199 = vmatprep.subr.bf16.mxu1 %v2384_v0  ;;  %2063 = vmatprep.mubr.msk.f32.mxu1 %vm2385_vm0, %v2386_v8 }
 0x592   :  { %2202 = vmatprep.subr.bf16.mxu0 %v2384_v0 }
 0x594   :  { %2201 = vmatpush3.bf16.msra.mxu1 %v2449_v13 }
 0x595   :  { %2208 = vmatprep.subr.bf16.mxu1 %v2384_v0 }
 0x65e   :  { %v550_v42 = vpop.f32.mrb[4].mxu0 }
 0x65f   :  { %v554_v43 = vadd.f32 %v1852_v40, %v550_v42  ;;  %v2032_v44 = vpop.f32.mrb[5].mxu0 }
 0x661   :  { %2288 = vtanh.f32 %v554_v43  ;;  %v1856_v52 = vmul.f32 -1.442695, %v554_v43 }
 0x662   :  { %v625_v46 = vpop.f32.mrb[4].mxu1 }
 0x663   :  { %v632_v47 = vadd.f32 %v630_v45, %v625_v46  ;;  %v2043_v48 = vpop.f32.mrb[5].mxu1 }
 0x665   :  { %2290 = vtanh.f32 %v632_v47  ;;  %v1857_v53 = vmul.f32 -1.442695, %v632_v47 }
 0x666   :  { %2292 = vpow2.f32 %v1856_v52 }
 0x667   :  { %2294 = vpow2.f32 %v1857_v53 }
 0x66b   :  { %v2289_v49 = vpop.eup %2288 }
 0x66c   :  { %642 = vrot.lane.b32.xlu0 %v2289_v49, %s2387_s30 }
 0x66f   :  { %v2291_v51 = vpop.eup %2290 }
 0x670   :  { %666 = vrot.lane.b32.xlu1 %v2291_v51, %s2387_s30  ;;  %v2293_v54 = vpop.eup %2292 }
 0x671   :  { %v636_v55 = vadd.f32 1.0, %v2293_v54  ;;  %v2295_v57 = vpop.eup %2294 }
 0x672   :  { %v660_v58 = vadd.f32 1.0, %v2295_v57 }
 0x673   :  { %2296 = vrcp.f32 %v636_v55 }
 0x674   :  { %2298 = vrcp.f32 %v660_v58 }
 0x67d   :  { %v2297_v59 = vpop.eup %2296 }
 0x67e   :  { %v2299_v62 = vpop.eup %2298  ;;  %v640_v2 = vmul.f32 %v2297_v59, %v2526_v26 }
 0x67f   :  { %v664_v6 = vmul.f32 %v2299_v62, %v2530_v29 }
 0x6de   :  { %v643_v60 = vpop.permute.xlu0 %642 }
 0x6df   :  { %v645_v61 = vmul.f32 %v2297_v59, %v643_v60 }
 0x6e1   :  { %647 = vrot.lane.b32.xlu0 %v645_v61, %s2388_s4 }
 0x6e2   :  { %v667_v63 = vpop.permute.xlu1 %666 }
 0x6e3   :  { %v669_v1 = vmul.f32 %v2299_v62, %v667_v63 }
 0x6e5   :  { %671 = vrot.lane.b32.xlu1 %v669_v1, %s2388_s4 }
 0x753   :  { %v648_v3 = vpop.permute.xlu0 %647 }
 0x754   :  { %v2571_v5 = vadd.f32 %v648_v3, %v640_v2  ;;  %v1868_v2 = vld [vmem:[%s2841_s0 + $0x10] sm:$0xf]  ;;  %v1869_v3 = vld [vmem:[%s2841_s0 + $0xc] sm:$0xf] }
 0x756   :  { %2300 = vtanh.f32 %v2571_v5 }
 0x757   :  { %v672_v7 = vpop.permute.xlu1 %671 }
 0x758   :  { %v2575_v10 = vadd.f32 %v672_v7, %v664_v6 }
 0x75a   :  { %2302 = vtanh.f32 %v2575_v10 }
 0x760   :  { %v2301_v11 = vpop.eup %2300 }
 0x761   :  { %653 = vrot.lane.b32.xlu0 %v2301_v11, %s2387_s30 }
 0x764   :  { %v2303_v14 = vpop.eup %2302 }
 0x765   :  { %677 = vrot.lane.b32.xlu1 %v2303_v14, %s2387_s30 }
 0x7d3   :  { %v654_v15 = vpop.permute.xlu0 %653 }
 0x7d4   :  { %v656_v16 = vmul.f32 %v2297_v59, %v654_v15 }
 0x7d6   :  { %v688_v17 = vrot.slane %v656_v16, %v2488_v50 }
 0x7d7   :  { %v678_v18 = vpop.permute.xlu1 %677 }
 0x7d8   :  { %v680_v19 = vmul.f32 %v2299_v62, %v678_v18  ;;  %689 = vrot.lane.b32.xlu0 %v688_v17, %s2388_s4 }
 0x7da   :  { %v2583_v20 = vrot.slane %v680_v19, %v2488_v50 }
 0x7dc   :  { %784 = vrot.lane.b32.xlu1 %v2583_v20, %s2388_s4 }
 0x84a   :  { %v690_v21 = vpop.permute.xlu0 %689 }
 0x84b   :  { %1858 = vst.msk [vmem:[%s2842_s3 + $0x4] sm:$0x3] %vm233_vm1, %v690_v21  ;;  %2053 = vmatmul.mubr.msk.f32.vlgmr.msra.gmra.mrb[6].mxu0 %vm25_vm2, %v690_v21 }
 0x84c   :  { %2204 = vmatpush3.bf16.msra.mxu0 %v2421_v4  ;;  %2074 = vmatprep.mubr.msk.f32.mxu0 %vm2385_vm0, %v2386_v8 }
 0x84d   :  { %2205 = vmatprep.subr.bf16.mxu0 %v2384_v0 }
 0x84e   :  { %v785_v22 = vpop.permute.xlu1 %784 }
 0x84f   :  { %2064 = vmatmul.mubr.msk.f32.vlgmr.msra.gmra.mrb[6].mxu1 %vm25_vm2, %v785_v22 }
 0x850   :  { %2207 = vmatpush3.bf16.msra.mxu0 %v2445_v12  ;;  %2210 = vmatpush3.bf16.msra.mxu1 %v2436_v9 }
 0x851   :  { %2211 = vmatprep.subr.bf16.mxu1 %v2384_v0  ;;  %2085 = vmatprep.mubr.msk.f32.mxu1 %vm2385_vm0, %v2386_v8 }
 0x852   :  { %2214 = vmatprep.subr.bf16.mxu0 %v2384_v0 }
 0x854   :  { %2213 = vmatpush3.bf16.msra.mxu1 %v2449_v13 }
 0x855   :  { %2220 = vmatprep.subr.bf16.mxu1 %v2384_v0 }
 0x91e   :  { %v779_v25 = vpop.f32.mrb[6].mxu0 }
 0x91f   :  { %v783_v26 = vadd.f32 %v1860_v23, %v779_v25  ;;  %v2054_v27 = vpop.f32.mrb[7].mxu0 }
 0x921   :  { %2304 = vtanh.f32 %v783_v26  ;;  %v1864_v34 = vmul.f32 -1.442695, %v783_v26 }
 0x922   :  { %v854_v29 = vpop.f32.mrb[6].mxu1 }
 0x923   :  { %v861_v30 = vadd.f32 %v859_v28, %v854_v29  ;;  %v2065_v31 = vpop.f32.mrb[7].mxu1 }
 0x925   :  { %2306 = vtanh.f32 %v861_v30  ;;  %v1865_v35 = vmul.f32 -1.442695, %v861_v30 }
 0x926   :  { %2308 = vpow2.f32 %v1864_v34 }
 0x927   :  { %2310 = vpow2.f32 %v1865_v35 }
 0x92b   :  { %v2305_v32 = vpop.eup %2304 }
 0x92c   :  { %871 = vrot.lane.b32.xlu0 %v2305_v32, %s2387_s30 }
 0x92f   :  { %v2307_v33 = vpop.eup %2306 }
 0x930   :  { %895 = vrot.lane.b32.xlu1 %v2307_v33, %s2387_s30  ;;  %v2309_v36 = vpop.eup %2308 }
 0x931   :  { %v865_v38 = vadd.f32 1.0, %v2309_v36  ;;  %v2311_v39 = vpop.eup %2310 }
 0x932   :  { %v889_v40 = vadd.f32 1.0, %v2311_v39 }
 0x933   :  { %2312 = vrcp.f32 %v865_v38 }
 0x934   :  { %2314 = vrcp.f32 %v889_v40 }
 0x93d   :  { %v2313_v41 = vpop.eup %2312 }
 0x93e   :  { %v2315_v44 = vpop.eup %2314  ;;  %v869_v47 = vmul.f32 %v2313_v41, %v2571_v5 }
 0x93f   :  { %v893_v51 = vmul.f32 %v2315_v44, %v2575_v10  ;;  %v1086_v10 = vrot.slane %v1869_v3, 2 }
 0x99e   :  { %v872_v42 = vpop.permute.xlu0 %871 }
 0x99f   :  { %v874_v43 = vmul.f32 %v2313_v41, %v872_v42 }
 0x9a1   :  { %876 = vrot.lane.b32.xlu0 %v874_v43, %s2388_s4 }
 0x9a2   :  { %v896_v45 = vpop.permute.xlu1 %895 }
 0x9a3   :  { %v898_v46 = vmul.f32 %v2315_v44, %v896_v45 }
 0x9a5   :  { %900 = vrot.lane.b32.xlu1 %v898_v46, %s2388_s4 }
 0xa13   :  { %v877_v48 = vpop.permute.xlu0 %876 }
 0xa14   :  { %v2616_v49 = vadd.f32 %v877_v48, %v869_v47  ;;  %v1876_v48 = vld [vmem:[%s2841_s0 + $0x14] sm:$0xf] }
 0xa16   :  { %2316 = vtanh.f32 %v2616_v49 }
 0xa17   :  { %v901_v52 = vpop.permute.xlu1 %900 }
 0xa18   :  { %v2620_v53 = vadd.f32 %v901_v52, %v893_v51 }
 0xa1a   :  { %2318 = vtanh.f32 %v2620_v53 }
 0xa20   :  { %v2317_v54 = vpop.eup %2316 }
 0xa21   :  { %882 = vrot.lane.b32.xlu0 %v2317_v54, %s2387_s30 }
 0xa24   :  { %v2319_v55 = vpop.eup %2318 }
 0xa25   :  { %906 = vrot.lane.b32.xlu1 %v2319_v55, %s2387_s30 }
 0xa93   :  { %v883_v57 = vpop.permute.xlu0 %882 }
 0xa94   :  { %v885_v58 = vmul.f32 %v2313_v41, %v883_v57 }
 0xa96   :  { %v917_v59 = vrot.slane %v885_v58, %v2488_v50 }
 0xa97   :  { %v907_v60 = vpop.permute.xlu1 %906 }
 0xa98   :  { %v909_v61 = vmul.f32 %v2315_v44, %v907_v60  ;;  %918 = vrot.lane.b32.xlu0 %v917_v59, %s2388_s4 }
 0xa9a   :  { %v2628_v62 = vrot.slane %v909_v61, %v2488_v50 }
 0xa9c   :  { %1011 = vrot.lane.b32.xlu1 %v2628_v62, %s2388_s4 }
 0xb0a   :  { %v919_v63 = vpop.permute.xlu0 %918 }
 0xb0b   :  { %1866 = vst.msk [vmem:[%s2842_s3 + $0x6] sm:$0x3] %vm233_vm1, %v919_v63  ;;  %2075 = vmatmul.mubr.msk.f32.vlgmr.msra.gmra.mrb[8].mxu0 %vm25_vm2, %v919_v63 }
 0xb0c   :  { %2216 = vmatpush3.bf16.msra.mxu0 %v2421_v4  ;;  %2096 = vmatprep.mubr.msk.f32.mxu0 %vm2385_vm0, %v2386_v8 }
 0xb0d   :  { %2217 = vmatprep.subr.bf16.mxu0 %v2384_v0 }
 0xb0e   :  { %v1012_v1 = vpop.permute.xlu1 %1011 }
 0xb0f   :  { %2086 = vmatmul.mubr.msk.f32.vlgmr.msra.gmra.mrb[8].mxu1 %vm25_vm2, %v1012_v1 }
 0xb10   :  { %2219 = vmatpush3.bf16.msra.mxu0 %v2445_v12  ;;  %2222 = vmatpush3.bf16.msra.mxu1 %v2436_v9 }
 0xb11   :  { %2223 = vmatprep.subr.bf16.mxu1 %v2384_v0  ;;  %2107 = vmatprep.mubr.msk.f32.mxu1 %vm2385_vm0, %v2386_v8 }
 0xb12   :  { %2226 = vmatprep.subr.bf16.mxu0 %v2384_v0 }
 0xb14   :  { %2225 = vmatpush3.bf16.msra.mxu1 %v2449_v13 }
 0xb15   :  { %2232 = vmatprep.subr.bf16.mxu1 %v2384_v0 }
 0xbde   :  { %v1006_v5 = vpop.f32.mrb[8].mxu0 }
 0xbdf   :  { %v1010_v6 = vadd.f32 %v1868_v2, %v1006_v5  ;;  %v2076_v7 = vpop.f32.mrb[9].mxu0 }
 0xbe1   :  { %2320 = vtanh.f32 %v1010_v6  ;;  %v1872_v18 = vmul.f32 -1.442695, %v1010_v6 }
 0xbe2   :  { %v1081_v11 = vpop.f32.mrb[8].mxu1 }
 0xbe3   :  { %v1088_v14 = vadd.f32 %v1086_v10, %v1081_v11  ;;  %v2087_v15 = vpop.f32.mrb[9].mxu1 }
 0xbe5   :  { %2322 = vtanh.f32 %v1088_v14  ;;  %v1873_v19 = vmul.f32 -1.442695, %v1088_v14 }
 0xbe6   :  { %2324 = vpow2.f32 %v1872_v18 }
 0xbe7   :  { %2326 = vpow2.f32 %v1873_v19 }
 0xbeb   :  { %v2321_v16 = vpop.eup %2320 }
 0xbec   :  { %1098 = vrot.lane.b32.xlu0 %v2321_v16, %s2387_s30 }
 0xbef   :  { %v2323_v17 = vpop.eup %2322 }
 0xbf0   :  { %1122 = vrot.lane.b32.xlu1 %v2323_v17, %s2387_s30  ;;  %v2325_v21 = vpop.eup %2324 }
 0xbf1   :  { %v1092_v22 = vadd.f32 1.0, %v2325_v21  ;;  %v2327_v23 = vpop.eup %2326 }
 0xbf2   :  { %v1116_v24 = vadd.f32 1.0, %v2327_v23 }
 0xbf3   :  { %2328 = vrcp.f32 %v1092_v22 }
 0xbf4   :  { %2330 = vrcp.f32 %v1116_v24 }
 0xbfd   :  { %v2329_v25 = vpop.eup %2328 }
 0xbfe   :  { %v2331_v28 = vpop.eup %2330  ;;  %v1096_v31 = vmul.f32 %v2329_v25, %v2616_v49  ;;  %v1877_v49 = vld [vmem:[%s2841_s0 + $0x8] sm:$0xf] }
 0xbff   :  { %v1120_v34 = vmul.f32 %v2331_v28, %v2620_v53  ;;  %v1311_v54 = vrot.slane %v1877_v49, 2 }
 0xc5e   :  { %v1099_v26 = vpop.permute.xlu0 %1098 }
 0xc5f   :  { %v1101_v27 = vmul.f32 %v2329_v25, %v1099_v26 }
 0xc61   :  { %1103 = vrot.lane.b32.xlu0 %v1101_v27, %s2388_s4 }
 0xc62   :  { %v1123_v29 = vpop.permute.xlu1 %1122 }
 0xc63   :  { %v1125_v30 = vmul.f32 %v2331_v28, %v1123_v29 }
 0xc65   :  { %1127 = vrot.lane.b32.xlu1 %v1125_v30, %s2388_s4 }
 0xcd3   :  { %v1104_v32 = vpop.permute.xlu0 %1103 }
 0xcd4   :  { %v2661_v33 = vadd.f32 %v1104_v32, %v1096_v31 }
 0xcd6   :  { %2332 = vtanh.f32 %v2661_v33 }
 0xcd7   :  { %v1128_v35 = vpop.permute.xlu1 %1127 }
 0xcd8   :  { %v2665_v36 = vadd.f32 %v1128_v35, %v1120_v34 }
 0xcda   :  { %2334 = vtanh.f32 %v2665_v36 }
 0xce0   :  { %v2333_v38 = vpop.eup %2332 }
 0xce1   :  { %1109 = vrot.lane.b32.xlu0 %v2333_v38, %s2387_s30 }
 0xce4   :  { %v2335_v39 = vpop.eup %2334 }
 0xce5   :  { %1133 = vrot.lane.b32.xlu1 %v2335_v39, %s2387_s30 }
 0xd53   :  { %v1110_v40 = vpop.permute.xlu0 %1109 }
 0xd54   :  { %v1112_v41 = vmul.f32 %v2329_v25, %v1110_v40 }
 0xd56   :  { %v1144_v42 = vrot.slane %v1112_v41, %v2488_v50 }
 0xd57   :  { %v1134_v43 = vpop.permute.xlu1 %1133 }
 0xd58   :  { %v1136_v44 = vmul.f32 %v2331_v28, %v1134_v43  ;;  %1145 = vrot.lane.b32.xlu0 %v1144_v42, %s2388_s4 }
 0xd5a   :  { %v2673_v45 = vrot.slane %v1136_v44, %v2488_v50 }
 0xd5c   :  { %1236 = vrot.lane.b32.xlu1 %v2673_v45, %s2388_s4 }
 0xdca   :  { %v2677_v46 = vpop.permute.xlu0 %1145 }
 0xdcb   :  { %2097 = vmatmul.mubr.msk.f32.vlgmr.msra.gmra.mrb[10].mxu0 %vm25_vm2, %v2677_v46 }
 0xdcc   :  { %2228 = vmatpush3.bf16.msra.mxu0 %v2421_v4  ;;  %2118 = vmatprep.mubr.msk.f32.mxu0 %vm2385_vm0, %v2386_v8 }
 0xdcd   :  { %2229 = vmatprep.subr.bf16.mxu0 %v2384_v0 }
 0xdce   :  { %v1237_v47 = vpop.permute.xlu1 %1236 }
 0xdcf   :  { %2108 = vmatmul.mubr.msk.f32.vlgmr.msra.gmra.mrb[10].mxu1 %vm25_vm2, %v1237_v47 }
 0xdd0   :  { %2231 = vmatpush3.bf16.msra.mxu0 %v2445_v12  ;;  %2234 = vmatpush3.bf16.msra.mxu1 %v2436_v9 }
 0xdd1   :  { %2235 = vmatprep.subr.bf16.mxu1 %v2384_v0  ;;  %2129 = vmatprep.mubr.msk.f32.mxu1 %vm2385_vm0, %v2386_v8 }
 0xdd2   :  { %2238 = vmatprep.subr.bf16.mxu0 %v2384_v0 }
 0xdd4   :  { %2237 = vmatpush3.bf16.msra.mxu1 %v2449_v13 }
 0xdd5   :  { %2244 = vmatprep.subr.bf16.mxu1 %v2384_v0 }
 0xe9e   :  { %v1231_v51 = vpop.f32.mrb[10].mxu0 }
 0xe9f   :  { %v1235_v52 = vadd.f32 %v1876_v48, %v1231_v51  ;;  %v2098_v53 = vpop.f32.mrb[11].mxu0 }
 0xea1   :  { %2336 = vtanh.f32 %v1235_v52  ;;  %v1880_v61 = vmul.f32 -1.442695, %v1235_v52 }
 0xea2   :  { %v1306_v55 = vpop.f32.mrb[10].mxu1 }
 0xea3   :  { %v1313_v57 = vadd.f32 %v1311_v54, %v1306_v55  ;;  %v2109_v58 = vpop.f32.mrb[11].mxu1 }
 0xea5   :  { %2338 = vtanh.f32 %v1313_v57  ;;  %v1881_v63 = vmul.f32 -1.442695, %v1313_v57 }
 0xea6   :  { %2340 = vpow2.f32 %v1880_v61 }
 0xea7   :  { %2342 = vpow2.f32 %v1881_v63 }
 0xeab   :  { %v2337_v59 = vpop.eup %2336 }
 0xeac   :  { %1323 = vrot.lane.b32.xlu0 %v2337_v59, %s2387_s30 }
 0xeaf   :  { %v2339_v60 = vpop.eup %2338 }
 0xeb0   :  { %1347 = vrot.lane.b32.xlu1 %v2339_v60, %s2387_s30  ;;  %v2341_v1 = vpop.eup %2340 }
 0xeb1   :  { %v1317_v2 = vadd.f32 1.0, %v2341_v1  ;;  %v2343_v3 = vpop.eup %2342 }
 0xeb2   :  { %v1341_v5 = vadd.f32 1.0, %v2343_v3 }
 0xeb3   :  { %2344 = vrcp.f32 %v1317_v2 }
 0xeb4   :  { %2346 = vrcp.f32 %v1341_v5 }
 0xebd   :  { %v2345_v6 = vpop.eup %2344 }
 0xebe   :  { %v2347_v11 = vpop.eup %2346  ;;  %v1321_v16 = vmul.f32 %v2345_v6, %v2661_v33  ;;  %v1885_v33 = vld [vmem:[%s2841_s0 + $0x4] sm:$0xf] }
 0xebf   :  { %v1345_v19 = vmul.f32 %v2347_v11, %v2665_v36  ;;  %v1536_v36 = vrot.slane %v1885_v33, 2 }
 0xf1e   :  { %v1324_v7 = vpop.permute.xlu0 %1323 }
 0xf1f   :  { %v1326_v10 = vmul.f32 %v2345_v6, %v1324_v7 }
 0xf21   :  { %1328 = vrot.lane.b32.xlu0 %v1326_v10, %s2388_s4 }
 0xf22   :  { %v1348_v14 = vpop.permute.xlu1 %1347 }
 0xf23   :  { %v1350_v15 = vmul.f32 %v2347_v11, %v1348_v14  ;;  %v1892_v14 = vld [vmem:[%s2841_s0 + $0x1c] sm:$0xf] }
 0xf25   :  { %1352 = vrot.lane.b32.xlu1 %v1350_v15, %s2388_s4  ;;  %v1612_v15 = vld [vmem:[%s2841_s0] sm:$0xf] }
 0xf93   :  { %v1329_v17 = vpop.permute.xlu0 %1328 }
 0xf94   :  { %v2705_v18 = vadd.f32 %v1329_v17, %v1321_v16 }
 0xf96   :  { %2348 = vtanh.f32 %v2705_v18 }
 0xf97   :  { %v1353_v21 = vpop.permute.xlu1 %1352 }
 0xf98   :  { %v2709_v22 = vadd.f32 %v1353_v21, %v1345_v19  ;;  %v1761_v19 = vrot.slane %v1612_v15, 2 }
 0xf9a   :  { %2350 = vtanh.f32 %v2709_v22 }
 0xfa0   :  { %v2349_v23 = vpop.eup %2348 }
 0xfa1   :  { %1334 = vrot.lane.b32.xlu0 %v2349_v23, %s2387_s30 }
 0xfa4   :  { %v2351_v24 = vpop.eup %2350 }
 0xfa5   :  { %1358 = vrot.lane.b32.xlu1 %v2351_v24, %s2387_s30 }
0x1013   :  { %v1335_v25 = vpop.permute.xlu0 %1334 }
0x1014   :  { %v1337_v26 = vmul.f32 %v2345_v6, %v1335_v25 }
0x1016   :  { %v1369_v27 = vrot.slane %v1337_v26, %v2488_v50 }
0x1017   :  { %v1359_v28 = vpop.permute.xlu1 %1358 }
0x1018   :  { %v1361_v29 = vmul.f32 %v2347_v11, %v1359_v28  ;;  %1370 = vrot.lane.b32.xlu0 %v1369_v27, %s2388_s4 }
0x101a   :  { %v2717_v30 = vrot.slane %v1361_v29, %v2488_v50 }
0x101c   :  { %1461 = vrot.lane.b32.xlu1 %v2717_v30, %s2388_s4 }
0x108a   :  { %v2721_v31 = vpop.permute.xlu0 %1370 }
0x108b   :  { %2119 = vmatmul.mubr.msk.f32.vlgmr.msra.gmra.mrb[12].mxu0 %vm25_vm2, %v2721_v31 }
0x108c   :  { %2240 = vmatpush3.bf16.msra.mxu0 %v2421_v4  ;;  %2140 = vmatprep.mubr.msk.f32.mxu0 %vm2385_vm0, %v2386_v8  ;;  %v1884_v4 = vld [vmem:[%s2841_s0 + $0x18] sm:$0xf] }
0x108d   :  { %2241 = vmatprep.subr.bf16.mxu0 %v2384_v0 }
0x108e   :  { %v1462_v32 = vpop.permute.xlu1 %1461 }
0x108f   :  { %2130 = vmatmul.mubr.msk.f32.vlgmr.msra.gmra.mrb[12].mxu1 %vm25_vm2, %v1462_v32 }
0x1090   :  { %2243 = vmatpush3.bf16.msra.mxu0 %v2445_v12  ;;  %2246 = vmatpush3.bf16.msra.mxu1 %v2436_v9 }
0x1091   :  { %2247 = vmatprep.subr.bf16.mxu1 %v2384_v0  ;;  %2151 = vmatprep.mubr.msk.f32.mxu1 %vm2385_vm0, %v2386_v8 }
0x1094   :  { %2249 = vmatpush3.bf16.msra.mxu1 %v2449_v13 }
0x115e   :  { %v1456_v34 = vpop.f32.mrb[12].mxu0 }
0x115f   :  { %v1460_v35 = vadd.f32 %v1884_v4, %v1456_v34  ;;  %v2120_v12 = vpop.f32.mrb[13].mxu0 }
0x1161   :  { %2352 = vtanh.f32 %v1460_v35  ;;  %v1888_v39 = vmul.f32 -1.442695, %v1460_v35 }
0x1162   :  { %v1531_v9 = vpop.f32.mrb[12].mxu1 }
0x1163   :  { %v1538_v0 = vadd.f32 %v1536_v36, %v1531_v9  ;;  %v2131_v38 = vpop.f32.mrb[13].mxu1 }
0x1165   :  { %2354 = vtanh.f32 %v1538_v0  ;;  %v1889_v40 = vmul.f32 -1.442695, %v1538_v0 }
0x1166   :  { %2356 = vpow2.f32 %v1888_v39 }
0x1167   :  { %2358 = vpow2.f32 %v1889_v40 }
0x116b   :  { %v2353_v8 = vpop.eup %2352 }
0x116c   :  { %1548 = vrot.lane.b32.xlu0 %v2353_v8, %s2387_s30 }
0x116f   :  { %v2355_v13 = vpop.eup %2354 }
0x1170   :  { %1572 = vrot.lane.b32.xlu1 %v2355_v13, %s2387_s30  ;;  %v2357_v41 = vpop.eup %2356 }
0x1171   :  { %v1542_v42 = vadd.f32 1.0, %v2357_v41  ;;  %v2359_v43 = vpop.eup %2358 }
0x1172   :  { %v1566_v44 = vadd.f32 1.0, %v2359_v43 }
0x1173   :  { %2360 = vrcp.f32 %v1542_v42 }
0x1174   :  { %2362 = vrcp.f32 %v1566_v44 }
0x117d   :  { %v2361_v47 = vpop.eup %2360 }
0x117e   :  { %v2363_v51 = vpop.eup %2362  ;;  %v1546_v54 = vmul.f32 %v2361_v47, %v2705_v18 }
0x117f   :  { %v1570_v58 = vmul.f32 %v2363_v51, %v2709_v22 }
0x11de   :  { %v1549_v48 = vpop.permute.xlu0 %1548 }
0x11df   :  { %v1551_v49 = vmul.f32 %v2361_v47, %v1549_v48 }
0x11e1   :  { %1553 = vrot.lane.b32.xlu0 %v1551_v49, %s2388_s4 }
0x11e2   :  { %v1573_v52 = vpop.permute.xlu1 %1572 }
0x11e3   :  { %v1575_v53 = vmul.f32 %v2363_v51, %v1573_v52 }
0x11e5   :  { %1577 = vrot.lane.b32.xlu1 %v1575_v53, %s2388_s4 }
0x1253   :  { %v1554_v55 = vpop.permute.xlu0 %1553 }
0x1254   :  { %v1556_v57 = vadd.f32 %v1554_v55, %v1546_v54 }
0x1256   :  { %2364 = vtanh.f32 %v1556_v57 }
0x1257   :  { %v1578_v59 = vpop.permute.xlu1 %1577 }
0x1258   :  { %v1580_v60 = vadd.f32 %v1578_v59, %v1570_v58 }
0x125a   :  { %2366 = vtanh.f32 %v1580_v60 }
0x1260   :  { %v2365_v61 = vpop.eup %2364 }
0x1261   :  { %1559 = vrot.lane.b32.xlu0 %v2365_v61, %s2387_s30 }
0x1264   :  { %v2367_v63 = vpop.eup %2366 }
0x1265   :  { %1583 = vrot.lane.b32.xlu1 %v2367_v63, %s2387_s30 }
0x12d3   :  { %v1560_v1 = vpop.permute.xlu0 %1559 }
0x12d4   :  { %v1562_v2 = vmul.f32 %v2361_v47, %v1560_v1 }
0x12d6   :  { %v1594_v3 = vrot.slane %v1562_v2, %v2488_v50 }
0x12d7   :  { %v1584_v5 = vpop.permute.xlu1 %1583 }
0x12d8   :  { %v1586_v6 = vmul.f32 %v2363_v51, %v1584_v5  ;;  %1595 = vrot.lane.b32.xlu0 %v1594_v3, %s2388_s4 }
0x12da   :  { %v1606_v7 = vrot.slane %v1586_v6, %v2488_v50 }
0x12dc   :  { %1686 = vrot.lane.b32.xlu1 %v1606_v7, %s2388_s4 }
0x134a   :  { %v2754_v10 = vpop.permute.xlu0 %1595 }
0x134b   :  { %2141 = vmatmul.mubr.msk.f32.vlgmr.msra.gmra.mrb[14].mxu0 %vm25_vm2, %v2754_v10 }
0x134e   :  { %v1687_v11 = vpop.permute.xlu1 %1686 }
0x134f   :  { %2152 = vmatmul.mubr.msk.f32.vlgmr.msra.gmra.mrb[14].mxu1 %vm25_vm2, %v1687_v11 }
0x141e   :  { %v1681_v16 = vpop.f32.mrb[14].mxu0 }
0x141f   :  { %v1685_v17 = vadd.f32 %v1892_v14, %v1681_v16  ;;  %v2142_v18 = vpop.f32.mrb[15].mxu0 }
0x1421   :  { %2368 = vtanh.f32 %v1685_v17  ;;  %v1895_v26 = vmul.f32 -1.442695, %v1685_v17 }
0x1422   :  { %v1756_v21 = vpop.f32.mrb[14].mxu1 }
0x1423   :  { %v1763_v22 = vadd.f32 %v1761_v19, %v1756_v21  ;;  %v2153_v23 = vpop.f32.mrb[15].mxu1 }
0x1425   :  { %2370 = vtanh.f32 %v1763_v22  ;;  %v1896_v27 = vmul.f32 -1.442695, %v1763_v22 }
0x1426   :  { %2372 = vpow2.f32 %v1895_v26 }
0x1427   :  { %2374 = vpow2.f32 %v1896_v27 }
0x142b   :  { %v2369_v24 = vpop.eup %2368 }
0x142c   :  { %1773 = vrot.lane.b32.xlu0 %v2369_v24, %s2387_s30 }
0x142f   :  { %v2371_v25 = vpop.eup %2370 }
0x1430   :  { %1797 = vrot.lane.b32.xlu1 %v2371_v25, %s2387_s30  ;;  %v2373_v28 = vpop.eup %2372 }
0x1431   :  { %v1767_v29 = vadd.f32 1.0, %v2373_v28  ;;  %v2375_v32 = vpop.eup %2374 }
0x1432   :  { %v1791_v4 = vadd.f32 1.0, %v2375_v32 }
0x1433   :  { %2376 = vrcp.f32 %v1767_v29 }
0x1434   :  { %2378 = vrcp.f32 %v1791_v4 }
0x143d   :  { %v2377_v33 = vpop.eup %2376 }
0x143e   :  { %v2379_v12 = vpop.eup %2378  ;;  %v1771_v0 = vmul.f32 %v2377_v33, %v1556_v57 }
0x143f   :  { %v1795_v13 = vmul.f32 %v2379_v12, %v1580_v60 }
0x149e   :  { %v1774_v34 = vpop.permute.xlu0 %1773 }
0x149f   :  { %v1776_v35 = vmul.f32 %v2377_v33, %v1774_v34 }
0x14a1   :  { %1778 = vrot.lane.b32.xlu0 %v1776_v35, %s2388_s4 }
0x14a2   :  { %v1798_v36 = vpop.permute.xlu1 %1797 }
0x14a3   :  { %v1800_v9 = vmul.f32 %v2379_v12, %v1798_v36 }
0x14a5   :  { %1802 = vrot.lane.b32.xlu1 %v1800_v9, %s2388_s4 }
0x1513   :  { %v1779_v38 = vpop.permute.xlu0 %1778 }
0x1514   :  { %v1781_v8 = vadd.f32 %v1779_v38, %v1771_v0 }
0x1516   :  { %2380 = vtanh.f32 %v1781_v8 }
0x1517   :  { %v1803_v39 = vpop.permute.xlu1 %1802 }
0x1518   :  { %v1805_v40 = vadd.f32 %v1803_v39, %v1795_v13 }
0x151a   :  { %2382 = vtanh.f32 %v1805_v40 }
0x1520   :  { %v2381_v41 = vpop.eup %2380 }
0x1521   :  { %1784 = vrot.lane.b32.xlu0 %v2381_v41, %s2387_s30 }
0x1524   :  { %v2383_v42 = vpop.eup %2382 }
0x1525   :  { %1808 = vrot.lane.b32.xlu1 %v2383_v42, %s2387_s30  ;;  %243 = vrot.lane.b32.xlu0 %v2493_v56, %s2387_s30 }
0x1529   :  { %473 = vrot.lane.b32.xlu1 %v2538_v37, %s2387_s30  ;;  %702 = vrot.lane.b32.xlu0 %v2583_v20, %s2387_s30 }
0x152d   :  { %931 = vrot.lane.b32.xlu1 %v2628_v62, %s2387_s30  ;;  %1157 = vrot.lane.b32.xlu0 %v2673_v45, %s2387_s30 }
0x1531   :  { %1382 = vrot.lane.b32.xlu1 %v2717_v30, %s2387_s30  ;;  %1607 = vrot.lane.b32.xlu0 %v1606_v7, %s2387_s30 }
0x1593   :  { %v1785_v43 = vpop.permute.xlu0 %1784 }
0x1594   :  { %v1787_v44 = vmul.f32 %v2377_v33, %v1785_v43 }
0x1596   :  { %v1819_v56 = vrot.slane %v1787_v44, %v2488_v50 }
0x1597   :  { %v1809_v37 = vpop.permute.xlu1 %1808  ;;  %v244_v47 = vpop.permute.xlu0 %243 }
0x1598   :  { %v1811_v48 = vmul.f32 %v2379_v12, %v1809_v37  ;;  %1843 = vst.msk [vmem:[%s2842_s3 + $0xe] sm:$0x3] %vm247_vm3, %v244_v47  ;;  %1820 = vrot.lane.b32.xlu1 %v1819_v56, %s2388_s4 }
0x159a   :  { %v1831_v20 = vrot.slane %v1811_v48, %v2488_v50 }
0x159b   :  { %v474_v62 = vpop.permute.xlu1 %473  ;;  %v703_v45 = vpop.permute.xlu0 %702 }
0x159c   :  { %1851 = vst.msk [vmem:[%s2842_s3 + $0xc] sm:$0x3] %vm247_vm3, %v474_v62  ;;  %1859 = vst.msk [vmem:[%s2842_s3 + $0xa] sm:$0x3] %vm247_vm3, %v703_v45  ;;  %1832 = vrot.lane.b32.xlu0 %v1831_v20, %s2387_s30 }
0x159d   :  { %1890 = vst.msk [vmem:[%s2842_s3 + $0xc] sm:$0x3] %vm233_vm1, %v2754_v10  ;;  %1882 = vst.msk [vmem:[%s2842_s3 + $0xa] sm:$0x3] %vm233_vm1, %v2721_v31 }
0x159f   :  { %v932_v50 = vpop.permute.xlu1 %931  ;;  %v1158_v30 = vpop.permute.xlu0 %1157 }
0x15a0   :  { %1867 = vst.msk [vmem:[%s2842_s3 + $0x8] sm:$0x3] %vm247_vm3, %v932_v50  ;;  %1875 = vst.msk [vmem:[%s2842_s3 + $0x6] sm:$0x3] %vm247_vm3, %v1158_v30 }
0x15a1   :  { %1874 = vst.msk [vmem:[%s2842_s3 + $0x8] sm:$0x3] %vm233_vm1, %v2677_v46 }
0x15a3   :  { %v1383_v49 = vpop.permute.xlu1 %1382  ;;  %v1608_v31 = vpop.permute.xlu0 %1607 }
0x15a4   :  { %1883 = vst.msk [vmem:[%s2842_s3 + $0x4] sm:$0x3] %vm247_vm3, %v1383_v49  ;;  %1891 = vst.msk [vmem:[%s2842_s3 + $0x2] sm:$0x3] %vm247_vm3, %v1608_v31 }
0x160a   :  { %v1821_v51 = vpop.permute.xlu1 %1820 }
0x160b   :  { %1897 = vst.msk [vmem:[%s2842_s3 + $0xe] sm:$0x3] %vm233_vm1, %v1821_v51 }
0x160e   :  { %v1833_v52 = vpop.permute.xlu0 %1832 }
0x160f   :  { %1835 = vst.msk [vmem:[%s2842_s3] sm:$0x3] %vm247_vm3, %v1833_v52 }

// kernel: forward.7
= control target key start
LH: loop header
LB: loop body
LE: loop exit
PB: predicated region body
PF: predicated region fallthrough
CT: control target
= control target key end

     0   :  { %v4488_v3 = vmov 0.0   ;;  %vm120_vm0 = vcmask 1041409   ;;  %vm123_vm1 = vcmask 1042434   ;;  %vm126_vm2 = vcmask 1043459   ;;  %s4491_s29 = smov 120   ;;  %s5427_s30 = smov 88   ;;  %s5400_s1 = inlined_call_operand.vmem [shape: f32[64,192], index: 1, kind: input, shape index: {}]   ;;  %s5401_s0 = inlined_call_operand.vmem [shape: f32[8,2,64], index: 0, kind: input, shape index: {}]   ;;  %s5402_s2 = inlined_call_operand.vmem [shape: f32[1,192], index: 2, kind: input, shape index: {}]   ;;  %s5403_s3 = inlined_call_operand.vmem [shape: f32[64,64], index: 3, kind: input, shape index: {}]   ;;  %s5404_s5 = inlined_call_operand.vmem [shape: f32[64,32], index: 5, kind: input, shape index: {}]   ;;  %s5405_s4 = inlined_call_operand.vmem [shape: f32[1,64], index: 4, kind: input, shape index: {}]   ;;  %s5406_s6 = inlined_call_operand.vmem [shape: f32[1,32], index: 6, kind: input, shape index: {}]   ;;  %s5407_s9 = inlined_call_operand.vmem [shape: f32[32,16], index: 9, kind: input, shape index: {}]   ;;  %s5408_s7 = inlined_call_operand.vmem [shape: f32[1,32], index: 7, kind: input, shape index: {}]   ;;  %s5409_s8 = inlined_call_operand.vmem [shape: f32[1,32], index: 8, kind: input, shape index: {}]   ;;  %s5410_s11 = inlined_call_operand.vmem [shape: f32[16,1], index: 11, kind: input, shape index: {}]   ;;  %s5411_s12 = inlined_call_operand.<no memory space> [shape: f32[1,1], index: 12, kind: input, shape index: {}]   ;;  %s5412_s10 = inlined_call_operand.vmem [shape: f32[1,16], index: 10, kind: input, shape index: {}]   ;;  %s5413_s13 = inlined_call_operand.vmem [shape: f32[64,32], index: 13, kind: input, shape index: {}]   ;;  %s5414_s15 = inlined_call_operand.vmem [shape: f32[32,128], index: 15, kind: input, shape index: {}]   ;;  %s5415_s14 = inlined_call_operand.vmem [shape: f32[1,32], index: 14, kind: input, shape index: {}]   ;;  %s5416_s17 = inlined_call_operand.vmem [shape: f32[128,64], index: 17, kind: input, shape index: {}]   ;;  %s5417_s19 = inlined_call_operand.vmem [shape: f32[2,1], index: 19, kind: output, shape index: {0}]   ;;  %s5418_s16 = inlined_call_operand.vmem [shape: f32[1,128], index: 16, kind: input, shape index: {}]   ;;  %s5419_s18 = inlined_call_operand.vmem [shape: f32[1,64], index: 18, kind: input, shape index: {}]   ;;  %s5420_s20 = inlined_call_operand.vmem [shape: f32[2,64], index: 20, kind: output, shape index: {1}]  }
   0x1   :  { %5433 = sst [smem:[#allocation3_spill]] %s5400_s1  ;;  %207 = vmatprep.mubr.f32.mxu1 %v4488_v3  ;;  %4001 = vmatprep.subr.mxu0 %v4488_v3  ;;  %vm129_vm3 = vcmask 1044484   ;;  %vm132_vm4 = vcmask 1045509   ;;  %vm135_vm5 = vcmask 1046534   ;;  %vm138_vm6 = vcmask 1047559   ;;  %s4493_s1 = smov 112  }
   0x2   :  { %5434 = sst [smem:[#allocation4_spill]] %s5401_s0  ;;  %s5438_s23 = sld [smem:[#allocation3_spill]]  ;;  %vm140_vm7 = vcmask 523264   ;;  %v101_v47 = vlaneseq  ;;  %vm4489_vm8 = vmmov 0   ;;  %vm269_vm9 = vcmask 64512  }
   0x3   :  { %5435 = sst [smem:[#allocation5_spill]] %s5402_s2  ;;  %s5439_s24 = sld [smem:[#allocation4_spill]]  ;;  %4003 = vmatprep.mubr.msk.f32.mxu0 %vm4489_vm8, %v4488_v3  ;;  %vm1577_vm10 = vcmask 130048   ;;  %vm1579_vm11 = vcmask 195584   ;;  %vm1581_vm12 = vcmask 261120   ;;  %vm1583_vm13 = vcmask 326656  }
   0x4   :  { %5436 = sst [smem:[#allocation6_spill]] %s5403_s3  ;;  %v4742_v48 = vshrl.u32 %v101_v47, 7  ;;  %s5440_s28 = sld [smem:[#allocation5_spill]]  ;;  %vm1585_vm14 = vcmask 392192   ;;  %vm1587_vm15 = vcmask 457728  }
   0x5   :  { %5437 = sst [smem:[#allocation7_spill]] %s5404_s5  ;;  %s4490_s5 = smov 104  }
   0x6   :  { %v103_v49 = vsub.s32 0, %v4742_v48  ;;  %s4494_s21 = smov 64   ;;  %s5431_s0 = smov 72  }
   0x7   :  { %s5425_s22 = smov 80   ;;  %s4497_s2 = smov 96  }
   0x8   :  { %v75_v0 = vld [vmem:[%s5438_s23 + $0x8] sm:$0xff]  ;;  %v77_v1 = vld [vmem:[%s5438_s23 + $0x18] sm:$0xff]  ;;  %v74_v2 = vld [vmem:[%s5438_s23] sm:$0xff]  ;;  %s5429_s25 = smov 8   ;;  %s5430_s3 = smov 24  }
   0x9   :  { %v4622_v4 = vpack.c.bf16 %v77_v1, %v75_v0  ;;  %v76_v5 = vld [vmem:[%s5438_s23 + $0x10] sm:$0xff]  ;;  %v79_v6 = vld [vmem:[%s5438_s23 + $0x28] sm:$0xff]  ;;  %v81_v7 = vld [vmem:[%s5438_s23 + $0x38] sm:$0xff]  ;;  %s4503_s27 = smov 16  }
   0xa   :  { %v4633_v8 = vpack.c.bf16 %v76_v5, %v74_v2  ;;  %v4635_v9 = vpack.c.bf16 %v81_v7, %v79_v6  ;;  %v78_v10 = vld [vmem:[%s5438_s23 + $0x20] sm:$0xff]  ;;  %v80_v11 = vld [vmem:[%s5438_s23 + $0x30] sm:$0xff]  ;;  %v83_v12 = vld [vmem:[%s5438_s23 + $0x48] sm:$0xff] }
   0xb   :  { %4282 = vmatprep.subr.bf16.mxu1 %v4622_v4  ;;  %v85_v13 = vld [vmem:[%s5438_s23 + $0x58] sm:$0xff]  ;;  %v4651_v14 = vpack.c.bf16 %v80_v11, %v78_v10  ;;  %v82_v15 = vld [vmem:[%s5438_s23 + $0x40] sm:$0xff]  ;;  %v84_v16 = vld [vmem:[%s5438_s23 + $0x50] sm:$0xff] }
   0xc   :  { %4284 = vmatpush1.bf16.msra.mxu1 %v4633_v8  ;;  %v4660_v17 = vpack.c.bf16 %v85_v13, %v83_v12  ;;  %v87_v18 = vld [vmem:[%s5438_s23 + $0x68] sm:$0xff]  ;;  %v89_v19 = vld [vmem:[%s5438_s23 + $0x78] sm:$0xff]  ;;  %v4671_v20 = vld [vmem:[%s5439_s24 + $0x2] sm:$0x3]  ;;  %v4699_v26 = vpack.c.bf16 %v84_v16, %v82_v15 }
   0xd   :  { %4286 = vmatprep.subr.bf16.mxu1 %v4635_v9  ;;  %v4676_v21 = vld [vmem:[%s5439_s24 + $0x4] sm:$0x3]  ;;  %v4681_v22 = vld [vmem:[%s5439_s24 + $0x6] sm:$0x3]  ;;  %v4686_v23 = vld [vmem:[%s5439_s24 + $0x8] sm:$0x3]  ;;  %v4710_v31 = vpack.c.bf16 %v89_v19, %v87_v18 }
   0xe   :  { %v4691_v24 = vld [vmem:[%s5439_s24] sm:$0x3]  ;;  %v4696_v25 = vld [vmem:[%s5439_s24 + $0xa] sm:$0x3]  ;;  %v4704_v27 = vld [vmem:[%s5439_s24 + $0xc] sm:$0x3] }
   0xf   :  { %v119_v28 = vrot.slane %v4671_v20, 7  ;;  %v122_v29 = vrot.slane %v4676_v21, 6  ;;  %v125_v30 = vrot.slane %v4681_v22, 5  ;;  %v86_v32 = vld [vmem:[%s5438_s23 + $0x60] sm:$0xff]  ;;  %v88_v33 = vld [vmem:[%s5438_s23 + $0x70] sm:$0xff]  ;;  %v128_v35 = vrot.slane %v4686_v23, 4 }
  0x10   :  { %4288 = vmatpush1.bf16.msra.mxu1 %v4651_v14  ;;  %v4721_v34 = vld [vmem:[%s5439_s24 + $0xe] sm:$0x3]  ;;  %v131_v37 = vrot.slane %v4696_v25, 3  ;;  %v134_v39 = vrot.slane %v4704_v27, 2  ;;  %v4730_v40 = vpack.c.bf16 %v88_v33, %v86_v32  ;;  %v4748_v50 = vld [vmem:[%s5440_s28] sm:$0x3] }
  0x11   :  { %4290 = vmatprep.subr.bf16.mxu1 %v4660_v17  ;;  %v121_v36 = vsel %vm120_vm0, %v119_v28, %v4691_v24  ;;  %v137_v42 = vrot.slane %v4721_v34, 1  ;;  %v4751_v51 = vrot.slane %v4748_v50, %v103_v49  ;;  %v107_v18 = vsub.s32 1, %v4742_v48  ;;  %s5441_s23 = sld [smem:[#allocation6_spill]]  ;;  %s4502_s24 = smov 56  }
  0x12   :  { %v124_v38 = vsel %vm123_vm1, %v122_v29, %v121_v36 }
  0x13   :  { %v127_v41 = vsel %vm126_vm2, %v125_v30, %v124_v38  ;;  %v4818_v29 = vrot.slane %v4748_v50, %v107_v18 }
  0x14   :  { %4292 = vmatpush1.bf16.msra.mxu1 %v4699_v26  ;;  %v130_v43 = vsel %vm129_vm3, %v128_v35, %v127_v41 }
  0x15   :  { %4294 = vmatprep.subr.bf16.mxu1 %v4710_v31  ;;  %v133_v44 = vsel %vm132_vm4, %v131_v37, %v130_v43 }
  0x16   :  { %v136_v45 = vsel %vm135_vm5, %v134_v39, %v133_v44 }
  0x17   :  { %v139_v46 = vsel %vm138_vm6, %v137_v42, %v136_v45 }
  0x18   :  { %4296 = vmatpush1.bf16.msra.mxu1 %v4730_v40 }
  0x19   :  { %3981 = vmatprep.subr.mxu1 %v4488_v3 }
  0x1b   :  { %3784 = vmatmul.mubr.msk.f32.vlgmr.msra.gmra.mrb[0].mxu1 %vm140_vm7, %v139_v46 }
  0x1c   :  { %3983 = vmatprep.mubr.msk.f32.mxu1 %vm4489_vm8, %v4488_v3 }
  0xee   :  { %v209_v52 = vpop.f32.mrb[0].mxu1 }
  0xef   :  { %v210_v53 = vadd.f32 %v209_v52, %v4751_v51  ;;  %v4758_v54 = vpop.f32.mrb[1].mxu1 }
  0xf0   :  { %v4827_v32 = vadd.f32 %v4758_v54, %v4818_v29 }
  0xf1   :  { %235 = vrot.lane.b32.xlu1 %v210_v53, %s4490_s5  ;;  %231 = vrot.lane.b32.xlu0 %v210_v53, %s4491_s29  ;;  %v214_v55 = vmul.f32 0.35355338, %v210_v53 }
  0xf5   :  { %239 = vrot.lane.b32.xlu1 %v210_v53, %s5427_s30  ;;  %233 = vrot.lane.b32.xlu0 %v210_v53, %s4493_s1 }
  0xf9   :  { %267 = vrot.lane.b32.xlu1 %v210_v53, %s4494_s21  ;;  %243 = vrot.lane.b32.xlu0 %v210_v53, %s5431_s0 }
  0xfd   :  { %216 = vrot.lane.b32.xlu1 %v214_v55, %s4491_s29 }
 0x101   :  { %218 = vrot.lane.b32.xlu1 %v214_v55, %s4493_s1 }
 0x105   :  { %220 = vrot.lane.b32.xlu1 %v214_v55, %s4490_s5 }
 0x109   :  { %224 = vrot.lane.b32.xlu1 %v214_v55, %s5427_s30 }
 0x10d   :  { %228 = vrot.lane.b32.xlu1 %v214_v55, %s5431_s0 }
 0x111   :  { %241 = vrot.lane.b32.xlu1 %v210_v53, %s5425_s22 }
 0x115   :  { %222 = vrot.lane.b32.xlu1 %v214_v55, %s4497_s2 }
 0x119   :  { %226 = vrot.lane.b32.xlu1 %v214_v55, %s5425_s22 }
 0x163   :  { %v236_v56 = vpop.permute.xlu1 %235  ;;  %v232_v57 = vpop.permute.xlu0 %231 }
 0x164   :  { %344 = vrot.lane.b32.xlu0 %v232_v57, %s4494_s21 }
 0x167   :  { %v240_v58 = vpop.permute.xlu1 %239  ;;  %v234_v59 = vpop.permute.xlu0 %233 }
 0x168   :  { %420 = vrot.lane.b32.xlu0 %v234_v59, %s4494_s21 }
 0x16b   :  { %v268_v60 = vpop.permute.xlu1 %267  ;;  %v244_v61 = vpop.permute.xlu0 %243 }
 0x16c   :  { %3982 = vmatpush3.xpose.msk.msra.mxu1 %vm269_vm9, %v268_v60  ;;  %496 = vrot.lane.b32.xlu0 %v236_v56, %s4494_s21 }
 0x16d   :  { %3986 = vmatprep.subr.mxu1 %v4488_v3 }
 0x16f   :  { %3984 = vmatmul.mubr.msk.f32.vlgmr.msra.gmra.mrb[2].mxu1 %vm269_vm9, %v214_v55  ;;  %v217_v62 = vpop.permute.xlu1 %216 }
 0x170   :  { %648 = vrot.lane.b32.xlu0 %v240_v58, %s4494_s21  ;;  %3988 = vmatprep.mubr.msk.f32.mxu1 %vm4489_vm8, %v4488_v3 }
 0x173   :  { %v219_v63 = vpop.permute.xlu1 %218 }
 0x174   :  { %800 = vrot.lane.b32.xlu0 %v244_v61, %s4494_s21 }
 0x177   :  { %v221_v2 = vpop.permute.xlu1 %220 }
 0x178   :  { %237 = vrot.lane.b32.xlu0 %v210_v53, %s4497_s2 }
 0x17b   :  { %v225_v6 = vpop.permute.xlu1 %224 }
 0x17f   :  { %v229_v11 = vpop.permute.xlu1 %228 }
 0x183   :  { %v242_v13 = vpop.permute.xlu1 %241 }
 0x187   :  { %v223_v28 = vpop.permute.xlu1 %222 }
 0x18b   :  { %v227_v33 = vpop.permute.xlu1 %226 }
 0x1d6   :  { %v345_v0 = vpop.permute.xlu0 %344 }
 0x1d7   :  { %3987 = vmatpush3.xpose.msk.msra.mxu1 %vm269_vm9, %v345_v0 }
 0x1d8   :  { %3991 = vmatprep.subr.mxu1 %v4488_v3 }
 0x1da   :  { %v421_v1 = vpop.permute.xlu0 %420  ;;  %3989 = vmatmul.mubr.msk.f32.vlgmr.msra.gmra.mrb[4].mxu1 %vm269_vm9, %v217_v62 }
 0x1db   :  { %3992 = vmatpush3.xpose.msk.msra.mxu1 %vm269_vm9, %v421_v1  ;;  %3993 = vmatprep.mubr.msk.f32.mxu1 %vm4489_vm8, %v4488_v3 }
 0x1dc   :  { %3996 = vmatprep.subr.mxu1 %v4488_v3 }
 0x1de   :  { %v497_v5 = vpop.permute.xlu0 %496  ;;  %3994 = vmatmul.mubr.msk.f32.vlgmr.msra.gmra.mrb[6].mxu1 %vm269_vm9, %v219_v63 }
 0x1df   :  { %3997 = vmatpush3.xpose.msk.msra.mxu1 %vm269_vm9, %v497_v5  ;;  %3998 = vmatprep.mubr.msk.f32.mxu1 %vm4489_vm8, %v4488_v3 }
 0x1e0   :  { %4006 = vmatprep.subr.mxu1 %v4488_v3 }
 0x1e2   :  { %v649_v7 = vpop.permute.xlu0 %648  ;;  %3999 = vmatmul.mubr.msk.f32.vlgmr.msra.gmra.mrb[8].mxu1 %vm269_vm9, %v221_v2 }
 0x1e3   :  { %4007 = vmatpush3.xpose.msk.msra.mxu1 %vm269_vm9, %v649_v7  ;;  %4008 = vmatprep.mubr.msk.f32.mxu1 %vm4489_vm8, %v4488_v3 }
 0x1e4   :  { %4016 = vmatprep.subr.mxu1 %v4488_v3 }
 0x1e6   :  { %v801_v10 = vpop.permute.xlu0 %800  ;;  %4009 = vmatmul.mubr.msk.f32.vlgmr.msra.gmra.mrb[10].mxu1 %vm269_vm9, %v225_v6 }
 0x1e7   :  { %4017 = vmatpush3.xpose.msk.msra.mxu1 %vm269_vm9, %v801_v10  ;;  %4018 = vmatprep.mubr.msk.f32.mxu1 %vm4489_vm8, %v4488_v3 }
 0x1e8   :  { %4026 = vmatprep.subr.mxu1 %v4488_v3 }
 0x1ea   :  { %v238_v12 = vpop.permute.xlu0 %237  ;;  %4019 = vmatmul.mubr.msk.f32.vlgmr.msra.gmra.mrb[12].mxu1 %vm269_vm9, %v229_v11 }
 0x1eb   :  { %572 = vrot.lane.b32.xlu0 %v238_v12, %s4494_s21  ;;  %4028 = vmatprep.mubr.msk.f32.mxu1 %vm4489_vm8, %v4488_v3 }
 0x1ef   :  { %724 = vrot.lane.b32.xlu0 %v242_v13, %s4494_s21 }
 0x242   :  { %v4812_v15 = vpop.f32.mrb[2].mxu1 }
 0x243   :  { %v3985_v16 = vpop.f32.mrb[3].mxu1  ;;  %v876_v46 = vsel %vm269_vm9, %v4812_v15, -inf }
 0x25d   :  { %v573_v19 = vpop.permute.xlu0 %572 }
 0x25e   :  { %4002 = vmatpush3.xpose.msk.msra.mxu0 %vm269_vm9, %v573_v19 }
 0x25f   :  { %4011 = vmatprep.subr.mxu0 %v4488_v3 }
 0x261   :  { %v725_v30 = vpop.permute.xlu0 %724  ;;  %4004 = vmatmul.mubr.msk.f32.vlgmr.msra.gmra.mrb[0].mxu0 %vm269_vm9, %v223_v28 }
 0x262   :  { %4012 = vmatpush3.xpose.msk.msra.mxu0 %vm269_vm9, %v725_v30  ;;  %4013 = vmatprep.mubr.msk.f32.mxu0 %vm4489_vm8, %v4488_v3 }
 0x263   :  { %4021 = vmatprep.subr.mxu0 %v4488_v3 }
 0x265   :  { %4014 = vmatmul.mubr.msk.f32.vlgmr.msra.gmra.mrb[2].mxu0 %vm269_vm9, %v227_v33 }
 0x266   :  { %4022 = vmatpush3.msra.mxu0 %v4827_v32  ;;  %4023 = vmatprep.mubr.msk.f32.mxu0 %vm4489_vm8, %v4488_v3 }
 0x267   :  { %4031 = vmatprep.subr.mxu0 %v4488_v3 }
 0x2ad   :  { %v416_v35 = vpop.f32.mrb[4].mxu1 }
 0x2ae   :  { %v3990_v36 = vpop.f32.mrb[5].mxu1  ;;  %v879_v37 = vsel %vm269_vm9, %v416_v35, -inf }
 0x2af   :  { %880 = vmax.xlane.f32.xlu0 %v879_v37 }
 0x2b1   :  { %v4835_v38 = vpop.f32.mrb[6].mxu1 }
 0x2b2   :  { %v3995_v39 = vpop.f32.mrb[7].mxu1  ;;  %v882_v52 = vsel %vm269_vm9, %v4835_v38, -inf }
 0x2b5   :  { %v568_v41 = vpop.f32.mrb[8].mxu1 }
 0x2b6   :  { %v4000_v42 = vpop.f32.mrb[9].mxu1  ;;  %v885_v43 = vsel %vm269_vm9, %v568_v41, -inf }
 0x2b7   :  { %886 = vmax.xlane.f32.xlu1 %v885_v43 }
 0x2b9   :  { %v720_v44 = vpop.f32.mrb[10].mxu1 }
 0x2ba   :  { %v4010_v45 = vpop.f32.mrb[11].mxu1  ;;  %v891_v47 = vsel %vm269_vm9, %v720_v44, -inf }
 0x2bb   :  { %877 = vmax.xlane.f32.xlu1 %v876_v46  ;;  %892 = vmax.xlane.f32.xlu0 %v891_v47  ;;  %v1681_v45 = vrot.slane %v4681_v22, 6  ;;  %v1683_v46 = vrot.slane %v4686_v23, 5  ;;  %v1685_v47 = vrot.slane %v4696_v25, 4 }
 0x2bd   :  { %v872_v48 = vpop.f32.mrb[12].mxu1 }
 0x2be   :  { %v4020_v49 = vpop.f32.mrb[13].mxu1  ;;  %v897_v50 = vsel %vm269_vm9, %v872_v48, -inf }
 0x2bf   :  { %898 = vmax.xlane.f32.xlu0 %v897_v50  ;;  %v1687_v49 = vrot.slane %v4704_v27, 3  ;;  %v1689_v50 = vrot.slane %v4721_v34, 2 }
 0x2c3   :  { %883 = vmax.xlane.f32.xlu0 %v882_v52 }
 0x334   :  { %v4844_v53 = vpop.f32.mrb[0].mxu0 }
 0x335   :  { %v4005_v54 = vpop.f32.mrb[1].mxu0  ;;  %v888_v55 = vsel %vm269_vm9, %v4844_v53, -inf }
 0x336   :  { %889 = vmax.xlane.f32.xlu1 %v888_v55 }
 0x338   :  { %v4848_v56 = vpop.f32.mrb[2].mxu0 }
 0x339   :  { %v4015_v57 = vpop.f32.mrb[3].mxu0  ;;  %v894_v58 = vsel %vm269_vm9, %v4848_v56, -inf }
 0x33a   :  { %895 = vmax.xlane.f32.xlu0 %v894_v58 }
 0x33c   :  { %v881_v59 = vpop.xlane.xlu0 %880 }
 0x33d   :  { %v901_v7 = vsub.f32 %v416_v35, %v881_v59 }
 0x33f   :  { %v910_v10 = vmul.f32 1.442695, %v901_v7 }
 0x344   :  { %v887_v60 = vpop.xlane.xlu1 %886 }
 0x345   :  { %v903_v61 = vsub.f32 %v568_v41, %v887_v60 }
 0x347   :  { %v914_v62 = vmul.f32 1.442695, %v903_v61  ;;  %246 = vrot.lane.b32.xlu1 %v4827_v32, %s4491_s29 }
 0x348   :  { %v893_v63 = vpop.xlane.xlu0 %892  ;;  %v878_v33 = vpop.xlane.xlu1 %877 }
 0x349   :  { %4418 = vpow2.f32 %v914_v62  ;;  %v905_v11 = vsub.f32 %v720_v44, %v893_v63  ;;  %v900_v35 = vsub.f32 %v4812_v15, %v878_v33  ;;  %v1677_v15 = vrot.slane %v4691_v24, 1 }
 0x34a   :  { %v1679_v44 = vrot.slane %v4676_v21, 7 }
 0x34b   :  { %v918_v16 = vmul.f32 1.442695, %v905_v11  ;;  %v908_v36 = vmul.f32 1.442695, %v900_v35 }
 0x34c   :  { %v899_v0 = vpop.xlane.xlu0 %898 }
 0x34d   :  { %v907_v1 = vsub.f32 %v872_v48, %v899_v0  ;;  %v1678_v48 = vsel %vm120_vm0, %v4671_v20, %v1677_v15  ;;  %vm3213_vm0 = vcmask 1040384  }
 0x34f   :  { %v922_v2 = vmul.f32 1.442695, %v907_v1 }
 0x350   :  { %v884_v39 = vpop.xlane.xlu0 %883 }
 0x351   :  { %4420 = vpow2.f32 %v922_v2  ;;  %v902_v42 = vsub.f32 %v4835_v38, %v884_v39  ;;  %v1680_v38 = vsel %vm123_vm1, %v1679_v44, %v1678_v48  ;;  %vm3305_vm1 = vcmask 254976  }
 0x352   :  { %4422 = vpow2.f32 %v910_v10  ;;  %v1682_v24 = vsel %vm126_vm2, %v1681_v45, %v1680_v38  ;;  %vm3508_vm2 = vcmask 1024  }
 0x353   :  { %v4854_v5 = vpop.eup %4418  ;;  %4424 = vpow2.f32 %v918_v16  ;;  %v912_v43 = vmul.f32 1.442695, %v902_v42  ;;  %v1684_v21 = vsel %vm129_vm3, %v1683_v46, %v1682_v24  ;;  %v91_v24 = vld [vmem:[%s5441_s23] sm:$0xff]  ;;  %vm3774_vm3 = vcmask 517120  }
 0x354   :  { %v933_v6 = vsel %vm269_vm9, %v4854_v5, 0.0  ;;  %4426 = vpow2.f32 %v908_v36  ;;  %v1686_v22 = vsel %vm132_vm4, %v1685_v47, %v1684_v21  ;;  %v92_v21 = vld [vmem:[%s5441_s23 + $0x8] sm:$0xff] }
 0x355   :  { %934 = vadd.xlane.f32.xlu0 %v933_v6  ;;  %4428 = vpow2.f32 %v912_v43  ;;  %v1688_v23 = vsel %vm135_vm5, %v1687_v49, %v1686_v22  ;;  %v93_v22 = vld [vmem:[%s5441_s23 + $0x10] sm:$0xff] }
 0x356   :  { %v4897_v52 = vsel %vm138_vm6, %v1689_v50, %v1688_v23  ;;  %v4993_v23 = vpack.c.bf16 %v92_v21, %v91_v24 }
 0x35b   :  { %v4858_v12 = vpop.eup %4420 }
 0x35c   :  { %v945_v13 = vsel %vm269_vm9, %v4858_v12, 0.0  ;;  %v4862_v18 = vpop.eup %4422 }
 0x35d   :  { %946 = vadd.xlane.f32.xlu0 %v945_v13  ;;  %v927_v19 = vsel %vm269_vm9, %v4862_v18, 0.0  ;;  %v4866_v28 = vpop.eup %4424 }
 0x35e   :  { %v939_v30 = vsel %vm269_vm9, %v4866_v28, 0.0  ;;  %v4877_v37 = vpop.eup %4426 }
 0x35f   :  { %v924_v41 = vsel %vm269_vm9, %v4877_v37, 0.0  ;;  %v4899_v25 = vpop.eup %4428 }
 0x360   :  { %v930_v20 = vsel %vm269_vm9, %v4899_v25, 0.0 }
 0x36b   :  { %928 = vadd.xlane.f32.xlu1 %v927_v19 }
 0x36f   :  { %940 = vadd.xlane.f32.xlu1 %v939_v30 }
 0x373   :  { %252 = vrot.lane.b32.xlu0 %v4827_v32, %s4490_s5 }
 0x380   :  { %258 = vrot.lane.b32.xlu1 %v4827_v32, %s5427_s30 }
 0x384   :  { %264 = vrot.lane.b32.xlu1 %v4827_v32, %s5431_s0 }
 0x392   :  { %925 = vadd.xlane.f32.xlu0 %v924_v41 }
 0x3a8   :  { %931 = vadd.xlane.f32.xlu1 %v930_v20  ;;  %v95_v20 = vld [vmem:[%s5441_s23 + $0x20] sm:$0xff] }
 0x3b9   :  { %249 = vrot.lane.b32.xlu1 %v4827_v32, %s4493_s1 }
 0x3bd   :  { %261 = vrot.lane.b32.xlu1 %v4827_v32, %s5425_s22 }
 0x3c3   :  { %v890_v27 = vpop.xlane.xlu1 %889 }
 0x3c4   :  { %v904_v34 = vsub.f32 %v4844_v53, %v890_v27  ;;  %v96_v27 = vld [vmem:[%s5441_s23 + $0x28] sm:$0xff] }
 0x3c6   :  { %v916_v54 = vmul.f32 1.442695, %v904_v34 }
 0x3c7   :  { %v247_v55 = vpop.permute.xlu1 %246  ;;  %v896_v57 = vpop.xlane.xlu0 %895 }
 0x3c8   :  { %4430 = vpow2.f32 %v916_v54  ;;  %v906_v58 = vsub.f32 %v4848_v56, %v896_v57  ;;  %4027 = vmatpush3.msra.mxu1 %v247_v55  ;;  %v5012_v54 = vpack.c.bf16 %v96_v27, %v95_v20  ;;  %v97_v55 = vld [vmem:[%s5441_s23 + $0x30] sm:$0xff]  ;;  %v98_v57 = vld [vmem:[%s5441_s23 + $0x38] sm:$0xff] }
 0x3c9   :  { %4036 = vmatprep.subr.mxu1 %v4488_v3 }
 0x3ca   :  { %v920_v59 = vmul.f32 1.442695, %v906_v58 }
 0x3cc   :  { %4432 = vpow2.f32 %v920_v59  ;;  %v5024_v59 = vpack.c.bf16 %v98_v57, %v97_v55 }
 0x3d2   :  { %v4910_v60 = vpop.eup %4430 }
 0x3d3   :  { %v936_v61 = vsel %vm269_vm9, %v4910_v60, 0.0 }
 0x3d4   :  { %937 = vadd.xlane.f32.xlu0 %v936_v61 }
 0x3d6   :  { %v4914_v62 = vpop.eup %4432 }
 0x3d7   :  { %v942_v53 = vsel %vm269_vm9, %v4914_v62, 0.0 }
 0x3d8   :  { %943 = vadd.xlane.f32.xlu0 %v942_v53 }
 0x3e2   :  { %v935_v56 = vpop.xlane.xlu0 %934 }
 0x3ea   :  { %v947_v1 = vpop.xlane.xlu0 %946 }
 0x3ee   :  { %255 = vrot.lane.b32.xlu0 %v4827_v32, %s4497_s2  ;;  %v253_v10 = vpop.permute.xlu0 %252 }
 0x3f8   :  { %v929_v63 = vpop.xlane.xlu1 %928 }
 0x3f9   :  { %4434 = vrcp.f32 %v929_v63 }
 0x3fa   :  { %4436 = vrcp.f32 %v935_v56 }
 0x3fc   :  { %v941_v0 = vpop.xlane.xlu1 %940 }
 0x3fd   :  { %4438 = vrcp.f32 %v941_v0 }
 0x3fe   :  { %4440 = vrcp.f32 %v947_v1 }
 0x400   :  { %v259_v11 = vpop.permute.xlu1 %258 }
 0x403   :  { %v4435_v2 = vpop.eup %4434 }
 0x404   :  { %v951_v6 = vmul.f32 %v4435_v2, %v4862_v18  ;;  %v4437_v7 = vpop.eup %4436  ;;  %v265_v19 = vpop.permute.xlu1 %264 }
 0x405   :  { %v955_v32 = vmul.f32 %v4437_v7, %v4854_v5 }
 0x406   :  { %4029 = vmatmul.mubr.msk.f32.vlgmr.msra.gmra.mrb[14].mxu1 %vm269_vm9, %v951_v6 }
 0x407   :  { %4037 = vmatpush3.msra.mxu1 %v253_v10  ;;  %4038 = vmatprep.mubr.msk.f32.mxu1 %vm4489_vm8, %v4488_v3  ;;  %v4439_v13 = vpop.eup %4438 }
 0x408   :  { %4046 = vmatprep.subr.mxu1 %v4488_v3  ;;  %v959_v16 = vmul.f32 %v4439_v13, %v4866_v28  ;;  %v4441_v18 = vpop.eup %4440 }
 0x409   :  { %v963_v5 = vmul.f32 %v4441_v18, %v4858_v12 }
 0x40a   :  { %4039 = vmatmul.mubr.msk.f32.vlgmr.msra.gmra.mrb[16].mxu1 %vm269_vm9, %v955_v32 }
 0x40b   :  { %4047 = vmatpush3.msra.mxu1 %v259_v11  ;;  %4048 = vmatprep.mubr.msk.f32.mxu1 %vm4489_vm8, %v4488_v3 }
 0x40c   :  { %4056 = vmatprep.subr.mxu1 %v4488_v3 }
 0x40e   :  { %4049 = vmatmul.mubr.msk.f32.vlgmr.msra.gmra.mrb[18].mxu1 %vm269_vm9, %v959_v16 }
 0x40f   :  { %4057 = vmatpush3.msra.mxu1 %v265_v19  ;;  %4058 = vmatprep.mubr.msk.f32.mxu1 %vm4489_vm8, %v4488_v3 }
 0x410   :  { %4310 = vmatprep.subr.bf16.mxu1 %v4622_v4 }
 0x412   :  { %4059 = vmatmul.mubr.msk.f32.vlgmr.msra.gmra.mrb[20].mxu1 %vm269_vm9, %v963_v5 }
 0x413   :  { %4312 = vmatpush1.bf16.msra.mxu1 %v4633_v8  ;;  %1757 = vmatprep.mubr.f32.mxu1 %v4488_v3 }
 0x414   :  { %4314 = vmatprep.subr.bf16.mxu1 %v4635_v9 }
 0x417   :  { %4316 = vmatpush1.bf16.msra.mxu1 %v4651_v14 }
 0x418   :  { %4318 = vmatprep.subr.bf16.mxu1 %v4660_v17 }
 0x41b   :  { %4320 = vmatpush1.bf16.msra.mxu1 %v4699_v26 }
 0x41c   :  { %4322 = vmatprep.subr.bf16.mxu1 %v4710_v31 }
 0x41f   :  { %4324 = vmatpush1.bf16.msra.mxu1 %v4730_v40  ;;  %v926_v12 = vpop.xlane.xlu0 %925 }
 0x420   :  { %4442 = vrcp.f32 %v926_v12  ;;  %4085 = vmatprep.subr.mxu1 %v4488_v3 }
 0x422   :  { %3811 = vmatmul.mubr.msk.f32.vlgmr.msra.gmra.mrb[22].mxu1 %vm140_vm7, %v4897_v52  ;;  %v94_v52 = vld [vmem:[%s5441_s23 + $0x18] sm:$0xff]  ;;  %s4504_s23 = smov 32  }
 0x423   :  { %4087 = vmatprep.mubr.msk.f32.mxu1 %vm4489_vm8, %v4488_v3 }
 0x42a   :  { %v4443_v4 = vpop.eup %4442 }
 0x42b   :  { %v949_v8 = vmul.f32 %v4443_v4, %v4877_v37 }
 0x42d   :  { %4024 = vmatmul.mubr.msk.f32.vlgmr.msra.gmra.mrb[4].mxu0 %vm269_vm9, %v949_v8 }
 0x42e   :  { %4033 = vmatprep.mubr.msk.f32.mxu0 %vm4489_vm8, %v4488_v3 }
 0x435   :  { %v932_v9 = vpop.xlane.xlu1 %931 }
 0x436   :  { %4444 = vrcp.f32 %v932_v9 }
 0x439   :  { %v250_v14 = vpop.permute.xlu1 %249 }
 0x43a   :  { %4032 = vmatpush3.msra.mxu0 %v250_v14 }
 0x43b   :  { %4041 = vmatprep.subr.mxu0 %v4488_v3 }
 0x43d   :  { %v262_v35 = vpop.permute.xlu1 %261 }
 0x440   :  { %v4445_v17 = vpop.eup %4444 }
 0x441   :  { %v953_v26 = vmul.f32 %v4445_v17, %v4899_v25  ;;  %v4999_v25 = vpack.c.bf16 %v94_v52, %v93_v22 }
 0x443   :  { %4034 = vmatmul.mubr.msk.f32.vlgmr.msra.gmra.mrb[6].mxu0 %vm269_vm9, %v953_v26 }
 0x444   :  { %4043 = vmatprep.mubr.msk.f32.mxu0 %vm4489_vm8, %v4488_v3 }
 0x461   :  { %v938_v31 = vpop.xlane.xlu0 %937 }
 0x462   :  { %4446 = vrcp.f32 %v938_v31 }
 0x465   :  { %v944_v40 = vpop.xlane.xlu0 %943 }
 0x466   :  { %4448 = vrcp.f32 %v944_v40 }
 0x469   :  { %v256_v28 = vpop.permute.xlu0 %255 }
 0x46a   :  { %4042 = vmatpush3.msra.mxu0 %v256_v28 }
 0x46b   :  { %4051 = vmatprep.subr.mxu0 %v4488_v3 }
 0x46c   :  { %v4447_v30 = vpop.eup %4446 }
 0x46d   :  { %v957_v33 = vmul.f32 %v4447_v30, %v4910_v60 }
 0x46f   :  { %4044 = vmatmul.mubr.msk.f32.vlgmr.msra.gmra.mrb[8].mxu0 %vm269_vm9, %v957_v33 }
 0x470   :  { %v4449_v36 = vpop.eup %4448  ;;  %4052 = vmatpush3.msra.mxu0 %v262_v35  ;;  %4053 = vmatprep.mubr.msk.f32.mxu0 %vm4489_vm8, %v4488_v3 }
 0x471   :  { %v961_v37 = vmul.f32 %v4449_v36, %v4914_v62 }
 0x473   :  { %4054 = vmatmul.mubr.msk.f32.vlgmr.msra.gmra.mrb[10].mxu0 %vm269_vm9, %v961_v37 }
 0x474   :  { %4077 = vmatprep.mubr.msk.f32.mxu0 %vm4489_vm8, %v4488_v3 }
 0x4d9   :  { %v1106_v39 = vpop.f32.mrb[14].mxu1 }
 0x4da   :  { %v4030_v41 = vpop.f32.mrb[15].mxu1 }
 0x4dd   :  { %v1252_v42 = vpop.f32.mrb[16].mxu1 }
 0x4de   :  { %v4040_v43 = vpop.f32.mrb[17].mxu1 }
 0x4e1   :  { %v1398_v15 = vpop.f32.mrb[18].mxu1 }
 0x4e2   :  { %v4050_v44 = vpop.f32.mrb[19].mxu1 }
 0x4e5   :  { %v1544_v45 = vpop.f32.mrb[20].mxu1 }
 0x4e6   :  { %v4060_v46 = vpop.f32.mrb[21].mxu1 }
 0x4f5   :  { %v1759_v47 = vpop.f32.mrb[22].mxu1 }
 0x4f6   :  { %v1760_v48 = vadd.f32 %v1759_v47, %v4751_v51  ;;  %v4969_v49 = vpop.f32.mrb[23].mxu1  ;;  %v4500_v51 = vmov 0.0|0.0  }
 0x4f7   :  { %4297 = vmatprep.subr.bf16.mxu0 %v4500_v51  ;;  %v5100_v44 = vadd.f32 %v4969_v49, %v4818_v29 }
 0x4f8   :  { %1783 = vrot.lane.b32.xlu0 %v1760_v48, %s4493_s1  ;;  %1781 = vrot.lane.b32.xlu1 %v1760_v48, %s4491_s29  ;;  %v5009_v34 = vmul.f32 0.35355338, %v1760_v48 }
 0x4f9   :  { %4299 = vmatpush3.bf16.msra.mxu0 %v4993_v23 }
 0x4fa   :  { %4300 = vmatprep.subr.bf16.mxu0 %v4500_v51 }
 0x4fc   :  { %1787 = vrot.lane.b32.xlu0 %v1760_v48, %s4497_s2  ;;  %1785 = vrot.lane.b32.xlu1 %v1760_v48, %s4490_s5 }
 0x4fd   :  { %4302 = vmatpush3.bf16.msra.mxu0 %v4999_v25 }
 0x4fe   :  { %4303 = vmatprep.subr.bf16.mxu0 %v4500_v51 }
 0x500   :  { %1791 = vrot.lane.b32.xlu0 %v1760_v48, %s5425_s22  ;;  %1789 = vrot.lane.b32.xlu1 %v1760_v48, %s5427_s30  ;;  %v4977_v38 = vpop.f32.mrb[4].mxu0  ;;  %s4505_s30 = smov 48   ;;  %s5442_s22 = smov 88  }
 0x501   :  { %v4025_v50 = vpop.f32.mrb[5].mxu0  ;;  %4305 = vmatpush3.bf16.msra.mxu0 %v5012_v54 }
 0x502   :  { %4306 = vmatprep.subr.bf16.mxu0 %v4500_v51 }
 0x504   :  { %1549 = vrot.lane.b32.xlu0 %v1106_v39, %s5429_s25  ;;  %1793 = vrot.lane.b32.xlu1 %v1760_v48, %s5431_s0  ;;  %s4501_s25 = smov 40   ;;  %s5443_s0 = smov 80  }
 0x505   :  { %4308 = vmatpush3.bf16.msra.mxu0 %v5024_v59 }
 0x506   :  { %4080 = vmatprep.subr.mxu0 %v4488_v3 }
 0x508   :  { %1557 = vrot.lane.b32.xlu0 %v1252_v42, %s5430_s3  ;;  %s5444_s3 = smov 72  }
 0x50c   :  { %1565 = vrot.lane.b32.xlu0 %v1398_v15, %s4501_s25 }
 0x510   :  { %1573 = vrot.lane.b32.xlu0 %v1544_v45, %s4502_s24 }
 0x514   :  { %1768 = vrot.lane.b32.xlu0 %v5009_v34, %s4493_s1 }
 0x516   :  { %v1179_v58 = vpop.f32.mrb[6].mxu0 }
 0x517   :  { %v4035_v60 = vpop.f32.mrb[7].mxu0  ;;  %1553 = vrot.lane.b32.xlu1 %v1179_v58, %s4503_s27 }
 0x518   :  { %1772 = vrot.lane.b32.xlu0 %v5009_v34, %s4497_s2 }
 0x542   :  { %v1325_v61 = vpop.f32.mrb[8].mxu0 }
 0x543   :  { %v4045_v62 = vpop.f32.mrb[9].mxu0  ;;  %1561 = vrot.lane.b32.xlu1 %v1325_v61, %s4504_s23 }
 0x546   :  { %v1471_v53 = vpop.f32.mrb[10].mxu0 }
 0x547   :  { %v4055_v56 = vpop.f32.mrb[11].mxu0  ;;  %1569 = vrot.lane.b32.xlu1 %v1471_v53, %s4505_s30 }
 0x54b   :  { %1817 = vrot.lane.b32.xlu1 %v1760_v48, %s4494_s21 }
 0x54f   :  { %1766 = vrot.lane.b32.xlu1 %v5009_v34, %s4491_s29 }
 0x553   :  { %1770 = vrot.lane.b32.xlu1 %v5009_v34, %s4490_s5 }
 0x557   :  { %1774 = vrot.lane.b32.xlu1 %v5009_v34, %s5442_s22 }
 0x56a   :  { %v1784_v63 = vpop.permute.xlu0 %1783  ;;  %v1782_v0 = vpop.permute.xlu1 %1781 }
 0x56b   :  { %1893 = vrot.lane.b32.xlu0 %v1782_v0, %s4494_s21 }
 0x56e   :  { %v1786_v1 = vpop.permute.xlu1 %1785  ;;  %v1788_v2 = vpop.permute.xlu0 %1787 }
 0x56f   :  { %1969 = vrot.lane.b32.xlu0 %v1784_v63, %s4494_s21  ;;  %2045 = vrot.lane.b32.xlu1 %v1786_v1, %s4494_s21 }
 0x572   :  { %v1790_v6 = vpop.permute.xlu1 %1789  ;;  %v1792_v7 = vpop.permute.xlu0 %1791 }
 0x573   :  { %2121 = vrot.lane.b32.xlu0 %v1788_v2, %s4494_s21  ;;  %2197 = vrot.lane.b32.xlu1 %v1790_v6, %s4494_s21 }
 0x576   :  { %v1794_v10 = vpop.permute.xlu1 %1793  ;;  %v1550_v32 = vpop.permute.xlu0 %1549 }
 0x577   :  { %2273 = vrot.lane.b32.xlu0 %v1792_v7, %s4494_s21  ;;  %2349 = vrot.lane.b32.xlu1 %v1794_v10, %s4494_s21  ;;  %v1576_v16 = vsel %vm269_vm9, %v4977_v38, %v1550_v32 }
 0x57a   :  { %v1558_v11 = vpop.permute.xlu0 %1557 }
 0x57b   :  { %1776 = vrot.lane.b32.xlu0 %v5009_v34, %s5443_s0  ;;  %1778 = vrot.lane.b32.xlu1 %v5009_v34, %s5444_s3 }
 0x57e   :  { %v1566_v19 = vpop.permute.xlu0 %1565 }
 0x582   :  { %v1574_v14 = vpop.permute.xlu0 %1573 }
 0x586   :  { %v1769_v28 = vpop.permute.xlu0 %1768 }
 0x589   :  { %v1554_v13 = vpop.permute.xlu1 %1553 }
 0x58a   :  { %v1578_v18 = vsel %vm1577_vm10, %v1576_v16, %v1554_v13  ;;  %v1773_v33 = vpop.permute.xlu0 %1772 }
 0x58b   :  { %v1580_v5 = vsel %vm1579_vm11, %v1578_v18, %v1558_v11 }
 0x5b5   :  { %v1562_v12 = vpop.permute.xlu1 %1561 }
 0x5b6   :  { %v1582_v4 = vsel %vm1581_vm12, %v1580_v5, %v1562_v12 }
 0x5b7   :  { %v1584_v8 = vsel %vm1583_vm13, %v1582_v4, %v1566_v19 }
 0x5b9   :  { %v1570_v9 = vpop.permute.xlu1 %1569 }
 0x5ba   :  { %v1586_v17 = vsel %vm1585_vm14, %v1584_v8, %v1570_v9 }
 0x5bb   :  { %v1588_v26 = vsel %vm1587_vm15, %v1586_v17, %v1574_v14 }
 0x5bc   :  { %4078 = vmatmul.mubr.msk.f32.vlgmr.msra.gmra.mrb[12].mxu0 %vm140_vm7, %v1588_v26 }
 0x5bd   :  { %v1818_v31 = vpop.permute.xlu1 %1817  ;;  %4082 = vmatprep.mubr.msk.f32.mxu0 %vm4489_vm8, %v4488_v3 }
 0x5be   :  { %4081 = vmatpush3.xpose.msk.msra.mxu0 %vm269_vm9, %v1818_v31 }
 0x5bf   :  { %4090 = vmatprep.subr.mxu0 %v4488_v3 }
 0x5c1   :  { %4083 = vmatmul.mubr.msk.f32.vlgmr.msra.gmra.mrb[14].mxu0 %vm269_vm9, %v5009_v34  ;;  %v1767_v40 = vpop.permute.xlu1 %1766 }
 0x5c2   :  { %4092 = vmatprep.mubr.msk.f32.mxu0 %vm4489_vm8, %v4488_v3 }
 0x5c5   :  { %v1771_v30 = vpop.permute.xlu1 %1770 }
 0x5c9   :  { %v1775_v35 = vpop.permute.xlu1 %1774 }
 0x5dd   :  { %v1894_v36 = vpop.permute.xlu0 %1893 }
 0x5de   :  { %4086 = vmatpush3.xpose.msk.msra.mxu1 %vm269_vm9, %v1894_v36 }
 0x5df   :  { %4095 = vmatprep.subr.mxu1 %v4488_v3 }
 0x5e1   :  { %v1970_v37 = vpop.permute.xlu0 %1969  ;;  %4088 = vmatmul.mubr.msk.f32.vlgmr.msra.gmra.mrb[24].mxu1 %vm269_vm9, %v1767_v40  ;;  %v2046_v39 = vpop.permute.xlu1 %2045 }
 0x5e2   :  { %4091 = vmatpush3.xpose.msk.msra.mxu0 %vm269_vm9, %v1970_v37  ;;  %4096 = vmatpush3.xpose.msk.msra.mxu1 %vm269_vm9, %v2046_v39 }
 0x5e3   :  { %4097 = vmatprep.mubr.msk.f32.mxu1 %vm4489_vm8, %v4488_v3  ;;  %4105 = vmatprep.subr.mxu1 %v4488_v3 }
 0x5e4   :  { %4100 = vmatprep.subr.mxu0 %v4488_v3 }
 0x5e5   :  { %v2122_v41 = vpop.permute.xlu0 %2121  ;;  %4098 = vmatmul.mubr.msk.f32.vlgmr.msra.gmra.mrb[26].mxu1 %vm269_vm9, %v1771_v30  ;;  %v2198_v42 = vpop.permute.xlu1 %2197  ;;  %4093 = vmatmul.mubr.msk.f32.vlgmr.msra.gmra.mrb[16].mxu0 %vm269_vm9, %v1769_v28 }
 0x5e6   :  { %4101 = vmatpush3.xpose.msk.msra.mxu0 %vm269_vm9, %v2122_v41  ;;  %4106 = vmatpush3.xpose.msk.msra.mxu1 %vm269_vm9, %v2198_v42 }
 0x5e7   :  { %4102 = vmatprep.mubr.msk.f32.mxu0 %vm4489_vm8, %v4488_v3  ;;  %4107 = vmatprep.mubr.msk.f32.mxu1 %vm4489_vm8, %v4488_v3 }
 0x5e8   :  { %4115 = vmatprep.subr.mxu1 %v4488_v3  ;;  %4110 = vmatprep.subr.mxu0 %v4488_v3 }
 0x5e9   :  { %v2274_v43 = vpop.permute.xlu0 %2273  ;;  %4108 = vmatmul.mubr.msk.f32.vlgmr.msra.gmra.mrb[28].mxu1 %vm269_vm9, %v1775_v35  ;;  %v2350_v15 = vpop.permute.xlu1 %2349  ;;  %4103 = vmatmul.mubr.msk.f32.vlgmr.msra.gmra.mrb[18].mxu0 %vm269_vm9, %v1773_v33 }
 0x5ea   :  { %4111 = vmatpush3.xpose.msk.msra.mxu0 %vm269_vm9, %v2274_v43  ;;  %4116 = vmatpush3.xpose.msk.msra.mxu1 %vm269_vm9, %v2350_v15 }
 0x5eb   :  { %4117 = vmatprep.mubr.msk.f32.mxu1 %vm4489_vm8, %v4488_v3  ;;  %4112 = vmatprep.mubr.msk.f32.mxu0 %vm4489_vm8, %v4488_v3 }
 0x5ec   :  { %4120 = vmatprep.subr.mxu0 %v4488_v3  ;;  %4125 = vmatprep.subr.mxu1 %v4488_v3 }
 0x5ed   :  { %v1777_v45 = vpop.permute.xlu0 %1776  ;;  %v1779_v46 = vpop.permute.xlu1 %1778 }
 0x5ee   :  { %4113 = vmatmul.mubr.msk.f32.vlgmr.msra.gmra.mrb[20].mxu0 %vm269_vm9, %v1777_v45  ;;  %4118 = vmatmul.mubr.msk.f32.vlgmr.msra.gmra.mrb[30].mxu1 %vm269_vm9, %v1779_v46 }
 0x5ef   :  { %4121 = vmatpush3.msra.mxu0 %v5100_v44  ;;  %4122 = vmatprep.mubr.msk.f32.mxu0 %vm4489_vm8, %v4488_v3 }
 0x5f0   :  { %4130 = vmatprep.subr.mxu0 %v4488_v3  ;;  %4127 = vmatprep.mubr.msk.f32.mxu1 %vm4489_vm8, %v4488_v3 }
 0x68f   :  { %v5110_v47 = vpop.f32.mrb[12].mxu0 }
 0x690   :  { %v4079_v29 = vpop.f32.mrb[13].mxu0 }
 0x694   :  { %v1889_v48 = vpop.f32.mrb[14].mxu0 }
 0x695   :  { %v4084_v49 = vpop.f32.mrb[15].mxu0  ;;  %v2425_v38 = vsel %vm269_vm9, %v1889_v48, -inf }
 0x696   :  { %2426 = vmax.xlane.f32.xlu0 %v2425_v38 }
 0x6b4   :  { %v1965_v50 = vpop.f32.mrb[24].mxu1 }
 0x6b5   :  { %v4089_v24 = vpop.f32.mrb[25].mxu1  ;;  %v2428_v21 = vsel %vm269_vm9, %v1965_v50, -inf }
 0x6b6   :  { %2429 = vmax.xlane.f32.xlu1 %v2428_v21 }
 0x6b8   :  { %v2041_v22 = vpop.f32.mrb[16].mxu0  ;;  %v2117_v52 = vpop.f32.mrb[26].mxu1 }
 0x6b9   :  { %v4094_v20 = vpop.f32.mrb[17].mxu0  ;;  %v4099_v27 = vpop.f32.mrb[27].mxu1  ;;  %v2431_v34 = vsel %vm269_vm9, %v2041_v22, -inf  ;;  %v2434_v61 = vsel %vm269_vm9, %v2117_v52, -inf }
 0x6ba   :  { %2432 = vmax.xlane.f32.xlu0 %v2431_v34 }
 0x6bc   :  { %v2193_v55 = vpop.f32.mrb[18].mxu0  ;;  %v2269_v57 = vpop.f32.mrb[28].mxu1 }
 0x6bd   :  { %v4104_v58 = vpop.f32.mrb[19].mxu0  ;;  %v4109_v60 = vpop.f32.mrb[29].mxu1  ;;  %v2437_v62 = vsel %vm269_vm9, %v2193_v55, -inf  ;;  %v2440_v63 = vsel %vm269_vm9, %v2269_v57, -inf }
 0x6be   :  { %2435 = vmax.xlane.f32.xlu0 %v2434_v61  ;;  %2438 = vmax.xlane.f32.xlu1 %v2437_v62 }
 0x6c1   :  { %v2345_v53 = vpop.f32.mrb[20].mxu0  ;;  %v2421_v56 = vpop.f32.mrb[30].mxu1 }
 0x6c2   :  { %v4119_v0 = vpop.f32.mrb[31].mxu1  ;;  %2441 = vmax.xlane.f32.xlu0 %v2440_v63  ;;  %v4114_v1 = vpop.f32.mrb[21].mxu0  ;;  %v2443_v2 = vsel %vm269_vm9, %v2345_v53, -inf  ;;  %v2446_v6 = vsel %vm269_vm9, %v2421_v56, -inf }
 0x6c3   :  { %2444 = vmax.xlane.f32.xlu1 %v2443_v2 }
 0x6c6   :  { %2447 = vmax.xlane.f32.xlu0 %v2446_v6 }
 0x6d4   :  { %1796 = vrot.lane.b32.xlu1 %v5100_v44, %s4491_s29  ;;  %s5446_s29 = smov 24  }
 0x6d8   :  { %1802 = vrot.lane.b32.xlu1 %v5100_v44, %s4490_s5  ;;  %s5445_s5 = smov 8  }
 0x6dc   :  { %1799 = vrot.lane.b32.xlu0 %v5100_v44, %s4493_s1  ;;  %1805 = vrot.lane.b32.xlu1 %v5100_v44, %s4497_s2  ;;  %s5447_s2 = sld [smem:[#allocation7_spill]] }
 0x6e0   :  { %1808 = vrot.lane.b32.xlu0 %v5100_v44, %s5442_s22 }
 0x723   :  { %v2427_v7 = vpop.xlane.xlu0 %2426 }
 0x724   :  { %v2449_v10 = vsub.f32 %v1889_v48, %v2427_v7 }
 0x726   :  { %v2457_v32 = vmul.f32 1.442695, %v2449_v10 }
 0x728   :  { %4450 = vpow2.f32 %v2457_v32 }
 0x732   :  { %v4451_v11 = vpop.eup %4450 }
 0x733   :  { %v2473_v13 = vsel %vm269_vm9, %v4451_v11, 0.0 }
 0x734   :  { %2474 = vadd.xlane.f32.xlu1 %v2473_v13 }
 0x743   :  { %v2430_v16 = vpop.xlane.xlu1 %2429 }
 0x744   :  { %v2450_v18 = vsub.f32 %v1965_v50, %v2430_v16 }
 0x746   :  { %v2459_v19 = vmul.f32 1.442695, %v2450_v18 }
 0x747   :  { %v2433_v5 = vpop.xlane.xlu0 %2432 }
 0x748   :  { %4452 = vpow2.f32 %v2459_v19  ;;  %v2451_v12 = vsub.f32 %v2041_v22, %v2433_v5 }
 0x74a   :  { %v2461_v4 = vmul.f32 1.442695, %v2451_v12 }
 0x74b   :  { %v2436_v8 = vpop.xlane.xlu0 %2435  ;;  %v2439_v9 = vpop.xlane.xlu1 %2438 }
 0x74c   :  { %4454 = vpow2.f32 %v2461_v4  ;;  %v2452_v14 = vsub.f32 %v2117_v52, %v2436_v8  ;;  %v2453_v17 = vsub.f32 %v2193_v55, %v2439_v9 }
 0x74e   :  { %v2463_v26 = vmul.f32 1.442695, %v2452_v14  ;;  %v2465_v31 = vmul.f32 1.442695, %v2453_v17 }
 0x74f   :  { %v2442_v40 = vpop.xlane.xlu0 %2441 }
 0x750   :  { %4456 = vpow2.f32 %v2463_v26  ;;  %v2454_v28 = vsub.f32 %v2269_v57, %v2442_v40  ;;  %v2445_v30 = vpop.xlane.xlu1 %2444 }
 0x751   :  { %4458 = vpow2.f32 %v2465_v31  ;;  %v2455_v33 = vsub.f32 %v2345_v53, %v2445_v30 }
 0x752   :  { %v4453_v35 = vpop.eup %4452  ;;  %v2467_v36 = vmul.f32 1.442695, %v2454_v28 }
 0x753   :  { %v2469_v37 = vmul.f32 1.442695, %v2455_v33  ;;  %v2448_v39 = vpop.xlane.xlu0 %2447  ;;  %v2476_v41 = vsel %vm269_vm9, %v4453_v35, 0.0 }
 0x754   :  { %4460 = vpow2.f32 %v2467_v36  ;;  %v2456_v42 = vsub.f32 %v2421_v56, %v2448_v39  ;;  %2477 = vadd.xlane.f32.xlu0 %v2476_v41  ;;  %v1797_v43 = vpop.permute.xlu1 %1796 }
 0x755   :  { %4462 = vpow2.f32 %v2469_v37  ;;  %4126 = vmatpush3.msra.mxu1 %v1797_v43 }
 0x756   :  { %v4455_v15 = vpop.eup %4454  ;;  %v2471_v45 = vmul.f32 1.442695, %v2456_v42  ;;  %4135 = vmatprep.subr.mxu1 %v4488_v3 }
 0x757   :  { %v2479_v46 = vsel %vm269_vm9, %v4455_v15, 0.0  ;;  %v1800_v60 = vpop.permute.xlu0 %1799 }
 0x758   :  { %4464 = vpow2.f32 %v2471_v45  ;;  %2480 = vadd.xlane.f32.xlu1 %v2479_v46  ;;  %v1803_v27 = vpop.permute.xlu1 %1802 }
 0x75a   :  { %v4457_v29 = vpop.eup %4456 }
 0x75b   :  { %v4459_v48 = vpop.eup %4458  ;;  %v2482_v49 = vsel %vm269_vm9, %v4457_v29, 0.0  ;;  %v1809_v61 = vpop.permute.xlu0 %1808 }
 0x75c   :  { %2483 = vadd.xlane.f32.xlu0 %v2482_v49  ;;  %v2485_v38 = vsel %vm269_vm9, %v4459_v48, 0.0  ;;  %v1806_v34 = vpop.permute.xlu1 %1805 }
 0x75d   :  { %2486 = vadd.xlane.f32.xlu1 %v2485_v38 }
 0x75e   :  { %v4461_v50 = vpop.eup %4460 }
 0x75f   :  { %v4463_v24 = vpop.eup %4462  ;;  %v2488_v21 = vsel %vm269_vm9, %v4461_v50, 0.0 }
 0x760   :  { %2489 = vadd.xlane.f32.xlu0 %v2488_v21  ;;  %v2491_v22 = vsel %vm269_vm9, %v4463_v24, 0.0 }
 0x761   :  { %2492 = vadd.xlane.f32.xlu1 %v2491_v22 }
 0x762   :  { %v5138_v52 = vpop.eup %4464 }
 0x763   :  { %v2494_v20 = vsel %vm269_vm9, %v5138_v52, 0.0 }
 0x764   :  { %2495 = vadd.xlane.f32.xlu0 %v2494_v20  ;;  %v3215_v20 = vld [vmem:[%s5447_s2] sm:$0xff] }
 0x772   :  { %1811 = vrot.lane.b32.xlu1 %v5100_v44, %s5443_s0 }
 0x77a   :  { %1814 = vrot.lane.b32.xlu0 %v5100_v44, %s5444_s3 }
 0x7c1   :  { %v2475_v55 = vpop.xlane.xlu1 %2474 }
 0x7c2   :  { %4466 = vrcp.f32 %v2475_v55  ;;  %v3217_v55 = vld [vmem:[%s5447_s2 + $0x10] sm:$0xff] }
 0x7cc   :  { %v4467_v57 = vpop.eup %4466 }
 0x7cd   :  { %v2498_v58 = vmul.f32 %v4467_v57, %v4451_v11  ;;  %v3218_v57 = vld [vmem:[%s5447_s2 + $0x18] sm:$0xff] }
 0x7cf   :  { %4123 = vmatmul.mubr.msk.f32.vlgmr.msra.gmra.mrb[22].mxu0 %vm269_vm9, %v2498_v58  ;;  %v4341_v58 = vpack.c.bf16 %v3218_v57, %v3217_v55  ;;  %v3510_v55 = vld [vmem:[%s5413_s13] sm:$0xff]  ;;  %v3511_v57 = vld [vmem:[%s5413_s13 + $0x8] sm:$0xff] }
 0x7d0   :  { %4131 = vmatpush3.msra.mxu0 %v1800_v60  ;;  %4132 = vmatprep.mubr.msk.f32.mxu0 %vm4489_vm8, %v4488_v3  ;;  %v3219_v60 = vld [vmem:[%s5447_s2 + $0x20] sm:$0xff] }
 0x7d1   :  { %4140 = vmatprep.subr.mxu0 %v4488_v3 }
 0x7e1   :  { %v2478_v62 = vpop.xlane.xlu0 %2477 }
 0x7e2   :  { %4468 = vrcp.f32 %v2478_v62 }
 0x7e5   :  { %v2481_v53 = vpop.xlane.xlu1 %2480 }
 0x7e6   :  { %4470 = vrcp.f32 %v2481_v53  ;;  %v3221_v53 = vld [vmem:[%s5447_s2 + $0x30] sm:$0xff] }
 0x7e9   :  { %v2484_v44 = vpop.xlane.xlu0 %2483 }
 0x7ea   :  { %4472 = vrcp.f32 %v2484_v44  ;;  %v2487_v56 = vpop.xlane.xlu1 %2486  ;;  %v3222_v44 = vld [vmem:[%s5447_s2 + $0x38] sm:$0xff] }
 0x7eb   :  { %4474 = vrcp.f32 %v2487_v56  ;;  %v4347_v56 = vpack.c.bf16 %v3222_v44, %v3221_v53  ;;  %v3512_v44 = vld [vmem:[%s5413_s13 + $0x10] sm:$0xff] }
 0x7ec   :  { %v4469_v63 = vpop.eup %4468 }
 0x7ed   :  { %v2500_v0 = vmul.f32 %v4469_v63, %v4453_v35  ;;  %v2490_v1 = vpop.xlane.xlu0 %2489  ;;  %v3809_v63 = vld [vmem:[%s5405_s4] ss:$0 sm:$0xff] }
 0x7ee   :  { %4476 = vrcp.f32 %v2490_v1  ;;  %v2493_v2 = vpop.xlane.xlu1 %2492 }
 0x7ef   :  { %4478 = vrcp.f32 %v2493_v2  ;;  %4128 = vmatmul.mubr.msk.f32.vlgmr.msra.gmra.mrb[32].mxu1 %vm269_vm9, %v2500_v0  ;;  %v1665_v0 = vadd.f32 %v3809_v63, %v5110_v47 }
 0x7f0   :  { %v4471_v6 = vpop.eup %4470  ;;  %4136 = vmatpush3.msra.mxu1 %v1803_v27  ;;  %4137 = vmatprep.mubr.msk.f32.mxu1 %vm4489_vm8, %v4488_v3  ;;  %v3216_v27 = vld [vmem:[%s5447_s2 + $0x8] sm:$0xff] }
 0x7f1   :  { %v2502_v7 = vmul.f32 %v4471_v6, %v4455_v15  ;;  %v2496_v10 = vpop.xlane.xlu0 %2495  ;;  %4145 = vmatprep.subr.mxu1 %v4488_v3  ;;  %v1668_v1 = vsel %vm140_vm7, %v1665_v0, 0.0  ;;  %v3514_v0 = vld [vmem:[%s5413_s13 + $0x20] sm:$0xff] }
 0x7f2   :  { %4480 = vrcp.f32 %v2496_v10  ;;  %v1812_v19 = vpop.permute.xlu1 %1811  ;;  %v1669_v2 = vrot.slane %v1668_v1, 4 }
 0x7f3   :  { %4133 = vmatmul.mubr.msk.f32.vlgmr.msra.gmra.mrb[24].mxu0 %vm269_vm9, %v2502_v7 }
 0x7f4   :  { %v4473_v32 = vpop.eup %4472  ;;  %4141 = vmatpush3.msra.mxu0 %v1806_v34  ;;  %4142 = vmatprep.mubr.msk.f32.mxu0 %vm4489_vm8, %v4488_v3  ;;  %v4338_v34 = vpack.c.bf16 %v3216_v27, %v3215_v20  ;;  %v1670_v6 = vadd.f32 %v1669_v2, %v1668_v1  ;;  %v26_v27 = vstv %s5411_s12  ;;  %v3515_v1 = vld [vmem:[%s5413_s13 + $0x28] sm:$0xff] }
 0x7f5   :  { %v4475_v11 = vpop.eup %4474  ;;  %v2504_v13 = vmul.f32 %v4473_v32, %v4457_v29  ;;  %4150 = vmatprep.subr.mxu0 %v4488_v3  ;;  %v1815_v8 = vpop.permute.xlu0 %1814  ;;  %27 = vst [vmem:[#allocation2] sm:$0x1] %v26_v27  ;;  %v4365_v2 = vpack.c.bf16 %v3515_v1, %v3514_v0 }
 0x7f6   :  { %v2506_v16 = vmul.f32 %v4475_v11, %v4459_v48  ;;  %v1671_v7 = vrot.slane %v1670_v6, 2 }
 0x7f7   :  { %4138 = vmatmul.mubr.msk.f32.vlgmr.msra.gmra.mrb[34].mxu1 %vm269_vm9, %v2504_v13 }
 0x7f8   :  { %v4477_v18 = vpop.eup %4476  ;;  %4143 = vmatmul.mubr.msk.f32.vlgmr.msra.gmra.mrb[26].mxu0 %vm269_vm9, %v2506_v16  ;;  %4146 = vmatpush3.msra.mxu1 %v1809_v61  ;;  %v3220_v61 = vld [vmem:[%s5447_s2 + $0x28] sm:$0xff]  ;;  %v1672_v16 = vadd.f32 %v1671_v7, %v1670_v6  ;;  %v3516_v6 = vld [vmem:[%s5413_s13 + $0x30] sm:$0xff]  ;;  %v3517_v7 = vld [vmem:[%s5413_s13 + $0x38] sm:$0xff] }
 0x7f9   :  { %v4479_v5 = vpop.eup %4478  ;;  %v2508_v12 = vmul.f32 %v4477_v18, %v4461_v50  ;;  %4151 = vmatpush3.msra.mxu0 %v1812_v19  ;;  %4147 = vmatprep.mubr.msk.f32.mxu1 %vm4489_vm8, %v4488_v3  ;;  %v4344_v62 = vpack.c.bf16 %v3220_v61, %v3219_v60 }
 0x7fa   :  { %v2510_v4 = vmul.f32 %v4479_v5, %v4463_v24  ;;  %4155 = vmatprep.subr.mxu1 %v4488_v3  ;;  %4152 = vmatprep.mubr.msk.f32.mxu0 %vm4489_vm8, %v4488_v3  ;;  %v1673_v5 = vrot.slane %v1672_v16, 1 }
 0x7fb   :  { %4148 = vmatmul.mubr.msk.f32.vlgmr.msra.gmra.mrb[36].mxu1 %vm269_vm9, %v2508_v12  ;;  %4325 = vmatprep.subr.bf16.mxu0 %v4500_v51 }
 0x7fc   :  { %v4481_v9 = vpop.eup %4480  ;;  %4156 = vmatpush3.msra.mxu1 %v1815_v8  ;;  %4153 = vmatmul.mubr.msk.f32.vlgmr.msra.gmra.mrb[28].mxu0 %vm269_vm9, %v2510_v4  ;;  %v1674_v8 = vadd.f32 %v1673_v5, %v1672_v16  ;;  %v3598_v16 = vld [vmem:[%s5414_s15 + $0x10] sm:$0xff]  ;;  %v3843_v5 = vld [vmem:[#allocation2] ss:$0 sm:$0xff] }
 0x7fd   :  { %v2512_v14 = vmul.f32 %v4481_v9, %v5138_v52  ;;  %4157 = vmatprep.mubr.msk.f32.mxu1 %vm4489_vm8, %v4488_v3  ;;  %4327 = vmatpush3.bf16.msra.mxu0 %v4993_v23 }
 0x7fe   :  { %4328 = vmatprep.subr.bf16.mxu0 %v4500_v51  ;;  %4176 = vmatprep.mubr.msk.f32.mxu0 %vm4489_vm8, %v4488_v3  ;;  %v1676_v47 = vmul.f32 0.125, %v1674_v8 }
 0x7ff   :  { %4158 = vmatmul.mubr.msk.f32.vlgmr.msra.gmra.mrb[38].mxu1 %vm269_vm9, %v2512_v14  ;;  %4337 = vmatprep.subr.bf16.mxu1 %v4500_v51 }
 0x800   :  { %4195 = vmatprep.mubr.msk.f32.mxu1 %vm4489_vm8, %v4488_v3  ;;  %4339 = vmatpush3.bf16.msra.mxu1 %v4338_v34  ;;  %v3841_v34 = vld [vmem:[%s5412_s10] ss:$0 sm:$0xff] }
 0x801   :  { %4330 = vmatpush3.bf16.msra.mxu0 %v4999_v25  ;;  %4340 = vmatprep.subr.bf16.mxu1 %v4500_v51 }
 0x802   :  { %4331 = vmatprep.subr.bf16.mxu0 %v4500_v51 }
 0x804   :  { %4342 = vmatpush3.bf16.msra.mxu1 %v4341_v58 }
 0x805   :  { %4333 = vmatpush3.bf16.msra.mxu0 %v5012_v54  ;;  %4343 = vmatprep.subr.bf16.mxu1 %v4500_v51 }
 0x806   :  { %4334 = vmatprep.subr.bf16.mxu0 %v4500_v51 }
 0x808   :  { %4345 = vmatpush3.bf16.msra.mxu1 %v4344_v62  ;;  %v4359_v62 = vpack.c.bf16 %v3511_v57, %v3510_v55 }
 0x809   :  { %4336 = vmatpush3.bf16.msra.mxu0 %v5024_v59  ;;  %4346 = vmatprep.subr.bf16.mxu1 %v4500_v51 }
 0x80a   :  { %4349 = vmatprep.subr.bf16.mxu0 %v4500_v51 }
 0x80c   :  { %4348 = vmatpush3.bf16.msra.mxu1 %v4347_v56  ;;  %v3513_v56 = vld [vmem:[%s5413_s13 + $0x18] sm:$0xff] }
 0x80d   :  { %4355 = vmatprep.subr.bf16.mxu1 %v4500_v51 }
 0x8a2   :  { %v2582_v23 = vpop.f32.mrb[22].mxu0 }
 0x8a3   :  { %v4124_v17 = vpop.f32.mrb[23].mxu0 }
 0x8c2   :  { %v2655_v26 = vpop.f32.mrb[32].mxu1 }
 0x8c3   :  { %3098 = vrot.lane.b32.xlu1 %v2655_v26, %s5445_s5  ;;  %v4129_v31 = vpop.f32.mrb[33].mxu1  ;;  %v3837_v26 = vld [vmem:[%s5406_s6] ss:$0 sm:$0xff] }
 0x8c6   :  { %v2728_v40 = vpop.f32.mrb[24].mxu0 }
 0x8c7   :  { %3102 = vrot.lane.b32.xlu0 %v2728_v40, %s4503_s27  ;;  %v4134_v25 = vpop.f32.mrb[25].mxu0 }
 0x8ca   :  { %v2801_v28 = vpop.f32.mrb[34].mxu1 }
 0x8cb   :  { %v2874_v30 = vpop.f32.mrb[26].mxu0  ;;  %3106 = vrot.lane.b32.xlu1 %v2801_v28, %s5446_s29  ;;  %v4139_v54 = vpop.f32.mrb[35].mxu1 }
 0x8cc   :  { %3110 = vrot.lane.b32.xlu0 %v2874_v30, %s4504_s23  ;;  %v4144_v59 = vpop.f32.mrb[27].mxu0 }
 0x8ce   :  { %v2947_v33 = vpop.f32.mrb[36].mxu1 }
 0x8cf   :  { %3114 = vrot.lane.b32.xlu1 %v2947_v33, %s4501_s25  ;;  %v4149_v35 = vpop.f32.mrb[37].mxu1  ;;  %v3020_v36 = vpop.f32.mrb[28].mxu0 }
 0x8d0   :  { %3118 = vrot.lane.b32.xlu0 %v3020_v36, %s4505_s30  ;;  %v4154_v37 = vpop.f32.mrb[29].mxu0  ;;  %v3335_v36 = vld [vmem:[%s5407_s9] sm:$0xff] }
 0x8d1   :  { %v3336_v37 = vld [vmem:[%s5407_s9 + $0x8] sm:$0xff] }
 0x8d2   :  { %v3093_v39 = vpop.f32.mrb[38].mxu1 }
 0x8d3   :  { %3122 = vrot.lane.b32.xlu1 %v3093_v39, %s4502_s24  ;;  %v4159_v41 = vpop.f32.mrb[39].mxu1  ;;  %v4350_v39 = vpack.c.bf16 %v3336_v37, %v3335_v36  ;;  %v3686_v36 = vld [vmem:[%s5416_s17 + $0x28] sm:$0xff] }
 0x8d4   :  { %v3337_v41 = vld [vmem:[%s5407_s9 + $0x10] sm:$0xff] }
 0x935   :  { %v3099_v42 = vpop.permute.xlu1 %3098 }
 0x936   :  { %v3125_v15 = vsel %vm269_vm9, %v2582_v23, %v3099_v42  ;;  %v3338_v42 = vld [vmem:[%s5407_s9 + $0x18] sm:$0xff] }
 0x939   :  { %v3103_v43 = vpop.permute.xlu0 %3102 }
 0x93a   :  { %v3126_v45 = vsel %vm1577_vm10, %v3125_v15, %v3103_v43  ;;  %v4353_v43 = vpack.c.bf16 %v3338_v42, %v3337_v41 }
 0x93d   :  { %v3107_v46 = vpop.permute.xlu1 %3106 }
 0x93e   :  { %v3127_v29 = vsel %vm1579_vm11, %v3126_v45, %v3107_v46  ;;  %v3111_v48 = vpop.permute.xlu0 %3110 }
 0x93f   :  { %v3128_v49 = vsel %vm1581_vm12, %v3127_v29, %v3111_v48  ;;  %v3839_v48 = vld [vmem:[%s5408_s7] ss:$0 sm:$0xff] }
 0x941   :  { %v3115_v38 = vpop.permute.xlu1 %3114 }
 0x942   :  { %v3129_v50 = vsel %vm1583_vm13, %v3128_v49, %v3115_v38  ;;  %v3119_v24 = vpop.permute.xlu0 %3118  ;;  %v3840_v38 = vld [vmem:[%s5409_s8] ss:$0 sm:$0xff] }
 0x943   :  { %v3130_v21 = vsel %vm1585_vm14, %v3129_v50, %v3119_v24 }
 0x945   :  { %v3123_v22 = vpop.permute.xlu1 %3122 }
 0x946   :  { %v3131_v52 = vsel %vm1587_vm15, %v3130_v21, %v3123_v22  ;;  %v3420_v22 = vld [vmem:[%s5410_s11] sm:$0xff] }
 0x947   :  { %4177 = vmatmul.mubr.msk.f32.vlgmr.msra.gmra.mrb[30].mxu0 %vm140_vm7, %v3131_v52  ;;  %v3421_v52 = vld [vmem:[%s5410_s11 + $0x8] sm:$0xff] }
 0x948   :  { %4206 = vmatprep.mubr.msk.f32.mxu0 %vm4489_vm8, %v4488_v3  ;;  %4351 = vmatpush3.bf16.msra.mxu0 %v4350_v39  ;;  %v4356_v20 = vpack.c.bf16 %v3421_v52, %v3420_v22  ;;  %v3687_v39 = vld [vmem:[%s5416_s17 + $0x30] sm:$0xff]  ;;  %v3848_v52 = vld [vmem:[%s5418_s16] ss:$0 sm:$0xff] }
 0x949   :  { %4352 = vmatprep.subr.bf16.mxu0 %v4500_v51 }
 0x94c   :  { %4354 = vmatpush3.bf16.msra.mxu0 %v4353_v43  ;;  %v3689_v43 = vld [vmem:[%s5416_s17 + $0x40] sm:$0xff] }
 0x94d   :  { %4370 = vmatprep.subr.bf16.mxu0 %v4500_v51 }
 0xa1a   :  { %v3201_v10 = vpop.f32.mrb[30].mxu0 }
 0xa1b   :  { %v3202_v32 = vadd.f32 %v3809_v63, %v3201_v10  ;;  %v4178_v11 = vpop.f32.mrb[31].mxu0  ;;  %v4362_v63 = vpack.c.bf16 %v3513_v56, %v3512_v44  ;;  %v4368_v10 = vpack.c.bf16 %v3517_v7, %v3516_v6 }
 0xa1c   :  { %v3597_v11 = vld [vmem:[%s5414_s15 + $0x8] sm:$0xff] }
 0xa1d   :  { %v3205_v13 = vsel %vm140_vm7, %v3202_v32, 0.0  ;;  %v3596_v32 = vld [vmem:[%s5414_s15] sm:$0xff] }
 0xa1e   :  { %v3206_v18 = vrot.slane %v3205_v13, 4 }
 0xa20   :  { %v3207_v19 = vadd.f32 %v3206_v18, %v3205_v13  ;;  %v4371_v13 = vpack.c.bf16 %v3597_v11, %v3596_v32  ;;  %v3599_v18 = vld [vmem:[%s5414_s15 + $0x18] sm:$0xff] }
 0xa22   :  { %v3208_v12 = vrot.slane %v3207_v19, 2 }
 0xa24   :  { %v3209_v4 = vadd.f32 %v3208_v12, %v3207_v19  ;;  %v4374_v19 = vpack.c.bf16 %v3599_v18, %v3598_v16 }
 0xa26   :  { %v3210_v9 = vrot.slane %v3209_v4, 1 }
 0xa28   :  { %v3211_v14 = vadd.f32 %v3210_v9, %v3209_v4 }
 0xa2a   :  { %v3212_v23 = vmul.f32 0.125, %v3211_v14  ;;  %v3846_v14 = vld [vmem:[%s5415_s14] ss:$0 sm:$0xff] }
 0xa2c   :  { %v5236_v17 = vsel %vm3213_vm0, %v1676_v47, %v3212_v23  ;;  %v3681_v23 = vld [vmem:[%s5416_s17] sm:$0xff] }
 0xa2d   :  { %4196 = vmatmul.mubr.msk.f32.vlgmr.msra.gmra.mrb[40].mxu1 %vm140_vm7, %v5236_v17 }
 0xa2e   :  { %4213 = vmatprep.mubr.msk.f32.mxu1 %vm4489_vm8, %v4488_v3  ;;  %4357 = vmatpush3.bf16.msra.mxu1 %v4356_v20 }
 0xa2f   :  { %4358 = vmatprep.subr.bf16.mxu1 %v4500_v51 }
 0xb00   :  { %v3299_v31 = vpop.f32.mrb[40].mxu1 }
 0xb01   :  { %v3300_v40 = vadd.f32 %v3837_v26, %v3299_v31  ;;  %v4197_v25 = vpop.f32.mrb[41].mxu1 }
 0xb03   :  { %v3306_v28 = vsel %vm3305_vm1, %v3300_v40, 0.0 }
 0xb04   :  { %3307 = vadd.xlane.f32.xlu0 %v3306_v28 }
 0xb91   :  { %v3308_v30 = vpop.xlane.xlu0 %3307 }
 0xb92   :  { %v3310_v54 = vmul.f32 0.03125, %v3308_v30 }
 0xb94   :  { %v3311_v59 = vsub.f32 %v3300_v40, %v3310_v54  ;;  %v3683_v54 = vld [vmem:[%s5416_s17 + $0x10] sm:$0xff] }
 0xb96   :  { %v3312_v33 = vmul.f32 %v3311_v59, %v3311_v59 }
 0xb98   :  { %v3313_v35 = vsel %vm3305_vm1, %v3312_v33, 0.0 }
 0xb99   :  { %3314 = vadd.xlane.f32.xlu1 %v3313_v35  ;;  %v3685_v35 = vld [vmem:[%s5416_s17 + $0x20] sm:$0xff] }
 0xb9a   :  { %v4383_v37 = vpack.c.bf16 %v3686_v36, %v3685_v35 }
 0xc26   :  { %v3315_v15 = vpop.xlane.xlu1 %3314 }
 0xc27   :  { %v3316_v45 = vmul.f32 0.03125, %v3315_v15  ;;  %v3690_v15 = vld [vmem:[%s5416_s17 + $0x48] sm:$0xff] }
 0xc29   :  { %v3317_v46 = vadd.f32 1e-05, %v3316_v45  ;;  %v4389_v45 = vpack.c.bf16 %v3690_v15, %v3689_v43 }
 0xc2b   :  { %4482 = vrsqrt.f32 %v3317_v46  ;;  %v3691_v46 = vld [vmem:[%s5416_s17 + $0x50] sm:$0xff] }
 0xc35   :  { %v4483_v29 = vpop.eup %4482 }
 0xc36   :  { %v3319_v49 = vmul.f32 %v4483_v29, %v3311_v59  ;;  %v3684_v59 = vld [vmem:[%s5416_s17 + $0x18] sm:$0xff] }
 0xc37   :  { %v4380_v33 = vpack.c.bf16 %v3684_v59, %v3683_v54  ;;  %v3692_v29 = vld [vmem:[%s5416_s17 + $0x58] sm:$0xff] }
 0xc38   :  { %v3326_v50 = vmul.f32 %v3839_v48, %v3319_v49  ;;  %v4392_v48 = vpack.c.bf16 %v3692_v29, %v3691_v46  ;;  %v3693_v49 = vld [vmem:[%s5416_s17 + $0x60] sm:$0xff] }
 0xc3a   :  { %v3333_v24 = vadd.f32 %v3840_v38, %v3326_v50  ;;  %v3694_v38 = vld [vmem:[%s5416_s17 + $0x68] sm:$0xff] }
 0xc3b   :  { %v4395_v50 = vpack.c.bf16 %v3694_v38, %v3693_v49 }
 0xc3c   :  { %v3334_v21 = vmax.f32 %v3333_v24, 0.0  ;;  %v3695_v24 = vld [vmem:[%s5416_s17 + $0x70] sm:$0xff] }
 0xc3e   :  { %4207 = vmatmul.mubr.msk.f32.vlgmr.msra.gmra.mrb[32].mxu0 %vm1581_vm12, %v3334_v21  ;;  %v3696_v21 = vld [vmem:[%s5416_s17 + $0x78] sm:$0xff] }
 0xc3f   :  { %4243 = vmatprep.mubr.msk.f32.mxu0 %vm4489_vm8, %v4488_v3  ;;  %4372 = vmatpush3.bf16.msra.mxu0 %v4371_v13  ;;  %v4398_v22 = vpack.c.bf16 %v3696_v21, %v3695_v24 }
 0xc40   :  { %4373 = vmatprep.subr.bf16.mxu0 %v4500_v51 }
 0xc43   :  { %4375 = vmatpush3.bf16.msra.mxu0 %v4374_v19 }
 0xc44   :  { %4376 = vmatprep.subr.bf16.mxu0 %v4500_v51 }
 0xd11   :  { %v3415_v58 = vpop.f32.mrb[32].mxu0 }
 0xd12   :  { %v3416_v60 = vadd.f32 %v3841_v34, %v3415_v58  ;;  %v4208_v61 = vpop.f32.mrb[33].mxu0 }
 0xd14   :  { %v3419_v53 = vmax.f32 %v3416_v60, 0.0 }
 0xd16   :  { %4214 = vmatmul.mubr.msk.f32.vlgmr.msra.gmra.mrb[42].mxu1 %vm1577_vm10, %v3419_v53 }
 0xd17   :  { %4360 = vmatpush3.bf16.msra.mxu1 %v4359_v62  ;;  %4232 = vmatprep.mubr.msk.f32.mxu1 %vm4489_vm8, %v4488_v3 }
 0xd18   :  { %4361 = vmatprep.subr.bf16.mxu1 %v4500_v51 }
 0xd1b   :  { %4363 = vmatpush3.bf16.msra.mxu1 %v4362_v63 }
 0xd1c   :  { %4364 = vmatprep.subr.bf16.mxu1 %v4500_v51 }
 0xd1f   :  { %4366 = vmatpush3.bf16.msra.mxu1 %v4365_v2 }
 0xd20   :  { %4367 = vmatprep.subr.bf16.mxu1 %v4500_v51 }
 0xd23   :  { %4369 = vmatpush3.bf16.msra.mxu1 %v4368_v10 }
 0xd26   :  { %4233 = vmatmul.mubr.msk.f32.vlgmr.msra.gmra.mrb[44].mxu1 %vm140_vm7, %v5236_v17  ;;  %v3682_v17 = vld [vmem:[%s5416_s17 + $0x8] sm:$0xff] }
 0xd27   :  { %v4377_v28 = vpack.c.bf16 %v3682_v17, %v3681_v23 }
 0xde9   :  { %v3498_v12 = vpop.f32.mrb[42].mxu1 }
 0xdea   :  { %v3499_v4 = vadd.f32 %v3843_v5, %v3498_v12  ;;  %v4215_v8 = vpop.f32.mrb[43].mxu1 }
 0xdec   :  { %v3845_v9 = vmul.f32 -1.442695, %v3499_v4 }
 0xdee   :  { %4484 = vpow2.f32 %v3845_v9 }
 0xdf8   :  { %v4485_v47 = vpop.eup %4484 }
 0xdf9   :  { %v3505_v26 = vadd.f32 1.0, %v4485_v47  ;;  %v3591_v31 = vpop.f32.mrb[44].mxu1 }
 0xdfa   :  { %v3592_v40 = vadd.f32 %v3846_v14, %v3591_v31  ;;  %v4234_v25 = vpop.f32.mrb[45].mxu1 }
 0xdfb   :  { %4486 = vrcp.f32 %v3505_v26 }
 0xdfc   :  { %v3595_v30 = vmax.f32 %v3592_v40, 0.0 }
 0xdfe   :  { %4244 = vmatmul.mubr.msk.f32.vlgmr.msra.gmra.mrb[34].mxu0 %vm1581_vm12, %v3595_v30 }
 0xdff   :  { %4378 = vmatpush3.bf16.msra.mxu0 %v4377_v28  ;;  %4278 = vmatprep.mubr.msk.f32.mxu0 %vm4489_vm8, %v4488_v3  ;;  %v3688_v3 = vld [vmem:[%s5416_s17 + $0x38] sm:$0xff] }
 0xe00   :  { %4379 = vmatprep.subr.bf16.mxu0 %v4500_v51  ;;  %v4386_v42 = vpack.c.bf16 %v3688_v3, %v3687_v39 }
 0xe03   :  { %4381 = vmatpush3.bf16.msra.mxu0 %v4380_v33 }
 0xe04   :  { %4382 = vmatprep.subr.bf16.mxu0 %v4500_v51 }
 0xe05   :  { %v4487_v41 = vpop.eup %4486 }
 0xe06   :  { %3509 = vst.msk [vmem:[%s5417_s19] sm:$0x3] %vm3508_vm2, %v4487_v41 }
 0xe07   :  { %4384 = vmatpush3.bf16.msra.mxu0 %v4383_v37 }
 0xe08   :  { %4385 = vmatprep.subr.bf16.mxu0 %v4500_v51 }
 0xe0b   :  { %4387 = vmatpush3.bf16.msra.mxu0 %v4386_v42 }
 0xe0c   :  { %4388 = vmatprep.subr.bf16.mxu0 %v4500_v51 }
 0xe0f   :  { %4390 = vmatpush3.bf16.msra.mxu0 %v4389_v45 }
 0xe10   :  { %4391 = vmatprep.subr.bf16.mxu0 %v4500_v51 }
 0xe13   :  { %4393 = vmatpush3.bf16.msra.mxu0 %v4392_v48 }
 0xe14   :  { %4394 = vmatprep.subr.bf16.mxu0 %v4500_v51 }
 0xe17   :  { %4396 = vmatpush3.bf16.msra.mxu0 %v4395_v50 }
 0xe18   :  { %4397 = vmatprep.subr.bf16.mxu0 %v4500_v51  ;;  %v3850_v51 = vld [vmem:[%s5419_s18] ss:$0 sm:$0xff] }
 0xe1b   :  { %4399 = vmatpush3.bf16.msra.mxu0 %v4398_v22 }
 0xed1   :  { %v3676_v20 = vpop.f32.mrb[34].mxu0 }
 0xed2   :  { %v3677_v27 = vadd.f32 %v3848_v52, %v3676_v20  ;;  %v4245_v34 = vpop.f32.mrb[35].mxu0 }
 0xed4   :  { %v3680_v55 = vmax.f32 %v3677_v27, 0.0 }
 0xed6   :  { %4279 = vmatmul.mubr.f32.vlgmr.msra.gmra.mrb[36].mxu0 %v3680_v55 }
 0xfa9   :  { %v3770_v57 = vpop.f32.mrb[36].mxu0 }
 0xfaa   :  { %v3771_v58 = vadd.f32 %v3850_v51, %v3770_v57  ;;  %v4280_v60 = vpop.f32.mrb[37].mxu0 }
 0xfac   :  { %3775 = vst.msk [vmem:[%s5420_s20] sm:$0x3] %vm3774_vm3, %v3771_v58 }

</bundles_post_ra>
